<compile_context>
chip_gen: v5e
topology: v5e:2x2
jax: 0.10.0
libtpu: 0.0.40
codegen_flags: <defaults>
</compile_context>

<pallas_src>
import functools
import math

import jax
import jax.numpy as jnp
from jax.experimental import pallas as pl
from jax.experimental.pallas import tpu as pltpu

K = 16                      # all three Conv1d kernel sizes
POOL = (2, 2, 6)            # MaxPool1d sizes
C_IN = (6, 16, 32)          # Conv1d in_channels
C_OUT = (16, 32, 64)        # Conv1d out_channels


def _cellcnn_kernel(x_ref, w1_ref, b1_ref, w2_ref, b2_ref, w3_ref, b3_ref,
                    wl_ref, bl_ref, o_ref, c1_ref, c2_ref, c3_ref,
                    *, b_blk, dims):
    L1, L2, L3, L4, L5, L6 = dims

    # ---- Conv1d(6->16, k=16): one 96-deep im2col matmul over the whole
    #      batch block (x_ref is the wrapper-side im2col slab, bf16).
    h1 = jnp.dot(x_ref[...], w1_ref[...], preferred_element_type=jnp.float32)
    c1_ref[...] = jnp.maximum(h1 + b1_ref[...], 0.0)        # bias + ReLU (f32)

    pooled = []
    for s in range(b_blk):
        base = s * L1
        # ---- MaxPool1d(2), fused into stride-2 VMEM reads of conv1 output.
        p1 = jnp.maximum(c1_ref[pl.ds(base, L2, stride=2), :],
                         c1_ref[pl.ds(base + 1, L2, stride=2), :])      # (L2,16)

        # ---- Conv1d(16->32, k=16): in-kernel im2col -> 256-deep matmul.
        slab2 = jnp.concatenate([p1[k:k + L3, :] for k in range(K)], axis=1)
        h2 = jnp.dot(slab2.astype(jnp.bfloat16), w2_ref[...],
                     preferred_element_type=jnp.float32)
        c2_ref[...] = jnp.maximum(h2 + b2_ref[...], 0.0)

        # ---- MaxPool1d(2)
        p2 = jnp.maximum(c2_ref[pl.ds(0, L4, stride=2), :],
                         c2_ref[pl.ds(1, L4, stride=2), :])             # (L4,32)

        # ---- Conv1d(32->64, k=16): in-kernel im2col -> 512-deep matmul.
        slab3 = jnp.concatenate([p2[k:k + L5, :] for k in range(K)], axis=1)
        h3 = jnp.dot(slab3.astype(jnp.bfloat16), w3_ref[...],
                     preferred_element_type=jnp.float32)
        c3_ref[...] = jnp.maximum(h3 + b3_ref[...], 0.0)

        # ---- MaxPool1d(6)
        m = c3_ref[pl.ds(0, L6, stride=POOL[2]), :]
        for i in range(1, POOL[2]):
            m = jnp.maximum(m, c3_ref[pl.ds(i, L6, stride=POOL[2]), :])
        pooled.append(m)                                                # (L6,64)

    feat = jnp.concatenate(pooled, axis=0) if b_blk > 1 else pooled[0]

    # ---- Linear(64 -> feat_dim): one matmul for the whole batch block.
    out = jnp.dot(feat.astype(jnp.bfloat16), wl_ref[...],
                  preferred_element_type=jnp.float32) + bl_ref[...]
    o_ref[...] = out.astype(o_ref.dtype)


def cellcnn_forward(x, params, b_blk=None):
    B, L, cin = x.shape
    assert cin == C_IN[0]
    L1 = L - K + 1
    L2 = L1 // POOL[0]
    L3 = L2 - K + 1
    L4 = L3 // POOL[1]
    L5 = L4 - K + 1
    L6 = L5 // POOL[2]
    assert L6 >= 1, "sequence too short for CellCNN"
    feat_dim = params["wl"].shape[1]

    if b_blk is None:
        b_blk = math.gcd(B, 8)
    assert B % b_blk == 0, "b_blk must divide the batch size"
    grid = B // b_blk
    if grid > 1:
        # keep the blocked (sublane) dims 8-aligned when the grid has >1 step
        assert (b_blk * L1) % 8 == 0 and (b_blk * L6) % 8 == 0, \
            "pick b_blk so that b_blk*L1 and b_blk*L6 are multiples of 8"

    # Wrapper-side im2col for conv1: (B, L, 6) -> (B*L1, K*6) lane-dense slab.
    xw = jnp.concatenate([x[:, k:k + L1, :] for k in range(K)], axis=-1)
    xw = xw.reshape(B * L1, K * C_IN[0]).astype(jnp.bfloat16)

    # Weights in im2col layout (K*Cin, Cout), bf16 for the MXU; biases stay f32.
    w1 = params["w1"].reshape(K * C_IN[0], C_OUT[0]).astype(jnp.bfloat16)
    w2 = params["w2"].reshape(K * C_IN[1], C_OUT[1]).astype(jnp.bfloat16)
    w3 = params["w3"].reshape(K * C_IN[2], C_OUT[2]).astype(jnp.bfloat16)
    wl = params["wl"].astype(jnp.bfloat16)
    b1, b2, b3, bl = params["b1"], params["b2"], params["b3"], params["bl"]

    kernel = functools.partial(_cellcnn_kernel, b_blk=b_blk,
                               dims=(L1, L2, L3, L4, L5, L6))

    def rep_spec(a):
        # whole-array block, re-used (same block index) on every grid step
        return pl.BlockSpec(a.shape, lambda i, n=a.ndim: (0,) * n)

    out_flat = pl.pallas_call(
        kernel,
        out_shape=jax.ShapeDtypeStruct((B * L6, feat_dim), jnp.float32),
        grid_spec=pltpu.PrefetchScalarGridSpec(
            num_scalar_prefetch=0,
            grid=(grid,),
            in_specs=[
                pl.BlockSpec((b_blk * L1, K * C_IN[0]), lambda i: (i, 0)),
                rep_spec(w1), rep_spec(b1),
                rep_spec(w2), rep_spec(b2),
                rep_spec(w3), rep_spec(b3),
                rep_spec(wl), rep_spec(bl),
            ],
            out_specs=pl.BlockSpec((b_blk * L6, feat_dim), lambda i: (i, 0)),
            scratch_shapes=[
                pltpu.VMEM((b_blk * L1, C_OUT[0]), jnp.float32),  # conv1 out (block)
                pltpu.VMEM((L3, C_OUT[1]), jnp.float32),          # conv2 out (per-seq)
                pltpu.VMEM((L5, C_OUT[2]), jnp.float32),          # conv3 out (per-seq)
            ],
        ),
        compiler_params=pltpu.CompilerParams(
            dimension_semantics=("parallel",)),
    )(xw, w1, b1, w2, b2, w3, b3, wl, bl)

    return out_flat.reshape(B, L6, feat_dim)


def init_params(key, feat_dim):
    """Deterministic synthetic init. Conv weights stored as (K, Cin, Cout)
    (PyTorch layout (Cout, Cin, K) transposed); Linear weight as (in, out).
    Weights ~ xavier_normal_, biases ~ PyTorch default uniform."""
    ks = jax.random.split(key, 8)

    def xavier(k, shape, fan_in, fan_out):
        std = (2.0 / (fan_in + fan_out)) ** 0.5
        return std * jax.random.normal(k, shape, jnp.float32)

    def bias(k, n, fan_in):
        bound = 1.0 / (fan_in ** 0.5)
        return jax.random.uniform(k, (1, n), jnp.float32, -bound, bound)

    p = {}
    p["w1"] = xavier(ks[0], (K, C_IN[0], C_OUT[0]), C_IN[0] * K, C_OUT[0] * K)
    p["w2"] = xavier(ks[1], (K, C_IN[1], C_OUT[1]), C_IN[1] * K, C_OUT[1] * K)
    p["w3"] = xavier(ks[2], (K, C_IN[2], C_OUT[2]), C_IN[2] * K, C_OUT[2] * K)
    p["wl"] = xavier(ks[3], (C_OUT[2], feat_dim), C_OUT[2], feat_dim)
    p["b1"] = bias(ks[4], C_OUT[0], C_IN[0] * K)
    p["b2"] = bias(ks[5], C_OUT[1], C_IN[1] * K)
    p["b3"] = bias(ks[6], C_OUT[2], C_IN[2] * K)
    p["bl"] = bias(ks[7], feat_dim, C_OUT[2])
    return p


def _reference(x, p):
    """Pure-JAX channels-last reference of the PyTorch forward (eval mode)."""
    hp = jax.lax.Precision.HIGHEST

    def conv(h, w, b):
        kk, _, cout = w.shape
        lout = h.shape[1] - kk + 1
        acc = jnp.zeros((h.shape[0], lout, cout), jnp.float32)
        for k in range(kk):
            acc += jnp.einsum("bli,io->blo", h[:, k:k + lout, :], w[k], precision=hp)
        return acc + b[0]

    def pool(h, psz):
        bsz, ln, c = h.shape
        lout = ln // psz
        return h[:, :lout * psz].reshape(bsz, lout, psz, c).max(axis=2)

    h = pool(jnp.maximum(conv(x, p["w1"], p["b1"]), 0.0), POOL[0])
    h = pool(jnp.maximum(conv(h, p["w2"], p["b2"]), 0.0), POOL[1])
    h = pool(jnp.maximum(conv(h, p["w3"], p["b3"]), 0.0), POOL[2])
    return jnp.einsum("blc,cf->blf", h, p["wl"], precision=hp) + p["bl"][0]


if __name__ == "__main__":
    B, L, feat_dim = 8, 159, 32   # L=159 -> conv/pool chain leaves 2 time steps
    key = jax.random.PRNGKey(0)
    kx, kp = jax.random.split(key)
    x = jax.random.normal(kx, (B, L, C_IN[0]), jnp.float32)
    params = init_params(kp, feat_dim)

    out = jax.block_until_ready(cellcnn_forward(x, params, b_blk=4))
    ref = _reference(x, params)

    assert out.shape == (B, 2, feat_dim), out.shape
    max_err = float(jnp.max(jnp.abs(out - ref)))
    assert jnp.allclose(out, ref, rtol=5e-2, atol=5e-2), f"max_err={max_err}"
    print("KERNEL_OK")
</pallas_src>

<mosaic_0001>
module attributes {stable_mosaic.version = 11 : i64} {
  func.func @_cellcnn_kernel(%arg0: i32, %arg1: memref<576x96xbf16, #tpu.memory_space<vmem>>, %arg2: memref<96x16xbf16, #tpu.memory_space<vmem>>, %arg3: memref<1x16xf32, #tpu.memory_space<vmem>>, %arg4: memref<256x32xbf16, #tpu.memory_space<vmem>>, %arg5: memref<1x32xf32, #tpu.memory_space<vmem>>, %arg6: memref<512x64xbf16, #tpu.memory_space<vmem>>, %arg7: memref<1x64xf32, #tpu.memory_space<vmem>>, %arg8: memref<64x32xbf16, #tpu.memory_space<vmem>>, %arg9: memref<1x32xf32, #tpu.memory_space<vmem>>, %arg10: memref<8x32xf32, #tpu.memory_space<vmem>>, %arg11: memref<576x16xf32, #tpu.memory_space<vmem>>, %arg12: memref<57x32xf32, #tpu.memory_space<vmem>>, %arg13: memref<13x64xf32, #tpu.memory_space<vmem>>) attributes {dimension_semantics = [#tpu.dimension_semantics<parallel>], iteration_bounds = array<i64: 2>, scalar_prefetch = 0 : i64, scratch_operands = 3 : i64, tpu.core_type = #tpu.core_type<tc>, window_params = [{transform_indices = @transform_0, window_bounds = array<i64: 576, 96>}, {pipeline_mode = #tpu.pipeline_mode<synchronous>, transform_indices = @transform_1, window_bounds = array<i64: 96, 16>}, {pipeline_mode = #tpu.pipeline_mode<synchronous>, transform_indices = @transform_2, window_bounds = array<i64: 1, 16>}, {pipeline_mode = #tpu.pipeline_mode<synchronous>, transform_indices = @transform_3, window_bounds = array<i64: 256, 32>}, {pipeline_mode = #tpu.pipeline_mode<synchronous>, transform_indices = @transform_4, window_bounds = array<i64: 1, 32>}, {pipeline_mode = #tpu.pipeline_mode<synchronous>, transform_indices = @transform_5, window_bounds = array<i64: 512, 64>}, {pipeline_mode = #tpu.pipeline_mode<synchronous>, transform_indices = @transform_6, window_bounds = array<i64: 1, 64>}, {pipeline_mode = #tpu.pipeline_mode<synchronous>, transform_indices = @transform_7, window_bounds = array<i64: 64, 32>}, {pipeline_mode = #tpu.pipeline_mode<synchronous>, transform_indices = @transform_8, window_bounds = array<i64: 1, 32>}, {transform_indices = @transform_9, window_bounds = array<i64: 8, 32>}]} {
    %c0 = arith.constant 0 : index
    %c0_0 = arith.constant 0 : index
    %0 = vector.load %arg1[%c0, %c0_0] : memref<576x96xbf16, #tpu.memory_space<vmem>>, vector<576x96xbf16>
    %c0_1 = arith.constant 0 : index
    %c0_2 = arith.constant 0 : index
    %1 = vector.load %arg2[%c0_1, %c0_2] : memref<96x16xbf16, #tpu.memory_space<vmem>>, vector<96x16xbf16>
    %cst = arith.constant dense<0.000000e+00> : vector<576x16xf32>
    %2 = tpu.matmul %0, %1, %cst {dimension_numbers = #tpu.dot_dimension_numbers<[1], [0], [0], [1], [0, 0, 1, 1], [], []>} : vector<576x96xbf16>, vector<96x16xbf16>, vector<576x16xf32> -> vector<576x16xf32>
    %c0_3 = arith.constant 0 : index
    %c0_4 = arith.constant 0 : index
    %3 = vector.load %arg3[%c0_3, %c0_4] : memref<1x16xf32, #tpu.memory_space<vmem>>, vector<1x16xf32>
    %4 = vector.broadcast %3 : vector<1x16xf32> to vector<576x16xf32>
    %5 = arith.addf %2, %4 : vector<576x16xf32>
    %cst_5 = arith.constant 0.000000e+00 : f32
    %6 = vector.broadcast %cst_5 : f32 to vector<576x16xf32>
    %7 = arith.maximumf %5, %6 : vector<576x16xf32>
    %c0_6 = arith.constant 0 : index
    %c0_7 = arith.constant 0 : index
    %8 = vector.load %arg11[%c0_6, %c0_7] : memref<576x16xf32, #tpu.memory_space<vmem>>, vector<576x16xf32>
    tpu.vector_store %arg11[%c0_6, %c0_7], %7 {strides = array<i32>} : memref<576x16xf32, #tpu.memory_space<vmem>>, vector<576x16xf32>,
    %c0_8 = arith.constant 0 : index
    %c0_9 = arith.constant 0 : index
    %9 = tpu.strided_load %arg11[%c0_8, %c0_9] {strides = array<i32: 2, 1>} : memref<576x16xf32, #tpu.memory_space<vmem>>, vector<72x16xf32>
    %c1 = arith.constant 1 : index
    %c0_10 = arith.constant 0 : index
    %10 = tpu.strided_load %arg11[%c1, %c0_10] {strides = array<i32: 2, 1>} : memref<576x16xf32, #tpu.memory_space<vmem>>, vector<72x16xf32>
    %11 = arith.maximumf %9, %10 : vector<72x16xf32>
    %12 = vector.extract_strided_slice %11 {offsets = [0, 0], sizes = [57, 16], strides = [1, 1]} : vector<72x16xf32> to vector<57x16xf32>
    %13 = vector.extract_strided_slice %11 {offsets = [1, 0], sizes = [57, 16], strides = [1, 1]} : vector<72x16xf32> to vector<57x16xf32>
    %14 = vector.extract_strided_slice %11 {offsets = [2, 0], sizes = [57, 16], strides = [1, 1]} : vector<72x16xf32> to vector<57x16xf32>
    %15 = vector.extract_strided_slice %11 {offsets = [3, 0], sizes = [57, 16], strides = [1, 1]} : vector<72x16xf32> to vector<57x16xf32>
    %16 = vector.extract_strided_slice %11 {offsets = [4, 0], sizes = [57, 16], strides = [1, 1]} : vector<72x16xf32> to vector<57x16xf32>
    %17 = vector.extract_strided_slice %11 {offsets = [5, 0], sizes = [57, 16], strides = [1, 1]} : vector<72x16xf32> to vector<57x16xf32>
    %18 = vector.extract_strided_slice %11 {offsets = [6, 0], sizes = [57, 16], strides = [1, 1]} : vector<72x16xf32> to vector<57x16xf32>
    %19 = vector.extract_strided_slice %11 {offsets = [7, 0], sizes = [57, 16], strides = [1, 1]} : vector<72x16xf32> to vector<57x16xf32>
    %20 = vector.extract_strided_slice %11 {offsets = [8, 0], sizes = [57, 16], strides = [1, 1]} : vector<72x16xf32> to vector<57x16xf32>
    %21 = vector.extract_strided_slice %11 {offsets = [9, 0], sizes = [57, 16], strides = [1, 1]} : vector<72x16xf32> to vector<57x16xf32>
    %22 = vector.extract_strided_slice %11 {offsets = [10, 0], sizes = [57, 16], strides = [1, 1]} : vector<72x16xf32> to vector<57x16xf32>
    %23 = vector.extract_strided_slice %11 {offsets = [11, 0], sizes = [57, 16], strides = [1, 1]} : vector<72x16xf32> to vector<57x16xf32>
    %24 = vector.extract_strided_slice %11 {offsets = [12, 0], sizes = [57, 16], strides = [1, 1]} : vector<72x16xf32> to vector<57x16xf32>
    %25 = vector.extract_strided_slice %11 {offsets = [13, 0], sizes = [57, 16], strides = [1, 1]} : vector<72x16xf32> to vector<57x16xf32>
    %26 = vector.extract_strided_slice %11 {offsets = [14, 0], sizes = [57, 16], strides = [1, 1]} : vector<72x16xf32> to vector<57x16xf32>
    %27 = vector.extract_strided_slice %11 {offsets = [15, 0], sizes = [57, 16], strides = [1, 1]} : vector<72x16xf32> to vector<57x16xf32>
    %28 = tpu.concatenate %12, %13, %14, %15, %16, %17, %18, %19, %20, %21, %22, %23, %24, %25, %26, %27 in 1 : vector<57x16xf32>, vector<57x16xf32>, vector<57x16xf32>, vector<57x16xf32>, vector<57x16xf32>, vector<57x16xf32>, vector<57x16xf32>, vector<57x16xf32>, vector<57x16xf32>, vector<57x16xf32>, vector<57x16xf32>, vector<57x16xf32>, vector<57x16xf32>, vector<57x16xf32>, vector<57x16xf32>, vector<57x16xf32> -> vector<57x256xf32>
    %29 = arith.truncf %28 : vector<57x256xf32> to vector<57x256xbf16>
    %c0_11 = arith.constant 0 : index
    %c0_12 = arith.constant 0 : index
    %30 = vector.load %arg4[%c0_11, %c0_12] : memref<256x32xbf16, #tpu.memory_space<vmem>>, vector<256x32xbf16>
    %cst_13 = arith.constant dense<0.000000e+00> : vector<57x32xf32>
    %31 = tpu.matmul %29, %30, %cst_13 {dimension_numbers = #tpu.dot_dimension_numbers<[1], [0], [0], [1], [0, 0, 1, 1], [], []>} : vector<57x256xbf16>, vector<256x32xbf16>, vector<57x32xf32> -> vector<57x32xf32>
    %c0_14 = arith.constant 0 : index
    %c0_15 = arith.constant 0 : index
    %32 = vector.load %arg5[%c0_14, %c0_15] : memref<1x32xf32, #tpu.memory_space<vmem>>, vector<1x32xf32>
    %33 = vector.broadcast %32 : vector<1x32xf32> to vector<57x32xf32>
    %34 = arith.addf %31, %33 : vector<57x32xf32>
    %cst_16 = arith.constant 0.000000e+00 : f32
    %35 = vector.broadcast %cst_16 : f32 to vector<57x32xf32>
    %36 = arith.maximumf %34, %35 : vector<57x32xf32>
    %c0_17 = arith.constant 0 : index
    %c0_18 = arith.constant 0 : index
    %37 = vector.load %arg12[%c0_17, %c0_18] : memref<57x32xf32, #tpu.memory_space<vmem>>, vector<57x32xf32>
    tpu.vector_store %arg12[%c0_17, %c0_18], %36 {strides = array<i32>} : memref<57x32xf32, #tpu.memory_space<vmem>>, vector<57x32xf32>,
    %c0_19 = arith.constant 0 : index
    %c0_20 = arith.constant 0 : index
    %38 = tpu.strided_load %arg12[%c0_19, %c0_20] {strides = array<i32: 2, 1>} : memref<57x32xf32, #tpu.memory_space<vmem>>, vector<28x32xf32>
    %c1_21 = arith.constant 1 : index
    %c0_22 = arith.constant 0 : index
    %39 = tpu.strided_load %arg12[%c1_21, %c0_22] {strides = array<i32: 2, 1>} : memref<57x32xf32, #tpu.memory_space<vmem>>, vector<28x32xf32>
    %40 = arith.maximumf %38, %39 : vector<28x32xf32>
    %41 = vector.extract_strided_slice %40 {offsets = [0, 0], sizes = [13, 32], strides = [1, 1]} : vector<28x32xf32> to vector<13x32xf32>
    %42 = vector.extract_strided_slice %40 {offsets = [1, 0], sizes = [13, 32], strides = [1, 1]} : vector<28x32xf32> to vector<13x32xf32>
    %43 = vector.extract_strided_slice %40 {offsets = [2, 0], sizes = [13, 32], strides = [1, 1]} : vector<28x32xf32> to vector<13x32xf32>
    %44 = vector.extract_strided_slice %40 {offsets = [3, 0], sizes = [13, 32], strides = [1, 1]} : vector<28x32xf32> to vector<13x32xf32>
    %45 = vector.extract_strided_slice %40 {offsets = [4, 0], sizes = [13, 32], strides = [1, 1]} : vector<28x32xf32> to vector<13x32xf32>
    %46 = vector.extract_strided_slice %40 {offsets = [5, 0], sizes = [13, 32], strides = [1, 1]} : vector<28x32xf32> to vector<13x32xf32>
    %47 = vector.extract_strided_slice %40 {offsets = [6, 0], sizes = [13, 32], strides = [1, 1]} : vector<28x32xf32> to vector<13x32xf32>
    %48 = vector.extract_strided_slice %40 {offsets = [7, 0], sizes = [13, 32], strides = [1, 1]} : vector<28x32xf32> to vector<13x32xf32>
    %49 = vector.extract_strided_slice %40 {offsets = [8, 0], sizes = [13, 32], strides = [1, 1]} : vector<28x32xf32> to vector<13x32xf32>
    %50 = vector.extract_strided_slice %40 {offsets = [9, 0], sizes = [13, 32], strides = [1, 1]} : vector<28x32xf32> to vector<13x32xf32>
    %51 = vector.extract_strided_slice %40 {offsets = [10, 0], sizes = [13, 32], strides = [1, 1]} : vector<28x32xf32> to vector<13x32xf32>
    %52 = vector.extract_strided_slice %40 {offsets = [11, 0], sizes = [13, 32], strides = [1, 1]} : vector<28x32xf32> to vector<13x32xf32>
    %53 = vector.extract_strided_slice %40 {offsets = [12, 0], sizes = [13, 32], strides = [1, 1]} : vector<28x32xf32> to vector<13x32xf32>
    %54 = vector.extract_strided_slice %40 {offsets = [13, 0], sizes = [13, 32], strides = [1, 1]} : vector<28x32xf32> to vector<13x32xf32>
    %55 = vector.extract_strided_slice %40 {offsets = [14, 0], sizes = [13, 32], strides = [1, 1]} : vector<28x32xf32> to vector<13x32xf32>
    %56 = vector.extract_strided_slice %40 {offsets = [15, 0], sizes = [13, 32], strides = [1, 1]} : vector<28x32xf32> to vector<13x32xf32>
    %57 = tpu.concatenate %41, %42, %43, %44, %45, %46, %47, %48, %49, %50, %51, %52, %53, %54, %55, %56 in 1 : vector<13x32xf32>, vector<13x32xf32>, vector<13x32xf32>, vector<13x32xf32>, vector<13x32xf32>, vector<13x32xf32>, vector<13x32xf32>, vector<13x32xf32>, vector<13x32xf32>, vector<13x32xf32>, vector<13x32xf32>, vector<13x32xf32>, vector<13x32xf32>, vector<13x32xf32>, vector<13x32xf32>, vector<13x32xf32> -> vector<13x512xf32>
    %58 = arith.truncf %57 : vector<13x512xf32> to vector<13x512xbf16>
    %c0_23 = arith.constant 0 : index
    %c0_24 = arith.constant 0 : index
    %59 = vector.load %arg6[%c0_23, %c0_24] : memref<512x64xbf16, #tpu.memory_space<vmem>>, vector<512x64xbf16>
    %cst_25 = arith.constant dense<0.000000e+00> : vector<13x64xf32>
    %60 = tpu.matmul %58, %59, %cst_25 {dimension_numbers = #tpu.dot_dimension_numbers<[1], [0], [0], [1], [0, 0, 1, 1], [], []>} : vector<13x512xbf16>, vector<512x64xbf16>, vector<13x64xf32> -> vector<13x64xf32>
    %c0_26 = arith.constant 0 : index
    %c0_27 = arith.constant 0 : index
    %61 = vector.load %arg7[%c0_26, %c0_27] : memref<1x64xf32, #tpu.memory_space<vmem>>, vector<1x64xf32>
    %62 = vector.broadcast %61 : vector<1x64xf32> to vector<13x64xf32>
    %63 = arith.addf %60, %62 : vector<13x64xf32>
    %cst_28 = arith.constant 0.000000e+00 : f32
    %64 = vector.broadcast %cst_28 : f32 to vector<13x64xf32>
    %65 = arith.maximumf %63, %64 : vector<13x64xf32>
    %c0_29 = arith.constant 0 : index
    %c0_30 = arith.constant 0 : index
    %66 = vector.load %arg13[%c0_29, %c0_30] : memref<13x64xf32, #tpu.memory_space<vmem>>, vector<13x64xf32>
    tpu.vector_store %arg13[%c0_29, %c0_30], %65 {strides = array<i32>} : memref<13x64xf32, #tpu.memory_space<vmem>>, vector<13x64xf32>,
    %c0_31 = arith.constant 0 : index
    %c0_32 = arith.constant 0 : index
    %67 = tpu.strided_load %arg13[%c0_31, %c0_32] {strides = array<i32: 6, 1>} : memref<13x64xf32, #tpu.memory_space<vmem>>, vector<2x64xf32>
    %c1_33 = arith.constant 1 : index
    %c0_34 = arith.constant 0 : index
    %68 = tpu.strided_load %arg13[%c1_33, %c0_34] {strides = array<i32: 6, 1>} : memref<13x64xf32, #tpu.memory_space<vmem>>, vector<2x64xf32>
    %69 = arith.maximumf %67, %68 : vector<2x64xf32>
    %c2 = arith.constant 2 : index
    %c0_35 = arith.constant 0 : index
    %70 = tpu.strided_load %arg13[%c2, %c0_35] {strides = array<i32: 6, 1>} : memref<13x64xf32, #tpu.memory_space<vmem>>, vector<2x64xf32>
    %71 = arith.maximumf %69, %70 : vector<2x64xf32>
    %c3 = arith.constant 3 : index
    %c0_36 = arith.constant 0 : index
    %72 = tpu.strided_load %arg13[%c3, %c0_36] {strides = array<i32: 6, 1>} : memref<13x64xf32, #tpu.memory_space<vmem>>, vector<2x64xf32>
    %73 = arith.maximumf %71, %72 : vector<2x64xf32>
    %c4 = arith.constant 4 : index
    %c0_37 = arith.constant 0 : index
    %74 = tpu.strided_load %arg13[%c4, %c0_37] {strides = array<i32: 6, 1>} : memref<13x64xf32, #tpu.memory_space<vmem>>, vector<2x64xf32>
    %75 = arith.maximumf %73, %74 : vector<2x64xf32>
    %c5 = arith.constant 5 : index
    %c0_38 = arith.constant 0 : index
    %76 = tpu.strided_load %arg13[%c5, %c0_38] {strides = array<i32: 6, 1>} : memref<13x64xf32, #tpu.memory_space<vmem>>, vector<2x64xf32>
    %77 = arith.maximumf %75, %76 : vector<2x64xf32>
    %c144 = arith.constant 144 : index
    %c0_39 = arith.constant 0 : index
    %78 = tpu.strided_load %arg11[%c144, %c0_39] {strides = array<i32: 2, 1>} : memref<576x16xf32, #tpu.memory_space<vmem>>, vector<72x16xf32>
    %c145 = arith.constant 145 : index
    %c0_40 = arith.constant 0 : index
    %79 = tpu.strided_load %arg11[%c145, %c0_40] {strides = array<i32: 2, 1>} : memref<576x16xf32, #tpu.memory_space<vmem>>, vector<72x16xf32>
    %80 = arith.maximumf %78, %79 : vector<72x16xf32>
    %81 = vector.extract_strided_slice %80 {offsets = [0, 0], sizes = [57, 16], strides = [1, 1]} : vector<72x16xf32> to vector<57x16xf32>
    %82 = vector.extract_strided_slice %80 {offsets = [1, 0], sizes = [57, 16], strides = [1, 1]} : vector<72x16xf32> to vector<57x16xf32>
    %83 = vector.extract_strided_slice %80 {offsets = [2, 0], sizes = [57, 16], strides = [1, 1]} : vector<72x16xf32> to vector<57x16xf32>
    %84 = vector.extract_strided_slice %80 {offsets = [3, 0], sizes = [57, 16], strides = [1, 1]} : vector<72x16xf32> to vector<57x16xf32>
    %85 = vector.extract_strided_slice %80 {offsets = [4, 0], sizes = [57, 16], strides = [1, 1]} : vector<72x16xf32> to vector<57x16xf32>
    %86 = vector.extract_strided_slice %80 {offsets = [5, 0], sizes = [57, 16], strides = [1, 1]} : vector<72x16xf32> to vector<57x16xf32>
    %87 = vector.extract_strided_slice %80 {offsets = [6, 0], sizes = [57, 16], strides = [1, 1]} : vector<72x16xf32> to vector<57x16xf32>
    %88 = vector.extract_strided_slice %80 {offsets = [7, 0], sizes = [57, 16], strides = [1, 1]} : vector<72x16xf32> to vector<57x16xf32>
    %89 = vector.extract_strided_slice %80 {offsets = [8, 0], sizes = [57, 16], strides = [1, 1]} : vector<72x16xf32> to vector<57x16xf32>
    %90 = vector.extract_strided_slice %80 {offsets = [9, 0], sizes = [57, 16], strides = [1, 1]} : vector<72x16xf32> to vector<57x16xf32>
    %91 = vector.extract_strided_slice %80 {offsets = [10, 0], sizes = [57, 16], strides = [1, 1]} : vector<72x16xf32> to vector<57x16xf32>
    %92 = vector.extract_strided_slice %80 {offsets = [11, 0], sizes = [57, 16], strides = [1, 1]} : vector<72x16xf32> to vector<57x16xf32>
    %93 = vector.extract_strided_slice %80 {offsets = [12, 0], sizes = [57, 16], strides = [1, 1]} : vector<72x16xf32> to vector<57x16xf32>
    %94 = vector.extract_strided_slice %80 {offsets = [13, 0], sizes = [57, 16], strides = [1, 1]} : vector<72x16xf32> to vector<57x16xf32>
    %95 = vector.extract_strided_slice %80 {offsets = [14, 0], sizes = [57, 16], strides = [1, 1]} : vector<72x16xf32> to vector<57x16xf32>
    %96 = vector.extract_strided_slice %80 {offsets = [15, 0], sizes = [57, 16], strides = [1, 1]} : vector<72x16xf32> to vector<57x16xf32>
    %97 = tpu.concatenate %81, %82, %83, %84, %85, %86, %87, %88, %89, %90, %91, %92, %93, %94, %95, %96 in 1 : vector<57x16xf32>, vector<57x16xf32>, vector<57x16xf32>, vector<57x16xf32>, vector<57x16xf32>, vector<57x16xf32>, vector<57x16xf32>, vector<57x16xf32>, vector<57x16xf32>, vector<57x16xf32>, vector<57x16xf32>, vector<57x16xf32>, vector<57x16xf32>, vector<57x16xf32>, vector<57x16xf32>, vector<57x16xf32> -> vector<57x256xf32>
    %98 = arith.truncf %97 : vector<57x256xf32> to vector<57x256xbf16>
    %c0_41 = arith.constant 0 : index
    %c0_42 = arith.constant 0 : index
    %99 = vector.load %arg4[%c0_41, %c0_42] : memref<256x32xbf16, #tpu.memory_space<vmem>>, vector<256x32xbf16>
    %cst_43 = arith.constant dense<0.000000e+00> : vector<57x32xf32>
    %100 = tpu.matmul %98, %99, %cst_43 {dimension_numbers = #tpu.dot_dimension_numbers<[1], [0], [0], [1], [0, 0, 1, 1], [], []>} : vector<57x256xbf16>, vector<256x32xbf16>, vector<57x32xf32> -> vector<57x32xf32>
    %c0_44 = arith.constant 0 : index
    %c0_45 = arith.constant 0 : index
    %101 = vector.load %arg5[%c0_44, %c0_45] : memref<1x32xf32, #tpu.memory_space<vmem>>, vector<1x32xf32>
    %102 = vector.broadcast %101 : vector<1x32xf32> to vector<57x32xf32>
    %103 = arith.addf %100, %102 : vector<57x32xf32>
    %cst_46 = arith.constant 0.000000e+00 : f32
    %104 = vector.broadcast %cst_46 : f32 to vector<57x32xf32>
    %105 = arith.maximumf %103, %104 : vector<57x32xf32>
    %c0_47 = arith.constant 0 : index
    %c0_48 = arith.constant 0 : index
    %106 = vector.load %arg12[%c0_47, %c0_48] : memref<57x32xf32, #tpu.memory_space<vmem>>, vector<57x32xf32>
    tpu.vector_store %arg12[%c0_47, %c0_48], %105 {strides = array<i32>} : memref<57x32xf32, #tpu.memory_space<vmem>>, vector<57x32xf32>,
    %c0_49 = arith.constant 0 : index
    %c0_50 = arith.constant 0 : index
    %107 = tpu.strided_load %arg12[%c0_49, %c0_50] {strides = array<i32: 2, 1>} : memref<57x32xf32, #tpu.memory_space<vmem>>, vector<28x32xf32>
    %c1_51 = arith.constant 1 : index
    %c0_52 = arith.constant 0 : index
    %108 = tpu.strided_load %arg12[%c1_51, %c0_52] {strides = array<i32: 2, 1>} : memref<57x32xf32, #tpu.memory_space<vmem>>, vector<28x32xf32>
    %109 = arith.maximumf %107, %108 : vector<28x32xf32>
    %110 = vector.extract_strided_slice %109 {offsets = [0, 0], sizes = [13, 32], strides = [1, 1]} : vector<28x32xf32> to vector<13x32xf32>
    %111 = vector.extract_strided_slice %109 {offsets = [1, 0], sizes = [13, 32], strides = [1, 1]} : vector<28x32xf32> to vector<13x32xf32>
    %112 = vector.extract_strided_slice %109 {offsets = [2, 0], sizes = [13, 32], strides = [1, 1]} : vector<28x32xf32> to vector<13x32xf32>
    %113 = vector.extract_strided_slice %109 {offsets = [3, 0], sizes = [13, 32], strides = [1, 1]} : vector<28x32xf32> to vector<13x32xf32>
    %114 = vector.extract_strided_slice %109 {offsets = [4, 0], sizes = [13, 32], strides = [1, 1]} : vector<28x32xf32> to vector<13x32xf32>
    %115 = vector.extract_strided_slice %109 {offsets = [5, 0], sizes = [13, 32], strides = [1, 1]} : vector<28x32xf32> to vector<13x32xf32>
    %116 = vector.extract_strided_slice %109 {offsets = [6, 0], sizes = [13, 32], strides = [1, 1]} : vector<28x32xf32> to vector<13x32xf32>
    %117 = vector.extract_strided_slice %109 {offsets = [7, 0], sizes = [13, 32], strides = [1, 1]} : vector<28x32xf32> to vector<13x32xf32>
    %118 = vector.extract_strided_slice %109 {offsets = [8, 0], sizes = [13, 32], strides = [1, 1]} : vector<28x32xf32> to vector<13x32xf32>
    %119 = vector.extract_strided_slice %109 {offsets = [9, 0], sizes = [13, 32], strides = [1, 1]} : vector<28x32xf32> to vector<13x32xf32>
    %120 = vector.extract_strided_slice %109 {offsets = [10, 0], sizes = [13, 32], strides = [1, 1]} : vector<28x32xf32> to vector<13x32xf32>
    %121 = vector.extract_strided_slice %109 {offsets = [11, 0], sizes = [13, 32], strides = [1, 1]} : vector<28x32xf32> to vector<13x32xf32>
    %122 = vector.extract_strided_slice %109 {offsets = [12, 0], sizes = [13, 32], strides = [1, 1]} : vector<28x32xf32> to vector<13x32xf32>
    %123 = vector.extract_strided_slice %109 {offsets = [13, 0], sizes = [13, 32], strides = [1, 1]} : vector<28x32xf32> to vector<13x32xf32>
    %124 = vector.extract_strided_slice %109 {offsets = [14, 0], sizes = [13, 32], strides = [1, 1]} : vector<28x32xf32> to vector<13x32xf32>
    %125 = vector.extract_strided_slice %109 {offsets = [15, 0], sizes = [13, 32], strides = [1, 1]} : vector<28x32xf32> to vector<13x32xf32>
    %126 = tpu.concatenate %110, %111, %112, %113, %114, %115, %116, %117, %118, %119, %120, %121, %122, %123, %124, %125 in 1 : vector<13x32xf32>, vector<13x32xf32>, vector<13x32xf32>, vector<13x32xf32>, vector<13x32xf32>, vector<13x32xf32>, vector<13x32xf32>, vector<13x32xf32>, vector<13x32xf32>, vector<13x32xf32>, vector<13x32xf32>, vector<13x32xf32>, vector<13x32xf32>, vector<13x32xf32>, vector<13x32xf32>, vector<13x32xf32> -> vector<13x512xf32>
    %127 = arith.truncf %126 : vector<13x512xf32> to vector<13x512xbf16>
    %c0_53 = arith.constant 0 : index
    %c0_54 = arith.constant 0 : index
    %128 = vector.load %arg6[%c0_53, %c0_54] : memref<512x64xbf16, #tpu.memory_space<vmem>>, vector<512x64xbf16>
    %cst_55 = arith.constant dense<0.000000e+00> : vector<13x64xf32>
    %129 = tpu.matmul %127, %128, %cst_55 {dimension_numbers = #tpu.dot_dimension_numbers<[1], [0], [0], [1], [0, 0, 1, 1], [], []>} : vector<13x512xbf16>, vector<512x64xbf16>, vector<13x64xf32> -> vector<13x64xf32>
    %c0_56 = arith.constant 0 : index
    %c0_57 = arith.constant 0 : index
    %130 = vector.load %arg7[%c0_56, %c0_57] : memref<1x64xf32, #tpu.memory_space<vmem>>, vector<1x64xf32>
    %131 = vector.broadcast %130 : vector<1x64xf32> to vector<13x64xf32>
    %132 = arith.addf %129, %131 : vector<13x64xf32>
    %cst_58 = arith.constant 0.000000e+00 : f32
    %133 = vector.broadcast %cst_58 : f32 to vector<13x64xf32>
    %134 = arith.maximumf %132, %133 : vector<13x64xf32>
    %c0_59 = arith.constant 0 : index
    %c0_60 = arith.constant 0 : index
    %135 = vector.load %arg13[%c0_59, %c0_60] : memref<13x64xf32, #tpu.memory_space<vmem>>, vector<13x64xf32>
    tpu.vector_store %arg13[%c0_59, %c0_60], %134 {strides = array<i32>} : memref<13x64xf32, #tpu.memory_space<vmem>>, vector<13x64xf32>,
    %c0_61 = arith.constant 0 : index
    %c0_62 = arith.constant 0 : index
    %136 = tpu.strided_load %arg13[%c0_61, %c0_62] {strides = array<i32: 6, 1>} : memref<13x64xf32, #tpu.memory_space<vmem>>, vector<2x64xf32>
    %c1_63 = arith.constant 1 : index
    %c0_64 = arith.constant 0 : index
    %137 = tpu.strided_load %arg13[%c1_63, %c0_64] {strides = array<i32: 6, 1>} : memref<13x64xf32, #tpu.memory_space<vmem>>, vector<2x64xf32>
    %138 = arith.maximumf %136, %137 : vector<2x64xf32>
    %c2_65 = arith.constant 2 : index
    %c0_66 = arith.constant 0 : index
    %139 = tpu.strided_load %arg13[%c2_65, %c0_66] {strides = array<i32: 6, 1>} : memref<13x64xf32, #tpu.memory_space<vmem>>, vector<2x64xf32>
    %140 = arith.maximumf %138, %139 : vector<2x64xf32>
    %c3_67 = arith.constant 3 : index
    %c0_68 = arith.constant 0 : index
    %141 = tpu.strided_load %arg13[%c3_67, %c0_68] {strides = array<i32: 6, 1>} : memref<13x64xf32, #tpu.memory_space<vmem>>, vector<2x64xf32>
    %142 = arith.maximumf %140, %141 : vector<2x64xf32>
    %c4_69 = arith.constant 4 : index
    %c0_70 = arith.constant 0 : index
    %143 = tpu.strided_load %arg13[%c4_69, %c0_70] {strides = array<i32: 6, 1>} : memref<13x64xf32, #tpu.memory_space<vmem>>, vector<2x64xf32>
    %144 = arith.maximumf %142, %143 : vector<2x64xf32>
    %c5_71 = arith.constant 5 : index
    %c0_72 = arith.constant 0 : index
    %145 = tpu.strided_load %arg13[%c5_71, %c0_72] {strides = array<i32: 6, 1>} : memref<13x64xf32, #tpu.memory_space<vmem>>, vector<2x64xf32>
    %146 = arith.maximumf %144, %145 : vector<2x64xf32>
    %c288 = arith.constant 288 : index
    %c0_73 = arith.constant 0 : index
    %147 = tpu.strided_load %arg11[%c288, %c0_73] {strides = array<i32: 2, 1>} : memref<576x16xf32, #tpu.memory_space<vmem>>, vector<72x16xf32>
    %c289 = arith.constant 289 : index
    %c0_74 = arith.constant 0 : index
    %148 = tpu.strided_load %arg11[%c289, %c0_74] {strides = array<i32: 2, 1>} : memref<576x16xf32, #tpu.memory_space<vmem>>, vector<72x16xf32>
    %149 = arith.maximumf %147, %148 : vector<72x16xf32>
    %150 = vector.extract_strided_slice %149 {offsets = [0, 0], sizes = [57, 16], strides = [1, 1]} : vector<72x16xf32> to vector<57x16xf32>
    %151 = vector.extract_strided_slice %149 {offsets = [1, 0], sizes = [57, 16], strides = [1, 1]} : vector<72x16xf32> to vector<57x16xf32>
    %152 = vector.extract_strided_slice %149 {offsets = [2, 0], sizes = [57, 16], strides = [1, 1]} : vector<72x16xf32> to vector<57x16xf32>
    %153 = vector.extract_strided_slice %149 {offsets = [3, 0], sizes = [57, 16], strides = [1, 1]} : vector<72x16xf32> to vector<57x16xf32>
    %154 = vector.extract_strided_slice %149 {offsets = [4, 0], sizes = [57, 16], strides = [1, 1]} : vector<72x16xf32> to vector<57x16xf32>
    %155 = vector.extract_strided_slice %149 {offsets = [5, 0], sizes = [57, 16], strides = [1, 1]} : vector<72x16xf32> to vector<57x16xf32>
    %156 = vector.extract_strided_slice %149 {offsets = [6, 0], sizes = [57, 16], strides = [1, 1]} : vector<72x16xf32> to vector<57x16xf32>
    %157 = vector.extract_strided_slice %149 {offsets = [7, 0], sizes = [57, 16], strides = [1, 1]} : vector<72x16xf32> to vector<57x16xf32>
    %158 = vector.extract_strided_slice %149 {offsets = [8, 0], sizes = [57, 16], strides = [1, 1]} : vector<72x16xf32> to vector<57x16xf32>
    %159 = vector.extract_strided_slice %149 {offsets = [9, 0], sizes = [57, 16], strides = [1, 1]} : vector<72x16xf32> to vector<57x16xf32>
    %160 = vector.extract_strided_slice %149 {offsets = [10, 0], sizes = [57, 16], strides = [1, 1]} : vector<72x16xf32> to vector<57x16xf32>
    %161 = vector.extract_strided_slice %149 {offsets = [11, 0], sizes = [57, 16], strides = [1, 1]} : vector<72x16xf32> to vector<57x16xf32>
    %162 = vector.extract_strided_slice %149 {offsets = [12, 0], sizes = [57, 16], strides = [1, 1]} : vector<72x16xf32> to vector<57x16xf32>
    %163 = vector.extract_strided_slice %149 {offsets = [13, 0], sizes = [57, 16], strides = [1, 1]} : vector<72x16xf32> to vector<57x16xf32>
    %164 = vector.extract_strided_slice %149 {offsets = [14, 0], sizes = [57, 16], strides = [1, 1]} : vector<72x16xf32> to vector<57x16xf32>
    %165 = vector.extract_strided_slice %149 {offsets = [15, 0], sizes = [57, 16], strides = [1, 1]} : vector<72x16xf32> to vector<57x16xf32>
    %166 = tpu.concatenate %150, %151, %152, %153, %154, %155, %156, %157, %158, %159, %160, %161, %162, %163, %164, %165 in 1 : vector<57x16xf32>, vector<57x16xf32>, vector<57x16xf32>, vector<57x16xf32>, vector<57x16xf32>, vector<57x16xf32>, vector<57x16xf32>, vector<57x16xf32>, vector<57x16xf32>, vector<57x16xf32>, vector<57x16xf32>, vector<57x16xf32>, vector<57x16xf32>, vector<57x16xf32>, vector<57x16xf32>, vector<57x16xf32> -> vector<57x256xf32>
    %167 = arith.truncf %166 : vector<57x256xf32> to vector<57x256xbf16>
    %c0_75 = arith.constant 0 : index
    %c0_76 = arith.constant 0 : index
    %168 = vector.load %arg4[%c0_75, %c0_76] : memref<256x32xbf16, #tpu.memory_space<vmem>>, vector<256x32xbf16>
    %cst_77 = arith.constant dense<0.000000e+00> : vector<57x32xf32>
    %169 = tpu.matmul %167, %168, %cst_77 {dimension_numbers = #tpu.dot_dimension_numbers<[1], [0], [0], [1], [0, 0, 1, 1], [], []>} : vector<57x256xbf16>, vector<256x32xbf16>, vector<57x32xf32> -> vector<57x32xf32>
    %c0_78 = arith.constant 0 : index
    %c0_79 = arith.constant 0 : index
    %170 = vector.load %arg5[%c0_78, %c0_79] : memref<1x32xf32, #tpu.memory_space<vmem>>, vector<1x32xf32>
    %171 = vector.broadcast %170 : vector<1x32xf32> to vector<57x32xf32>
    %172 = arith.addf %169, %171 : vector<57x32xf32>
    %cst_80 = arith.constant 0.000000e+00 : f32
    %173 = vector.broadcast %cst_80 : f32 to vector<57x32xf32>
    %174 = arith.maximumf %172, %173 : vector<57x32xf32>
    %c0_81 = arith.constant 0 : index
    %c0_82 = arith.constant 0 : index
    %175 = vector.load %arg12[%c0_81, %c0_82] : memref<57x32xf32, #tpu.memory_space<vmem>>, vector<57x32xf32>
    tpu.vector_store %arg12[%c0_81, %c0_82], %174 {strides = array<i32>} : memref<57x32xf32, #tpu.memory_space<vmem>>, vector<57x32xf32>,
    %c0_83 = arith.constant 0 : index
    %c0_84 = arith.constant 0 : index
    %176 = tpu.strided_load %arg12[%c0_83, %c0_84] {strides = array<i32: 2, 1>} : memref<57x32xf32, #tpu.memory_space<vmem>>, vector<28x32xf32>
    %c1_85 = arith.constant 1 : index
    %c0_86 = arith.constant 0 : index
    %177 = tpu.strided_load %arg12[%c1_85, %c0_86] {strides = array<i32: 2, 1>} : memref<57x32xf32, #tpu.memory_space<vmem>>, vector<28x32xf32>
    %178 = arith.maximumf %176, %177 : vector<28x32xf32>
    %179 = vector.extract_strided_slice %178 {offsets = [0, 0], sizes = [13, 32], strides = [1, 1]} : vector<28x32xf32> to vector<13x32xf32>
    %180 = vector.extract_strided_slice %178 {offsets = [1, 0], sizes = [13, 32], strides = [1, 1]} : vector<28x32xf32> to vector<13x32xf32>
    %181 = vector.extract_strided_slice %178 {offsets = [2, 0], sizes = [13, 32], strides = [1, 1]} : vector<28x32xf32> to vector<13x32xf32>
    %182 = vector.extract_strided_slice %178 {offsets = [3, 0], sizes = [13, 32], strides = [1, 1]} : vector<28x32xf32> to vector<13x32xf32>
    %183 = vector.extract_strided_slice %178 {offsets = [4, 0], sizes = [13, 32], strides = [1, 1]} : vector<28x32xf32> to vector<13x32xf32>
    %184 = vector.extract_strided_slice %178 {offsets = [5, 0], sizes = [13, 32], strides = [1, 1]} : vector<28x32xf32> to vector<13x32xf32>
    %185 = vector.extract_strided_slice %178 {offsets = [6, 0], sizes = [13, 32], strides = [1, 1]} : vector<28x32xf32> to vector<13x32xf32>
    %186 = vector.extract_strided_slice %178 {offsets = [7, 0], sizes = [13, 32], strides = [1, 1]} : vector<28x32xf32> to vector<13x32xf32>
    %187 = vector.extract_strided_slice %178 {offsets = [8, 0], sizes = [13, 32], strides = [1, 1]} : vector<28x32xf32> to vector<13x32xf32>
    %188 = vector.extract_strided_slice %178 {offsets = [9, 0], sizes = [13, 32], strides = [1, 1]} : vector<28x32xf32> to vector<13x32xf32>
    %189 = vector.extract_strided_slice %178 {offsets = [10, 0], sizes = [13, 32], strides = [1, 1]} : vector<28x32xf32> to vector<13x32xf32>
    %190 = vector.extract_strided_slice %178 {offsets = [11, 0], sizes = [13, 32], strides = [1, 1]} : vector<28x32xf32> to vector<13x32xf32>
    %191 = vector.extract_strided_slice %178 {offsets = [12, 0], sizes = [13, 32], strides = [1, 1]} : vector<28x32xf32> to vector<13x32xf32>
    %192 = vector.extract_strided_slice %178 {offsets = [13, 0], sizes = [13, 32], strides = [1, 1]} : vector<28x32xf32> to vector<13x32xf32>
    %193 = vector.extract_strided_slice %178 {offsets = [14, 0], sizes = [13, 32], strides = [1, 1]} : vector<28x32xf32> to vector<13x32xf32>
    %194 = vector.extract_strided_slice %178 {offsets = [15, 0], sizes = [13, 32], strides = [1, 1]} : vector<28x32xf32> to vector<13x32xf32>
    %195 = tpu.concatenate %179, %180, %181, %182, %183, %184, %185, %186, %187, %188, %189, %190, %191, %192, %193, %194 in 1 : vector<13x32xf32>, vector<13x32xf32>, vector<13x32xf32>, vector<13x32xf32>, vector<13x32xf32>, vector<13x32xf32>, vector<13x32xf32>, vector<13x32xf32>, vector<13x32xf32>, vector<13x32xf32>, vector<13x32xf32>, vector<13x32xf32>, vector<13x32xf32>, vector<13x32xf32>, vector<13x32xf32>, vector<13x32xf32> -> vector<13x512xf32>
    %196 = arith.truncf %195 : vector<13x512xf32> to vector<13x512xbf16>
    %c0_87 = arith.constant 0 : index
    %c0_88 = arith.constant 0 : index
    %197 = vector.load %arg6[%c0_87, %c0_88] : memref<512x64xbf16, #tpu.memory_space<vmem>>, vector<512x64xbf16>
    %cst_89 = arith.constant dense<0.000000e+00> : vector<13x64xf32>
    %198 = tpu.matmul %196, %197, %cst_89 {dimension_numbers = #tpu.dot_dimension_numbers<[1], [0], [0], [1], [0, 0, 1, 1], [], []>} : vector<13x512xbf16>, vector<512x64xbf16>, vector<13x64xf32> -> vector<13x64xf32>
    %c0_90 = arith.constant 0 : index
    %c0_91 = arith.constant 0 : index
    %199 = vector.load %arg7[%c0_90, %c0_91] : memref<1x64xf32, #tpu.memory_space<vmem>>, vector<1x64xf32>
    %200 = vector.broadcast %199 : vector<1x64xf32> to vector<13x64xf32>
    %201 = arith.addf %198, %200 : vector<13x64xf32>
    %cst_92 = arith.constant 0.000000e+00 : f32
    %202 = vector.broadcast %cst_92 : f32 to vector<13x64xf32>
    %203 = arith.maximumf %201, %202 : vector<13x64xf32>
    %c0_93 = arith.constant 0 : index
    %c0_94 = arith.constant 0 : index
    %204 = vector.load %arg13[%c0_93, %c0_94] : memref<13x64xf32, #tpu.memory_space<vmem>>, vector<13x64xf32>
    tpu.vector_store %arg13[%c0_93, %c0_94], %203 {strides = array<i32>} : memref<13x64xf32, #tpu.memory_space<vmem>>, vector<13x64xf32>,
    %c0_95 = arith.constant 0 : index
    %c0_96 = arith.constant 0 : index
    %205 = tpu.strided_load %arg13[%c0_95, %c0_96] {strides = array<i32: 6, 1>} : memref<13x64xf32, #tpu.memory_space<vmem>>, vector<2x64xf32>
    %c1_97 = arith.constant 1 : index
    %c0_98 = arith.constant 0 : index
    %206 = tpu.strided_load %arg13[%c1_97, %c0_98] {strides = array<i32: 6, 1>} : memref<13x64xf32, #tpu.memory_space<vmem>>, vector<2x64xf32>
    %207 = arith.maximumf %205, %206 : vector<2x64xf32>
    %c2_99 = arith.constant 2 : index
    %c0_100 = arith.constant 0 : index
    %208 = tpu.strided_load %arg13[%c2_99, %c0_100] {strides = array<i32: 6, 1>} : memref<13x64xf32, #tpu.memory_space<vmem>>, vector<2x64xf32>
    %209 = arith.maximumf %207, %208 : vector<2x64xf32>
    %c3_101 = arith.constant 3 : index
    %c0_102 = arith.constant 0 : index
    %210 = tpu.strided_load %arg13[%c3_101, %c0_102] {strides = array<i32: 6, 1>} : memref<13x64xf32, #tpu.memory_space<vmem>>, vector<2x64xf32>
    %211 = arith.maximumf %209, %210 : vector<2x64xf32>
    %c4_103 = arith.constant 4 : index
    %c0_104 = arith.constant 0 : index
    %212 = tpu.strided_load %arg13[%c4_103, %c0_104] {strides = array<i32: 6, 1>} : memref<13x64xf32, #tpu.memory_space<vmem>>, vector<2x64xf32>
    %213 = arith.maximumf %211, %212 : vector<2x64xf32>
    %c5_105 = arith.constant 5 : index
    %c0_106 = arith.constant 0 : index
    %214 = tpu.strided_load %arg13[%c5_105, %c0_106] {strides = array<i32: 6, 1>} : memref<13x64xf32, #tpu.memory_space<vmem>>, vector<2x64xf32>
    %215 = arith.maximumf %213, %214 : vector<2x64xf32>
    %c432 = arith.constant 432 : index
    %c0_107 = arith.constant 0 : index
    %216 = tpu.strided_load %arg11[%c432, %c0_107] {strides = array<i32: 2, 1>} : memref<576x16xf32, #tpu.memory_space<vmem>>, vector<72x16xf32>
    %c433 = arith.constant 433 : index
    %c0_108 = arith.constant 0 : index
    %217 = tpu.strided_load %arg11[%c433, %c0_108] {strides = array<i32: 2, 1>} : memref<576x16xf32, #tpu.memory_space<vmem>>, vector<72x16xf32>
    %218 = arith.maximumf %216, %217 : vector<72x16xf32>
    %219 = vector.extract_strided_slice %218 {offsets = [0, 0], sizes = [57, 16], strides = [1, 1]} : vector<72x16xf32> to vector<57x16xf32>
    %220 = vector.extract_strided_slice %218 {offsets = [1, 0], sizes = [57, 16], strides = [1, 1]} : vector<72x16xf32> to vector<57x16xf32>
    %221 = vector.extract_strided_slice %218 {offsets = [2, 0], sizes = [57, 16], strides = [1, 1]} : vector<72x16xf32> to vector<57x16xf32>
    %222 = vector.extract_strided_slice %218 {offsets = [3, 0], sizes = [57, 16], strides = [1, 1]} : vector<72x16xf32> to vector<57x16xf32>
    %223 = vector.extract_strided_slice %218 {offsets = [4, 0], sizes = [57, 16], strides = [1, 1]} : vector<72x16xf32> to vector<57x16xf32>
    %224 = vector.extract_strided_slice %218 {offsets = [5, 0], sizes = [57, 16], strides = [1, 1]} : vector<72x16xf32> to vector<57x16xf32>
    %225 = vector.extract_strided_slice %218 {offsets = [6, 0], sizes = [57, 16], strides = [1, 1]} : vector<72x16xf32> to vector<57x16xf32>
    %226 = vector.extract_strided_slice %218 {offsets = [7, 0], sizes = [57, 16], strides = [1, 1]} : vector<72x16xf32> to vector<57x16xf32>
    %227 = vector.extract_strided_slice %218 {offsets = [8, 0], sizes = [57, 16], strides = [1, 1]} : vector<72x16xf32> to vector<57x16xf32>
    %228 = vector.extract_strided_slice %218 {offsets = [9, 0], sizes = [57, 16], strides = [1, 1]} : vector<72x16xf32> to vector<57x16xf32>
    %229 = vector.extract_strided_slice %218 {offsets = [10, 0], sizes = [57, 16], strides = [1, 1]} : vector<72x16xf32> to vector<57x16xf32>
    %230 = vector.extract_strided_slice %218 {offsets = [11, 0], sizes = [57, 16], strides = [1, 1]} : vector<72x16xf32> to vector<57x16xf32>
    %231 = vector.extract_strided_slice %218 {offsets = [12, 0], sizes = [57, 16], strides = [1, 1]} : vector<72x16xf32> to vector<57x16xf32>
    %232 = vector.extract_strided_slice %218 {offsets = [13, 0], sizes = [57, 16], strides = [1, 1]} : vector<72x16xf32> to vector<57x16xf32>
    %233 = vector.extract_strided_slice %218 {offsets = [14, 0], sizes = [57, 16], strides = [1, 1]} : vector<72x16xf32> to vector<57x16xf32>
    %234 = vector.extract_strided_slice %218 {offsets = [15, 0], sizes = [57, 16], strides = [1, 1]} : vector<72x16xf32> to vector<57x16xf32>
    %235 = tpu.concatenate %219, %220, %221, %222, %223, %224, %225, %226, %227, %228, %229, %230, %231, %232, %233, %234 in 1 : vector<57x16xf32>, vector<57x16xf32>, vector<57x16xf32>, vector<57x16xf32>, vector<57x16xf32>, vector<57x16xf32>, vector<57x16xf32>, vector<57x16xf32>, vector<57x16xf32>, vector<57x16xf32>, vector<57x16xf32>, vector<57x16xf32>, vector<57x16xf32>, vector<57x16xf32>, vector<57x16xf32>, vector<57x16xf32> -> vector<57x256xf32>
    %236 = arith.truncf %235 : vector<57x256xf32> to vector<57x256xbf16>
    %c0_109 = arith.constant 0 : index
    %c0_110 = arith.constant 0 : index
    %237 = vector.load %arg4[%c0_109, %c0_110] : memref<256x32xbf16, #tpu.memory_space<vmem>>, vector<256x32xbf16>
    %cst_111 = arith.constant dense<0.000000e+00> : vector<57x32xf32>
    %238 = tpu.matmul %236, %237, %cst_111 {dimension_numbers = #tpu.dot_dimension_numbers<[1], [0], [0], [1], [0, 0, 1, 1], [], []>} : vector<57x256xbf16>, vector<256x32xbf16>, vector<57x32xf32> -> vector<57x32xf32>
    %c0_112 = arith.constant 0 : index
    %c0_113 = arith.constant 0 : index
    %239 = vector.load %arg5[%c0_112, %c0_113] : memref<1x32xf32, #tpu.memory_space<vmem>>, vector<1x32xf32>
    %240 = vector.broadcast %239 : vector<1x32xf32> to vector<57x32xf32>
    %241 = arith.addf %238, %240 : vector<57x32xf32>
    %cst_114 = arith.constant 0.000000e+00 : f32
    %242 = vector.broadcast %cst_114 : f32 to vector<57x32xf32>
    %243 = arith.maximumf %241, %242 : vector<57x32xf32>
    %c0_115 = arith.constant 0 : index
    %c0_116 = arith.constant 0 : index
    %244 = vector.load %arg12[%c0_115, %c0_116] : memref<57x32xf32, #tpu.memory_space<vmem>>, vector<57x32xf32>
    tpu.vector_store %arg12[%c0_115, %c0_116], %243 {strides = array<i32>} : memref<57x32xf32, #tpu.memory_space<vmem>>, vector<57x32xf32>,
    %c0_117 = arith.constant 0 : index
    %c0_118 = arith.constant 0 : index
    %245 = tpu.strided_load %arg12[%c0_117, %c0_118] {strides = array<i32: 2, 1>} : memref<57x32xf32, #tpu.memory_space<vmem>>, vector<28x32xf32>
    %c1_119 = arith.constant 1 : index
    %c0_120 = arith.constant 0 : index
    %246 = tpu.strided_load %arg12[%c1_119, %c0_120] {strides = array<i32: 2, 1>} : memref<57x32xf32, #tpu.memory_space<vmem>>, vector<28x32xf32>
    %247 = arith.maximumf %245, %246 : vector<28x32xf32>
    %248 = vector.extract_strided_slice %247 {offsets = [0, 0], sizes = [13, 32], strides = [1, 1]} : vector<28x32xf32> to vector<13x32xf32>
    %249 = vector.extract_strided_slice %247 {offsets = [1, 0], sizes = [13, 32], strides = [1, 1]} : vector<28x32xf32> to vector<13x32xf32>
    %250 = vector.extract_strided_slice %247 {offsets = [2, 0], sizes = [13, 32], strides = [1, 1]} : vector<28x32xf32> to vector<13x32xf32>
    %251 = vector.extract_strided_slice %247 {offsets = [3, 0], sizes = [13, 32], strides = [1, 1]} : vector<28x32xf32> to vector<13x32xf32>
    %252 = vector.extract_strided_slice %247 {offsets = [4, 0], sizes = [13, 32], strides = [1, 1]} : vector<28x32xf32> to vector<13x32xf32>
    %253 = vector.extract_strided_slice %247 {offsets = [5, 0], sizes = [13, 32], strides = [1, 1]} : vector<28x32xf32> to vector<13x32xf32>
    %254 = vector.extract_strided_slice %247 {offsets = [6, 0], sizes = [13, 32], strides = [1, 1]} : vector<28x32xf32> to vector<13x32xf32>
    %255 = vector.extract_strided_slice %247 {offsets = [7, 0], sizes = [13, 32], strides = [1, 1]} : vector<28x32xf32> to vector<13x32xf32>
    %256 = vector.extract_strided_slice %247 {offsets = [8, 0], sizes = [13, 32], strides = [1, 1]} : vector<28x32xf32> to vector<13x32xf32>
    %257 = vector.extract_strided_slice %247 {offsets = [9, 0], sizes = [13, 32], strides = [1, 1]} : vector<28x32xf32> to vector<13x32xf32>
    %258 = vector.extract_strided_slice %247 {offsets = [10, 0], sizes = [13, 32], strides = [1, 1]} : vector<28x32xf32> to vector<13x32xf32>
    %259 = vector.extract_strided_slice %247 {offsets = [11, 0], sizes = [13, 32], strides = [1, 1]} : vector<28x32xf32> to vector<13x32xf32>
    %260 = vector.extract_strided_slice %247 {offsets = [12, 0], sizes = [13, 32], strides = [1, 1]} : vector<28x32xf32> to vector<13x32xf32>
    %261 = vector.extract_strided_slice %247 {offsets = [13, 0], sizes = [13, 32], strides = [1, 1]} : vector<28x32xf32> to vector<13x32xf32>
    %262 = vector.extract_strided_slice %247 {offsets = [14, 0], sizes = [13, 32], strides = [1, 1]} : vector<28x32xf32> to vector<13x32xf32>
    %263 = vector.extract_strided_slice %247 {offsets = [15, 0], sizes = [13, 32], strides = [1, 1]} : vector<28x32xf32> to vector<13x32xf32>
    %264 = tpu.concatenate %248, %249, %250, %251, %252, %253, %254, %255, %256, %257, %258, %259, %260, %261, %262, %263 in 1 : vector<13x32xf32>, vector<13x32xf32>, vector<13x32xf32>, vector<13x32xf32>, vector<13x32xf32>, vector<13x32xf32>, vector<13x32xf32>, vector<13x32xf32>, vector<13x32xf32>, vector<13x32xf32>, vector<13x32xf32>, vector<13x32xf32>, vector<13x32xf32>, vector<13x32xf32>, vector<13x32xf32>, vector<13x32xf32> -> vector<13x512xf32>
    %265 = arith.truncf %264 : vector<13x512xf32> to vector<13x512xbf16>
    %c0_121 = arith.constant 0 : index
    %c0_122 = arith.constant 0 : index
    %266 = vector.load %arg6[%c0_121, %c0_122] : memref<512x64xbf16, #tpu.memory_space<vmem>>, vector<512x64xbf16>
    %cst_123 = arith.constant dense<0.000000e+00> : vector<13x64xf32>
    %267 = tpu.matmul %265, %266, %cst_123 {dimension_numbers = #tpu.dot_dimension_numbers<[1], [0], [0], [1], [0, 0, 1, 1], [], []>} : vector<13x512xbf16>, vector<512x64xbf16>, vector<13x64xf32> -> vector<13x64xf32>
    %c0_124 = arith.constant 0 : index
    %c0_125 = arith.constant 0 : index
    %268 = vector.load %arg7[%c0_124, %c0_125] : memref<1x64xf32, #tpu.memory_space<vmem>>, vector<1x64xf32>
    %269 = vector.broadcast %268 : vector<1x64xf32> to vector<13x64xf32>
    %270 = arith.addf %267, %269 : vector<13x64xf32>
    %cst_126 = arith.constant 0.000000e+00 : f32
    %271 = vector.broadcast %cst_126 : f32 to vector<13x64xf32>
    %272 = arith.maximumf %270, %271 : vector<13x64xf32>
    %c0_127 = arith.constant 0 : index
    %c0_128 = arith.constant 0 : index
    %273 = vector.load %arg13[%c0_127, %c0_128] : memref<13x64xf32, #tpu.memory_space<vmem>>, vector<13x64xf32>
    tpu.vector_store %arg13[%c0_127, %c0_128], %272 {strides = array<i32>} : memref<13x64xf32, #tpu.memory_space<vmem>>, vector<13x64xf32>,
    %c0_129 = arith.constant 0 : index
    %c0_130 = arith.constant 0 : index
    %274 = tpu.strided_load %arg13[%c0_129, %c0_130] {strides = array<i32: 6, 1>} : memref<13x64xf32, #tpu.memory_space<vmem>>, vector<2x64xf32>
    %c1_131 = arith.constant 1 : index
    %c0_132 = arith.constant 0 : index
    %275 = tpu.strided_load %arg13[%c1_131, %c0_132] {strides = array<i32: 6, 1>} : memref<13x64xf32, #tpu.memory_space<vmem>>, vector<2x64xf32>
    %276 = arith.maximumf %274, %275 : vector<2x64xf32>
    %c2_133 = arith.constant 2 : index
    %c0_134 = arith.constant 0 : index
    %277 = tpu.strided_load %arg13[%c2_133, %c0_134] {strides = array<i32: 6, 1>} : memref<13x64xf32, #tpu.memory_space<vmem>>, vector<2x64xf32>
    %278 = arith.maximumf %276, %277 : vector<2x64xf32>
    %c3_135 = arith.constant 3 : index
    %c0_136 = arith.constant 0 : index
    %279 = tpu.strided_load %arg13[%c3_135, %c0_136] {strides = array<i32: 6, 1>} : memref<13x64xf32, #tpu.memory_space<vmem>>, vector<2x64xf32>
    %280 = arith.maximumf %278, %279 : vector<2x64xf32>
    %c4_137 = arith.constant 4 : index
    %c0_138 = arith.constant 0 : index
    %281 = tpu.strided_load %arg13[%c4_137, %c0_138] {strides = array<i32: 6, 1>} : memref<13x64xf32, #tpu.memory_space<vmem>>, vector<2x64xf32>
    %282 = arith.maximumf %280, %281 : vector<2x64xf32>
    %c5_139 = arith.constant 5 : index
    %c0_140 = arith.constant 0 : index
    %283 = tpu.strided_load %arg13[%c5_139, %c0_140] {strides = array<i32: 6, 1>} : memref<13x64xf32, #tpu.memory_space<vmem>>, vector<2x64xf32>
    %284 = arith.maximumf %282, %283 : vector<2x64xf32>
    %285 = tpu.concatenate %77, %146, %215, %284 in 0 : vector<2x64xf32>, vector<2x64xf32>, vector<2x64xf32>, vector<2x64xf32> -> vector<8x64xf32>
    %286 = arith.truncf %285 : vector<8x64xf32> to vector<8x64xbf16>
    %c0_141 = arith.constant 0 : index
    %c0_142 = arith.constant 0 : index
    %287 = vector.load %arg8[%c0_141, %c0_142] : memref<64x32xbf16, #tpu.memory_space<vmem>>, vector<64x32xbf16>
    %cst_143 = arith.constant dense<0.000000e+00> : vector<8x32xf32>
    %288 = tpu.matmul %286, %287, %cst_143 {dimension_numbers = #tpu.dot_dimension_numbers<[1], [0], [0], [1], [0, 0, 1, 1], [], []>} : vector<8x64xbf16>, vector<64x32xbf16>, vector<8x32xf32> -> vector<8x32xf32>
    %c0_144 = arith.constant 0 : index
    %c0_145 = arith.constant 0 : index
    %289 = vector.load %arg9[%c0_144, %c0_145] : memref<1x32xf32, #tpu.memory_space<vmem>>, vector<1x32xf32>
    %290 = vector.broadcast %289 : vector<1x32xf32> to vector<8x32xf32>
    %291 = arith.addf %288, %290 : vector<8x32xf32>
    %c0_146 = arith.constant 0 : index
    %c0_147 = arith.constant 0 : index
    %292 = vector.load %arg10[%c0_146, %c0_147] : memref<8x32xf32, #tpu.memory_space<vmem>>, vector<8x32xf32>
    tpu.vector_store %arg10[%c0_146, %c0_147], %291 {strides = array<i32>} : memref<8x32xf32, #tpu.memory_space<vmem>>, vector<8x32xf32>,
    return
  }
  func.func @transform_0(%arg0: i32) -> (i32, i32) {
    %c0_i32 = arith.constant 0 : i32
    %c0_i32_0 = arith.constant 0 : i32
    return %arg0, %c0_i32 : i32, i32
  }
  func.func @transform_1(%arg0: i32) -> (i32, i32) {
    %c0_i32 = arith.constant 0 : i32
    %c0_i32_0 = arith.constant 0 : i32
    %c0_i32_1 = arith.constant 0 : i32
    return %c0_i32, %c0_i32_0 : i32, i32
  }
  func.func @transform_2(%arg0: i32) -> (i32, i32) {
    %c0_i32 = arith.constant 0 : i32
    %c0_i32_0 = arith.constant 0 : i32
    %c0_i32_1 = arith.constant 0 : i32
    return %c0_i32, %c0_i32_0 : i32, i32
  }
  func.func @transform_3(%arg0: i32) -> (i32, i32) {
    %c0_i32 = arith.constant 0 : i32
    %c0_i32_0 = arith.constant 0 : i32
    %c0_i32_1 = arith.constant 0 : i32
    return %c0_i32, %c0_i32_0 : i32, i32
  }
  func.func @transform_4(%arg0: i32) -> (i32, i32) {
    %c0_i32 = arith.constant 0 : i32
    %c0_i32_0 = arith.constant 0 : i32
    %c0_i32_1 = arith.constant 0 : i32
    return %c0_i32, %c0_i32_0 : i32, i32
  }
  func.func @transform_5(%arg0: i32) -> (i32, i32) {
    %c0_i32 = arith.constant 0 : i32
    %c0_i32_0 = arith.constant 0 : i32
    %c0_i32_1 = arith.constant 0 : i32
    return %c0_i32, %c0_i32_0 : i32, i32
  }
  func.func @transform_6(%arg0: i32) -> (i32, i32) {
    %c0_i32 = arith.constant 0 : i32
    %c0_i32_0 = arith.constant 0 : i32
    %c0_i32_1 = arith.constant 0 : i32
    return %c0_i32, %c0_i32_0 : i32, i32
  }
  func.func @transform_7(%arg0: i32) -> (i32, i32) {
    %c0_i32 = arith.constant 0 : i32
    %c0_i32_0 = arith.constant 0 : i32
    %c0_i32_1 = arith.constant 0 : i32
    return %c0_i32, %c0_i32_0 : i32, i32
  }
  func.func @transform_8(%arg0: i32) -> (i32, i32) {
    %c0_i32 = arith.constant 0 : i32
    %c0_i32_0 = arith.constant 0 : i32
    %c0_i32_1 = arith.constant 0 : i32
    return %c0_i32, %c0_i32_0 : i32, i32
  }
  func.func @transform_9(%arg0: i32) -> (i32, i32) {
    %c0_i32 = arith.constant 0 : i32
    %c0_i32_0 = arith.constant 0 : i32
    return %arg0, %c0_i32 : i32, i32
  }
}

</mosaic_0001>

<bundles_post_ra>
// kernel: tpu_custom_call.1
= control target key start
LH: loop header
LB: loop body
LE: loop exit
PB: predicated region body
PF: predicated region fallthrough
CT: control target
= control target key end

     0   :  { %s11521_s0 = inlined_call_operand.vmem [shape: bf16[1152,96], index: 0, kind: input, shape index: {}]   ;;  %s11522_s1 = inlined_call_operand.vmem [shape: bf16[96,16], index: 1, kind: input, shape index: {}]   ;;  %s11523_s2 = inlined_call_operand.vmem [shape: f32[1,16], index: 2, kind: input, shape index: {}]   ;;  %s11524_s3 = inlined_call_operand.vmem [shape: bf16[256,32], index: 3, kind: input, shape index: {}]   ;;  %s11525_s4 = inlined_call_operand.vmem [shape: f32[1,32], index: 4, kind: input, shape index: {}]   ;;  %s11526_s5 = inlined_call_operand.vmem [shape: bf16[512,64], index: 5, kind: input, shape index: {}]   ;;  %s11527_s6 = inlined_call_operand.vmem [shape: f32[1,64], index: 6, kind: input, shape index: {}]   ;;  %s11528_s7 = inlined_call_operand.vmem [shape: bf16[64,32], index: 7, kind: input, shape index: {}]   ;;  %s11529_s8 = inlined_call_operand.vmem [shape: f32[1,32], index: 8, kind: input, shape index: {}]   ;;  %s11530_s9 = inlined_call_operand.hbm [shape: f32[16,32], index: 9, kind: output, shape index: {}]  }
   0x1   :  { %11585 = sst [smem:[#allocation16_spill]] %s11521_s0 }
   0x2   :  { %11586 = sst [smem:[#allocation17_spill]] %s11522_s1 }
   0x3   :  { %11587 = sst [smem:[#allocation18_spill]] %s11523_s2 }
   0x4   :  { %14 = vsyncpa [#allocation6], 0 }
   0x5   :  { %16 = vsyncpa [#allocation6 + $0x1], 0  ;;  %s8180_s30 = smov 0   ;;  %s8182_s10 = smov 0  }
   0x6   :  { %s8184_s11 = smov 0   ;;  %s8186_s12 = smov 0  }
   0x7 LB: > { %11588 = sst [smem:[#allocation8_spill]] %s8117_s11  ;;  %s8201_s13 = sadd.s32 4294967295, %s8121_s12   ;;  %s8121_s12 = sphi %s8186_s12, %s11661_s12   ;;  %s8117_s11 = sphi %s8184_s11, %s11658_s11   ;;  %s8113_s10 = sphi %s8182_s10, %s11660_s10   ;;  %s8109_s30 = sphi %s8180_s30, %s11659_s30  }
   0x8   : > { %s5839_s14 = sadd.s32 4294967294, %s8121_s12   ;;  %s8205_s15 = sadd.s32 1, %s8121_s12  }
   0x9   : > { %s223_s16 = sadd.s32 1, %s8117_s11  ;;  %s220_s17 = ssub.s32 %s8121_s12, %s8205_s15 }
   0xa   : > { %p233_p0 = scmp.ne.s32.totalorder %s8117_s11, %s8113_s10  ;;  %p221_p1 = scmp.eq.s32.totalorder %s220_s17, 0 }
   0xb   : > { %p234_p2 = scmp.eq.s32.totalorder %s8201_s13, 1  ;;  %p239_p3 = scmp.ne.s32.totalorder %s8113_s10, %s8109_s30 }
   0xc   : > { %p240_p4 = scmp.eq.s32.totalorder %s5839_s14, 1  ;;  %p5842_p7 = scmp.ge.s32.totalorder %s8121_s12, 1 }
   0xd   : > { %s8216_s18 = scalar_select %p221_p1, %s8117_s11, %s223_s16  }
   0xe   : > { %p8218_p5 = por %p234_p2, %p233_p0  ;;  %p8222_p6 = por %p240_p4, %p239_p3 }
   0xf   : > { %11589 = sst [smem:[#allocation9_spill]] %s8216_s18  ;;  %p291_p8 = scmp.lt.s32.totalorder %s8121_s12, 3 }
  0x11   : > { %p292_p9 = pnand %p5842_p7, %p291_p8 }
  0x13   : > { %295 = sbr.rel (%p292_p9) target bundleno = 2595 (0xa23), region = 56 }
  0x18   : > { %s11592_s1 = sld [smem:[#allocation17_spill]]  ;;  %s327_s25 = smul.u32 72, %s8201_s13  ;;  %vm638_vm0 = vcmask 785408   ;;  %vm1008_vm1 = vcmask 130048   ;;  %vm1293_vm2 = vcmask 1042432   ;;  %vm1213_vm3 = vcmask 1044480  }
  0x19   : > { %s11593_s0 = sld [smem:[#allocation16_spill]]  ;;  %vm1133_vm4 = vcmask 1046528   ;;  %s11535_s28 = smov 80   ;;  %vm1253_vm5 = vcmask 1043456   ;;  %vm1173_vm6 = vcmask 1045504   ;;  %vm1333_vm7 = vcmask 1041408  }
  0x1a   : > { %p328_p10 = scmp.lt.s32.totalorder %s327_s25, 143  ;;  %s11594_s2 = sld [smem:[#allocation18_spill]]  ;;  %vm1373_vm8 = vcmask 1040384   ;;  %vm1478_vm9 = vcmask 261120   ;;  %vm1487_vm10 = vcmask 392192   ;;  %vm1496_vm11 = vcmask 523264  }
  0x1b   : > { %s11533_s29 = smov 48   ;;  %s11531_s14 = smov 16   ;;  %vm1505_vm12 = vcmask 654336   ;;  %vm1522_vm13 = vcmask 916480   ;;  %vm2236_vm14 = vcmask 520192  }
  0x1c   : > { %s11663_s25 = smov (!%p328_p10, %s327_s25), 143  ;;  %s11553_s16 = smov 64  }
  0x1d   : > { %s5844_s17 = sshll.u32 %s11663_s25, 2  ;;  %s11551_s21 = smov 96  }
  0x1e   : > { %v6879_v0 = vld [vmem:[%s11592_s1 + $0x28] sm:$0xff]  ;;  %v6878_v1 = vld [vmem:[%s11592_s1 + $0x20] sm:$0xff]  ;;  %v6877_v2 = vld [vmem:[%s11592_s1 + $0x18] sm:$0xff]  ;;  %s11537_s22 = smov 112   ;;  %s11603_s23 = smov 48  }
  0x1f   : > { %749 = vmatpush.bf16.msra.mxu0 %v6879_v0  ;;  %7077 = vmatpush.bf16.msra.mxu2 %v6879_v0  ;;  %v6876_v3 = vld [vmem:[%s11592_s1 + $0x10] sm:$0xff]  ;;  %v6875_v4 = vld [vmem:[%s11592_s1 + $0x8] sm:$0xff]  ;;  %v6874_v5 = vld [vmem:[%s11592_s1] sm:$0xff]  ;;  %s8250_s26 = scalar_lea.vmem %s11593_s0, %s5844_s17  ;;  %s11549_s17 = smov 32  }
  0x20   : > { %7076 = vmatpush.bf16.msra.mxu1 %v6879_v0  ;;  %7078 = vmatpush.bf16.msra.mxu3 %v6879_v0  ;;  %v6838_v6 = vld [vmem:[%s8250_s26] sm:$0xff]  ;;  %v6839_v7 = vld [vmem:[%s8250_s26 + $0x8] sm:$0xff]  ;;  %v6840_v8 = vld [vmem:[%s8250_s26 + $0x10] sm:$0xff]  ;;  %s11604_s24 = smov 16   ;;  %s11606_s25 = smov 64  }
  0x21   : > { %v6841_v9 = vld [vmem:[%s8250_s26 + $0x18] sm:$0xff]  ;;  %v6842_v10 = vld [vmem:[%s8250_s26 + $0x20] sm:$0xff]  ;;  %v6843_v11 = vld [vmem:[%s8250_s26 + $0x28] sm:$0xff]  ;;  %s11607_s27 = smov 32  }
  0x22   : > { %v6844_v12 = vld [vmem:[%s8250_s26 + $0x30] sm:$0xff]  ;;  %v6845_v13 = vld [vmem:[%s8250_s26 + $0x38] sm:$0xff]  ;;  %v8271_v14 = vld [vmem:[%s11594_s2] ss:$0 sm:$0xff] }
  0x23   : > { %750 = vmatpush.bf16.msra.mxu0 %v6878_v1  ;;  %7080 = vmatpush.bf16.msra.mxu2 %v6878_v1  ;;  %v6846_v15 = vld [vmem:[%s8250_s26 + $0x40] sm:$0xff]  ;;  %v6847_v22 = vld [vmem:[%s8250_s26 + $0x48] sm:$0xff]  ;;  %v6848_v29 = vld [vmem:[%s8250_s26 + $0x50] sm:$0xff] }
  0x24   : > { %7079 = vmatpush.bf16.msra.mxu1 %v6878_v1  ;;  %7081 = vmatpush.bf16.msra.mxu3 %v6878_v1  ;;  %v6849_v36 = vld [vmem:[%s8250_s26 + $0x58] sm:$0xff]  ;;  %v6850_v48 = vld [vmem:[%s8250_s26 + $0x60] sm:$0xff] }
  0x27   : > { %751 = vmatpush.bf16.msra.mxu0 %v6877_v2  ;;  %7083 = vmatpush.bf16.msra.mxu2 %v6877_v2 }
  0x28   : > { %7082 = vmatpush.bf16.msra.mxu1 %v6877_v2  ;;  %7084 = vmatpush.bf16.msra.mxu3 %v6877_v2 }
  0x2b   : > { %752 = vmatpush.bf16.msra.mxu0 %v6876_v3  ;;  %7086 = vmatpush.bf16.msra.mxu2 %v6876_v3 }
  0x2c   : > { %7085 = vmatpush.bf16.msra.mxu1 %v6876_v3  ;;  %7087 = vmatpush.bf16.msra.mxu3 %v6876_v3 }
  0x2f   : > { %753 = vmatpush.bf16.msra.mxu0 %v6875_v4  ;;  %7089 = vmatpush.bf16.msra.mxu2 %v6875_v4 }
  0x30   : > { %7088 = vmatpush.bf16.msra.mxu1 %v6875_v4  ;;  %7090 = vmatpush.bf16.msra.mxu3 %v6875_v4 }
  0x33   : > { %754 = vmatpush.bf16.msra.mxu0 %v6874_v5  ;;  %7092 = vmatpush.bf16.msra.mxu2 %v6874_v5 }
  0x34   : > { %7091 = vmatpush.bf16.msra.mxu1 %v6874_v5  ;;  %7093 = vmatpush.bf16.msra.mxu3 %v6874_v5 }
  0x36   : > { %6013 = vmatmul.msk.bf16.vlgmr.msra.gmra.mxu0 %vm638_vm0, %v6838_v6 }
  0x46   : > { %6014 = vmatmul.msk.bf16.gmra.mxu0 %vm638_vm0, %v6839_v7 }
  0x56   : > { %6015 = vmatmul.msk.bf16.gmra.mxu0 %vm638_vm0, %v6840_v8 }
  0x66   : > { %6016 = vmatmul.msk.bf16.gmra.mxu0 %vm638_vm0, %v6841_v9 }
  0x76   : > { %6017 = vmatmul.msk.bf16.gmra.mxu0 %vm638_vm0, %v6842_v10 }
  0x86   : > { %6018 = vmatmul.msk.bf16.gmra.mxu0 %vm638_vm0, %v6843_v11 }
  0x96   : > { %6019 = vmatmul.msk.bf16.gmra.mxu0 %vm638_vm0, %v6844_v12 }
  0xa6   : > { %6020 = vmatmul.msk.bf16.gmra.mxu0 %vm638_vm0, %v6845_v13 }
  0xb3   : > { %v756_v16 = vpop.f32.mrf.mxu0 }
  0xb4   : > { %v757_v17 = vadd.f32 %v8271_v14, %v756_v16 }
  0xb6   : > { %v936_v18 = vmax.f32 %v757_v17, 0.0  ;;  %6021 = vmatmul.msk.bf16.gmra.mxu0 %vm638_vm0, %v6846_v15 }
  0xb8   : > { %1009 = vst.msk [vmem:[#allocation2] sm:$0xff] %vm1008_vm1, %v936_v18  ;;  %v6851_v18 = vld [vmem:[%s8250_s26 + $0x68] sm:$0xff] }
  0xbb   : > { %v758_v19 = vpop.f32.mrf.mxu0 }
  0xbc   : > { %v759_v20 = vadd.f32 %v8271_v14, %v758_v19 }
  0xbe   : > { %v937_v21 = vmax.f32 %v759_v20, 0.0 }
  0xc0   : > { %1010 = vst.msk [vmem:[#allocation2 + $0x8] sm:$0xff] %vm1008_vm1, %v937_v21 }
  0xc3   : > { %v761_v23 = vpop.f32.mrf.mxu0 }
  0xc4   : > { %v762_v24 = vadd.f32 %v8271_v14, %v761_v23 }
  0xc6   : > { %v938_v25 = vmax.f32 %v762_v24, 0.0  ;;  %6022 = vmatmul.msk.bf16.gmra.mxu0 %vm638_vm0, %v6847_v22 }
  0xc7   : > { %v1081_v21 = vld [vmem:[#allocation2] ss:$2 sm:$0xff]  ;;  %v1099_v22 = vld [vmem:[#allocation2 + $0x1] ss:$2 sm:$0xff] }
  0xc8   : > { %1011 = vst.msk [vmem:[#allocation2 + $0x10] sm:$0xff] %vm1008_vm1, %v938_v25 }
  0xcb   : > { %v763_v26 = vpop.f32.mrf.mxu0 }
  0xcc   : > { %v764_v27 = vadd.f32 %v8271_v14, %v763_v26 }
  0xce   : > { %v939_v28 = vmax.f32 %v764_v27, 0.0 }
  0xd0   : > { %1012 = vst.msk [vmem:[#allocation2 + $0x18] sm:$0xff] %vm1008_vm1, %v939_v28 }
  0xd3   : > { %v766_v30 = vpop.f32.mrf.mxu0 }
  0xd4   : > { %v767_v31 = vadd.f32 %v8271_v14, %v766_v30  ;;  %v8357_v30 = vmax.f32 %v1081_v21, %v1099_v22 }
  0xd6   : > { %v940_v32 = vmax.f32 %v767_v31, 0.0  ;;  %6023 = vmatmul.msk.bf16.gmra.mxu0 %vm638_vm0, %v6848_v29  ;;  %v1374_v21 = vrot.slane %v8357_v30, 7 }
  0xd7   : > { %v1083_v45 = vld [vmem:[#allocation2 + $0x10] ss:$2 sm:$0xff]  ;;  %v1101_v46 = vld [vmem:[#allocation2 + $0x11] ss:$2 sm:$0xff] }
  0xd8   : > { %1013 = vst.msk [vmem:[#allocation2 + $0x20] sm:$0xff] %vm1008_vm1, %v940_v32  ;;  %v8301_v51 = vmax.f32 %v1083_v45, %v1101_v46 }
  0xda   : > { %v1295_v59 = vrot.slane %v8301_v51, 5  ;;  %v1215_v60 = vrot.slane %v8301_v51, 3  ;;  %v1135_v61 = vrot.slane %v8301_v51, 1  ;;  %v1255_v19 = vrot.slane %v8301_v51, 4 }
  0xdb   : > { %v768_v33 = vpop.f32.mrf.mxu0  ;;  %v1175_v24 = vrot.slane %v8301_v51, 2  ;;  %v1375_v45 = vrot.slane %v8301_v51, 7 }
  0xdc   : > { %v769_v34 = vadd.f32 %v8271_v14, %v768_v33 }
  0xde   : > { %v941_v35 = vmax.f32 %v769_v34, 0.0 }
  0xe0   : > { %1014 = vst.msk [vmem:[#allocation2 + $0x28] sm:$0xff] %vm1008_vm1, %v941_v35 }
  0xe3   : > { %v771_v37 = vpop.f32.mrf.mxu0 }
  0xe4   : > { %v772_v38 = vadd.f32 %v8271_v14, %v771_v37 }
  0xe6   : > { %v942_v39 = vmax.f32 %v772_v38, 0.0  ;;  %6024 = vmatmul.msk.bf16.gmra.mxu0 %vm638_vm0, %v6849_v36 }
  0xe7   : > { %v1085_v43 = vld [vmem:[#allocation2 + $0x20] ss:$2 sm:$0xff]  ;;  %v1103_v44 = vld [vmem:[#allocation2 + $0x21] ss:$2 sm:$0xff] }
  0xe8   : > { %1015 = vst.msk [vmem:[#allocation2 + $0x30] sm:$0xff] %vm1008_vm1, %v942_v39  ;;  %v8297_v47 = vmax.f32 %v1085_v43, %v1103_v44 }
  0xea   : > { %v1297_v53 = vrot.slane %v8297_v47, 5  ;;  %v1217_v56 = vrot.slane %v8297_v47, 3  ;;  %v1137_v57 = vrot.slane %v8297_v47, 1  ;;  %v1257_v16 = vrot.slane %v8297_v47, 4 }
  0xeb   : > { %v773_v40 = vpop.f32.mrf.mxu0  ;;  %v1177_v17 = vrot.slane %v8297_v47, 2  ;;  %v1337_v38 = vrot.slane %v8297_v47, 6  ;;  %v1377_v39 = vrot.slane %v8297_v47, 7 }
  0xec   : > { %v774_v41 = vadd.f32 %v8271_v14, %v773_v40  ;;  %v1298_v2 = vsel %vm1293_vm2, %v1295_v59, %v1297_v53  ;;  %v1218_v3 = vsel %vm1213_vm3, %v1215_v60, %v1217_v56  ;;  %v1138_v4 = vsel %vm1133_vm4, %v1135_v61, %v1137_v57 }
  0xed   : > { %v1258_v27 = vsel %vm1253_vm5, %v1255_v19, %v1257_v16  ;;  %v1178_v29 = vsel %vm1173_vm6, %v1175_v24, %v1177_v17  ;;  %v1335_v40 = vrot.slane %v8301_v51, 6 }
  0xee   : > { %v943_v42 = vmax.f32 %v774_v41, 0.0 }
  0xf0   : > { %1016 = vst.msk [vmem:[#allocation2 + $0x38] sm:$0xff] %vm1008_vm1, %v943_v42  ;;  %v1134_v42 = vrot.slane %v8357_v30, 1 }
  0xf3   : > { %v776_v49 = vpop.f32.mrf.mxu0 }
  0xf4   : > { %v777_v50 = vadd.f32 %v8271_v14, %v776_v49  ;;  %v1338_v49 = vsel %vm1333_vm7, %v1335_v40, %v1337_v38 }
  0xf6   : > { %v944_v52 = vmax.f32 %v777_v50, 0.0  ;;  %6025 = vmatmul.msk.bf16.gmra.mxu0 %vm638_vm0, %v6850_v48  ;;  %v1136_v50 = vsel %vm1133_vm4, %v1134_v42, %v1135_v61 }
  0xf7   : > { %v1087_v54 = vld [vmem:[#allocation2 + $0x30] ss:$2 sm:$0xff]  ;;  %v1105_v55 = vld [vmem:[#allocation2 + $0x31] ss:$2 sm:$0xff] }
  0xf8   : > { %v8307_v58 = vmax.f32 %v1087_v54, %v1105_v55  ;;  %1017 = vst.msk [vmem:[#allocation2 + $0x40] sm:$0xff] %vm1008_vm1, %v944_v52  ;;  %v1378_v54 = vsel %vm1373_vm8, %v1375_v45, %v1377_v39 }
  0xfa   : > { %v1299_v62 = vrot.slane %v8307_v58, 5  ;;  %v1219_v63 = vrot.slane %v8307_v58, 3  ;;  %v1139_v0 = vrot.slane %v8307_v58, 1  ;;  %v1259_v13 = vrot.slane %v8307_v58, 4 }
  0xfb   : > { %v778_v1 = vpop.f32.mrf.mxu0  ;;  %v1179_v15 = vrot.slane %v8307_v58, 2  ;;  %v1339_v33 = vrot.slane %v8307_v58, 6  ;;  %v1379_v36 = vrot.slane %v8307_v58, 7 }
  0xfc   : > { %v779_v5 = vadd.f32 %v8271_v14, %v778_v1  ;;  %v1300_v6 = vsel %vm1293_vm2, %v1297_v53, %v1299_v62  ;;  %v1220_v7 = vsel %vm1213_vm3, %v1217_v56, %v1219_v63  ;;  %v1140_v8 = vsel %vm1133_vm4, %v1137_v57, %v1139_v0 }
  0xfd   : > { %v7160_v9 = vpack.i.bf16 %v1300_v6, %v1298_v2  ;;  %v7150_v10 = vpack.i.bf16 %v1220_v7, %v1218_v3  ;;  %v7140_v11 = vpack.i.bf16 %v1140_v8, %v1138_v4  ;;  %v1260_v20 = vsel %vm1253_vm5, %v1257_v16, %v1259_v13 }
  0xfe   : > { %v945_v12 = vmax.f32 %v779_v5, 0.0  ;;  %v1180_v25 = vsel %vm1173_vm6, %v1177_v17, %v1179_v15  ;;  %v7155_v28 = vpack.i.bf16 %v1260_v20, %v1258_v27  ;;  %v1340_v41 = vsel %vm1333_vm7, %v1337_v38, %v1339_v33 }
  0xff   : > { %7161 = vrot.lane.b32.xlu2 %v7160_v9, %s11535_s28  ;;  %7151 = vrot.lane.b32.xlu1 %v7150_v10, %s11533_s29  ;;  %v7145_v32 = vpack.i.bf16 %v1180_v25, %v1178_v29  ;;  %v1380_v46 = vsel %vm1373_vm8, %v1377_v39, %v1379_v36  ;;  %v7165_v53 = vpack.i.bf16 %v1340_v41, %v1338_v49  ;;  %v1254_v3 = vrot.slane %v8357_v30, 4 }
 0x100   : > { %1018 = vst.msk [vmem:[#allocation2 + $0x48] sm:$0xff] %vm1008_vm1, %v945_v12  ;;  %7141 = vrot.lane.b32.xlu0 %v7140_v11, %s11531_s14  ;;  %v7170_v57 = vpack.i.bf16 %v1380_v46, %v1378_v54  ;;  %v1214_v5 = vrot.slane %v8357_v30, 3  ;;  %v1174_v8 = vrot.slane %v8357_v30, 2  ;;  %v1376_v29 = vsel %vm1373_vm8, %v1374_v21, %v1375_v45 }
 0x101   : > { %v1256_v11 = vsel %vm1253_vm5, %v1254_v3, %v1255_v19 }
 0x103   : > { %v781_v23 = vpop.f32.mrf.mxu0 }
 0x104   : > { %v782_v26 = vadd.f32 %v8271_v14, %v781_v23  ;;  %v1294_v23 = vrot.slane %v8357_v30, 5 }
 0x106   : > { %v946_v31 = vmax.f32 %v782_v26, 0.0  ;;  %6026 = vmatmul.msk.bf16.gmra.mxu0 %vm638_vm0, %v6851_v18  ;;  %v1334_v26 = vrot.slane %v8357_v30, 6 }
 0x107   : > { %v1089_v34 = vld [vmem:[#allocation2 + $0x40] ss:$2 sm:$0xff]  ;;  %v1107_v35 = vld [vmem:[#allocation2 + $0x41] ss:$2 sm:$0xff]  ;;  %7156 = vrot.lane.b32.xlu1 %v7155_v28, %s11553_s16 }
 0x108   : > { %v8363_v37 = vmax.f32 %v1089_v34, %v1107_v35  ;;  %1019 = vst.msk [vmem:[#allocation2 + $0x50] sm:$0xff] %vm1008_vm1, %v946_v31  ;;  %7146 = vrot.lane.b32.xlu0 %v7145_v32, %s11549_s17  ;;  %v1336_v32 = vsel %vm1333_vm7, %v1334_v26, %v1335_v40 }
 0x10a   : > { %v1141_v43 = vrot.slane %v8363_v37, 1  ;;  %v1261_v1 = vrot.slane %v8363_v37, 4  ;;  %v1221_v2 = vrot.slane %v8363_v37, 3  ;;  %v1181_v61 = vrot.slane %v8363_v37, 2 }
 0x10b   : > { %v783_v44 = vpop.f32.mrf.mxu0  ;;  %v1301_v20 = vrot.slane %v8363_v37, 5  ;;  %v1341_v19 = vrot.slane %v8363_v37, 6 }
 0x10c   : > { %v784_v48 = vadd.f32 %v8271_v14, %v783_v44  ;;  %v1142_v52 = vsel %vm1133_vm4, %v1139_v0, %v1141_v43  ;;  %v6852_v0 = vld [vmem:[%s8250_s26 + $0x70] sm:$0xff]  ;;  %v1262_v4 = vsel %vm1253_vm5, %v1259_v13, %v1261_v1  ;;  %v1222_v6 = vsel %vm1213_vm3, %v1219_v63, %v1221_v2 }
 0x10d   : > { %v7175_v55 = vpack.i.bf16 %v1142_v52, %v1136_v50  ;;  %v1182_v9 = vsel %vm1173_vm6, %v1179_v15, %v1181_v61  ;;  %v1216_v63 = vsel %vm1213_vm3, %v1214_v5, %v1215_v60  ;;  %v7190_v12 = vpack.i.bf16 %v1262_v4, %v1256_v11  ;;  %v6865_v60 = vld [vmem:[%s8250_s26 + $0xd8] sm:$0xff]  ;;  %v6866_v52 = vld [vmem:[%s8250_s26 + $0xe0] sm:$0xff] }
 0x10e   : > { %v947_v56 = vmax.f32 %v784_v48, 0.0  ;;  %v1176_v13 = vsel %vm1173_vm6, %v1174_v8, %v1175_v24  ;;  %v7185_v16 = vpack.i.bf16 %v1222_v6, %v1216_v63  ;;  %v1381_v15 = vrot.slane %v8363_v37, 7  ;;  %6040 = vmatmul.msk.bf16.vlgmr.msra.gmra.mxu2 %vm638_vm0, %v6865_v60 }
 0x10f   : > { %7166 = vrot.lane.b32.xlu1 %v7165_v53, %s11551_s21  ;;  %7176 = vrot.lane.b32.xlu2 %v7175_v55, %s11531_s14  ;;  %v7180_v18 = vpack.i.bf16 %v1182_v9, %v1176_v13  ;;  %v1302_v24 = vsel %vm1293_vm2, %v1299_v62, %v1301_v20  ;;  %v1342_v27 = vsel %vm1333_vm7, %v1339_v33, %v1341_v19  ;;  %v6853_v33 = vld [vmem:[%s8250_s26 + $0x78] sm:$0xff]  ;;  %v6863_v13 = vld [vmem:[%s8250_s26 + $0xc8] sm:$0xff] }
 0x110   : > { %1020 = vst.msk [vmem:[#allocation2 + $0x58] sm:$0xff] %vm1008_vm1, %v947_v56  ;;  %7171 = vrot.lane.b32.xlu0 %v7170_v57, %s11537_s22  ;;  %v1382_v22 = vsel %vm1373_vm8, %v1379_v36, %v1381_v15  ;;  %v1296_v62 = vsel %vm1293_vm2, %v1294_v23, %v1295_v59  ;;  %v7200_v36 = vpack.i.bf16 %v1342_v27, %v1336_v32 }
 0x111   : > { %v7205_v31 = vpack.i.bf16 %v1382_v22, %v1376_v29  ;;  %v7195_v34 = vpack.i.bf16 %v1302_v24, %v1296_v62  ;;  %6038 = vmatmul.msk.bf16.vlgmr.msra.gmra.mxu1 %vm638_vm0, %v6863_v13 }
 0x113   : > { %v786_v7 = vpop.f32.mrf.mxu0 }
 0x114   : > { %v787_v10 = vadd.f32 %v8271_v14, %v786_v7 }
 0x116   : > { %v948_v17 = vmax.f32 %v787_v10, 0.0  ;;  %6027 = vmatmul.msk.bf16.gmra.mxu0 %vm638_vm0, %v6852_v0 }
 0x117   : > { %7191 = vrot.lane.b32.xlu1 %v7190_v12, %s11553_s16  ;;  %7186 = vrot.lane.b32.xlu2 %v7185_v16, %s11533_s29  ;;  %v1091_v38 = vld [vmem:[#allocation2 + $0x50] ss:$2 sm:$0xff]  ;;  %v1109_v39 = vld [vmem:[#allocation2 + $0x51] ss:$2 sm:$0xff] }
 0x118   : > { %1021 = vst.msk [vmem:[#allocation2 + $0x60] sm:$0xff] %vm1008_vm1, %v948_v17  ;;  %7181 = vrot.lane.b32.xlu0 %v7180_v18, %s11549_s17  ;;  %v8462_v59 = vmax.f32 %v1091_v38, %v1109_v39  ;;  %v6854_v17 = vld [vmem:[%s8250_s26 + $0x80] sm:$0xff] }
 0x11a   : > { %v1223_v44 = vrot.slane %v8462_v59, 3  ;;  %v1183_v48 = vrot.slane %v8462_v59, 2  ;;  %v1143_v49 = vrot.slane %v8462_v59, 1  ;;  %v1343_v63 = vrot.slane %v8462_v59, 6 }
 0x11b   : > { %v788_v25 = vpop.f32.mrf.mxu0  ;;  %v1303_v12 = vrot.slane %v8462_v59, 5  ;;  %v1263_v16 = vrot.slane %v8462_v59, 4 }
 0x11c   : > { %v789_v28 = vadd.f32 %v8271_v14, %v788_v25  ;;  %v1224_v57 = vsel %vm1213_vm3, %v1221_v2, %v1223_v44  ;;  %v1184_v0 = vsel %vm1173_vm6, %v1181_v61, %v1183_v48  ;;  %v1144_v3 = vsel %vm1133_vm4, %v1141_v43, %v1143_v49 }
 0x11d   : > { %v1344_v24 = vsel %vm1333_vm7, %v1341_v19, %v1343_v63  ;;  %v1304_v25 = vsel %vm1293_vm2, %v1301_v20, %v1303_v12  ;;  %v6867_v20 = vld [vmem:[%s8250_s26 + $0xe8] sm:$0xff] }
 0x11e   : > { %v949_v35 = vmax.f32 %v789_v28, 0.0  ;;  %6041 = vmatmul.msk.bf16.gmra.mxu2 %vm638_vm0, %v6866_v52  ;;  %v1264_v28 = vsel %vm1253_vm5, %v1261_v1, %v1263_v16  ;;  %v1383_v1 = vrot.slane %v8462_v59, 7 }
 0x11f   : > { %7206 = vrot.lane.b32.xlu1 %v7205_v31, %s11537_s22  ;;  %7196 = vrot.lane.b32.xlu2 %v7195_v34, %s11535_s28 }
 0x120   : > { %1022 = vst.msk [vmem:[#allocation2 + $0x68] sm:$0xff] %vm1008_vm1, %v949_v35  ;;  %7201 = vrot.lane.b32.xlu0 %v7200_v36, %s11551_s21 }
 0x123   : > { %v791_v41 = vpop.f32.mrf.mxu0 }
 0x124   : > { %v792_v40 = vadd.f32 %v8271_v14, %v791_v41 }
 0x126   : > { %v950_v42 = vmax.f32 %v792_v40, 0.0  ;;  %6028 = vmatmul.msk.bf16.gmra.mxu0 %vm638_vm0, %v6853_v33  ;;  %v1384_v40 = vsel %vm1373_vm8, %v1381_v15, %v1383_v1 }
 0x127   : > { %v1093_v45 = vld [vmem:[#allocation2 + $0x60] ss:$2 sm:$0xff]  ;;  %v1111_v46 = vld [vmem:[#allocation2 + $0x61] ss:$2 sm:$0xff] }
 0x128   : > { %v8470_v50 = vmax.f32 %v1093_v45, %v1111_v46  ;;  %1023 = vst.msk [vmem:[#allocation2 + $0x70] sm:$0xff] %vm1008_vm1, %v950_v42  ;;  %v6864_v46 = vld [vmem:[%s8250_s26 + $0xd0] sm:$0xff] }
 0x129   : > { %6039 = vmatmul.msk.bf16.gmra.mxu1 %vm638_vm0, %v6864_v46  ;;  %v6880_v46 = vld [vmem:[%s11524_s3] sm:$0xff] }
 0x12a   : > { %v1225_v53 = vrot.slane %v8470_v50, 3  ;;  %v1185_v54 = vrot.slane %v8470_v50, 2  ;;  %v1145_v55 = vrot.slane %v8470_v50, 1  ;;  %v1345_v43 = vrot.slane %v8470_v50, 6 }
 0x12b   : > { %v793_v56 = vpop.f32.mrf.mxu0  ;;  %v1305_v10 = vrot.slane %v8470_v50, 5  ;;  %v1265_v11 = vrot.slane %v8470_v50, 4  ;;  %v1385_v19 = vrot.slane %v8470_v50, 7 }
 0x12c   : > { %v794_v4 = vadd.f32 %v8271_v14, %v793_v56  ;;  %v1226_v5 = vsel %vm1213_vm3, %v1223_v44, %v1225_v53  ;;  %v1186_v6 = vsel %vm1173_vm6, %v1183_v48, %v1185_v54  ;;  %v1146_v2 = vsel %vm1133_vm4, %v1143_v49, %v1145_v55  ;;  %v6855_v48 = vld [vmem:[%s8250_s26 + $0x88] sm:$0xff] }
 0x12d   : > { %v7220_v7 = vpack.i.bf16 %v1226_v5, %v1224_v57  ;;  %v7215_v61 = vpack.i.bf16 %v1186_v6, %v1184_v0  ;;  %v7210_v8 = vpack.i.bf16 %v1146_v2, %v1144_v3  ;;  %v1346_v18 = vsel %vm1333_vm7, %v1343_v63, %v1345_v43  ;;  %v6895_v57 = vld [vmem:[%s11524_s3 + $0x78] sm:$0xff]  ;;  %v6868_v0 = vld [vmem:[%s8250_s26 + $0xf0] sm:$0xff]  ;;  %v6893_v2 = vld [vmem:[%s11524_s3 + $0x68] sm:$0xff] }
 0x12e   : > { %v951_v9 = vmax.f32 %v794_v4, 0.0  ;;  %v1306_v60 = vsel %vm1293_vm2, %v1303_v12, %v1305_v10  ;;  %v1266_v22 = vsel %vm1253_vm5, %v1263_v16, %v1265_v11  ;;  %v7235_v26 = vpack.i.bf16 %v1346_v18, %v1344_v24  ;;  %6042 = vmatmul.msk.bf16.gmra.mxu2 %vm638_vm0, %v6867_v20  ;;  %v6894_v5 = vld [vmem:[%s11524_s3 + $0x70] sm:$0xff]  ;;  %v6887_v63 = vld [vmem:[%s11524_s3 + $0x38] sm:$0xff] }
 0x12f   : > { %7221 = vrot.lane.b32.xlu1 %v7220_v7, %s11533_s29  ;;  %7216 = vrot.lane.b32.xlu0 %v7215_v61, %s11549_s17  ;;  %v7230_v27 = vpack.i.bf16 %v1306_v60, %v1304_v25  ;;  %v7225_v62 = vpack.i.bf16 %v1266_v22, %v1264_v28  ;;  %v1386_v38 = vsel %vm1373_vm8, %v1383_v1, %v1385_v19  ;;  %v6856_v6 = vld [vmem:[%s8250_s26 + $0x90] sm:$0xff]  ;;  %v6891_v12 = vld [vmem:[%s11524_s3 + $0x58] sm:$0xff] }
 0x130   : > { %1024 = vst.msk [vmem:[#allocation2 + $0x78] sm:$0xff] %vm1008_vm1, %v951_v9  ;;  %7211 = vrot.lane.b32.xlu2 %v7210_v8, %s11531_s14  ;;  %v7240_v44 = vpack.i.bf16 %v1386_v38, %v1384_v40  ;;  %1714 = vmatpush.bf16.msrb.mxu2 %v6895_v57  ;;  %v6892_v9 = vld [vmem:[%s11524_s3 + $0x60] sm:$0xff]  ;;  %v6886_v18 = vld [vmem:[%s11524_s3 + $0x30] sm:$0xff]  ;;  %v6885_v22 = vld [vmem:[%s11524_s3 + $0x28] sm:$0xff] }
 0x131   : > { %1685 = vmatpush.bf16.msrb.mxu1 %v6887_v63  ;;  %v6890_v60 = vld [vmem:[%s11524_s3 + $0x50] sm:$0xff]  ;;  %v6888_v28 = vld [vmem:[%s11524_s3 + $0x40] sm:$0xff] }
 0x132   : > { %v6882_v1 = vld [vmem:[%s11524_s3 + $0x10] sm:$0xff] }
 0x133   : > { %v796_v21 = vpop.f32.mrf.mxu0 }
 0x134   : > { %v797_v23 = vadd.f32 %v8271_v14, %v796_v21  ;;  %1715 = vmatpush.bf16.msrb.mxu2 %v6894_v5  ;;  %v6857_v21 = vld [vmem:[%s8250_s26 + $0x98] sm:$0xff] }
 0x135   : > { %1686 = vmatpush.bf16.msrb.mxu1 %v6886_v18 }
 0x136   : > { %v952_v29 = vmax.f32 %v797_v23, 0.0  ;;  %6029 = vmatmul.msk.bf16.gmra.mxu0 %vm638_vm0, %v6854_v17  ;;  %v6889_v23 = vld [vmem:[%s11524_s3 + $0x48] sm:$0xff] }
 0x137   : > { %v1095_v31 = vld [vmem:[#allocation2 + $0x70] ss:$2 sm:$0xff]  ;;  %v1113_v32 = vld [vmem:[#allocation2 + $0x71] ss:$2 sm:$0xff]  ;;  %7236 = vrot.lane.b32.xlu1 %v7235_v26, %s11551_s21  ;;  %7231 = vrot.lane.b32.xlu0 %v7230_v27, %s11535_s28  ;;  %v6884_v27 = vld [vmem:[%s11524_s3 + $0x20] sm:$0xff]  ;;  %s11601_s28 = smov 112  }
 0x138   : > { %v8531_v34 = vmax.f32 %v1095_v31, %v1113_v32  ;;  %1025 = vst.msk [vmem:[#allocation2 + $0x80] sm:$0xff] %vm1008_vm1, %v952_v29  ;;  %7226 = vrot.lane.b32.xlu2 %v7225_v62, %s11553_s16  ;;  %1716 = vmatpush.bf16.msrb.mxu2 %v6893_v2  ;;  %v6869_v29 = vld [vmem:[%s8250_s26 + $0xf8] sm:$0xff] }
 0x139   : > { %1687 = vmatpush.bf16.msrb.mxu1 %v6885_v22  ;;  %v6883_v62 = vld [vmem:[%s11524_s3 + $0x18] sm:$0xff]  ;;  %6044 = vmatmul.msk.bf16.vlgmr.msra.gmra.mxu3 %vm638_vm0, %v6869_v29 }
 0x13a   : > { %v8538_v35 = vrot.slane %v8531_v34, 1  ;;  %v8553_v45 = vrot.slane %v8531_v34, 3 }
 0x13b   : > { %v798_v36 = vpop.f32.mrf.mxu0 }
 0x13c   : > { %v799_v39 = vadd.f32 %v8271_v14, %v798_v36  ;;  %v1148_v33 = vsel %vm1133_vm4, %v1145_v55, %v8538_v35  ;;  %v1228_v15 = vsel %vm1213_vm3, %v1225_v53, %v8553_v45  ;;  %1717 = vmatpush.bf16.msrb.mxu2 %v6892_v9 }
 0x13d   : > { %v7245_v41 = vpack.i.bf16 %v8538_v35, %v1148_v33  ;;  %v7250_v56 = vpack.i.bf16 %v8553_v45, %v1228_v15  ;;  %1688 = vmatpush.bf16.msrb.mxu1 %v6884_v27  ;;  %v6858_v33 = vld [vmem:[%s8250_s26 + $0xa0] sm:$0xff] }
 0x13e   : > { %v953_v42 = vmax.f32 %v799_v39, 0.0  ;;  %6043 = vmatmul.msk.bf16.gmra.mxu2 %vm638_vm0, %v6868_v0 }
 0x13f   : > { %7246 = vrot.lane.b32.xlu0 %v7245_v41, %s11531_s14  ;;  %v6881_v41 = vld [vmem:[%s11524_s3 + $0x8] sm:$0xff] }
 0x140   : > { %1026 = vst.msk [vmem:[#allocation2 + $0x88] sm:$0xff] %vm1008_vm1, %v953_v42  ;;  %7241 = vrot.lane.b32.xlu2 %v7240_v44, %s11537_s22  ;;  %1718 = vmatpush.bf16.msrb.mxu2 %v6891_v12  ;;  %s11602_s22 = smov 80  }
 0x141   : > { %1689 = vmatpush.bf16.msrb.mxu1 %v6883_v62 }
 0x143   : > { %v801_v49 = vpop.f32.mrf.mxu0 }
 0x144   : > { %v802_v52 = vadd.f32 %v8271_v14, %v801_v49  ;;  %1719 = vmatpush.bf16.msrb.mxu2 %v6890_v60 }
 0x145   : > { %1690 = vmatpush.bf16.msrb.mxu1 %v6882_v1 }
 0x146   : > { %v954_v55 = vmax.f32 %v802_v52, 0.0  ;;  %6030 = vmatmul.msk.bf16.gmra.mxu0 %vm638_vm0, %v6855_v48 }
 0x148   : > { %1027 = vst.msk [vmem:[#allocation2 + $0x90] sm:$0xff] %vm1008_vm1, %v954_v55  ;;  %7251 = vrot.lane.b32.xlu2 %v7250_v56, %s11533_s29  ;;  %1720 = vmatpush.bf16.msrb.mxu2 %v6889_v23  ;;  %v6859_v23 = vld [vmem:[%s8250_s26 + $0xa8] sm:$0xff] }
 0x149   : > { %1691 = vmatpush.bf16.msrb.mxu1 %v6881_v41 }
 0x14b   : > { %v803_v3 = vpop.f32.mrf.mxu0 }
 0x14c   : > { %v804_v53 = vadd.f32 %v8271_v14, %v803_v3  ;;  %1721 = vmatpush.bf16.msrb.mxu2 %v6888_v28 }
 0x14d   : > { %1692 = vmatpush.bf16.msrb.mxu1 %v6880_v46 }
 0x14e   : > { %v955_v4 = vmax.f32 %v804_v53, 0.0 }
 0x150   : > { %1028 = vst.msk [vmem:[#allocation2 + $0x98] sm:$0xff] %vm1008_vm1, %v955_v4 }
 0x153   : > { %v806_v7 = vpop.f32.mrf.mxu0 }
 0x154   : > { %v807_v61 = vadd.f32 %v8271_v14, %v806_v7 }
 0x156   : > { %v956_v8 = vmax.f32 %v807_v61, 0.0  ;;  %6031 = vmatmul.msk.bf16.gmra.mxu0 %vm638_vm0, %v6856_v6 }
 0x158   : > { %1029 = vst.msk [vmem:[#allocation2 + $0xa0] sm:$0xff] %vm1008_vm1, %v956_v8 }
 0x159   : > { %v7162_v36 = vpop.permute.xlu2 %7161 }
 0x15b   : > { %v808_v13 = vpop.f32.mrf.mxu0 }
 0x15c   : > { %v809_v16 = vadd.f32 %v8271_v14, %v808_v13  ;;  %v7164_v13 = vunpack.i.h.bf16 %v7162_v36 }
 0x15e   : > { %v957_v17 = vmax.f32 %v809_v16, 0.0  ;;  %v7163_v16 = vunpack.i.l.bf16 %v7162_v36 }
 0x160   : > { %1030 = vst.msk [vmem:[#allocation2 + $0xa8] sm:$0xff] %vm1008_vm1, %v957_v17 }
 0x163   : > { %v811_v24 = vpop.f32.mrf.mxu0 }
 0x164   : > { %v812_v25 = vadd.f32 %v8271_v14, %v811_v24 }
 0x166   : > { %v958_v26 = vmax.f32 %v812_v25, 0.0  ;;  %6032 = vmatmul.msk.bf16.gmra.mxu0 %vm638_vm0, %v6857_v21 }
 0x168   : > { %1031 = vst.msk [vmem:[#allocation2 + $0xb0] sm:$0xff] %vm1008_vm1, %v958_v26 }
 0x169   : > { %v8638_v48 = vpop.permute.xlu2 %7176 }
 0x16b   : > { %v813_v31 = vpop.f32.mrf.mxu0 }
 0x16c   : > { %v814_v32 = vadd.f32 %v8271_v14, %v813_v31 }
 0x16e   : > { %v959_v20 = vmax.f32 %v814_v32, 0.0 }
 0x170   : > { %1032 = vst.msk [vmem:[#allocation2 + $0xb8] sm:$0xff] %vm1008_vm1, %v959_v20 }
 0x171   : > { %v7152_v38 = vpop.permute.xlu1 %7151  ;;  %v7187_v18 = vpop.permute.xlu2 %7186 }
 0x172   : > { %v7142_v39 = vpop.permute.xlu0 %7141  ;;  %v7154_v56 = vunpack.i.h.bf16 %v7152_v38  ;;  %v7153_v53 = vunpack.i.l.bf16 %v7152_v38  ;;  %v7178_v38 = vunpack.i.l.bf16 %v8638_v48 }
 0x173   : > { %v816_v40 = vpop.f32.mrf.mxu0  ;;  %v7144_v49 = vunpack.i.h.bf16 %v7142_v39  ;;  %v7143_v15 = vunpack.i.l.bf16 %v7142_v39 }
 0x174   : > { %v817_v42 = vadd.f32 %v8271_v14, %v816_v40 }
 0x175   : > { %v1472_v4 = vsel %vm1008_vm1, %v8297_v47, %v7144_v49  ;;  %v1471_v5 = vsel %vm1008_vm1, %v8301_v51, %v7143_v15 }
 0x176   : > { %v960_v44 = vmax.f32 %v817_v42, 0.0  ;;  %6033 = vmatmul.msk.bf16.gmra.mxu0 %vm638_vm0, %v6858_v33  ;;  %v1470_v42 = vsel %vm1008_vm1, %v8357_v30, %v7178_v38  ;;  %v6861_v38 = vld [vmem:[%s8250_s26 + $0xb8] sm:$0xff] }
 0x178   : > { %1033 = vst.msk [vmem:[#allocation2 + $0xc0] sm:$0xff] %vm1008_vm1, %v960_v44  ;;  %v7188_v44 = vunpack.i.l.bf16 %v7187_v18 }
 0x179   : > { %v7157_v52 = vpop.permute.xlu1 %7156  ;;  %v7197_v46 = vpop.permute.xlu2 %7196 }
 0x17a   : > { %v7147_v55 = vpop.permute.xlu0 %7146  ;;  %v7159_v2 = vunpack.i.h.bf16 %v7157_v52  ;;  %v7158_v8 = vunpack.i.l.bf16 %v7157_v52 }
 0x17b   : > { %v7149_v57 = vunpack.i.h.bf16 %v7147_v55  ;;  %v7148_v0 = vunpack.i.l.bf16 %v7147_v55  ;;  %v818_v3 = vpop.f32.mrf.mxu0 }
 0x17c   : > { %v819_v6 = vadd.f32 %v8271_v14, %v818_v3  ;;  %v7179_v3 = vunpack.i.h.bf16 %v8638_v48 }
 0x17d   : > { %v1480_v7 = vsel %vm1478_vm9, %v1471_v5, %v7148_v0  ;;  %v1481_v61 = vsel %vm1478_vm9, %v1472_v4, %v7149_v57  ;;  %v6860_v5 = vld [vmem:[%s8250_s26 + $0xb0] sm:$0xff] }
 0x17e   : > { %v1489_v9 = vsel %vm1487_vm10, %v1480_v7, %v7153_v53  ;;  %v1490_v63 = vsel %vm1487_vm10, %v1481_v61, %v7154_v56  ;;  %v961_v12 = vmax.f32 %v819_v6, 0.0  ;;  %v7198_v53 = vunpack.i.l.bf16 %v7197_v46 }
 0x17f   : > { %v1498_v47 = vsel %vm1496_vm11, %v1489_v9, %v7158_v8  ;;  %v1499_v51 = vsel %vm1496_vm11, %v1490_v63, %v7159_v2 }
 0x180   : > { %1034 = vst.msk [vmem:[#allocation2 + $0xc8] sm:$0xff] %vm1008_vm1, %v961_v12  ;;  %v1507_v27 = vsel %vm1505_vm12, %v1498_v47, %v7163_v16  ;;  %v1508_v28 = vsel %vm1505_vm12, %v1499_v51, %v7164_v13  ;;  %v1473_v12 = vsel %vm1008_vm1, %v8307_v58, %v7179_v3  ;;  %v7189_v16 = vunpack.i.h.bf16 %v7187_v18 }
 0x181   : > { %v7167_v17 = vpop.permute.xlu1 %7166 }
 0x182   : > { %v7169_v60 = vunpack.i.h.bf16 %v7167_v17  ;;  %v7168_v21 = vunpack.i.l.bf16 %v7167_v17  ;;  %v7172_v22 = vpop.permute.xlu0 %7171 }
 0x183   : > { %v7174_v24 = vunpack.i.h.bf16 %v7172_v22  ;;  %v7173_v25 = vunpack.i.l.bf16 %v7172_v22  ;;  %v821_v26 = vpop.f32.mrf.mxu0 }
 0x184   : > { %v822_v29 = vadd.f32 %v8271_v14, %v821_v26  ;;  %v1515_v62 = vsel %vm638_vm0, %v1507_v27, %v7168_v21  ;;  %v1516_v31 = vsel %vm638_vm0, %v1508_v28, %v7169_v60 }
 0x185   : > { %v1524_v32 = vsel %vm1522_vm13, %v1515_v62, %v7173_v25  ;;  %v8661_v20 = vsel %vm1522_vm13, %v1516_v31, %v7174_v24  ;;  %v7199_v24 = vunpack.i.h.bf16 %v7197_v46 }
 0x186   : > { %v962_v1 = vmax.f32 %v822_v29, 0.0  ;;  %6034 = vmatmul.msk.bf16.gmra.mxu0 %vm638_vm0, %v6859_v23  ;;  %v1546_v36 = vpack.c.bf16 %v8661_v20, %v1524_v32 }
 0x188   : > { %1035 = vst.msk [vmem:[#allocation2 + $0xd0] sm:$0xff] %vm1008_vm1, %v962_v1  ;;  %1722 = vmatmul.bf16.vlgmr.msrb.gmra.mxu2 %v1546_v36 }
 0x189   : > { %v7192_v39 = vpop.permute.xlu1 %7191 }
 0x18a   : > { %v7182_v33 = vpop.permute.xlu0 %7181  ;;  %v7193_v56 = vunpack.i.l.bf16 %v7192_v39  ;;  %v7212_v61 = vpop.permute.xlu2 %7211  ;;  %v7194_v60 = vunpack.i.h.bf16 %v7192_v39 }
 0x18b   : > { %v7183_v41 = vunpack.i.l.bf16 %v7182_v33  ;;  %v823_v40 = vpop.f32.mrf.mxu0  ;;  %v7184_v6 = vunpack.i.h.bf16 %v7182_v33  ;;  %v7213_v28 = vunpack.i.l.bf16 %v7212_v61  ;;  %v7214_v1 = vunpack.i.h.bf16 %v7212_v61 }
 0x18c   : > { %v824_v49 = vadd.f32 %v8271_v14, %v823_v40 }
 0x18d   : > { %v1479_v15 = vsel %vm1478_vm9, %v1470_v42, %v7183_v41  ;;  %v1482_v51 = vsel %vm1478_vm9, %v1473_v12, %v7184_v6  ;;  %v1474_v41 = vsel %vm1008_vm1, %v8363_v37, %v7213_v28 }
 0x18e   : > { %v1488_v52 = vsel %vm1487_vm10, %v1479_v15, %v7188_v44  ;;  %v963_v55 = vmax.f32 %v824_v49, 0.0  ;;  %v1491_v17 = vsel %vm1487_vm10, %v1482_v51, %v7189_v16  ;;  %v1475_v49 = vsel %vm1008_vm1, %v8462_v59, %v7214_v1 }
 0x18f   : > { %v1497_v0 = vsel %vm1496_vm11, %v1488_v52, %v7193_v56  ;;  %v1500_v23 = vsel %vm1496_vm11, %v1491_v17, %v7194_v60 }
 0x190   : > { %1036 = vst.msk [vmem:[#allocation2 + $0xd8] sm:$0xff] %vm1008_vm1, %v963_v55  ;;  %v1506_v9 = vsel %vm1505_vm12, %v1497_v0, %v7198_v53  ;;  %v1509_v18 = vsel %vm1505_vm12, %v1500_v23, %v7199_v24 }
 0x191   : > { %v7207_v57 = vpop.permute.xlu1 %7206  ;;  %v891_v27 = vpop.f32.mrf.mxu2 }
 0x192   : > { %v7208_v4 = vunpack.i.l.bf16 %v7207_v57  ;;  %v7202_v30 = vpop.permute.xlu0 %7201  ;;  %v7227_v25 = vpop.permute.xlu2 %7226  ;;  %v7209_v29 = vunpack.i.h.bf16 %v7207_v57  ;;  %v892_v3 = vadd.f32 %v8271_v14, %v891_v27  ;;  %v8722_v27 = vld [vmem:[%s11594_s2] ss:$0 sm:$0xff] }
 0x193   : > { %v7203_v2 = vunpack.i.l.bf16 %v7202_v30  ;;  %v826_v7 = vpop.f32.mrf.mxu0  ;;  %v7204_v58 = vunpack.i.h.bf16 %v7202_v30 }
 0x194   : > { %v827_v8 = vadd.f32 %v8271_v14, %v826_v7 }
 0x195   : > { %v1514_v63 = vsel %vm638_vm0, %v1506_v9, %v7203_v2  ;;  %v990_v9 = vmax.f32 %v892_v3, 0.0 }
 0x196   : > { %v964_v47 = vmax.f32 %v827_v8, 0.0  ;;  %6035 = vmatmul.msk.bf16.gmra.mxu0 %vm638_vm0, %v6860_v5  ;;  %v1523_v48 = vsel %vm1522_vm13, %v1514_v63, %v7208_v4  ;;  %v7228_v4 = vunpack.i.l.bf16 %v7227_v25 }
 0x197   : > { %v1545_v13 = vpack.c.bf16 %v1524_v32, %v1523_v48  ;;  %v1517_v32 = vsel %vm638_vm0, %v1509_v18, %v7204_v58  ;;  %1063 = vst.msk [vmem:[#allocation2 + $0x1b0] sm:$0xff] %vm1008_vm1, %v990_v9  ;;  %v881_v58 = vpop.f32.mrf.mxu1 }
 0x198   : > { %1037 = vst.msk [vmem:[#allocation2 + $0xe0] sm:$0xff] %vm1008_vm1, %v964_v47  ;;  %v1526_v44 = vsel %vm1522_vm13, %v1517_v32, %v7209_v29  ;;  %v882_v1 = vadd.f32 %v8722_v27, %v881_v58 }
 0x199   : > { %1693 = vmatmul.bf16.vlgmr.msrb.gmra.mxu1 %v1545_v13  ;;  %v1547_v56 = vpack.c.bf16 %v1526_v44, %v8661_v20  ;;  %v893_v57 = vpop.f32.mrf.mxu2  ;;  %v7229_v20 = vunpack.i.h.bf16 %v7227_v25  ;;  %v6862_v25 = vld [vmem:[%s8250_s26 + $0xc0] sm:$0xff] }
 0x19a   : > { %v7242_v37 = vpop.permute.xlu2 %7241  ;;  %v894_v53 = vadd.f32 %v8271_v14, %v893_v57 }
 0x19b   : > { %v828_v21 = vpop.f32.mrf.mxu0  ;;  %v7243_v12 = vunpack.i.l.bf16 %v7242_v37  ;;  %v7244_v24 = vunpack.i.h.bf16 %v7242_v37 }
 0x19c   : > { %v829_v22 = vadd.f32 %v8271_v14, %v828_v21  ;;  %v991_v63 = vmax.f32 %v894_v53, 0.0 }
 0x19e   : > { %v965_v26 = vmax.f32 %v829_v22, 0.0  ;;  %1064 = vst.msk [vmem:[#allocation2 + $0x1b8] sm:$0xff] %vm1008_vm1, %v991_v63 }
 0x1a0   : > { %1038 = vst.msk [vmem:[#allocation2 + $0xe8] sm:$0xff] %vm1008_vm1, %v965_v26 }
 0x1a1   : > { %v7222_v62 = vpop.permute.xlu1 %7221  ;;  %v7217_v31 = vpop.permute.xlu0 %7216 }
 0x1a2   : > { %v7218_v36 = vunpack.i.l.bf16 %v7217_v31  ;;  %v7219_v39 = vunpack.i.h.bf16 %v7217_v31  ;;  %v7223_v40 = vunpack.i.l.bf16 %v7222_v62  ;;  %v7224_v15 = vunpack.i.h.bf16 %v7222_v62  ;;  %v883_v31 = vpop.f32.mrf.mxu1 }
 0x1a3   : > { %v831_v33 = vpop.f32.mrf.mxu0 }
 0x1a4   : > { %v832_v42 = vadd.f32 %v8271_v14, %v831_v33  ;;  %v1483_v46 = vsel %vm1478_vm9, %v1474_v41, %v7218_v36  ;;  %v1484_v55 = vsel %vm1478_vm9, %v1475_v49, %v7219_v39  ;;  %v986_v33 = vmax.f32 %v882_v1, 0.0 }
 0x1a5   : > { %v1492_v0 = vsel %vm1487_vm10, %v1483_v46, %v7223_v40  ;;  %v1493_v5 = vsel %vm1487_vm10, %v1484_v55, %v7224_v15 }
 0x1a6   : > { %v966_v52 = vmax.f32 %v832_v42, 0.0  ;;  %6036 = vmatmul.msk.bf16.gmra.mxu0 %vm638_vm0, %v6861_v38  ;;  %v1501_v8 = vsel %vm1496_vm11, %v1492_v0, %v7228_v4  ;;  %v1502_v16 = vsel %vm1496_vm11, %v1493_v5, %v7229_v20  ;;  %v884_v38 = vadd.f32 %v8722_v27, %v883_v31  ;;  %1059 = vst.msk [vmem:[#allocation2 + $0x190] sm:$0xff] %vm1008_vm1, %v986_v33 }
 0x1a8   : > { %1039 = vst.msk [vmem:[#allocation2 + $0xf0] sm:$0xff] %vm1008_vm1, %v966_v52  ;;  %v987_v40 = vmax.f32 %v884_v38, 0.0 }
 0x1a9   : > { %1698 = vmatmul.bf16.gmra.mxu1 %v1547_v56  ;;  %v7237_v59 = vpop.permute.xlu1 %7236  ;;  %v7232_v30 = vpop.permute.xlu0 %7231 }
 0x1aa   : > { %v7238_v6 = vunpack.i.l.bf16 %v7237_v59  ;;  %v7234_v2 = vunpack.i.h.bf16 %v7232_v30  ;;  %v7233_v7 = vunpack.i.l.bf16 %v7232_v30  ;;  %v7239_v51 = vunpack.i.h.bf16 %v7237_v59  ;;  %1060 = vst.msk [vmem:[#allocation2 + $0x198] sm:$0xff] %vm1008_vm1, %v987_v40  ;;  %v886_v15 = vpop.f32.mrf.mxu1 }
 0x1ab   : > { %v833_v61 = vpop.f32.mrf.mxu0  ;;  %v887_v3 = vadd.f32 %v8722_v27, %v886_v15 }
 0x1ac   : > { %v834_v47 = vadd.f32 %v8271_v14, %v833_v61  ;;  %v1510_v48 = vsel %vm1505_vm12, %v1501_v8, %v7233_v7  ;;  %v1511_v21 = vsel %vm1505_vm12, %v1502_v16, %v7234_v2  ;;  %v896_v14 = vpop.f32.mrf.mxu2 }
 0x1ad   : > { %v1518_v13 = vsel %vm638_vm0, %v1510_v48, %v7238_v6  ;;  %v1519_v23 = vsel %vm638_vm0, %v1511_v21, %v7239_v51  ;;  %v897_v36 = vadd.f32 %v8722_v27, %v896_v14  ;;  %v988_v30 = vmax.f32 %v887_v3, 0.0 }
 0x1ae   : > { %v967_v17 = vmax.f32 %v834_v47, 0.0  ;;  %v1527_v60 = vsel %vm1522_vm13, %v1518_v13, %v7243_v12  ;;  %v8726_v29 = vsel %vm1522_vm13, %v1519_v23, %v7244_v24 }
 0x1af   : > { %v1548_v22 = vpack.c.bf16 %v1527_v60, %v1526_v44  ;;  %v1549_v62 = vpack.c.bf16 %v8726_v29, %v1527_v60  ;;  %v992_v41 = vmax.f32 %v897_v36, 0.0  ;;  %1061 = vst.msk [vmem:[#allocation2 + $0x1a0] sm:$0xff] %vm1008_vm1, %v988_v30 }
 0x1b0   : > { %1040 = vst.msk [vmem:[#allocation2 + $0xf8] sm:$0xff] %vm1008_vm1, %v967_v17 }
 0x1b1   : > { %1727 = vmatmul.bf16.gmra.mxu2 %v1548_v22  ;;  %1065 = vst.msk [vmem:[#allocation2 + $0x1c0] sm:$0xff] %vm1008_vm1, %v992_v41 }
 0x1b2   : > { %v888_v37 = vpop.f32.mrf.mxu1 }
 0x1b3   : > { %v836_v26 = vpop.f32.mrf.mxu0  ;;  %v889_v4 = vadd.f32 %v8722_v27, %v888_v37 }
 0x1b4   : > { %v837_v28 = vadd.f32 %v8722_v27, %v836_v26  ;;  %v898_v32 = vpop.f32.mrf.mxu2 }
 0x1b5   : > { %v899_v39 = vadd.f32 %v8722_v27, %v898_v32  ;;  %v989_v6 = vmax.f32 %v889_v4, 0.0 }
 0x1b6   : > { %v968_v18 = vmax.f32 %v837_v28, 0.0  ;;  %6037 = vmatmul.msk.bf16.gmra.mxu0 %vm638_vm0, %v6862_v25 }
 0x1b7   : > { %v993_v44 = vmax.f32 %v899_v39, 0.0  ;;  %1062 = vst.msk [vmem:[#allocation2 + $0x1a8] sm:$0xff] %vm1008_vm1, %v989_v6 }
 0x1b8   : > { %1041 = vst.msk [vmem:[#allocation2 + $0x100] sm:$0xff] %vm1008_vm1, %v968_v18 }
 0x1b9   : > { %1703 = vmatmul.bf16.gmra.mxu1 %v1549_v62  ;;  %1066 = vst.msk [vmem:[#allocation2 + $0x1c8] sm:$0xff] %vm1008_vm1, %v993_v44 }
 0x1bb   : > { %v838_v42 = vpop.f32.mrf.mxu0 }
 0x1bc   : > { %v839_v46 = vadd.f32 %v8722_v27, %v838_v42  ;;  %v901_v52 = vpop.f32.mrf.mxu2  ;;  %v911_v25 = vpop.f32.mrf.mxu3 }
 0x1bd   : > { %v902_v53 = vadd.f32 %v8722_v27, %v901_v52  ;;  %v912_v28 = vadd.f32 %v8722_v27, %v911_v25 }
 0x1be   : > { %v969_v49 = vmax.f32 %v839_v46, 0.0  ;;  %v3419_v40 = vld [vmem:[#allocation2 + $0x1a0] ss:$2 sm:$0xff]  ;;  %v3437_v42 = vld [vmem:[#allocation2 + $0x1a1] ss:$2 sm:$0xff] }
 0x1bf   : > { %v994_v5 = vmax.f32 %v902_v53, 0.0  ;;  %v998_v18 = vmax.f32 %v912_v28, 0.0  ;;  %v8774_v52 = vmax.f32 %v3419_v40, %v3437_v42 }
 0x1c0   : > { %1042 = vst.msk [vmem:[#allocation2 + $0x108] sm:$0xff] %vm1008_vm1, %v969_v49 }
 0x1c1   : > { %1067 = vst.msk [vmem:[#allocation2 + $0x1d0] sm:$0xff] %vm1008_vm1, %v994_v5  ;;  %v11559_v3 = vrot.slane %v8774_v52, 2  ;;  %v11557_v53 = vrot.slane %v8774_v52, 3  ;;  %v11548_v4 = vrot.slane %v8774_v52, 5  ;;  %v11546_v30 = vrot.slane %v8774_v52, 4 }
 0x1c2   : > { %1071 = vst.msk [vmem:[#allocation2 + $0x1f0] sm:$0xff] %vm1008_vm1, %v998_v18 }
 0x1c3   : > { %v841_v55 = vpop.f32.mrf.mxu0 }
 0x1c4   : > { %v842_v56 = vadd.f32 %v8722_v27, %v841_v55  ;;  %v903_v0 = vpop.f32.mrf.mxu2  ;;  %v913_v32 = vpop.f32.mrf.mxu3 }
 0x1c5   : > { %v904_v59 = vadd.f32 %v8722_v27, %v903_v0  ;;  %v914_v36 = vadd.f32 %v8722_v27, %v913_v32  ;;  %v8858_v32 = vld [vmem:[%s11525_s4] ss:$0 sm:$0xff] }
 0x1c6   : > { %v970_v57 = vmax.f32 %v842_v56, 0.0 }
 0x1c7   : > { %v995_v7 = vmax.f32 %v904_v59, 0.0  ;;  %v999_v38 = vmax.f32 %v914_v36, 0.0  ;;  %v11547_v59 = vrot.slane %v8774_v52, 6 }
 0x1c8   : > { %1043 = vst.msk [vmem:[#allocation2 + $0x110] sm:$0xff] %vm1008_vm1, %v970_v57 }
 0x1c9   : > { %1068 = vst.msk [vmem:[#allocation2 + $0x1d8] sm:$0xff] %vm1008_vm1, %v995_v7 }
 0x1ca   : > { %1072 = vst.msk [vmem:[#allocation2 + $0x1f8] sm:$0xff] %vm1008_vm1, %v999_v38 }
 0x1cb   : > { %v843_v2 = vpop.f32.mrf.mxu0 }
 0x1cc   : > { %v844_v20 = vadd.f32 %v8722_v27, %v843_v2  ;;  %v906_v8 = vpop.f32.mrf.mxu2 }
 0x1cd   : > { %v907_v48 = vadd.f32 %v8722_v27, %v906_v8 }
 0x1ce   : > { %v971_v61 = vmax.f32 %v844_v20, 0.0 }
 0x1cf   : > { %v996_v13 = vmax.f32 %v907_v48, 0.0 }
 0x1d0   : > { %1044 = vst.msk [vmem:[#allocation2 + $0x118] sm:$0xff] %vm1008_vm1, %v971_v61 }
 0x1d1   : > { %1069 = vst.msk [vmem:[#allocation2 + $0x1e0] sm:$0xff] %vm1008_vm1, %v996_v13  ;;  %v4559_v55 = vld [vmem:[#allocation2 + $0x1f0] ss:$2 sm:$0xff]  ;;  %v4577_v56 = vld [vmem:[#allocation2 + $0x1f1] ss:$2 sm:$0xff] }
 0x1d2   : > { %v8779_v0 = vmax.f32 %v4559_v55, %v4577_v56 }
 0x1d3   : > { %v846_v9 = vpop.f32.mrf.mxu0 }
 0x1d4   : > { %v847_v63 = vadd.f32 %v8722_v27, %v846_v9  ;;  %v908_v47 = vpop.f32.mrf.mxu2  ;;  %v11540_v9 = vrot.slane %v8779_v0, 4  ;;  %v11541_v48 = vrot.slane %v8779_v0, 5 }
 0x1d5   : > { %v909_v51 = vadd.f32 %v8722_v27, %v908_v47  ;;  %v11542_v47 = vrot.slane %v8779_v0, 6 }
 0x1d6   : > { %v972_v12 = vmax.f32 %v847_v63, 0.0  ;;  %v11544_v63 = vrot.slane %v8779_v0, 3 }
 0x1d7   : > { %v997_v16 = vmax.f32 %v909_v51, 0.0  ;;  %v11539_v51 = vrot.slane %v8779_v0, 7 }
 0x1d8   : > { %1045 = vst.msk [vmem:[#allocation2 + $0x120] sm:$0xff] %vm1008_vm1, %v972_v12  ;;  %v11543_v12 = vrot.slane %v8779_v0, 2 }
 0x1d9   : > { %1070 = vst.msk [vmem:[#allocation2 + $0x1e8] sm:$0xff] %vm1008_vm1, %v997_v16 }
 0x1db   : > { %v848_v17 = vpop.f32.mrf.mxu0 }
 0x1dc   : > { %v849_v60 = vadd.f32 %v8722_v27, %v848_v17 }
 0x1de   : > { %v973_v21 = vmax.f32 %v849_v60, 0.0 }
 0x1e0   : > { %1046 = vst.msk [vmem:[#allocation2 + $0x128] sm:$0xff] %vm1008_vm1, %v973_v21  ;;  %v4557_v46 = vld [vmem:[#allocation2 + $0x1e0] ss:$2 sm:$0xff]  ;;  %v4575_v49 = vld [vmem:[#allocation2 + $0x1e1] ss:$2 sm:$0xff]  ;;  %v11545_v21 = vrot.slane %v8774_v52, 7 }
 0x1e1   : > { %v8776_v37 = vmax.f32 %v4557_v46, %v4575_v49 }
 0x1e3   : > { %v851_v22 = vpop.f32.mrf.mxu0  ;;  %v11562_v6 = vrot.slane %v8776_v37, 3  ;;  %v11561_v2 = vrot.slane %v8776_v37, 4  ;;  %v11560_v7 = vrot.slane %v8776_v37, 2  ;;  %v11558_v20 = vrot.slane %v8776_v37, 5 }
 0x1e4   : > { %v852_v58 = vadd.f32 %v8722_v27, %v851_v22  ;;  %v11556_v8 = vrot.slane %v8776_v37, 7  ;;  %v11555_v16 = vrot.slane %v8776_v37, 6 }
 0x1e5   : > { %v4728_v17 = vsel %vm1253_vm5, %v11561_v2, %v11540_v9  ;;  %v4689_v60 = vsel %vm1213_vm3, %v11562_v6, %v11544_v63  ;;  %v4767_v25 = vsel %vm1293_vm2, %v11558_v20, %v11541_v48 }
 0x1e6   : > { %v974_v14 = vmax.f32 %v852_v58, 0.0  ;;  %v8812_v22 = vpack.i.bf16 %v4728_v17, %v11546_v30  ;;  %v8816_v58 = vpack.i.bf16 %v4689_v60, %v11557_v53  ;;  %v8849_v18 = vpack.i.bf16 %v4767_v25, %v11548_v4 }
 0x1e8   : > { %1047 = vst.msk [vmem:[#allocation2 + $0x130] sm:$0xff] %vm1008_vm1, %v974_v14  ;;  %v4650_v14 = vsel %vm1173_vm6, %v11560_v7, %v11543_v12 }
 0x1e9   : > { %11595 = vst [vmem:[#allocation10_spill] sm:$0xff] %v8812_v22 }
 0x1ea   : > { %11596 = vst [vmem:[#allocation11_spill] sm:$0xff] %v8816_v58 }
 0x1eb   : > { %v853_v23 = vpop.f32.mrf.mxu0  ;;  %11599 = vst [vmem:[#allocation14_spill] sm:$0xff] %v8849_v18 }
 0x1ec   : > { %v854_v24 = vadd.f32 %v8722_v27, %v853_v23  ;;  %v8826_v23 = vpack.i.bf16 %v4650_v14, %v11559_v3 }
 0x1ee   : > { %v975_v26 = vmax.f32 %v854_v24, 0.0  ;;  %11597 = vst [vmem:[#allocation12_spill] sm:$0xff] %v8826_v23  ;;  %v4806_v24 = vsel %vm1333_vm7, %v11555_v16, %v11542_v47 }
 0x1ef   : > { %v8845_v28 = vpack.i.bf16 %v4806_v24, %v11547_v59 }
 0x1f0   : > { %1048 = vst.msk [vmem:[#allocation2 + $0x138] sm:$0xff] %vm1008_vm1, %v975_v26  ;;  %v4845_v26 = vsel %vm1373_vm8, %v11556_v8, %v11539_v51 }
 0x1f1   : > { %11598 = vst [vmem:[#allocation13_spill] sm:$0xff] %v8845_v28 }
 0x1f3   : > { %v856_v62 = vpop.f32.mrf.mxu0 }
 0x1f4   : > { %v857_v31 = vadd.f32 %v8722_v27, %v856_v62  ;;  %v8853_v62 = vpack.i.bf16 %v4845_v26, %v11545_v21 }
 0x1f6   : > { %v976_v1 = vmax.f32 %v857_v31, 0.0  ;;  %11600 = vst [vmem:[#allocation15_spill] sm:$0xff] %v8853_v62 }
 0x1f8   : > { %1049 = vst.msk [vmem:[#allocation2 + $0x140] sm:$0xff] %vm1008_vm1, %v976_v1 }
 0x1fb   : > { %v858_v39 = vpop.f32.mrf.mxu0 }
 0x1fc   : > { %v859_v33 = vadd.f32 %v8722_v27, %v858_v39 }
 0x1fe   : > { %v977_v41 = vmax.f32 %v859_v33, 0.0 }
 0x200   : > { %1050 = vst.msk [vmem:[#allocation2 + $0x148] sm:$0xff] %vm1008_vm1, %v977_v41 }
 0x203   : > { %v861_v44 = vpop.f32.mrf.mxu0 }
 0x204   : > { %v862_v15 = vadd.f32 %v8722_v27, %v861_v44 }
 0x206   : > { %v978_v57 = vmax.f32 %v862_v15, 0.0 }
 0x208   : > { %1051 = vst.msk [vmem:[#allocation2 + $0x150] sm:$0xff] %vm1008_vm1, %v978_v57 }
 0x20b   : > { %v863_v5 = vpop.f32.mrf.mxu0  ;;  %v1723_v36 = vpop.f32.mrf.mxu2 }
 0x20c   : > { %v864_v61 = vadd.f32 %v8722_v27, %v863_v5 }
 0x20e   : > { %v979_v13 = vmax.f32 %v864_v61, 0.0 }
 0x210   : > { %1052 = vst.msk [vmem:[#allocation2 + $0x158] sm:$0xff] %vm1008_vm1, %v979_v13 }
 0x213   : > { %v866_v31 = vpop.f32.mrf.mxu0  ;;  %v1725_v55 = vpop.f32.mrf.mxu2 }
 0x214   : > { %v867_v1 = vadd.f32 %v8722_v27, %v866_v31 }
 0x216   : > { %v980_v38 = vmax.f32 %v867_v1, 0.0  ;;  %v1694_v39 = vpop.f32.mrf.mxu1 }
 0x217   : > { %v1695_v33 = vadd.f32 %v8858_v32, %v1694_v39 }
 0x218   : > { %1053 = vst.msk [vmem:[#allocation2 + $0x160] sm:$0xff] %vm1008_vm1, %v980_v38 }
 0x219   : > { %v1724_v41 = vadd.f32 %v1723_v36, %v1695_v33 }
 0x21b   : > { %v1743_v40 = vmax.f32 %v1724_v41, 0.0  ;;  %v868_v42 = vpop.f32.mrf.mxu0 }
 0x21c   : > { %v869_v44 = vadd.f32 %v8722_v27, %v868_v42 }
 0x21d   : > { %1751 = vst.msk [vmem:[#allocation3] sm:$0xff] %vm1478_vm9, %v1743_v40 }
 0x21e   : > { %v981_v46 = vmax.f32 %v869_v44, 0.0  ;;  %v1696_v49 = vpop.f32.mrf.mxu1 }
 0x21f   : > { %v1697_v15 = vadd.f32 %v8858_v32, %v1696_v49 }
 0x220   : > { %1054 = vst.msk [vmem:[#allocation2 + $0x168] sm:$0xff] %vm1008_vm1, %v981_v46 }
 0x221   : > { %v1726_v56 = vadd.f32 %v1725_v55, %v1697_v15 }
 0x223   : > { %v1744_v57 = vmax.f32 %v1726_v56, 0.0  ;;  %v871_v5 = vpop.f32.mrf.mxu0 }
 0x224   : > { %v872_v61 = vadd.f32 %v8722_v27, %v871_v5 }
 0x225   : > { %1752 = vst.msk [vmem:[#allocation3 + $0x8] sm:$0xff] %vm1478_vm9, %v1744_v57 }
 0x226   : > { %v982_v13 = vmax.f32 %v872_v61, 0.0  ;;  %v1699_v14 = vpop.f32.mrf.mxu1 }
 0x227   : > { %v1700_v25 = vadd.f32 %v8858_v32, %v1699_v14  ;;  %v8891_v14 = vrot.slane %v8531_v34, 2 }
 0x228   : > { %1055 = vst.msk [vmem:[#allocation2 + $0x170] sm:$0xff] %vm1008_vm1, %v982_v13  ;;  %v8883_v13 = vrot.slane %v8531_v34, 6 }
 0x22b   : > { %v873_v17 = vpop.f32.mrf.mxu0 }
 0x22c   : > { %v874_v60 = vadd.f32 %v8722_v27, %v873_v17  ;;  %v1760_v55 = vld [vmem:[#allocation3] ss:$2 sm:$0xff]  ;;  %v1768_v56 = vld [vmem:[#allocation3 + $0x1] ss:$2 sm:$0xff]  ;;  %v8886_v17 = vrot.slane %v8531_v34, 4 }
 0x22d   : > { %v8880_v57 = vmax.f32 %v1760_v55, %v1768_v56  ;;  %v8924_v56 = vrot.slane %v8531_v34, 7 }
 0x22e   : > { %v983_v24 = vmax.f32 %v874_v60, 0.0  ;;  %v1701_v33 = vpop.f32.mrf.mxu1 }
 0x22f   : > { %v1702_v41 = vadd.f32 %v8858_v32, %v1701_v33  ;;  %v2255_v33 = vld [vmem:[#allocation2 + $0x90] ss:$2 sm:$0xff] }
 0x230   : > { %1056 = vst.msk [vmem:[#allocation2 + $0x178] sm:$0xff] %vm1008_vm1, %v983_v24  ;;  %v1799_v24 = vrot.slane %v8880_v57, 3 }
 0x233   : > { %v876_v26 = vpop.f32.mrf.mxu0 }
 0x234   : > { %v877_v31 = vadd.f32 %v8722_v27, %v876_v26  ;;  %v1728_v1 = vpop.f32.mrf.mxu2 }
 0x235   : > { %v1729_v36 = vadd.f32 %v1728_v1, %v1700_v25  ;;  %v1790_v25 = vrot.slane %v8880_v57, 2  ;;  %v1781_v1 = vrot.slane %v8880_v57, 1 }
 0x236   : > { %v984_v38 = vmax.f32 %v877_v31, 0.0 }
 0x237   : > { %v1745_v39 = vmax.f32 %v1729_v36, 0.0 }
 0x238   : > { %1057 = vst.msk [vmem:[#allocation2 + $0x180] sm:$0xff] %vm1008_vm1, %v984_v38  ;;  %v1348_v38 = vsel %vm1333_vm7, %v1345_v43, %v8883_v13 }
 0x239   : > { %1753 = vst.msk [vmem:[#allocation3 + $0x10] sm:$0xff] %vm1478_vm9, %v1745_v39  ;;  %v1268_v39 = vsel %vm1253_vm5, %v1265_v11, %v8886_v17 }
 0x23b   : > { %v878_v40 = vpop.f32.mrf.mxu0 }
 0x23c   : > { %v879_v42 = vadd.f32 %v8722_v27, %v878_v40  ;;  %v1730_v44 = vpop.f32.mrf.mxu2 }
 0x23d   : > { %v1731_v46 = vadd.f32 %v1730_v44, %v1702_v41  ;;  %v2273_v44 = vld [vmem:[#allocation2 + $0x91] ss:$2 sm:$0xff] }
 0x23e   : > { %v985_v49 = vmax.f32 %v879_v42, 0.0  ;;  %v1188_v42 = vsel %vm1173_vm6, %v1185_v54, %v8891_v14  ;;  %v8929_v54 = vrot.slane %v8531_v34, 5 }
 0x23f   : > { %v1746_v15 = vmax.f32 %v1731_v46, 0.0  ;;  %v2257_v46 = vld [vmem:[#allocation2 + $0xa0] ss:$2 sm:$0xff] }
 0x240   : > { %1058 = vst.msk [vmem:[#allocation2 + $0x188] sm:$0xff] %vm1008_vm1, %v985_v49  ;;  %v2275_v49 = vld [vmem:[#allocation2 + $0xa1] ss:$2 sm:$0xff] }
 0x241   : > { %1754 = vst.msk [vmem:[#allocation3 + $0x18] sm:$0xff] %vm1478_vm9, %v1746_v15 }
 0x248   : > { %v1762_v5 = vld [vmem:[#allocation3 + $0x10] ss:$2 sm:$0xff]  ;;  %v1770_v61 = vld [vmem:[#allocation3 + $0x11] ss:$2 sm:$0xff] }
 0x249   : > { %v8888_v60 = vmax.f32 %v1762_v5, %v1770_v61  ;;  %v2259_v5 = vld [vmem:[#allocation2 + $0xb0] ss:$2 sm:$0xff]  ;;  %v2277_v61 = vld [vmem:[#allocation2 + $0xb1] ss:$2 sm:$0xff] }
 0x24b   : > { %v8896_v26 = vrot.slane %v8888_v60, 3  ;;  %v8899_v31 = vrot.slane %v8888_v60, 2  ;;  %v8903_v36 = vrot.slane %v8888_v60, 1 }
 0x24d   : > { %v1801_v41 = vsel %vm1213_vm3, %v1799_v24, %v8896_v26  ;;  %v1792_v40 = vsel %vm1173_vm6, %v1790_v25, %v8899_v31  ;;  %v1783_v43 = vsel %vm1133_vm4, %v1781_v1, %v8903_v36  ;;  %v8931_v24 = vmax.f32 %v2255_v33, %v2273_v44 }
 0x24e   : > { %v7270_v15 = vpack.i.bf16 %v1801_v41, %v1348_v38  ;;  %v7265_v11 = vpack.i.bf16 %v1792_v40, %v1268_v39  ;;  %v7255_v55 = vpack.i.bf16 %v1783_v43, %v1188_v42  ;;  %v8933_v25 = vmax.f32 %v2257_v46, %v2275_v49 }
 0x24f   : > { %v8936_v1 = vmax.f32 %v2259_v5, %v2277_v61  ;;  %v1388_v38 = vsel %vm1373_vm8, %v1385_v19, %v8924_v56  ;;  %v1308_v39 = vsel %vm1293_vm2, %v1305_v10, %v8929_v54  ;;  %v2346_v41 = vrot.slane %v8931_v24, 2 }
 0x250   : > { %7271 = vrot.lane.b32.xlu2 %v7270_v15, %s11551_s21  ;;  %7266 = vrot.lane.b32.xlu0 %v7265_v11, %s11553_s16  ;;  %v2347_v33 = vrot.slane %v8933_v25, 2  ;;  %v7285_v40 = vpack.i.bf16 %v8886_v17, %v8899_v31  ;;  %v7275_v42 = vpack.i.bf16 %v8924_v56, %v1388_v38  ;;  %v7260_v43 = vpack.i.bf16 %v8929_v54, %v1308_v39  ;;  %v1097_v39 = vld [vmem:[#allocation2 + $0x80] ss:$2 sm:$0xff] }
 0x251   : > { %7256 = vrot.lane.b32.xlu1 %v7255_v55, %s11549_s17  ;;  %v2349_v44 = vrot.slane %v8936_v1, 2  ;;  %v2463_v49 = vrot.slane %v8931_v24, 5  ;;  %v2464_v15 = vrot.slane %v8933_v25, 5  ;;  %v2385_v11 = vrot.slane %v8931_v24, 3 }
 0x252   : > { %v2348_v10 = vsel %vm1173_vm6, %v2346_v41, %v2347_v33  ;;  %v2386_v55 = vrot.slane %v8933_v25, 3  ;;  %v7290_v5 = vpack.i.bf16 %v8883_v13, %v8896_v26  ;;  %v2307_v61 = vrot.slane %v8931_v24, 1  ;;  %v1115_v41 = vld [vmem:[#allocation2 + $0x81] ss:$2 sm:$0xff] }
 0x253   : > { %v2350_v19 = vsel %vm1173_vm6, %v2347_v33, %v2349_v44  ;;  %v2308_v38 = vrot.slane %v8933_v25, 1  ;;  %v7280_v33 = vpack.i.bf16 %v8891_v14, %v8903_v36  ;;  %v2465_v51 = vsel %vm1293_vm2, %v2463_v49, %v2464_v15 }
 0x254   : > { %v7300_v46 = vpack.i.bf16 %v2350_v19, %v2348_v10  ;;  %v2279_v10 = vld [vmem:[#allocation2 + $0xc1] ss:$2 sm:$0xff]  ;;  %v2310_v19 = vrot.slane %v8936_v1, 1  ;;  %v2387_v48 = vsel %vm1213_vm3, %v2385_v11, %v2386_v55  ;;  %v8984_v63 = vmax.f32 %v1097_v39, %v1115_v41 }
 0x255   : > { %v2309_v12 = vsel %vm1133_vm4, %v2307_v61, %v2308_v38  ;;  %v2502_v30 = vrot.slane %v8931_v24, 6  ;;  %v2424_v11 = vrot.slane %v8931_v24, 4  ;;  %v2505_v39 = vrot.slane %v8936_v1, 6 }
 0x256   : > { %v1414_v61 = vrot.slane %v8984_v63, 1  ;;  %v2541_v59 = vrot.slane %v8931_v24, 7  ;;  %v1422_v4 = vrot.slane %v8984_v63, 2 }
 0x258   : > { %7286 = vrot.lane.b32.xlu2 %v7285_v40, %s11553_s16  ;;  %7276 = vrot.lane.b32.xlu0 %v7275_v42, %s11601_s28  ;;  %v2466_v40 = vrot.slane %v8936_v1, 5  ;;  %v2388_v42 = vrot.slane %v8936_v1, 3 }
 0x259   : > { %7261 = vrot.lane.b32.xlu1 %v7260_v43, %s11602_s22  ;;  %v2261_v43 = vld [vmem:[#allocation2 + $0xc0] ss:$2 sm:$0xff] }
 0x25a   : > { %v2467_v9 = vsel %vm1293_vm2, %v2464_v15, %v2466_v40  ;;  %v2389_v47 = vsel %vm1213_vm3, %v2386_v55, %v2388_v42  ;;  %v2503_v15 = vrot.slane %v8933_v25, 6  ;;  %v2425_v55 = vrot.slane %v8933_v25, 4 }
 0x25b   : > { %v7315_v21 = vpack.i.bf16 %v2467_v9, %v2465_v51  ;;  %v2427_v9 = vrot.slane %v8936_v1, 4 }
 0x25c   : > { %v2426_v51 = vsel %vm1253_vm5, %v2424_v11, %v2425_v55  ;;  %v1430_v11 = vrot.slane %v8984_v63, 3 }
 0x25d   : > { %v2428_v41 = vsel %vm1253_vm5, %v2425_v55, %v2427_v9 }
 0x260   : > { %7301 = vrot.lane.b32.xlu2 %v7300_v46, %s11549_s17  ;;  %7291 = vrot.lane.b32.xlu0 %v7290_v5, %s11551_s21  ;;  %v2311_v46 = vsel %vm1133_vm4, %v2308_v38, %v2310_v19  ;;  %v8986_v5 = vmax.f32 %v2261_v43, %v2279_v10 }
 0x261   : > { %7281 = vrot.lane.b32.xlu1 %v7280_v33, %s11549_s17  ;;  %v7305_v33 = vpack.i.bf16 %v2389_v47, %v2387_v48  ;;  %v7295_v49 = vpack.i.bf16 %v2311_v46, %v2309_v12  ;;  %v2504_v12 = vsel %vm1333_vm7, %v2502_v30, %v2503_v15  ;;  %v2506_v47 = vsel %vm1333_vm7, %v2503_v15, %v2505_v39  ;;  %v6870_v48 = vld [vmem:[%s8250_s26 + $0x100] sm:$0xff]  ;;  %v2281_v30 = vld [vmem:[#allocation2 + $0xd1] ss:$2 sm:$0xff] }
 0x262   : > { %v2312_v38 = vrot.slane %v8986_v5, 1  ;;  %6045 = vmatmul.msk.bf16.gmra.mxu3 %vm638_vm0, %v6870_v48  ;;  %v7320_v10 = vpack.i.bf16 %v2506_v47, %v2504_v12  ;;  %v7310_v46 = vpack.i.bf16 %v2428_v41, %v2426_v51  ;;  %v2542_v15 = vrot.slane %v8933_v25, 7 }
 0x263   : > { %v2390_v55 = vrot.slane %v8986_v5, 3  ;;  %v1431_v51 = vsel %vm1213_vm3, %v8553_v45, %v1430_v11 }
 0x264   : > { %v2313_v43 = vsel %vm1133_vm4, %v2310_v19, %v2312_v38  ;;  %v2544_v19 = vrot.slane %v8936_v1, 7  ;;  %v2543_v47 = vsel %vm1373_vm8, %v2541_v59, %v2542_v15 }
 0x265   : > { %v2391_v41 = vsel %vm1213_vm3, %v2388_v42, %v2390_v55 }
 0x266   : > { %v2545_v48 = vsel %vm1373_vm8, %v2542_v15, %v2544_v19  ;;  %v6871_v15 = vld [vmem:[%s8250_s26 + $0x108] sm:$0xff] }
 0x268   : > { %7316 = vrot.lane.b32.xlu2 %v7315_v21, %s11602_s22  ;;  %7306 = vrot.lane.b32.xlu0 %v7305_v33, %s11603_s23  ;;  %v1415_v21 = vsel %vm1133_vm4, %v8538_v35, %v1414_v61  ;;  %v2263_v33 = vld [vmem:[#allocation2 + $0xd0] ss:$2 sm:$0xff]  ;;  %v2351_v35 = vrot.slane %v8986_v5, 2 }
 0x269   : > { %7296 = vrot.lane.b32.xlu1 %v7295_v49, %s11604_s24  ;;  %v7330_v49 = vpack.i.bf16 %v1415_v21, %v2313_v43  ;;  %v9019_v12 = vmax.f32 %v2263_v33, %v2281_v30  ;;  %v1423_v21 = vsel %vm1173_vm6, %v8891_v14, %v1422_v4  ;;  %v7345_v33 = vpack.i.bf16 %v1431_v51, %v2391_v41 }
 0x26a   : > { %v2352_v43 = vsel %vm1173_vm6, %v2349_v44, %v2351_v35  ;;  %v1446_v51 = vrot.slane %v8984_v63, 5  ;;  %v2468_v41 = vrot.slane %v8986_v5, 5 }
 0x26b   : > { %v2392_v59 = vrot.slane %v9019_v12, 3  ;;  %v7335_v30 = vpack.i.bf16 %v1423_v21, %v2352_v43 }
 0x26d   : > { %v2393_v14 = vsel %vm1213_vm3, %v2390_v55, %v2392_v59  ;;  %v2429_v55 = vrot.slane %v8986_v5, 4 }
 0x270   : > { %7331 = vrot.lane.b32.xlu2 %v7330_v49, %s11604_s24  ;;  %7321 = vrot.lane.b32.xlu0 %v7320_v10, %s11551_s21  ;;  %v7325_v10 = vpack.i.bf16 %v2545_v48, %v2543_v47  ;;  %v2314_v49 = vrot.slane %v9019_v12, 1  ;;  %v7360_v47 = vpack.i.bf16 %v2393_v14, %v1430_v11  ;;  %v2430_v11 = vsel %vm1253_vm5, %v2427_v9, %v2429_v55  ;;  %v6901_v9 = vld [vmem:[%s11526_s5 + $0x28] sm:$0xff]  ;;  %v6896_v14 = vld [vmem:[%s11526_s5] sm:$0xff] }
 0x271   : > { %7311 = vrot.lane.b32.xlu1 %v7310_v46, %s11553_s16  ;;  %v2353_v46 = vrot.slane %v9019_v12, 2 }
 0x272   : > { %v2315_v44 = vsel %vm1133_vm4, %v2312_v38, %v2314_v49  ;;  %6046 = vmatmul.msk.bf16.gmra.mxu3 %vm638_vm0, %v6871_v15  ;;  %v6898_v15 = vld [vmem:[%s11526_s5 + $0x10] sm:$0xff] }
 0x273   : > { %v2354_v45 = vsel %vm1173_vm6, %v2351_v35, %v2353_v46  ;;  %v7340_v48 = vpack.i.bf16 %v2315_v44, %v1414_v61  ;;  %v1438_v35 = vrot.slane %v8984_v63, 4  ;;  %v2469_v61 = vsel %vm1293_vm2, %v2466_v40, %v2468_v41  ;;  %v6903_v40 = vld [vmem:[%s11526_s5 + $0x38] sm:$0xff]  ;;  %v7247_v44 = vpop.permute.xlu0 %7246 }
 0x274   : > { %v7350_v42 = vpack.i.bf16 %v2354_v45, %v1422_v4  ;;  %v1447_v4 = vsel %vm1293_vm2, %v8929_v54, %v1446_v51  ;;  %v6872_v54 = vld [vmem:[%s8250_s26 + $0x110] sm:$0xff]  ;;  %2177 = vmatpush.bf16.msrb.mxu3 %v6903_v40  ;;  %v6897_v45 = vld [vmem:[%s11526_s5 + $0x8] sm:$0xff] }
 0x275   : > { %v1439_v38 = vsel %vm1253_vm5, %v8886_v17, %v1438_v35  ;;  %v7365_v21 = vpack.i.bf16 %v1447_v4, %v2469_v61  ;;  %v6902_v17 = vld [vmem:[%s11526_s5 + $0x30] sm:$0xff] }
 0x276   : > { %v7355_v43 = vpack.i.bf16 %v1439_v38, %v2430_v11 }
 0x278   : > { %7346 = vrot.lane.b32.xlu2 %v7345_v33, %s11603_s23  ;;  %7336 = vrot.lane.b32.xlu0 %v7335_v30, %s11549_s17  ;;  %v6873_v33 = vld [vmem:[%s8250_s26 + $0x118] sm:$0xff] }
 0x279   : > { %7326 = vrot.lane.b32.xlu1 %v7325_v10, %s11601_s28  ;;  %2178 = vmatpush.bf16.msrb.mxu3 %v6902_v17  ;;  %v6900_v10 = vld [vmem:[%s11526_s5 + $0x20] sm:$0xff]  ;;  %v6899_v30 = vld [vmem:[%s11526_s5 + $0x18] sm:$0xff] }
 0x27d   : > { %2179 = vmatpush.bf16.msrb.mxu3 %v6901_v9 }
 0x280   : > { %7351 = vrot.lane.b32.xlu0 %v7350_v42, %s11549_s17  ;;  %7361 = vrot.lane.b32.xlu2 %v7360_v47, %s11603_s23  ;;  %v7252_v42 = vpop.permute.xlu2 %7251  ;;  %v7248_v47 = vunpack.i.l.bf16 %v7247_v44 }
 0x281   : > { %7341 = vrot.lane.b32.xlu1 %v7340_v48, %s11604_s24  ;;  %2180 = vmatpush.bf16.msrb.mxu3 %v6900_v10 }
 0x282   : > { %6047 = vmatmul.msk.bf16.gmra.mxu3 %vm638_vm0, %v6872_v54  ;;  %v1476_v38 = vsel %vm1008_vm1, %v8470_v50, %v7248_v47  ;;  %v7249_v47 = vunpack.i.h.bf16 %v7247_v44 }
 0x285   : > { %2181 = vmatpush.bf16.msrb.mxu3 %v6899_v30 }
 0x288   : > { %7366 = vrot.lane.b32.xlu0 %v7365_v21, %s11602_s22  ;;  %v7253_v21 = vunpack.i.l.bf16 %v7252_v42 }
 0x289   : > { %7356 = vrot.lane.b32.xlu1 %v7355_v43, %s11553_s16  ;;  %2182 = vmatpush.bf16.msrb.mxu3 %v6898_v15  ;;  %s11605_s16 = smov 96  }
 0x28d   : > { %2183 = vmatpush.bf16.msrb.mxu3 %v6897_v45 }
 0x291   : > { %2184 = vmatpush.bf16.msrb.mxu3 %v6896_v14 }
 0x292   : > { %6048 = vmatmul.msk.bf16.gmra.mxu3 %vm638_vm0, %v6873_v33 }
 0x2aa   : > { %v7272_v43 = vpop.permute.xlu2 %7271 }
 0x2ab   : > { %v7273_v33 = vunpack.i.l.bf16 %v7272_v43 }
 0x2c2   : > { %v7267_v48 = vpop.permute.xlu0 %7266 }
 0x2c3   : > { %v7257_v4 = vpop.permute.xlu1 %7256  ;;  %v7268_v17 = vunpack.i.l.bf16 %v7267_v48 }
 0x2c4   : > { %v7258_v61 = vunpack.i.l.bf16 %v7257_v4  ;;  %v7259_v15 = vunpack.i.h.bf16 %v7257_v4 }
 0x2c6   : > { %v1485_v11 = vsel %vm1478_vm9, %v1476_v38, %v7258_v61  ;;  %v7269_v61 = vunpack.i.h.bf16 %v7267_v48 }
 0x2c7   : > { %v1494_v54 = vsel %vm1487_vm10, %v1485_v11, %v7253_v21  ;;  %v7287_v11 = vpop.permute.xlu2 %7286  ;;  %v1892_v21 = vsel %vm1478_vm9, %v8880_v57, %v7259_v15 }
 0x2c8   : > { %v1503_v30 = vsel %vm1496_vm11, %v1494_v54, %v7268_v17  ;;  %v7254_v54 = vunpack.i.h.bf16 %v7252_v42  ;;  %v7289_v44 = vunpack.i.h.bf16 %v7287_v11 }
 0x2ca   : > { %v7277_v40 = vpop.permute.xlu0 %7276 }
 0x2cb   : > { %v7262_v9 = vpop.permute.xlu1 %7261  ;;  %v7278_v45 = vunpack.i.l.bf16 %v7277_v40 }
 0x2cc   : > { %v7263_v10 = vunpack.i.l.bf16 %v7262_v9 }
 0x2ce   : > { %v1512_v14 = vsel %vm1505_vm12, %v1503_v30, %v7263_v10  ;;  %v1477_v10 = vsel %vm1008_vm1, %v8531_v34, %v7249_v47  ;;  %v7288_v30 = vunpack.i.l.bf16 %v7287_v11 }
 0x2cf   : > { %v1520_v16 = vsel %vm638_vm0, %v1512_v14, %v7273_v33  ;;  %v7274_v33 = vunpack.i.h.bf16 %v7272_v43 }
 0x2d0   : > { %v1529_v50 = vsel %vm1522_vm13, %v1520_v16, %v7278_v45  ;;  %v1894_v16 = vsel %vm1496_vm11, %v1892_v21, %v7269_v61  ;;  %v7264_v45 = vunpack.i.h.bf16 %v7262_v9  ;;  %v7279_v61 = vunpack.i.h.bf16 %v7277_v40 }
 0x2d1   : > { %v1550_v38 = vpack.c.bf16 %v1529_v50, %v8726_v29 }
 0x2d2   : > { %v7292_v8 = vpop.permute.xlu0 %7291 }
 0x2d3   : > { %v7282_v53 = vpop.permute.xlu1 %7281  ;;  %1732 = vmatmul.bf16.gmra.mxu2 %v1550_v38  ;;  %v7293_v48 = vunpack.i.l.bf16 %v7292_v8  ;;  %v1896_v38 = vsel %vm638_vm0, %v1894_v16, %v7274_v33 }
 0x2d4   : > { %v7284_v4 = vunpack.i.h.bf16 %v7282_v53  ;;  %v7283_v17 = vunpack.i.l.bf16 %v7282_v53  ;;  %v7294_v53 = vunpack.i.h.bf16 %v7292_v8 }
 0x2d6   : > { %v1486_v29 = vsel %vm1478_vm9, %v1477_v10, %v7284_v4  ;;  %v1893_v15 = vsel %vm1478_vm9, %v8888_v60, %v7283_v17 }
 0x2d7   : > { %v1495_v14 = vsel %vm1487_vm10, %v1486_v29, %v7254_v54  ;;  %v1895_v42 = vsel %vm1496_vm11, %v1893_v15, %v7288_v30 }
 0x2d8   : > { %v1897_v43 = vsel %vm638_vm0, %v1895_v42, %v7293_v48  ;;  %v1504_v47 = vsel %vm1496_vm11, %v1495_v14, %v7289_v44 }
 0x2d9   : > { %v1913_v11 = vpack.c.bf16 %v1897_v43, %v1896_v38  ;;  %v1513_v21 = vsel %vm1505_vm12, %v1504_v47, %v7264_v45 }
 0x2da   : > { %v1521_v4 = vsel %vm638_vm0, %v1513_v21, %v7294_v53 }
 0x2db   : > { %2185 = vmatmul.bf16.vlgmr.msrb.gmra.mxu3 %v1913_v11  ;;  %v1530_v9 = vsel %vm1522_vm13, %v1521_v4, %v7279_v61 }
 0x2dc   : > { %v1551_v17 = vpack.c.bf16 %v1530_v9, %v1529_v50 }
 0x2de   : > { %1708 = vmatmul.bf16.gmra.mxu1 %v1551_v17  ;;  %v1704_v17 = vpop.f32.mrf.mxu1 }
 0x2e5   : > { %v916_v54 = vpop.f32.mrf.mxu3 }
 0x2e6   : > { %v917_v8 = vadd.f32 %v8722_v27, %v916_v54  ;;  %v1705_v54 = vadd.f32 %v8858_v32, %v1704_v17 }
 0x2e8   : > { %v1000_v10 = vmax.f32 %v917_v8, 0.0 }
 0x2ea   : > { %1073 = vst.msk [vmem:[#allocation2 + $0x200] sm:$0xff] %vm1008_vm1, %v1000_v10 }
 0x2ed   : > { %v918_v33 = vpop.f32.mrf.mxu3 }
 0x2ee   : > { %v919_v30 = vadd.f32 %v8722_v27, %v918_v33 }
 0x2f0   : > { %v1001_v40 = vmax.f32 %v919_v30, 0.0  ;;  %v1706_v30 = vpop.f32.mrf.mxu1 }
 0x2f2   : > { %1074 = vst.msk [vmem:[#allocation2 + $0x208] sm:$0xff] %vm1008_vm1, %v1001_v40  ;;  %v1707_v40 = vadd.f32 %v8858_v32, %v1706_v30 }
 0x2f5   : > { %v921_v16 = vpop.f32.mrf.mxu3 }
 0x2f6   : > { %v922_v44 = vadd.f32 %v8722_v27, %v921_v16 }
 0x2f8   : > { %v1002_v48 = vmax.f32 %v922_v44, 0.0 }
 0x2fa   : > { %1075 = vst.msk [vmem:[#allocation2 + $0x210] sm:$0xff] %vm1008_vm1, %v1002_v48 }
 0x2fd   : > { %v923_v50 = vpop.f32.mrf.mxu3 }
 0x2fe   : > { %v924_v29 = vadd.f32 %v8722_v27, %v923_v50 }
 0x300   : > { %v1003_v15 = vmax.f32 %v924_v29, 0.0  ;;  %v1839_v29 = vrot.slane %v8888_v60, 7 }
 0x302   : > { %1076 = vst.msk [vmem:[#allocation2 + $0x218] sm:$0xff] %vm1008_vm1, %v1003_v15  ;;  %v1828_v15 = vrot.slane %v8888_v60, 6 }
 0x305   : > { %v926_v45 = vpop.f32.mrf.mxu3 }
 0x306   : > { %v927_v14 = vadd.f32 %v8722_v27, %v926_v45 }
 0x308   : > { %v1004_v42 = vmax.f32 %v927_v14, 0.0  ;;  %v1817_v14 = vrot.slane %v8888_v60, 5 }
 0x30a   : > { %1077 = vst.msk [vmem:[#allocation2 + $0x220] sm:$0xff] %vm1008_vm1, %v1004_v42  ;;  %v1838_v42 = vrot.slane %v8880_v57, 7 }
 0x30d   : > { %v928_v53 = vpop.f32.mrf.mxu3 }
 0x30e   : > { %v929_v38 = vadd.f32 %v8722_v27, %v928_v53  ;;  %v1827_v53 = vrot.slane %v8880_v57, 6 }
 0x310   : > { %v1005_v43 = vmax.f32 %v929_v38, 0.0 }
 0x312   : > { %1078 = vst.msk [vmem:[#allocation2 + $0x228] sm:$0xff] %vm1008_vm1, %v1005_v43  ;;  %v1816_v43 = vrot.slane %v8880_v57, 5 }
 0x315   : > { %v931_v47 = vpop.f32.mrf.mxu3 }
 0x316   : > { %v932_v61 = vadd.f32 %v8722_v27, %v931_v47 }
 0x318   : > { %v1006_v11 = vmax.f32 %v932_v61, 0.0  ;;  %v1840_v61 = vsel %vm1373_vm8, %v1838_v42, %v1839_v29  ;;  %v2507_v42 = vrot.slane %v8986_v5, 6 }
 0x31a   : > { %1079 = vst.msk [vmem:[#allocation2 + $0x230] sm:$0xff] %vm1008_vm1, %v1006_v11  ;;  %v1829_v11 = vsel %vm1333_vm7, %v1827_v53, %v1828_v15  ;;  %v2508_v53 = vsel %vm1333_vm7, %v2505_v39, %v2507_v42  ;;  %v2546_v39 = vrot.slane %v8986_v5, 7 }
 0x31d   : > { %v933_v21 = vpop.f32.mrf.mxu3 }
 0x31e   : > { %v934_v4 = vadd.f32 %v8722_v27, %v933_v21 }
 0x320   : > { %v1007_v9 = vmax.f32 %v934_v4, 0.0 }
 0x322   : > { %1080 = vst.msk [vmem:[#allocation2 + $0x238] sm:$0xff] %vm1008_vm1, %v1007_v9  ;;  %v1818_v9 = vsel %vm1293_vm2, %v1816_v43, %v1817_v14 }
 0x356   : > { %v1733_v8 = vpop.f32.mrf.mxu2 }
 0x357   : > { %v1734_v10 = vadd.f32 %v1733_v8, %v1705_v54 }
 0x359   : > { %v1747_v33 = vmax.f32 %v1734_v10, 0.0 }
 0x35b   : > { %1755 = vst.msk [vmem:[#allocation3 + $0x20] sm:$0xff] %vm1478_vm9, %v1747_v33 }
 0x35e   : > { %v1735_v16 = vpop.f32.mrf.mxu2 }
 0x35f   : > { %v1736_v44 = vadd.f32 %v1735_v16, %v1707_v40 }
 0x361   : > { %v1748_v48 = vmax.f32 %v1736_v44, 0.0 }
 0x363   : > { %1756 = vst.msk [vmem:[#allocation3 + $0x28] sm:$0xff] %vm1478_vm9, %v1748_v48 }
 0x36a   : > { %v1764_v27 = vld [vmem:[#allocation3 + $0x20] ss:$2 sm:$0xff]  ;;  %v1772_v50 = vld [vmem:[#allocation3 + $0x21] ss:$2 sm:$0xff] }
 0x36b   : > { %v9151_v45 = vmax.f32 %v1764_v27, %v1772_v50 }
 0x36d   : > { %v1841_v32 = vrot.slane %v9151_v45, 7  ;;  %v1830_v38 = vrot.slane %v9151_v45, 6  ;;  %v1819_v47 = vrot.slane %v9151_v45, 5  ;;  %v1865_v33 = vrot.slane %v9151_v45, 3 }
 0x36e   : > { %v1857_v30 = vrot.slane %v9151_v45, 2  ;;  %v1849_v40 = vrot.slane %v9151_v45, 1 }
 0x36f   : > { %v1842_v21 = vsel %vm1373_vm8, %v1839_v29, %v1841_v32  ;;  %v1831_v4 = vsel %vm1333_vm7, %v1828_v15, %v1830_v38  ;;  %v1820_v17 = vsel %vm1293_vm2, %v1817_v14, %v1819_v47  ;;  %v1866_v16 = vsel %vm1213_vm3, %v8896_v26, %v1865_v33 }
 0x370   : > { %v7380_v54 = vpack.i.bf16 %v1842_v21, %v1840_v61  ;;  %v7375_v8 = vpack.i.bf16 %v1831_v4, %v1829_v11  ;;  %v7370_v10 = vpack.i.bf16 %v1820_v17, %v1818_v9  ;;  %v1858_v44 = vsel %vm1173_vm6, %v8899_v31, %v1857_v30  ;;  %v2265_v61 = vld [vmem:[#allocation2 + $0xe0] ss:$2 sm:$0xff]  ;;  %v2283_v11 = vld [vmem:[#allocation2 + $0xe1] ss:$2 sm:$0xff]  ;;  %v2267_v21 = vld [vmem:[#allocation2 + $0xf0] ss:$2 sm:$0xff] }
 0x371   : > { %v1850_v48 = vsel %vm1133_vm4, %v8903_v36, %v1849_v40  ;;  %v7405_v27 = vpack.i.bf16 %v1865_v33, %v1866_v16  ;;  %v7395_v50 = vpack.i.bf16 %v1857_v30, %v1858_v44  ;;  %v2470_v15 = vrot.slane %v9019_v12, 5  ;;  %v6910_v44 = vld [vmem:[%s11526_s5 + $0x70] sm:$0xff] }
 0x372   : > { %7381 = vrot.lane.b32.xlu0 %v7380_v54, %s11605_s16  ;;  %7376 = vrot.lane.b32.xlu2 %v7375_v8, %s11606_s25  ;;  %v7385_v29 = vpack.i.bf16 %v1849_v40, %v1850_v48  ;;  %v1454_v14 = vrot.slane %v8984_v63, 6  ;;  %v2431_v26 = vrot.slane %v9019_v12, 4  ;;  %v1462_v9 = vrot.slane %v8984_v63, 7  ;;  %v6918_v48 = vld [vmem:[%s11526_s5 + $0xb0] sm:$0xff] }
 0x373   : > { %7371 = vrot.lane.b32.xlu1 %v7370_v10, %s11607_s27  ;;  %v2471_v31 = vsel %vm1293_vm2, %v2468_v41, %v2470_v15  ;;  %v2548_v54 = vrot.slane %v9019_v12, 7  ;;  %v2509_v8 = vrot.slane %v9019_v12, 6  ;;  %v2547_v16 = vsel %vm1373_vm8, %v2544_v19, %v2546_v39 }
 0x374   : > { %v1455_v36 = vsel %vm1333_vm7, %v8883_v13, %v1454_v14  ;;  %v2432_v43 = vsel %vm1253_vm5, %v2429_v55, %v2431_v26  ;;  %v7410_v4 = vpack.i.bf16 %v2471_v31, %v1446_v51  ;;  %v2285_v13 = vld [vmem:[#allocation2 + $0xf1] ss:$2 sm:$0xff]  ;;  %v9220_v55 = vmax.f32 %v2265_v61, %v2283_v11 }
 0x375   : > { %v7400_v41 = vpack.i.bf16 %v1455_v36, %v2508_v53  ;;  %v7390_v17 = vpack.i.bf16 %v2432_v43, %v1438_v35  ;;  %v6911_v51 = vld [vmem:[%s11526_s5 + $0x78] sm:$0xff]  ;;  %v9222_v10 = vmax.f32 %v2267_v21, %v2285_v13  ;;  %v2549_v33 = vsel %vm1373_vm8, %v2546_v39, %v2548_v54  ;;  %v6909_v36 = vld [vmem:[%s11526_s5 + $0x68] sm:$0xff] }
 0x376   : > { %v6919_v35 = vld [vmem:[%s11526_s5 + $0xb8] sm:$0xff]  ;;  %v2510_v30 = vsel %vm1333_vm7, %v2507_v42, %v2509_v8  ;;  %v1463_v40 = vsel %vm1373_vm8, %v8924_v56, %v1462_v9  ;;  %2191 = vmatpush.bf16.msra.mxu3 %v6911_v51  ;;  %v2394_v42 = vrot.slane %v9220_v55, 3  ;;  %v2355_v31 = vrot.slane %v9220_v55, 2 }
 0x377   : > { %2205 = vmatpush.bf16.msra.mxu1 %v6919_v35  ;;  %v2396_v56 = vrot.slane %v9222_v10, 3  ;;  %v2357_v19 = vrot.slane %v9222_v10, 2  ;;  %v2318_v53 = vrot.slane %v9222_v10, 1  ;;  %v2513_v39 = vrot.slane %v9222_v10, 6 }
 0x378   : > { %v2395_v43 = vsel %vm1213_vm3, %v2392_v59, %v2394_v42  ;;  %v2356_v11 = vsel %vm1173_vm6, %v2353_v46, %v2355_v31  ;;  %v2511_v46 = vrot.slane %v9220_v55, 6  ;;  %v2472_v51 = vrot.slane %v9220_v55, 5 }
 0x379   : > { %v2397_v61 = vsel %vm1213_vm3, %v2394_v42, %v2396_v56  ;;  %v2358_v21 = vsel %vm1173_vm6, %v2355_v31, %v2357_v19  ;;  %v11564_v35 = vrot.slane %v9222_v10, 5  ;;  %v2552_v42 = vrot.slane %v9222_v10, 7 }
 0x37a   : > { %7406 = vrot.lane.b32.xlu0 %v7405_v27, %s11605_s16  ;;  %7396 = vrot.lane.b32.xlu2 %v7395_v50, %s11606_s25  ;;  %v7425_v27 = vpack.i.bf16 %v2549_v33, %v1462_v9  ;;  %v7420_v50 = vpack.i.bf16 %v2510_v30, %v1454_v14  ;;  %v2316_v14 = vrot.slane %v9220_v55, 1  ;;  %v7440_v9 = vpack.i.bf16 %v2397_v61, %v2395_v43  ;;  %v6907_v43 = vld [vmem:[%s11526_s5 + $0x58] sm:$0xff]  ;;  %v6917_v61 = vld [vmem:[%s11526_s5 + $0xa8] sm:$0xff] }
 0x37b   : > { %7386 = vrot.lane.b32.xlu1 %v7385_v29, %s11607_s27  ;;  %v7415_v29 = vpack.i.bf16 %v1463_v40, %v2547_v16  ;;  %2192 = vmatpush.bf16.msra.mxu3 %v6910_v44  ;;  %v7435_v13 = vpack.i.bf16 %v2358_v21, %v2356_v11  ;;  %v2435_v33 = vrot.slane %v9222_v10, 4  ;;  %v2512_v30 = vsel %vm1333_vm7, %v2509_v8, %v2511_v46  ;;  %v6916_v11 = vld [vmem:[%s11526_s5 + $0xa0] sm:$0xff]  ;;  %v9326_v21 = vpop.permute.xlu0 %7306 }
 0x37c   : > { %2206 = vmatpush.bf16.msra.mxu1 %v6918_v48  ;;  %v2317_v59 = vsel %vm1133_vm4, %v2314_v49, %v2316_v14  ;;  %v2433_v49 = vrot.slane %v9220_v55, 4  ;;  %v2514_v40 = vsel %vm1333_vm7, %v2511_v46, %v2513_v39  ;;  %v2473_v16 = vsel %vm1293_vm2, %v2470_v15, %v2472_v51  ;;  %v6914_v46 = vld [vmem:[%s11526_s5 + $0x90] sm:$0xff] }
 0x37d   : > { %v2475_v44 = vsel %vm1293_vm2, %v2472_v51, %v11564_v35  ;;  %v2550_v15 = vrot.slane %v9220_v55, 7 }
 0x37e   : > { %v2434_v48 = vsel %vm1253_vm5, %v2431_v26, %v2433_v49  ;;  %v2436_v8 = vsel %vm1253_vm5, %v2433_v49, %v2435_v33 }
 0x37f   : > { %2193 = vmatpush.bf16.msra.mxu3 %v6909_v36  ;;  %v2551_v26 = vsel %vm1373_vm8, %v2548_v54, %v2550_v15  ;;  %v2553_v31 = vsel %vm1373_vm8, %v2550_v15, %v2552_v42  ;;  %v6906_v54 = vld [vmem:[%s11526_s5 + $0x50] sm:$0xff] }
 0x380   : > { %v7460_v36 = vpack.i.bf16 %v2553_v31, %v2551_v26  ;;  %2207 = vmatpush.bf16.msra.mxu1 %v6917_v61  ;;  %v6942_v15 = vld [vmem:[%s11524_s3 + $0x70] sm:$0xff]  ;;  %v6931_v31 = vld [vmem:[%s11524_s3 + $0x18] sm:$0xff]  ;;  %v6940_v61 = vld [vmem:[%s11524_s3 + $0x60] sm:$0xff] }
 0x382   : > { %7411 = vrot.lane.b32.xlu0 %v7410_v4, %s11602_s22  ;;  %7401 = vrot.lane.b32.xlu2 %v7400_v41, %s11605_s16  ;;  %v6908_v4 = vld [vmem:[%s11526_s5 + $0x60] sm:$0xff]  ;;  %v2319_v41 = vsel %vm1133_vm4, %v2316_v14, %v2318_v53  ;;  %v9312_v14 = vpop.permute.xlu2 %7301 }
 0x383   : > { %7391 = vrot.lane.b32.xlu1 %v7390_v17, %s11606_s25  ;;  %v7430_v17 = vpack.i.bf16 %v2319_v41, %v2317_v59  ;;  %2194 = vmatpush.bf16.msra.mxu3 %v6908_v4  ;;  %v7297_v4 = vpop.permute.xlu1 %7296  ;;  %v6905_v59 = vld [vmem:[%s11526_s5 + $0x48] sm:$0xff]  ;;  %v6915_v41 = vld [vmem:[%s11526_s5 + $0x98] sm:$0xff]  ;;  %v9345_v51 = vpop.permute.xlu0 %7321 }
 0x384   : > { %2208 = vmatpush.bf16.msra.mxu1 %v6916_v11 }
 0x387   : > { %2195 = vmatpush.bf16.msra.mxu3 %v6907_v43  ;;  %v6930_v43 = vld [vmem:[%s11524_s3 + $0x10] sm:$0xff] }
 0x388   : > { %2209 = vmatpush.bf16.msra.mxu1 %v6915_v41  ;;  %v6929_v41 = vld [vmem:[%s11524_s3 + $0x8] sm:$0xff] }
 0x38a   : > { %7426 = vrot.lane.b32.xlu0 %v7425_v27, %s11601_s28  ;;  %7421 = vrot.lane.b32.xlu2 %v7420_v50, %s11605_s16  ;;  %v7455_v27 = vpack.i.bf16 %v2514_v40, %v2512_v30  ;;  %v7450_v50 = vpack.i.bf16 %v2475_v44, %v2473_v16  ;;  %v6913_v30 = vld [vmem:[%s11526_s5 + $0x88] sm:$0xff]  ;;  %v6934_v40 = vld [vmem:[%s11524_s3 + $0x30] sm:$0xff] }
 0x38b   : > { %7416 = vrot.lane.b32.xlu1 %v7415_v29, %s11601_s28  ;;  %v7445_v29 = vpack.i.bf16 %v2436_v8, %v2434_v48  ;;  %2196 = vmatpush.bf16.msra.mxu3 %v6906_v54  ;;  %v9347_v49 = vpop.permute.xlu1 %7311  ;;  %v6912_v44 = vld [vmem:[%s11526_s5 + $0x80] sm:$0xff]  ;;  %v6933_v48 = vld [vmem:[%s11524_s3 + $0x28] sm:$0xff]  ;;  %v6943_v8 = vld [vmem:[%s11524_s3 + $0x78] sm:$0xff] }
 0x38c   : > { %2210 = vmatpush.bf16.msra.mxu1 %v6914_v46  ;;  %v6928_v46 = vld [vmem:[%s11524_s3] sm:$0xff]  ;;  %v7313_v3 = vunpack.i.l.bf16 %v9347_v49 }
 0x38f   : > { %2197 = vmatpush.bf16.msra.mxu3 %v6905_v59 }
 0x390   : > { %2211 = vmatpush.bf16.msra.mxu1 %v6913_v30  ;;  %v7298_v30 = vunpack.i.l.bf16 %v7297_v4 }
 0x392   : > { %7441 = vrot.lane.b32.xlu0 %v7440_v9, %s11603_s23  ;;  %7436 = vrot.lane.b32.xlu2 %v7435_v13, %s11607_s27  ;;  %v9334_v9 = vpop.permute.xlu2 %7316  ;;  %v6904_v13 = vld [vmem:[%s11526_s5 + $0x40] sm:$0xff] }
 0x393   : > { %7431 = vrot.lane.b32.xlu1 %v7430_v17, %s11604_s24  ;;  %2198 = vmatpush.bf16.msra.mxu3 %v6904_v13  ;;  %v6935_v17 = vld [vmem:[%s11524_s3 + $0x38] sm:$0xff]  ;;  %v7318_v2 = vunpack.i.l.bf16 %v9334_v9 }
 0x394   : > { %2212 = vmatpush.bf16.msra.mxu1 %v6912_v44  ;;  %v6939_v13 = vld [vmem:[%s11524_s3 + $0x58] sm:$0xff]  ;;  %v7299_v44 = vunpack.i.h.bf16 %v7297_v4 }
 0x396   : > { %v2638_v4 = vsel %vm1008_vm1, %v8933_v25, %v7299_v44 }
 0x397   : > { %2847 = vmatpush.bf16.msrb.mxu3 %v6935_v17  ;;  %v6938_v17 = vld [vmem:[%s11524_s3 + $0x50] sm:$0xff] }
 0x398   : > { %2876 = vmatpush.bf16.msrb.mxu1 %v6943_v8 }
 0x39a   : > { %7456 = vrot.lane.b32.xlu0 %v7455_v27, %s11605_s16  ;;  %7451 = vrot.lane.b32.xlu2 %v7450_v50, %s11602_s22  ;;  %v9355_v16 = vpop.permute.xlu2 %7331  ;;  %v9366_v27 = vpop.permute.xlu0 %7336 }
 0x39b   : > { %7446 = vrot.lane.b32.xlu1 %v7445_v29, %s11606_s25  ;;  %2848 = vmatpush.bf16.msrb.mxu3 %v6934_v40  ;;  %v9368_v50 = vpop.permute.xlu1 %7326  ;;  %v6932_v29 = vld [vmem:[%s11524_s3 + $0x20] sm:$0xff] }
 0x39c   : > { %2877 = vmatpush.bf16.msrb.mxu1 %v6942_v15  ;;  %v6937_v15 = vld [vmem:[%s11524_s3 + $0x48] sm:$0xff] }
 0x39f   : > { %2849 = vmatpush.bf16.msrb.mxu3 %v6933_v48 }
 0x3a2   : > { %v9376_v26 = vpop.permute.xlu2 %7346  ;;  %v9390_v54 = vpop.permute.xlu0 %7351 }
 0x3a3   : > { %7461 = vrot.lane.b32.xlu1 %v7460_v36, %s11601_s28  ;;  %2850 = vmatpush.bf16.msrb.mxu3 %v6932_v29  ;;  %v6941_v36 = vld [vmem:[%s11524_s3 + $0x68] sm:$0xff]  ;;  %v9392_v11 = vpop.permute.xlu1 %7341  ;;  %v7303_v29 = vunpack.i.l.bf16 %v9312_v14 }
 0x3a4   : > { %2878 = vmatpush.bf16.msrb.mxu1 %v6941_v36  ;;  %v2637_v36 = vsel %vm1008_vm1, %v8931_v24, %v7298_v30  ;;  %v1809_v24 = vrot.slane %v8880_v57, 4 }
 0x3a7   : > { %2851 = vmatpush.bf16.msrb.mxu3 %v6931_v31  ;;  %v7304_v31 = vunpack.i.h.bf16 %v9312_v14 }
 0x3a8   : > { %2879 = vmatpush.bf16.msrb.mxu1 %v6940_v61  ;;  %v1810_v61 = vrot.slane %v8888_v60, 4 }
 0x3a9   : > { %v2646_v14 = vsel %vm1478_vm9, %v2638_v4, %v7304_v31  ;;  %v7314_v31 = vunpack.i.h.bf16 %v9347_v49  ;;  %v7319_v49 = vunpack.i.h.bf16 %v9334_v9  ;;  %v7323_v9 = vunpack.i.l.bf16 %v9345_v51 }
 0x3aa   : > { %v9394_v59 = vpop.permute.xlu2 %7361  ;;  %v9408_v48 = vpop.permute.xlu0 %7366 }
 0x3ab   : > { %2852 = vmatpush.bf16.msrb.mxu3 %v6930_v43  ;;  %v9410_v8 = vpop.permute.xlu1 %7356  ;;  %v7308_v43 = vunpack.i.l.bf16 %v9326_v21  ;;  %v7363_v35 = vunpack.i.l.bf16 %v9394_v59 }
 0x3ac   : > { %2880 = vmatpush.bf16.msrb.mxu1 %v6939_v13  ;;  %v7309_v13 = vunpack.i.h.bf16 %v9326_v21 }
 0x3ae   : > { %v2654_v21 = vsel %vm1487_vm10, %v2646_v14, %v7309_v13 }
 0x3af   : > { %2853 = vmatpush.bf16.msrb.mxu3 %v6929_v41  ;;  %v6936_v41 = vld [vmem:[%s11524_s3 + $0x40] sm:$0xff] }
 0x3b0   : > { %2881 = vmatpush.bf16.msrb.mxu1 %v6938_v17  ;;  %v11563_v17 = vrot.slane %v9151_v45, 4 }
 0x3b2   : > { %v1813_v4 = vsel %vm1253_vm5, %v1810_v61, %v11563_v17 }
 0x3b3   : > { %2854 = vmatpush.bf16.msrb.mxu3 %v6928_v46  ;;  %v2645_v46 = vsel %vm1478_vm9, %v2637_v36, %v7303_v29 }
 0x3b4   : > { %2882 = vmatpush.bf16.msrb.mxu1 %v6937_v15  ;;  %v2653_v30 = vsel %vm1487_vm10, %v2645_v46, %v7308_v43  ;;  %v1811_v15 = vsel %vm1253_vm5, %v1809_v24, %v1810_v61 }
 0x3b8   : > { %2883 = vmatpush.bf16.msrb.mxu1 %v6936_v41 }
 0x3cc   : > { %v7377_v40 = vpop.permute.xlu2 %7376 }
 0x3cd   : > { %v7379_v36 = vunpack.i.h.bf16 %v7377_v40  ;;  %v7378_v57 = vunpack.i.l.bf16 %v7377_v40  ;;  %v2661_v40 = vsel %vm1496_vm11, %v2653_v30, %v7313_v3  ;;  %v7343_v30 = vunpack.i.l.bf16 %v9392_v11 }
 0x3ce   : > { %v2669_v3 = vsel %vm1505_vm12, %v2661_v40, %v7318_v2 }
 0x3cf   : > { %v2677_v17 = vsel %vm638_vm0, %v2669_v3, %v7323_v9  ;;  %v7348_v3 = vunpack.i.l.bf16 %v9376_v26 }
 0x3d4   : > { %v7397_v44 = vpop.permute.xlu2 %7396 }
 0x3e4   : > { %v7382_v25 = vpop.permute.xlu0 %7381 }
 0x3e5   : > { %v7372_v20 = vpop.permute.xlu1 %7371  ;;  %v7384_v41 = vunpack.i.h.bf16 %v7382_v25  ;;  %v7383_v43 = vunpack.i.l.bf16 %v7382_v25  ;;  %v2662_v25 = vsel %vm1496_vm11, %v2654_v21, %v7314_v31  ;;  %v7339_v21 = vunpack.i.h.bf16 %v9366_v27 }
 0x3e6   : > { %v7374_v7 = vunpack.i.h.bf16 %v7372_v20  ;;  %v7373_v29 = vunpack.i.l.bf16 %v7372_v20 }
 0x3e8   : > { %v1898_v46 = vsel %vm1478_vm9, %v1811_v15, %v7373_v29  ;;  %v1899_v24 = vsel %vm1478_vm9, %v1813_v4, %v7374_v7  ;;  %v7334_v7 = vunpack.i.h.bf16 %v9355_v16  ;;  %v7333_v29 = vunpack.i.l.bf16 %v9355_v16 }
 0x3e9   : > { %v1900_v13 = vsel %vm1496_vm11, %v1898_v46, %v7378_v57  ;;  %v1901_v20 = vsel %vm1496_vm11, %v1899_v24, %v7379_v36  ;;  %v7324_v36 = vunpack.i.h.bf16 %v9345_v51  ;;  %v2269_v46 = vld [vmem:[#allocation2 + $0x100] ss:$2 sm:$0xff]  ;;  %v2287_v24 = vld [vmem:[#allocation2 + $0x101] ss:$2 sm:$0xff]  ;;  %v7338_v16 = vunpack.i.l.bf16 %v9366_v27 }
 0x3ea   : > { %v1902_v14 = vsel %vm638_vm0, %v1900_v13, %v7383_v43  ;;  %v9448_v61 = vsel %vm638_vm0, %v1901_v20, %v7384_v41  ;;  %v2670_v41 = vsel %vm1505_vm12, %v2662_v25, %v7319_v49  ;;  %v7353_v13 = vunpack.i.l.bf16 %v9390_v54 }
 0x3eb   : > { %v1914_v15 = vpack.c.bf16 %v9448_v61, %v1902_v14  ;;  %v7399_v20 = vunpack.i.h.bf16 %v7397_v44  ;;  %v7398_v51 = vunpack.i.l.bf16 %v7397_v44  ;;  %v9462_v14 = vpop.permute.xlu2 %7401  ;;  %v7328_v25 = vunpack.i.l.bf16 %v9368_v50 }
 0x3ec   : > { %v7407_v57 = vpop.permute.xlu0 %7406  ;;  %v9473_v44 = vmax.f32 %v2269_v46, %v2287_v24  ;;  %v7349_v46 = vunpack.i.h.bf16 %v9376_v26  ;;  %v2678_v24 = vsel %vm638_vm0, %v2670_v41, %v7324_v36  ;;  %v7359_v26 = vunpack.i.h.bf16 %v9410_v8 }
 0x3ed   : > { %v7387_v4 = vpop.permute.xlu1 %7386  ;;  %2199 = vmatmul.bf16.vlgmr.msra.gmra.mxu3 %v1914_v15  ;;  %v7409_v2 = vunpack.i.h.bf16 %v7407_v57  ;;  %v7408_v40 = vunpack.i.l.bf16 %v7407_v57 }
 0x3ee   : > { %v7389_v31 = vunpack.i.h.bf16 %v7387_v4  ;;  %v7388_v43 = vunpack.i.l.bf16 %v7387_v4  ;;  %v1532_v4 = vsel %vm1008_vm1, %v8984_v63, %v7343_v30  ;;  %v2639_v30 = vsel %vm1008_vm1, %v8936_v1, %v7333_v29 }
 0x3ef   : > { %v1534_v9 = vsel %vm1478_vm9, %v1532_v4, %v7353_v13  ;;  %v7358_v1 = vunpack.i.l.bf16 %v9410_v8  ;;  %v9494_v36 = vrot.slane %v9473_v44, 1  ;;  %v7369_v4 = vunpack.i.h.bf16 %v9408_v48 }
 0x3f0   : > { %v1905_v15 = vsel %vm1478_vm9, %v9151_v45, %v7389_v31  ;;  %v1904_v49 = vsel %vm1478_vm9, %v8888_v60, %v7388_v43  ;;  %v1531_v60 = vsel %vm1008_vm1, %v8531_v34, %v7334_v7  ;;  %v7329_v43 = vunpack.i.h.bf16 %v9368_v50 }
 0x3f1   : > { %v1907_v27 = vsel %vm1496_vm11, %v1905_v15, %v7399_v20  ;;  %v1906_v6 = vsel %vm1496_vm11, %v1904_v49, %v7398_v51  ;;  %v1533_v20 = vsel %vm1478_vm9, %v1531_v60, %v7339_v21  ;;  %v2647_v34 = vsel %vm1478_vm9, %v2639_v30, %v7338_v16 }
 0x3f2   : > { %v1908_v57 = vsel %vm638_vm0, %v1906_v6, %v7408_v40  ;;  %v1909_v31 = vsel %vm638_vm0, %v1907_v27, %v7409_v2  ;;  %v2685_v50 = vsel %vm1522_vm13, %v2677_v17, %v7328_v25  ;;  %v7344_v51 = vunpack.i.h.bf16 %v9392_v11 }
 0x3f3   : > { %v1915_v63 = vpack.c.bf16 %v1909_v31, %v1908_v57  ;;  %v2686_v41 = vsel %vm1522_vm13, %v2678_v24, %v7329_v43  ;;  %v1536_v21 = vsel %vm1487_vm10, %v1534_v9, %v7363_v35  ;;  %v1535_v16 = vsel %vm1487_vm10, %v1533_v20, %v7349_v46  ;;  %v7422_v49 = vpop.permute.xlu2 %7421 }
 0x3f4   : > { %v7412_v6 = vpop.permute.xlu0 %7411  ;;  %v2321_v11 = vsel %vm1133_vm4, %v2318_v53, %v9494_v36  ;;  %v7354_v2 = vunpack.i.h.bf16 %v9390_v54  ;;  %v7368_v40 = vunpack.i.l.bf16 %v9408_v48  ;;  %v2655_v15 = vsel %vm1487_vm10, %v2647_v34, %v7348_v3 }
 0x3f5   : > { %v7392_v7 = vpop.permute.xlu1 %7391  ;;  %2213 = vmatmul.bf16.vlgmr.msra.gmra.mxu1 %v1915_v63  ;;  %v7413_v13 = vunpack.i.l.bf16 %v7412_v6  ;;  %v7465_v8 = vpack.i.bf16 %v9494_v36, %v2321_v11  ;;  %v2707_v35 = vpack.c.bf16 %v2686_v41, %v2685_v50  ;;  %v2640_v25 = vsel %vm1008_vm1, %v8986_v5, %v7344_v51 }
 0x3f6   : > { %v7393_v29 = vunpack.i.l.bf16 %v7392_v7  ;;  %v2663_v27 = vsel %vm1496_vm11, %v2655_v15, %v7358_v1  ;;  %v1537_v57 = vsel %vm1496_vm11, %v1535_v16, %v7359_v26  ;;  %v7404_v53 = vunpack.i.h.bf16 %v9462_v14 }
 0x3f7   : > { %v7403_v54 = vunpack.i.l.bf16 %v9462_v14  ;;  %7466 = vrot.lane.b32.xlu2 %v7465_v8, %s11604_s24  ;;  %v7364_v60 = vunpack.i.h.bf16 %v9394_v59  ;;  %v7423_v43 = vunpack.i.l.bf16 %v7422_v49  ;;  %v2648_v5 = vsel %vm1478_vm9, %v2640_v25, %v7354_v2 }
 0x3f8   : > { %v1538_v17 = vsel %vm1496_vm11, %v1536_v21, %v7393_v29  ;;  %v2671_v48 = vsel %vm1505_vm12, %v2663_v27, %v7368_v40  ;;  %v7394_v30 = vunpack.i.h.bf16 %v7392_v7  ;;  %v1539_v14 = vsel %vm1505_vm12, %v1537_v57, %v7369_v4 }
 0x3f9   : > { %v1540_v31 = vsel %vm1505_vm12, %v1538_v17, %v7413_v13  ;;  %v2679_v34 = vsel %vm638_vm0, %v2671_v48, %v7403_v54  ;;  %v1541_v59 = vsel %vm638_vm0, %v1539_v14, %v7404_v53  ;;  %v2656_v51 = vsel %vm1487_vm10, %v2648_v5, %v7364_v60 }
 0x3fa   : > { %v1542_v20 = vsel %vm638_vm0, %v1540_v31, %v7423_v43  ;;  %v7414_v1 = vunpack.i.h.bf16 %v7412_v6  ;;  %v2664_v26 = vsel %vm1496_vm11, %v2656_v51, %v7394_v30  ;;  %v7424_v11 = vunpack.i.h.bf16 %v7422_v49 }
 0x3fb   : > { %v7437_v2 = vpop.permute.xlu2 %7436 }
 0x3fc   : > { %v7427_v63 = vpop.permute.xlu0 %7426  ;;  %v2672_v17 = vsel %vm1505_vm12, %v2664_v26, %v7414_v1  ;;  %v7439_v27 = vunpack.i.h.bf16 %v7437_v2  ;;  %v7438_v57 = vunpack.i.l.bf16 %v7437_v2 }
 0x3fd   : > { %v7428_v46 = vunpack.i.l.bf16 %v7427_v63  ;;  %v7417_v24 = vpop.permute.xlu1 %7416  ;;  %2855 = vmatmul.bf16.vlgmr.msrb.gmra.mxu3 %v2707_v35  ;;  %v7429_v16 = vunpack.i.h.bf16 %v7427_v63  ;;  %v2680_v6 = vsel %vm638_vm0, %v2672_v17, %v7424_v11  ;;  %v2398_v17 = vrot.slane %v9473_v44, 3 }
 0x3fe   : > { %v7419_v9 = vunpack.i.h.bf16 %v7417_v24  ;;  %v7418_v3 = vunpack.i.l.bf16 %v7417_v24 }
 0x3ff   : > { %v1544_v50 = vsel %vm1522_vm13, %v1542_v20, %v7428_v46  ;;  %v2688_v25 = vsel %vm1522_vm13, %v2680_v6, %v7429_v16  ;;  %v2399_v11 = vsel %vm1213_vm3, %v2396_v56, %v2398_v17  ;;  %v3413_v56 = vld [vmem:[#allocation2 + $0x170] ss:$2 sm:$0xff] }
 0x400   : > { %v2687_v7 = vsel %vm1522_vm13, %v2679_v34, %v7418_v3  ;;  %v1543_v29 = vsel %vm1522_vm13, %v1541_v59, %v7419_v9  ;;  %v7470_v2 = vpack.i.bf16 %v2398_v17, %v2399_v11  ;;  %v3407_v11 = vld [vmem:[#allocation2 + $0x140] ss:$2 sm:$0xff] }
 0x401   : > { %v1552_v21 = vpack.c.bf16 %v1544_v50, %v1543_v29  ;;  %v2708_v13 = vpack.c.bf16 %v2687_v7, %v2686_v41  ;;  %v2709_v53 = vpack.c.bf16 %v2688_v25, %v2687_v7 }
 0x402   : > { %7471 = vrot.lane.b32.xlu1 %v7470_v2, %s11603_s23  ;;  %v9639_v2 = vld [vmem:[%s11525_s4] ss:$0 sm:$0xff] }
 0x403   : > { %1737 = vmatmul.bf16.gmra.mxu2 %v1552_v21  ;;  %v7452_v48 = vpop.permute.xlu2 %7451 }
 0x404   : > { %v7442_v35 = vpop.permute.xlu0 %7441  ;;  %v7454_v24 = vunpack.i.h.bf16 %v7452_v48  ;;  %v7453_v9 = vunpack.i.l.bf16 %v7452_v48 }
 0x405   : > { %v7432_v40 = vpop.permute.xlu1 %7431  ;;  %2884 = vmatmul.bf16.vlgmr.msrb.gmra.mxu1 %v2708_v13  ;;  %v7444_v60 = vunpack.i.h.bf16 %v7442_v35  ;;  %v7443_v43 = vunpack.i.l.bf16 %v7442_v35  ;;  %v3411_v35 = vld [vmem:[#allocation2 + $0x160] ss:$2 sm:$0xff] }
 0x406   : > { %v7434_v15 = vunpack.i.h.bf16 %v7432_v40  ;;  %v7433_v8 = vunpack.i.l.bf16 %v7432_v40  ;;  %v2186_v40 = vpop.f32.mrf.mxu3 }
 0x408   : > { %v2642_v4 = vsel %vm1008_vm1, %v9220_v55, %v7434_v15  ;;  %v2641_v41 = vsel %vm1008_vm1, %v9019_v12, %v7433_v8  ;;  %v1709_v15 = vpop.f32.mrf.mxu1 }
 0x409   : > { %v2650_v49 = vsel %vm1478_vm9, %v2642_v4, %v7439_v27  ;;  %v2649_v54 = vsel %vm1478_vm9, %v2641_v41, %v7438_v57  ;;  %v9562_v4 = vld [vmem:[%s11527_s6] ss:$0 sm:$0xff]  ;;  %v2271_v41 = vld [vmem:[#allocation2 + $0x110] ss:$2 sm:$0xff]  ;;  %v2289_v27 = vld [vmem:[#allocation2 + $0x111] ss:$2 sm:$0xff] }
 0x40a   : > { %v2657_v30 = vsel %vm1487_vm10, %v2649_v54, %v7443_v43  ;;  %v2658_v55 = vsel %vm1487_vm10, %v2650_v49, %v7444_v60  ;;  %v2187_v49 = vadd.f32 %v9562_v4, %v2186_v40  ;;  %v9567_v54 = vmax.f32 %v2271_v41, %v2289_v27  ;;  %v8056_v41 = vld [vmem:[%s11525_s4] ss:$0 sm:$0xff] }
 0x40b   : > { %v1710_v27 = vadd.f32 %v8056_v41, %v1709_v15  ;;  %v3409_v15 = vld [vmem:[#allocation2 + $0x150] ss:$2 sm:$0xff]  ;;  %v9650_v41 = vrot.slane %v9473_v44, 6 }
 0x40c   : > { %v7457_v3 = vpop.permute.xlu0 %7456 }
 0x40d   : > { %v7447_v31 = vpop.permute.xlu1 %7446  ;;  %2860 = vmatmul.bf16.gmra.mxu3 %v2709_v53  ;;  %v7459_v34 = vunpack.i.h.bf16 %v7457_v3  ;;  %v7458_v59 = vunpack.i.l.bf16 %v7457_v3  ;;  %v3431_v53 = vld [vmem:[#allocation2 + $0x171] ss:$2 sm:$0xff] }
 0x40e   : > { %v7449_v63 = vunpack.i.h.bf16 %v7447_v31  ;;  %v7448_v5 = vunpack.i.l.bf16 %v7447_v31  ;;  %v9557_v8 = vpop.f32.mrf.mxu3  ;;  %v9569_v43 = vmax.f32 %v3413_v56, %v3431_v53 }
 0x410   : > { %v2665_v12 = vsel %vm1496_vm11, %v2657_v30, %v7448_v5  ;;  %v2666_v46 = vsel %vm1496_vm11, %v2658_v55, %v7449_v63  ;;  %v1711_v6 = vpop.f32.mrf.mxu1  ;;  %v11569_v55 = vrot.slane %v9567_v54, 3 }
 0x411   : > { %v2673_v14 = vsel %vm1505_vm12, %v2665_v12, %v7453_v9  ;;  %v2674_v20 = vsel %vm1505_vm12, %v2666_v46, %v7454_v24  ;;  %v11570_v12 = vrot.slane %v9569_v43, 3  ;;  %v11567_v46 = vrot.slane %v9567_v54, 5 }
 0x412   : > { %v2681_v7 = vsel %vm638_vm0, %v2673_v14, %v7458_v59  ;;  %v2682_v29 = vsel %vm638_vm0, %v2674_v20, %v7459_v34  ;;  %v9579_v24 = vrot.slane %v9473_v44, 5  ;;  %v11568_v9 = vrot.slane %v9569_v43, 5 }
 0x413   : > { %v9586_v14 = vsel %vm1213_vm3, %v2398_v17, %v11569_v55  ;;  %v3421_v55 = vld [vmem:[#allocation2 + $0x121] ss:$2 sm:$0xff] }
 0x414   : > { %v9601_v59 = vsel %vm1293_vm2, %v9579_v24, %v11567_v46  ;;  %v3425_v46 = vld [vmem:[#allocation2 + $0x141] ss:$2 sm:$0xff] }
 0x415   : > { %v7462_v50 = vpop.permute.xlu1 %7461 }
 0x416   : > { %v7464_v51 = vunpack.i.h.bf16 %v7462_v50  ;;  %v7463_v1 = vunpack.i.l.bf16 %v7462_v50 }
 0x418   : > { %v2689_v26 = vsel %vm1522_vm13, %v2681_v7, %v7463_v1  ;;  %v9549_v21 = vsel %vm1522_vm13, %v2682_v29, %v7464_v51  ;;  %v9613_v1 = vrot.slane %v9473_v44, 7  ;;  %v11565_v29 = vrot.slane %v9567_v54, 7 }
 0x419   : > { %v2710_v13 = vpack.c.bf16 %v2689_v26, %v2688_v25  ;;  %v2711_v16 = vpack.c.bf16 %v9549_v21, %v2689_v26  ;;  %v3429_v25 = vld [vmem:[#allocation2 + $0x161] ss:$2 sm:$0xff]  ;;  %v11566_v26 = vrot.slane %v9569_v43, 7 }
 0x41a   : > { %v9564_v57 = vmax.f32 %v3411_v35, %v3429_v25 }
 0x41b   : > { %2889 = vmatmul.bf16.gmra.mxu1 %v2710_v13 }
 0x41c   : > { %v11573_v5 = vrot.slane %v9564_v57, 3  ;;  %v11571_v30 = vrot.slane %v9564_v57, 5  ;;  %v11572_v3 = vrot.slane %v9564_v57, 7 }
 0x41d   : > { %2865 = vmatmul.bf16.gmra.mxu3 %v2711_v16  ;;  %v9625_v16 = vsel %vm1373_vm8, %v9613_v1, %v11565_v29 }
 0x41e   : > { %v9593_v20 = vsel %vm1213_vm3, %v11573_v5, %v11570_v12  ;;  %v9608_v50 = vsel %vm1293_vm2, %v11571_v30, %v11568_v9  ;;  %v9632_v17 = vsel %vm1373_vm8, %v11572_v3, %v11566_v26  ;;  %v3405_v26 = vld [vmem:[#allocation2 + $0x130] ss:$2 sm:$0xff] }
 0x470   : > { %v2200_v31 = vpop.f32.mrf.mxu3 }
 0x471   : > { %v2201_v60 = vadd.f32 %v2200_v31, %v2187_v49 }
 0x472   : > { %v2214_v63 = vpop.f32.mrf.mxu1 }
 0x473   : > { %v9572_v48 = vadd.f32 %v2214_v63, %v2201_v60 }
 0x478   : > { %v9610_v51 = vpop.f32.mrf.mxu3 }
 0x47a   : > { %v9619_v13 = vpop.f32.mrf.mxu1 }
 0x480   : > { %v2856_v40 = vpop.f32.mrf.mxu3 }
 0x481   : > { %v2857_v6 = vadd.f32 %v9639_v2, %v2856_v40 }
 0x482   : > { %v2885_v35 = vpop.f32.mrf.mxu1 }
 0x483   : > { %v2886_v25 = vadd.f32 %v2885_v35, %v2857_v6  ;;  %v3423_v35 = vld [vmem:[#allocation2 + $0x131] ss:$2 sm:$0xff] }
 0x485   : > { %v2905_v56 = vmax.f32 %v2886_v25, 0.0  ;;  %v3427_v25 = vld [vmem:[#allocation2 + $0x151] ss:$2 sm:$0xff] }
 0x486   : > { %v1738_v53 = vpop.f32.mrf.mxu2 }
 0x487   : > { %2913 = vst.msk [vmem:[#allocation3] sm:$0xff] %vm1478_vm9, %v2905_v56  ;;  %v1739_v49 = vadd.f32 %v1738_v53, %v1710_v27  ;;  %v9653_v27 = vrot.slane %v9473_v44, 4  ;;  %v9656_v56 = vrot.slane %v9473_v44, 2  ;;  %v9660_v53 = vmax.f32 %v3407_v11, %v3425_v46 }
 0x488   : > { %v2858_v31 = vpop.f32.mrf.mxu3 }
 0x489   : > { %v1749_v60 = vmax.f32 %v1739_v49, 0.0  ;;  %v2859_v63 = vadd.f32 %v9639_v2, %v2858_v31  ;;  %v9662_v49 = vmax.f32 %v3409_v15, %v3427_v25  ;;  %v2438_v46 = vsel %vm1253_vm5, %v2435_v33, %v9653_v27 }
 0x48a   : > { %v2887_v29 = vpop.f32.mrf.mxu1  ;;  %v2360_v11 = vsel %vm1173_vm6, %v2357_v19, %v9656_v56 }
 0x48b   : > { %1757 = vst.msk [vmem:[#allocation3 + $0x30] sm:$0xff] %vm1478_vm9, %v1749_v60  ;;  %v2888_v40 = vadd.f32 %v2887_v29, %v2859_v63  ;;  %v9658_v29 = vmax.f32 %v3405_v26, %v3423_v35  ;;  %v3499_v15 = vrot.slane %v9662_v49, 2 }
 0x48d   : > { %v2906_v6 = vmax.f32 %v2888_v40, 0.0  ;;  %v2516_v40 = vsel %vm1333_vm7, %v2513_v39, %v9650_v41  ;;  %v11577_v35 = vrot.slane %v9658_v29, 2  ;;  %v3497_v39 = vrot.slane %v9660_v53, 2 }
 0x48e   : > { %v1740_v9 = vpop.f32.mrf.mxu2 }
 0x48f   : > { %2914 = vst.msk [vmem:[#allocation3 + $0x8] sm:$0xff] %vm1478_vm9, %v2906_v6 }
 0x490   : > { %v2861_v9 = vpop.f32.mrf.mxu3 }
 0x491   : > { %v2862_v25 = vadd.f32 %v9639_v2, %v2861_v9 }
 0x492   : > { %v1766_v31 = vld [vmem:[#allocation3 + $0x30] ss:$2 sm:$0xf]  ;;  %v1774_v60 = vld [vmem:[#allocation3 + $0x31] ss:$2 sm:$0xf] }
 0x493   : > { %v9664_v63 = vmax.f32 %v1766_v31, %v1774_v60  ;;  %v3403_v60 = vld [vmem:[#allocation2 + $0x120] ss:$2 sm:$0xff] }
 0x495   : > { %v1887_v6 = vrot.slane %v9664_v63, 7  ;;  %v1882_v7 = vrot.slane %v9664_v63, 6  ;;  %v1877_v26 = vrot.slane %v9664_v63, 5 }
 0x497   : > { %v1888_v31 = vsel %vm1373_vm8, %v1841_v32, %v1887_v6  ;;  %v1883_v33 = vsel %vm1333_vm7, %v1830_v38, %v1882_v7  ;;  %v1878_v19 = vsel %vm1293_vm2, %v1819_v47, %v1877_v26  ;;  %v9696_v32 = vmax.f32 %v3403_v60, %v3421_v55 }
 0x498   : > { %v2890_v12 = vpop.f32.mrf.mxu1  ;;  %v7490_v34 = vpack.i.bf16 %v1888_v31, %v2516_v40  ;;  %v7485_v30 = vpack.i.bf16 %v1883_v33, %v2438_v46  ;;  %v7475_v3 = vpack.i.bf16 %v1878_v19, %v2360_v11  ;;  %v3498_v38 = vsel %vm1173_vm6, %v11577_v35, %v3497_v39  ;;  %v2863_v7 = vpop.f32.mrf.mxu3 }
 0x499   : > { %v2891_v5 = vadd.f32 %v2890_v12, %v2862_v25  ;;  %v3500_v47 = vsel %vm1173_vm6, %v3497_v39, %v3499_v15  ;;  %v11584_v12 = vrot.slane %v9658_v29, 4  ;;  %v11576_v40 = vrot.slane %v9662_v49, 4 }
 0x49a   : > { %7491 = vrot.lane.b32.xlu1 %v7490_v34, %s11605_s16  ;;  %7486 = vrot.lane.b32.xlu2 %v7485_v30, %s11606_s25  ;;  %v2555_v30 = vsel %vm1373_vm8, %v2552_v42, %v9613_v1  ;;  %v7505_v34 = vpack.i.bf16 %v3500_v47, %v3498_v38  ;;  %v3458_v6 = vrot.slane %v9660_v53, 1  ;;  %v3460_v46 = vrot.slane %v9662_v49, 1 }
 0x49b   : > { %v2907_v9 = vmax.f32 %v2891_v5, 0.0  ;;  %7476 = vrot.lane.b32.xlu0 %v7475_v3, %s11607_s27  ;;  %v11608_v5 = vrot.slane %v9222_v10, 5  ;;  %v3575_v3 = vrot.slane %v9660_v53, 4  ;;  %v2864_v26 = vadd.f32 %v9639_v2, %v2863_v7 }
 0x49c   : > { %v3455_v42 = vrot.slane %v9696_v32, 1  ;;  %v3456_v11 = vrot.slane %v9658_v29, 1  ;;  %v7495_v25 = vpack.i.bf16 %v9613_v1, %v2555_v30  ;;  %v11575_v31 = vrot.slane %v9564_v57, 1 }
 0x49d   : > { %2915 = vst.msk [vmem:[#allocation3 + $0x10] sm:$0xff] %vm1478_vm9, %v2907_v9  ;;  %v2477_v55 = vsel %vm1293_vm2, %v11608_v5, %v9579_v24  ;;  %v3576_v60 = vsel %vm1253_vm5, %v11584_v12, %v3575_v3  ;;  %v3578_v9 = vsel %vm1253_vm5, %v3575_v3, %v11576_v40  ;;  %v3461_v38 = vsel %vm1133_vm4, %v3458_v6, %v3460_v46 }
 0x49e   : > { %v7480_v19 = vpack.i.bf16 %v9579_v24, %v2477_v55  ;;  %v3463_v1 = vsel %vm1133_vm4, %v3460_v46, %v11575_v31  ;;  %v3457_v24 = vsel %vm1133_vm4, %v3455_v42, %v3456_v11  ;;  %v3459_v7 = vsel %vm1133_vm4, %v3456_v11, %v3458_v6 }
 0x49f   : > { %v7520_v30 = vpack.i.bf16 %v3578_v9, %v3576_v60  ;;  %v7510_v5 = vpack.i.bf16 %v3463_v1, %v3461_v38  ;;  %v7500_v55 = vpack.i.bf16 %v3459_v7, %v3457_v24  ;;  %v11578_v3 = vrot.slane %v9658_v29, 6 }
 0x4a0   : > { %v2892_v39 = vpop.f32.mrf.mxu1  ;;  %v3536_v46 = vrot.slane %v9660_v53, 3  ;;  %v3534_v42 = vrot.slane %v9658_v29, 3  ;;  %v3692_v7 = vrot.slane %v9660_v53, 7  ;;  %v3501_v35 = vrot.slane %v9564_v57, 2 }
 0x4a1   : > { %v2893_v33 = vadd.f32 %v2892_v39, %v2864_v26  ;;  %v11574_v26 = vrot.slane %v9662_v49, 6  ;;  %v3538_v39 = vrot.slane %v9662_v49, 3 }
 0x4a2   : > { %7506 = vrot.lane.b32.xlu1 %v7505_v34, %s11607_s27  ;;  %7496 = vrot.lane.b32.xlu2 %v7495_v25, %s11601_s28  ;;  %v3653_v34 = vrot.slane %v9660_v53, 6  ;;  %v3533_v25 = vrot.slane %v9696_v32, 3  ;;  %v3537_v38 = vsel %vm1213_vm3, %v3534_v42, %v3536_v46 }
 0x4a3   : > { %v2908_v47 = vmax.f32 %v2893_v33, 0.0  ;;  %7481 = vrot.lane.b32.xlu0 %v7480_v19, %s11602_s22  ;;  %v3539_v33 = vsel %vm1213_vm3, %v3536_v46, %v3538_v39  ;;  %v11609_v19 = vrot.slane %v9564_v57, 3 }
 0x4a4   : > { %v3654_v6 = vsel %vm1333_vm7, %v11578_v3, %v3653_v34  ;;  %v3656_v11 = vsel %vm1333_vm7, %v3653_v34, %v11574_v26  ;;  %v3535_v9 = vsel %vm1213_vm3, %v3533_v25, %v3534_v42  ;;  %v3611_v34 = vrot.slane %v9696_v32, 5 }
 0x4a5   : > { %2916 = vst.msk [vmem:[#allocation3 + $0x18] sm:$0xff] %vm1478_vm9, %v2908_v47  ;;  %v3541_v60 = vsel %vm1213_vm3, %v3538_v39, %v11609_v19  ;;  %v7535_v1 = vpack.i.bf16 %v3656_v11, %v3654_v6  ;;  %v7515_v24 = vpack.i.bf16 %v3537_v38, %v3535_v9  ;;  %v3612_v26 = vrot.slane %v9658_v29, 5  ;;  %v2925_v9 = vld [vmem:[#allocation3 + $0x1] ss:$2 sm:$0xff] }
 0x4a6   : > { %v7525_v47 = vpack.i.bf16 %v3541_v60, %v3539_v33  ;;  %v11610_v25 = vrot.slane %v9564_v57, 7  ;;  %v11611_v11 = vrot.slane %v9564_v57, 5  ;;  %v2921_v60 = vld [vmem:[#allocation3] ss:$2 sm:$0xff]  ;;  %v3690_v3 = vrot.slane %v9658_v29, 7 }
 0x4a7   : > { %v3613_v38 = vsel %vm1293_vm2, %v3611_v34, %v3612_v26 }
 0x4aa   : > { %7521 = vrot.lane.b32.xlu1 %v7520_v30, %s11606_s25  ;;  %7511 = vrot.lane.b32.xlu2 %v7510_v5, %s11604_s24  ;;  %v3694_v30 = vrot.slane %v9662_v49, 7  ;;  %v3614_v5 = vrot.slane %v9660_v53, 5 }
 0x4ab   : > { %7501 = vrot.lane.b32.xlu0 %v7500_v55, %s11604_s24  ;;  %v3616_v55 = vrot.slane %v9662_v49, 5 }
 0x4ac   : > { %v2922_v39 = vld [vmem:[#allocation3 + $0x10] ss:$2 sm:$0xff]  ;;  %v2926_v19 = vld [vmem:[#allocation3 + $0x11] ss:$2 sm:$0xff]  ;;  %v3695_v46 = vsel %vm1373_vm8, %v3692_v7, %v3694_v30  ;;  %v3697_v42 = vsel %vm1373_vm8, %v3694_v30, %v11610_v25  ;;  %v9785_v30 = vmax.f32 %v2921_v60, %v2925_v9  ;;  %v3689_v25 = vrot.slane %v9696_v32, 7 }
 0x4ad   : > { %v3617_v6 = vsel %vm1293_vm2, %v3614_v5, %v3616_v55  ;;  %v3619_v33 = vsel %vm1293_vm2, %v3616_v55, %v11611_v11  ;;  %v11580_v55 = vrot.slane %v9569_v43, 2 }
 0x4ae   : > { %v7540_v31 = vpack.i.bf16 %v3619_v33, %v3617_v6  ;;  %v2970_v34 = vrot.slane %v9785_v30, 5  ;;  %v2935_v33 = vrot.slane %v9785_v30, 1 }
 0x4b2   : > { %7536 = vrot.lane.b32.xlu1 %v7535_v1, %s11605_s16  ;;  %7526 = vrot.lane.b32.xlu2 %v7525_v47, %s11603_s23  ;;  %v3615_v1 = vsel %vm1293_vm2, %v3612_v26, %v3614_v5  ;;  %v9782_v47 = vmax.f32 %v2922_v39, %v2926_v19  ;;  %v3502_v26 = vsel %vm1173_vm6, %v3499_v15, %v3501_v35 }
 0x4b3   : > { %7516 = vrot.lane.b32.xlu0 %v7515_v24, %s11603_s23  ;;  %v7550_v24 = vpack.i.bf16 %v3697_v42, %v3695_v46  ;;  %v7530_v40 = vpack.i.bf16 %v3615_v1, %v3613_v38  ;;  %v3504_v5 = vsel %vm1173_vm6, %v3501_v35, %v11580_v55  ;;  %v3691_v39 = vsel %vm1373_vm8, %v3689_v25, %v3690_v3 }
 0x4b4   : > { %v11581_v11 = vrot.slane %v9782_v47, 5  ;;  %v3693_v19 = vsel %vm1373_vm8, %v3690_v3, %v3692_v7  ;;  %v9804_v46 = vrot.slane %v9782_v47, 1  ;;  %v9811_v6 = vrot.slane %v9782_v47, 3 }
 0x4b5   : > { %v7545_v42 = vpack.i.bf16 %v3693_v19, %v3691_v39  ;;  %v9814_v35 = vrot.slane %v9782_v47, 2  ;;  %v2953_v3 = vrot.slane %v9785_v30, 3  ;;  %v2944_v7 = vrot.slane %v9785_v30, 2 }
 0x4b6   : > { %v2937_v38 = vsel %vm1133_vm4, %v2935_v33, %v9804_v46  ;;  %v2981_v39 = vrot.slane %v9785_v30, 6  ;;  %v6924_v33 = vld [vmem:[%s11526_s5 + $0xe0] sm:$0xff] }
 0x4b7   : > { %v2955_v60 = vsel %vm1213_vm3, %v2953_v3, %v9811_v6  ;;  %v2946_v9 = vsel %vm1173_vm6, %v2944_v7, %v9814_v35  ;;  %v7560_v25 = vpack.i.bf16 %v2937_v38, %v9656_v56  ;;  %v6926_v3 = vld [vmem:[%s11526_s5 + $0xf0] sm:$0xff]  ;;  %v6925_v7 = vld [vmem:[%s11526_s5 + $0xe8] sm:$0xff]  ;;  %v9866_v38 = vpop.permute.xlu2 %7466 }
 0x4b8   : > { %v7580_v1 = vpack.i.bf16 %v9811_v6, %v2955_v60  ;;  %v6923_v60 = vld [vmem:[%s11526_s5 + $0xd8] sm:$0xff] }
 0x4ba   : > { %7551 = vrot.lane.b32.xlu1 %v7550_v24, %s11601_s28  ;;  %7541 = vrot.lane.b32.xlu2 %v7540_v31, %s11602_s22  ;;  %v7555_v31 = vpack.i.bf16 %v3504_v5, %v3502_v26  ;;  %v7570_v24 = vpack.i.bf16 %v2946_v9, %v9653_v27  ;;  %v11582_v26 = vrot.slane %v9782_v47, 7  ;;  %v11583_v5 = vrot.slane %v9782_v47, 6  ;;  %v6922_v9 = vld [vmem:[%s11526_s5 + $0xd0] sm:$0xff] }
 0x4bb   : > { %7531 = vrot.lane.b32.xlu0 %v7530_v40, %s11602_s22  ;;  %v2972_v40 = vsel %vm1293_vm2, %v2970_v34, %v11581_v11  ;;  %v2992_v34 = vrot.slane %v9785_v30, 7 }
 0x4bc   : > { %v7565_v15 = vpack.i.bf16 %v2972_v40, %v9804_v46  ;;  %v2983_v40 = vsel %vm1333_vm7, %v2981_v39, %v11583_v5  ;;  %v9876_v39 = vpop.permute.xlu1 %7471 }
 0x4bd   : > { %v2994_v19 = vsel %vm1373_vm8, %v2992_v34, %v11582_v26  ;;  %v6950_v26 = vld [vmem:[%s11526_s5 + $0x30] sm:$0xff]  ;;  %v7473_v12 = vunpack.i.l.bf16 %v9876_v39 }
 0x4c2   : > { %7556 = vrot.lane.b32.xlu2 %v7555_v31, %s11607_s27  ;;  %7566 = vrot.lane.b32.xlu1 %v7565_v15, %s11607_s27  ;;  %v7585_v31 = vpack.i.bf16 %v2994_v19, %v9650_v41  ;;  %v6927_v15 = vld [vmem:[%s11526_s5 + $0xf8] sm:$0xff] }
 0x4c3   : > { %7546 = vrot.lane.b32.xlu0 %v7545_v42, %s11601_s28  ;;  %v7575_v42 = vpack.i.bf16 %v2983_v40, %v9814_v35  ;;  %2219 = vmatpush.bf16.msra.mxu2 %v6927_v15  ;;  %v6951_v40 = vld [vmem:[%s11526_s5 + $0x38] sm:$0xff] }
 0x4c7   : > { %2220 = vmatpush.bf16.msra.mxu2 %v6926_v3 }
 0x4ca   : > { %7581 = vrot.lane.b32.xlu1 %v7580_v1, %s11605_s16  ;;  %7571 = vrot.lane.b32.xlu2 %v7570_v24, %s11606_s25  ;;  %v6921_v1 = vld [vmem:[%s11526_s5 + $0xc8] sm:$0xff]  ;;  %v6920_v24 = vld [vmem:[%s11526_s5 + $0xc0] sm:$0xff] }
 0x4cb   : > { %7561 = vrot.lane.b32.xlu0 %v7560_v25, %s11607_s27  ;;  %2221 = vmatpush.bf16.msra.mxu2 %v6925_v7 }
 0x4cf   : > { %2222 = vmatpush.bf16.msra.mxu2 %v6924_v33 }
 0x4d2   : > { %7586 = vrot.lane.b32.xlu2 %v7585_v31, %s11605_s16  ;;  %v1874_v31 = vrot.slane %v9664_v63, 4 }
 0x4d3   : > { %7576 = vrot.lane.b32.xlu0 %v7575_v42, %s11606_s25  ;;  %2223 = vmatpush.bf16.msra.mxu2 %v6923_v60  ;;  %v7468_v42 = vunpack.i.l.bf16 %v9866_v38 }
 0x4d5   : > { %v2643_v55 = vsel %vm1008_vm1, %v9222_v10, %v7468_v42  ;;  %v6949_v10 = vld [vmem:[%s11526_s5 + $0x28] sm:$0xff] }
 0x4d7   : > { %2224 = vmatpush.bf16.msra.mxu2 %v6922_v9 }
 0x4db   : > { %2225 = vmatpush.bf16.msra.mxu2 %v6921_v1  ;;  %v11612_v1 = vrot.slane %v9151_v45, 4 }
 0x4df   : > { %2226 = vmatpush.bf16.msra.mxu2 %v6920_v24  ;;  %v1875_v24 = vsel %vm1253_vm5, %v11612_v1, %v1874_v31 }
 0x4e3   : > { %3331 = vmatpush.bf16.msrb.mxu2 %v6951_v40 }
 0x4e7   : > { %3332 = vmatpush.bf16.msrb.mxu2 %v6950_v26 }
 0x4eb   : > { %3333 = vmatpush.bf16.msrb.mxu2 %v6949_v10 }
 0x4f4   : > { %v7487_v25 = vpop.permute.xlu2 %7486 }
 0x4f5   : > { %v7489_v9 = vunpack.i.h.bf16 %v7487_v25 }
 0x4fc   : > { %v9874_v34 = vpop.permute.xlu2 %7496 }
 0x4fd   : > { %v7499_v23 = vunpack.i.h.bf16 %v9874_v34 }
 0x504   : > { %v7512_v19 = vpop.permute.xlu2 %7511 }
 0x505   : > { %v7513_v11 = vunpack.i.l.bf16 %v7512_v19 }
 0x507   : > { %v3787_v42 = vsel %vm1008_vm1, %v9660_v53, %v7513_v11  ;;  %v7498_v11 = vunpack.i.l.bf16 %v9874_v34 }
 0x50c   : > { %v7492_v15 = vpop.permute.xlu1 %7491  ;;  %v9883_v3 = vpop.permute.xlu2 %7526 }
 0x50d   : > { %v7477_v7 = vpop.permute.xlu0 %7476  ;;  %v7494_v40 = vunpack.i.h.bf16 %v7492_v15 }
 0x50e   : > { %v7479_v33 = vunpack.i.h.bf16 %v7477_v7  ;;  %v7478_v60 = vunpack.i.l.bf16 %v7477_v7 }
 0x510   : > { %v1910_v63 = vsel %vm1478_vm9, %v1875_v24, %v7479_v33  ;;  %v2651_v7 = vsel %vm1478_vm9, %v2643_v55, %v7478_v60  ;;  %v7528_v33 = vunpack.i.l.bf16 %v9883_v3  ;;  %v7488_v60 = vunpack.i.l.bf16 %v7487_v25 }
 0x511   : > { %v1911_v5 = vsel %vm1496_vm11, %v1910_v63, %v7489_v9  ;;  %v2659_v9 = vsel %vm1487_vm10, %v2651_v7, %v7473_v12  ;;  %v7514_v63 = vunpack.i.h.bf16 %v7512_v19  ;;  %v6947_v19 = vld [vmem:[%s11526_s5 + $0x18] sm:$0xff] }
 0x512   : > { %v1912_v45 = vsel %vm638_vm0, %v1911_v5, %v7494_v40  ;;  %v7493_v40 = vunpack.i.l.bf16 %v7492_v15  ;;  %v2667_v53 = vsel %vm1496_vm11, %v2659_v9, %v7488_v60 }
 0x513   : > { %v1916_v31 = vpack.c.bf16 %v1912_v45, %v9448_v61  ;;  %v6948_v45 = vld [vmem:[%s11526_s5 + $0x20] sm:$0xff] }
 0x514   : > { %v7507_v1 = vpop.permute.xlu1 %7506  ;;  %v9906_v55 = vpop.permute.xlu2 %7541  ;;  %3334 = vmatpush.bf16.msrb.mxu2 %v6948_v45 }
 0x515   : > { %v7509_v24 = vunpack.i.h.bf16 %v7507_v1  ;;  %v9908_v5 = vpop.permute.xlu0 %7481  ;;  %2227 = vmatmul.bf16.vlgmr.msra.gmra.mxu2 %v1916_v31  ;;  %v3788_v31 = vsel %vm1008_vm1, %v9662_v49, %v7514_v63  ;;  %v7508_v60 = vunpack.i.l.bf16 %v7507_v1 }
 0x516   : > { %v7483_v26 = vunpack.i.l.bf16 %v9908_v5 }
 0x517   : > { %v3795_v61 = vsel %vm1478_vm9, %v3787_v42, %v7509_v24  ;;  %v7543_v42 = vunpack.i.l.bf16 %v9906_v55 }
 0x518   : > { %v2675_v12 = vsel %vm1505_vm12, %v2667_v53, %v7483_v26  ;;  %v3803_v7 = vsel %vm1487_vm10, %v3795_v61, %v7528_v33  ;;  %3335 = vmatpush.bf16.msrb.mxu2 %v6947_v19 }
 0x519   : > { %v2683_v25 = vsel %vm638_vm0, %v2675_v12, %v7493_v40  ;;  %v6946_v12 = vld [vmem:[%s11526_s5 + $0x10] sm:$0xff] }
 0x51a   : > { %v9921_v10 = vsel %vm1522_vm13, %v2683_v25, %v7498_v11 }
 0x51b   : > { %v2712_v15 = vpack.c.bf16 %v9921_v10, %v9549_v21 }
 0x51c   : > { %v7522_v33 = vpop.permute.xlu1 %7521  ;;  %v9931_v9 = vpop.permute.xlu2 %7556  ;;  %3336 = vmatpush.bf16.msrb.mxu2 %v6946_v12 }
 0x51d   : > { %v7524_v24 = vunpack.i.h.bf16 %v7522_v33  ;;  %v7558_v26 = vunpack.i.l.bf16 %v9931_v9  ;;  %v9934_v40 = vpop.permute.xlu0 %7501  ;;  %2894 = vmatmul.bf16.gmra.mxu1 %v2712_v15  ;;  %v7523_v45 = vunpack.i.l.bf16 %v7522_v33 }
 0x51e   : > { %v7504_v21 = vunpack.i.h.bf16 %v9934_v40 }
 0x51f   : > { %v3811_v61 = vsel %vm1496_vm11, %v3803_v7, %v7524_v24  ;;  %v9939_v53 = vsel %vm1478_vm9, %v3788_v31, %v7558_v26  ;;  %v6945_v7 = vld [vmem:[%s11526_s5 + $0x8] sm:$0xff]  ;;  %v6944_v24 = vld [vmem:[%s11526_s5] sm:$0xff] }
 0x520   : > { %v3786_v11 = vsel %vm1008_vm1, %v9658_v29, %v7504_v21  ;;  %v3819_v63 = vsel %vm1505_vm12, %v3811_v61, %v7543_v42  ;;  %3337 = vmatpush.bf16.msrb.mxu2 %v6945_v7 }
 0x521   : > { %v3794_v1 = vsel %vm1478_vm9, %v3786_v11, %v7508_v60 }
 0x524   : > { %v7537_v25 = vpop.permute.xlu1 %7536  ;;  %3338 = vmatpush.bf16.msrb.mxu2 %v6944_v24 }
 0x525   : > { %v7539_v15 = vunpack.i.h.bf16 %v7537_v25  ;;  %v9951_v19 = vpop.permute.xlu0 %7516  ;;  %v7538_v33 = vunpack.i.l.bf16 %v7537_v25 }
 0x526   : > { %v7519_v31 = vunpack.i.h.bf16 %v9951_v19 }
 0x527   : > { %v3827_v42 = vsel %vm638_vm0, %v3819_v63, %v7539_v15  ;;  %v7572_v15 = vpop.permute.xlu2 %7571 }
 0x528   : > { %v3802_v60 = vsel %vm1487_vm10, %v3794_v1, %v7519_v31  ;;  %v7573_v18 = vunpack.i.l.bf16 %v7572_v15  ;;  %v7574_v58 = vunpack.i.h.bf16 %v7572_v15 }
 0x529   : > { %v3810_v26 = vsel %vm1496_vm11, %v3802_v60, %v7523_v45 }
 0x52c   : > { %v9960_v21 = vpop.permute.xlu1 %7551 }
 0x52d   : > { %v7553_v61 = vunpack.i.l.bf16 %v9960_v21  ;;  %v9963_v11 = vpop.permute.xlu0 %7531 }
 0x52e   : > { %v7534_v12 = vunpack.i.h.bf16 %v9963_v11 }
 0x52f   : > { %v9967_v63 = vsel %vm1522_vm13, %v3827_v42, %v7553_v61  ;;  %v7469_v42 = vunpack.i.h.bf16 %v9866_v38 }
 0x530   : > { %v3818_v1 = vsel %vm1505_vm12, %v3810_v26, %v7534_v12  ;;  %v9985_v12 = vpop.permute.xlu2 %7586 }
 0x531   : > { %v3826_v7 = vsel %vm638_vm0, %v3818_v1, %v7538_v33  ;;  %v2644_v26 = vsel %vm1008_vm1, %v9473_v44, %v7469_v42  ;;  %v7474_v33 = vunpack.i.h.bf16 %v9876_v39  ;;  %v7588_v28 = vunpack.i.l.bf16 %v9985_v12 }
 0x534   : > { %v9979_v24 = vpop.permute.xlu1 %7566 }
 0x535   : > { %v9971_v31 = vpop.permute.xlu0 %7546  ;;  %v7568_v42 = vunpack.i.l.bf16 %v9979_v24 }
 0x536   : > { %v7549_v45 = vunpack.i.h.bf16 %v9971_v31 }
 0x538   : > { %v9975_v25 = vsel %vm1522_vm13, %v3826_v7, %v7549_v45  ;;  %v7484_v45 = vunpack.i.h.bf16 %v9908_v5 }
 0x53c   : > { %v7582_v22 = vpop.permute.xlu1 %7581 }
 0x53d   : > { %v7562_v61 = vpop.permute.xlu0 %7561 }
 0x53e   : > { %v7563_v62 = vunpack.i.l.bf16 %v7562_v61  ;;  %v7564_v1 = vunpack.i.h.bf16 %v7562_v61 }
 0x540   : > { %v2652_v7 = vsel %vm1478_vm9, %v2644_v26, %v7563_v62  ;;  %v3046_v39 = vsel %vm1478_vm9, %v9785_v30, %v7564_v1  ;;  %v7584_v1 = vunpack.i.h.bf16 %v7582_v22 }
 0x541   : > { %v2660_v60 = vsel %vm1487_vm10, %v2652_v7, %v7474_v33  ;;  %v3048_v33 = vsel %vm1496_vm11, %v3046_v39, %v7574_v58  ;;  %v7583_v7 = vunpack.i.l.bf16 %v7582_v22  ;;  %v7529_v58 = vunpack.i.h.bf16 %v9883_v3 }
 0x542   : > { %v2668_v38 = vsel %vm1496_vm11, %v2660_v60, %v7573_v18  ;;  %v3047_v60 = vsel %vm1478_vm9, %v9782_v47, %v7568_v42  ;;  %v2189_v22 = vadd.f32 %v9562_v4, %v9557_v8 }
 0x543   : > { %v2676_v61 = vsel %vm1505_vm12, %v2668_v38, %v7484_v45 }
 0x544   : > { %v2684_v62 = vsel %vm638_vm0, %v2676_v61, %v7588_v28  ;;  %v3050_v28 = vsel %vm638_vm0, %v3048_v33, %v7583_v7 }
 0x545   : > { %v9998_v5 = vpop.permute.xlu0 %7576  ;;  %v2692_v26 = vsel %vm1522_vm13, %v2684_v62, %v7499_v23  ;;  %v10012_v23 = vsel %vm1487_vm10, %v9939_v53, %v7529_v58 }
 0x546   : > { %v7578_v18 = vunpack.i.l.bf16 %v9998_v5  ;;  %v2713_v34 = vpack.c.bf16 %v2692_v26, %v9921_v10  ;;  %v2866_v10 = vpop.f32.mrf.mxu3  ;;  %v2203_v26 = vadd.f32 %v9610_v51, %v2189_v22  ;;  %v11613_v22 = vrot.slane %v9658_v29, 4 }
 0x547   : > { %v2867_v42 = vadd.f32 %v9639_v2, %v2866_v10 }
 0x548   : > { %v3049_v15 = vsel %vm1496_vm11, %v3047_v60, %v7578_v18  ;;  %2870 = vmatmul.bf16.gmra.mxu3 %v2713_v34  ;;  %v2217_v53 = vadd.f32 %v9619_v13, %v2203_v26  ;;  %v3650_v13 = vrot.slane %v9696_v32, 6  ;;  %v11615_v26 = vrot.slane %v9658_v29, 2 }
 0x549   : > { %v3051_v45 = vsel %vm638_vm0, %v3049_v15, %v7584_v1  ;;  %v3572_v15 = vrot.slane %v9696_v32, 4 }
 0x54a   : > { %v3067_v38 = vpack.c.bf16 %v3051_v45, %v3050_v28 }
 0x54c   : > { %3339 = vmatmul.bf16.vlgmr.msrb.gmra.mxu2 %v3067_v38  ;;  %v3494_v38 = vrot.slane %v9696_v32, 2 }
 0x54e   : > { %v2868_v34 = vpop.f32.mrf.mxu3 }
 0x54f   : > { %v2869_v8 = vadd.f32 %v9639_v2, %v2868_v34 }
 0x598   : > { %v2228_v39 = vpop.f32.mrf.mxu2 }
 0x599   : > { %v2229_v61 = vadd.f32 %v2228_v39, %v9572_v48 }
 0x59a   : > { %v2895_v62 = vpop.f32.mrf.mxu1 }
 0x59b   : > { %v2233_v33 = vmax.f32 %v2229_v61, 0.0  ;;  %v2896_v18 = vadd.f32 %v2895_v62, %v2867_v42  ;;  %v3574_v42 = vsel %vm1253_vm5, %v3572_v15, %v11613_v22  ;;  %v11614_v61 = vrot.slane %v9658_v29, 6 }
 0x59c   : > { %v11616_v29 = vrot.slane %v9782_v47, 6 }
 0x59d   : > { %2235 = vst.msk [vmem:[#allocation4] sm:$0xff] %vm1496_vm11, %v2233_v33  ;;  %v2909_v3 = vmax.f32 %v2896_v18, 0.0  ;;  %v3652_v62 = vsel %vm1333_vm7, %v3650_v13, %v11614_v61  ;;  %v3496_v33 = vsel %vm1173_vm6, %v3494_v38, %v11615_v26  ;;  %v3579_v61 = vrot.slane %v9564_v57, 4 }
 0x59f   : > { %2917 = vst.msk [vmem:[#allocation3 + $0x20] sm:$0xff] %vm1478_vm9, %v2909_v3 }
 0x5a0   : > { %v2230_v60 = vpop.f32.mrf.mxu2 }
 0x5a1   : > { %v2231_v4 = vadd.f32 %v2230_v60, %v2217_v53 }
 0x5a2   : > { %v2897_v1 = vpop.f32.mrf.mxu1 }
 0x5a3   : > { %v2234_v48 = vmax.f32 %v2231_v4, 0.0  ;;  %v2898_v7 = vadd.f32 %v2897_v1, %v2869_v8  ;;  %v3415_v4 = vld [vmem:[#allocation2 + $0x180] ss:$2 sm:$0xff]  ;;  %v3433_v1 = vld [vmem:[#allocation2 + $0x181] ss:$2 sm:$0xff] }
 0x5a4   : > { %v10069_v22 = vmax.f32 %v3415_v4, %v3433_v1 }
 0x5a5   : > { %2237 = vst.msk [vmem:[#allocation4 + $0x8] sm:$0x1f] %vm2236_vm14, %v2234_v48  ;;  %v2910_v51 = vmax.f32 %v2898_v7, 0.0 }
 0x5a7   : > { %2918 = vst.msk [vmem:[#allocation3 + $0x28] sm:$0xff] %vm1478_vm9, %v2910_v51  ;;  %v11617_v51 = vrot.slane %v9782_v47, 7 }
 0x5ae   : > { %v2923_v28 = vld [vmem:[#allocation3 + $0x20] ss:$2 sm:$0xff]  ;;  %v2927_v45 = vld [vmem:[#allocation3 + $0x21] ss:$2 sm:$0xff] }
 0x5af   : > { %v10028_v58 = vmax.f32 %v2923_v28, %v2927_v45  ;;  %v11618_v45 = vrot.slane %v9782_v47, 5 }
 0x5b1   : > { %v3011_v2 = vrot.slane %v10028_v58, 2  ;;  %v3019_v10 = vrot.slane %v10028_v58, 3  ;;  %v3003_v39 = vrot.slane %v10028_v58, 1  ;;  %v2984_v53 = vrot.slane %v10028_v58, 6 }
 0x5b2   : > { %v2995_v60 = vrot.slane %v10028_v58, 7  ;;  %v2973_v8 = vrot.slane %v10028_v58, 5 }
 0x5b3   : > { %v7595_v18 = vpack.i.bf16 %v3574_v42, %v3011_v2  ;;  %v7600_v3 = vpack.i.bf16 %v3652_v62, %v3019_v10  ;;  %v7590_v34 = vpack.i.bf16 %v3496_v33, %v3003_v39  ;;  %v2985_v48 = vsel %vm1333_vm7, %v11616_v29, %v2984_v53 }
 0x5b4   : > { %v3012_v7 = vsel %vm1173_vm6, %v9814_v35, %v3011_v2  ;;  %v2996_v15 = vsel %vm1373_vm8, %v11617_v51, %v2995_v60  ;;  %v3020_v28 = vsel %vm1213_vm3, %v9811_v6, %v3019_v10  ;;  %v2974_v13 = vsel %vm1293_vm2, %v11618_v45, %v2973_v8 }
 0x5b5   : > { %7596 = vrot.lane.b32.xlu1 %v7595_v18, %s11606_s25  ;;  %7601 = vrot.lane.b32.xlu2 %v7600_v3, %s11605_s16  ;;  %v3004_v38 = vsel %vm1133_vm4, %v9804_v46, %v3003_v39  ;;  %v7615_v35 = vpack.i.bf16 %v3012_v7, %v2985_v48  ;;  %v7625_v2 = vpack.i.bf16 %v3020_v28, %v2996_v15  ;;  %v2581_v6 = vrot.slane %v9567_v54, 1 }
 0x5b6   : > { %7591 = vrot.lane.b32.xlu0 %v7590_v34, %s11607_s27  ;;  %v7605_v42 = vpack.i.bf16 %v3004_v38, %v2974_v13  ;;  %v3464_v10 = vrot.slane %v9569_v43, 1  ;;  %v3581_v62 = vrot.slane %v9569_v43, 4  ;;  %v3466_v46 = vrot.slane %v10069_v22, 1 }
 0x5b7   : > { %v11619_v39 = vrot.slane %v9662_v49, 4  ;;  %v2582_v3 = vsel %vm1133_vm4, %v9494_v36, %v2581_v6  ;;  %v11620_v34 = vrot.slane %v9564_v57, 1  ;;  %v2589_v7 = vrot.slane %v9567_v54, 2 }
 0x5b8   : > { %v3582_v33 = vsel %vm1253_vm5, %v3579_v61, %v3581_v62  ;;  %v3467_v18 = vsel %vm1133_vm4, %v3464_v10, %v3466_v46  ;;  %v3657_v51 = vrot.slane %v9564_v57, 6  ;;  %v3659_v15 = vrot.slane %v9569_v43, 6 }
 0x5b9   : > { %v3580_v26 = vsel %vm1253_vm5, %v11619_v39, %v3579_v61  ;;  %v3465_v4 = vsel %vm1133_vm4, %v11620_v34, %v3464_v10  ;;  %v7630_v29 = vpack.i.bf16 %v3467_v18, %v2581_v6  ;;  %v2590_v36 = vsel %vm1173_vm6, %v9656_v56, %v2589_v7 }
 0x5ba   : > { %v7620_v1 = vpack.i.bf16 %v3582_v33, %v3580_v26  ;;  %v7610_v48 = vpack.i.bf16 %v2582_v3, %v3465_v4  ;;  %v11621_v28 = vrot.slane %v9662_v49, 6  ;;  %v3660_v13 = vsel %vm1333_vm7, %v3657_v51, %v3659_v15 }
 0x5bb   : > { %v7640_v38 = vpack.i.bf16 %v2589_v7, %v2590_v36  ;;  %v3544_v56 = vrot.slane %v10069_v22, 3  ;;  %v11623_v61 = vrot.slane %v9569_v43, 3  ;;  %v11624_v39 = vrot.slane %v9567_v54, 3  ;;  %v6967_v36 = vld [vmem:[%s11526_s5 + $0xb8] sm:$0xff] }
 0x5bc   : > { %v3658_v45 = vsel %vm1333_vm7, %v11621_v28, %v3657_v51  ;;  %v2621_v33 = vrot.slane %v9567_v54, 6  ;;  %v3622_v18 = vrot.slane %v10069_v22, 5  ;;  %v11626_v34 = vrot.slane %v9569_v43, 5  ;;  %3359 = vmatpush.bf16.msra.mxu3 %v6967_v36 }
 0x5bd   : > { %7616 = vrot.lane.b32.xlu1 %v7615_v35, %s11606_s25  ;;  %7626 = vrot.lane.b32.xlu2 %v7625_v2, %s11605_s16  ;;  %v7645_v35 = vpack.i.bf16 %v3660_v13, %v3658_v45  ;;  %v2605_v2 = vrot.slane %v9567_v54, 4  ;;  %v3545_v6 = vsel %vm1213_vm3, %v11623_v61, %v3544_v56  ;;  %v11628_v7 = vpack.i.bf16 %v9625_v16, %v9632_v17  ;;  %v4573_v61 = vld [vmem:[#allocation2 + $0x1d1] ss:$2 sm:$0xff] }
 0x5be   : > { %7606 = vrot.lane.b32.xlu0 %v7605_v42, %s11607_s27  ;;  %v11622_v42 = vpack.i.bf16 %v9586_v14, %v9593_v20  ;;  %v7650_v26 = vpack.i.bf16 %v3545_v6, %v11624_v39  ;;  %v11625_v14 = vpack.i.bf16 %v9601_v59, %v9608_v50  ;;  %v3417_v20 = vld [vmem:[#allocation2 + $0x190] ss:$2 sm:$0xff]  ;;  %v2622_v3 = vsel %vm1333_vm7, %v9650_v41, %v2621_v33 }
 0x5bf   : > { %v2606_v49 = vsel %vm1253_vm5, %v9653_v27, %v2605_v2  ;;  %v3435_v27 = vld [vmem:[#allocation2 + $0x191] ss:$2 sm:$0xff]  ;;  %v3623_v4 = vsel %vm1293_vm2, %v11626_v34, %v3622_v18  ;;  %v7675_v59 = vpack.i.bf16 %v2621_v33, %v2622_v3  ;;  %v11627_v50 = vrot.slane %v9567_v54, 5  ;;  %v4571_v3 = vld [vmem:[#allocation2 + $0x1c1] ss:$2 sm:$0xff] }
 0x5c0   : > { %v7660_v10 = vpack.i.bf16 %v2605_v2, %v2606_v49  ;;  %v3700_v28 = vrot.slane %v10069_v22, 7  ;;  %v11629_v45 = vrot.slane %v9569_v43, 2  ;;  %v4555_v49 = vld [vmem:[#allocation2 + $0x1d0] ss:$2 sm:$0xff]  ;;  %v11631_v6 = vrot.slane %v9567_v54, 7 }
 0x5c1   : > { %v3661_v39 = vrot.slane %v10069_v22, 6  ;;  %v10184_v34 = vmax.f32 %v4555_v49, %v4573_v61  ;;  %v6957_v61 = vld [vmem:[%s11526_s5 + $0x68] sm:$0xff] }
 0x5c5   : > { %7621 = vrot.lane.b32.xlu1 %v7620_v1, %s11606_s25  ;;  %7631 = vrot.lane.b32.xlu2 %v7630_v29, %s11604_s24  ;;  %v10133_v1 = vmax.f32 %v3417_v20, %v3435_v27  ;;  %v7665_v29 = vpack.i.bf16 %v3623_v4, %v11627_v50  ;;  %v6966_v20 = vld [vmem:[%s11526_s5 + $0xb0] sm:$0xff]  ;;  %v4553_v27 = vld [vmem:[#allocation2 + $0x1c0] ss:$2 sm:$0xff]  ;;  %v3662_v50 = vsel %vm1333_vm7, %v3659_v15, %v3661_v39  ;;  %v4606_v15 = vrot.slane %v10184_v34, 1 }
 0x5c6   : > { %7611 = vrot.lane.b32.xlu0 %v7610_v48, %s11604_s24  ;;  %v3505_v48 = vrot.slane %v10069_v22, 2  ;;  %3360 = vmatpush.bf16.msra.mxu3 %v6966_v20  ;;  %v10199_v36 = vmax.f32 %v4553_v27, %v4571_v3  ;;  %v4569_v20 = vld [vmem:[#allocation2 + $0x1b1] ss:$2 sm:$0xff]  ;;  %v4723_v3 = vrot.slane %v10184_v34, 4 }
 0x5c7   : > { %v10145_v41 = vrot.slane %v10133_v1, 2  ;;  %v10148_v51 = vrot.slane %v10133_v1, 1  ;;  %v10176_v33 = vrot.slane %v10133_v1, 6  ;;  %v10187_v4 = vrot.slane %v10133_v1, 4 }
 0x5c8   : > { %v3506_v16 = vsel %vm1173_vm6, %v11629_v45, %v3505_v48 }
 0x5c9   : > { %v3508_v17 = vsel %vm1173_vm6, %v3505_v48, %v10145_v41  ;;  %v3469_v13 = vsel %vm1133_vm4, %v3466_v46, %v10148_v51  ;;  %v3583_v46 = vrot.slane %v10069_v22, 4 }
 0x5ca   : > { %v7685_v2 = vpack.i.bf16 %v3508_v17, %v3506_v16  ;;  %v4608_v17 = vrot.slane %v8776_v37, 1 }
 0x5cb   : > { %v3584_v48 = vsel %vm1253_vm5, %v3581_v62, %v3583_v46  ;;  %v10208_v62 = vrot.slane %v10133_v1, 7 }
 0x5cc   : > { %v4609_v49 = vsel %vm1133_vm4, %v4606_v15, %v4608_v17 }
 0x5cd   : > { %7641 = vrot.lane.b32.xlu1 %v7640_v38, %s11607_s27  ;;  %7646 = vrot.lane.b32.xlu2 %v7645_v35, %s11605_s16  ;;  %v11630_v38 = vrot.slane %v9569_v43, 7 }
 0x5ce   : > { %7636 = vrot.lane.b32.xlu0 %v11622_v42, %s11603_s23  ;;  %v7690_v42 = vpack.i.bf16 %v10148_v51, %v3469_v13  ;;  %v4604_v13 = vrot.slane %v10199_v36, 1 }
 0x5cf   : > { %v3701_v35 = vsel %vm1373_vm8, %v11630_v38, %v3700_v28  ;;  %v6958_v38 = vld [vmem:[%s11526_s5 + $0x70] sm:$0xff] }
 0x5d5   : > { %7656 = vrot.lane.b32.xlu1 %v11625_v14, %s11602_s22  ;;  %7661 = vrot.lane.b32.xlu2 %v7660_v10, %s11606_s25  ;;  %v7680_v10 = vpack.i.bf16 %v3701_v35, %v11631_v6  ;;  %v6959_v14 = vld [vmem:[%s11526_s5 + $0x78] sm:$0xff]  ;;  %v10215_v35 = vrot.slane %v10133_v1, 5  ;;  %v6965_v6 = vld [vmem:[%s11526_s5 + $0xa8] sm:$0xff] }
 0x5d6   : > { %7651 = vrot.lane.b32.xlu0 %v7650_v26, %s11603_s23  ;;  %v10173_v26 = vrot.slane %v10133_v1, 3  ;;  %3345 = vmatpush.bf16.msra.mxu2 %v6959_v14  ;;  %v4551_v14 = vld [vmem:[#allocation2 + $0x1b0] ss:$2 sm:$0xff] }
 0x5d7   : > { %3361 = vmatpush.bf16.msra.mxu3 %v6965_v6 }
 0x5da   : > { %3346 = vmatpush.bf16.msra.mxu2 %v6958_v38 }
 0x5dd   : > { %7671 = vrot.lane.b32.xlu1 %v11628_v7, %s11601_s28  ;;  %7676 = vrot.lane.b32.xlu2 %v7675_v59, %s11605_s16  ;;  %v3547_v59 = vsel %vm1213_vm3, %v3544_v56, %v10173_v26  ;;  %v3586_v7 = vsel %vm1253_vm5, %v3583_v46, %v10187_v4  ;;  %v4684_v46 = vrot.slane %v10184_v34, 3 }
 0x5de   : > { %7666 = vrot.lane.b32.xlu0 %v7665_v29, %s11602_s22  ;;  %v3664_v29 = vsel %vm1333_vm7, %v3661_v39, %v10176_v33  ;;  %v7700_v45 = vpack.i.bf16 %v10173_v26, %v3547_v59  ;;  %v7695_v56 = vpack.i.bf16 %v3586_v7, %v3584_v48  ;;  %3347 = vmatpush.bf16.msra.mxu2 %v6957_v61  ;;  %v4682_v59 = vrot.slane %v10199_v36, 3  ;;  %v6964_v48 = vld [vmem:[%s11526_s5 + $0xa0] sm:$0xff]  ;;  %v6963_v61 = vld [vmem:[%s11526_s5 + $0x98] sm:$0xff] }
 0x5df   : > { %v7705_v16 = vpack.i.bf16 %v3664_v29, %v3662_v50  ;;  %v4721_v50 = vrot.slane %v10199_v36, 4  ;;  %v6956_v29 = vld [vmem:[%s11526_s5 + $0x60] sm:$0xff]  ;;  %v10249_v7 = vmax.f32 %v4551_v14, %v4569_v20  ;;  %3362 = vmatpush.bf16.msra.mxu3 %v6964_v48  ;;  %v4762_v20 = vrot.slane %v10184_v34, 5  ;;  %v6954_v48 = vld [vmem:[%s11526_s5 + $0x50] sm:$0xff] }
 0x5e1   : > { %v4724_v38 = vsel %vm1253_vm5, %v4721_v50, %v4723_v3 }
 0x5e2   : > { %3348 = vmatpush.bf16.msra.mxu2 %v6956_v29  ;;  %v4603_v29 = vrot.slane %v10249_v7, 1 }
 0x5e3   : > { %3363 = vmatpush.bf16.msra.mxu3 %v6963_v61 }
 0x5e5   : > { %7686 = vrot.lane.b32.xlu1 %v7685_v2, %s11607_s27  ;;  %7691 = vrot.lane.b32.xlu2 %v7690_v42, %s11604_s24  ;;  %v3703_v2 = vsel %vm1373_vm8, %v3700_v28, %v10208_v62  ;;  %v4607_v42 = vsel %vm1133_vm4, %v4604_v13, %v4606_v15  ;;  %v3625_v28 = vsel %vm1293_vm2, %v3622_v18, %v10215_v35  ;;  %v4645_v18 = vrot.slane %v10184_v34, 2 }
 0x5e6   : > { %7681 = vrot.lane.b32.xlu0 %v7680_v10, %s11601_s28  ;;  %v7715_v10 = vpack.i.bf16 %v10208_v62, %v3703_v2  ;;  %v7720_v39 = vpack.i.bf16 %v4609_v49, %v4607_v42  ;;  %v7710_v27 = vpack.i.bf16 %v10215_v35, %v3625_v28  ;;  %v11633_v2 = vrot.slane %v8776_v37, 4  ;;  %v6955_v49 = vld [vmem:[%s11526_s5 + $0x58] sm:$0xff] }
 0x5e7   : > { %v11634_v28 = vrot.slane %v8776_v37, 2  ;;  %3349 = vmatpush.bf16.msra.mxu2 %v6955_v49 }
 0x5e8   : > { %v4726_v42 = vsel %vm1253_vm5, %v4723_v3, %v11633_v2  ;;  %v3729_v3 = vrot.slane %v8774_v52, 1  ;;  %v11636_v2 = vrot.slane %v8776_v37, 5 }
 0x5ea   : > { %v3730_v61 = vsel %vm1133_vm4, %v10148_v51, %v3729_v3  ;;  %v6952_v51 = vld [vmem:[%s11526_s5 + $0x40] sm:$0xff] }
 0x5eb   : > { %3350 = vmatpush.bf16.msra.mxu2 %v6954_v48  ;;  %v11637_v48 = vrot.slane %v8774_v52, 3 }
 0x5ed   : > { %7701 = vrot.lane.b32.xlu1 %v7700_v45, %s11603_s23  ;;  %7706 = vrot.lane.b32.xlu2 %v7705_v16, %s11605_s16  ;;  %v4685_v45 = vsel %vm1213_vm3, %v4682_v59, %v4684_v46  ;;  %v4643_v16 = vrot.slane %v10199_v36, 2 }
 0x5ee   : > { %7696 = vrot.lane.b32.xlu0 %v7695_v56, %s11606_s25  ;;  %v11632_v56 = vrot.slane %v8776_v37, 3 }
 0x5ef   : > { %v4646_v6 = vsel %vm1173_vm6, %v4643_v16, %v4645_v18 }
 0x5f0   : > { %v4687_v15 = vsel %vm1213_vm3, %v4684_v46, %v11632_v56  ;;  %v7735_v46 = vpack.i.bf16 %v4726_v42, %v4724_v38  ;;  %v11635_v56 = vrot.slane %v8774_v52, 2  ;;  %v4765_v42 = vsel %vm1293_vm2, %v4762_v20, %v11636_v2 }
 0x5f1   : > { %v11638_v2 = vrot.slane %v8776_v37, 7 }
 0x5f5   : > { %7716 = vrot.lane.b32.xlu1 %v7715_v10, %s11601_s28  ;;  %7721 = vrot.lane.b32.xlu2 %v7720_v39, %s11604_s24  ;;  %v4648_v10 = vsel %vm1173_vm6, %v4645_v18, %v11634_v28  ;;  %v7730_v39 = vpack.i.bf16 %v4687_v15, %v4685_v45  ;;  %v4760_v18 = vrot.slane %v10199_v36, 5  ;;  %v6962_v45 = vld [vmem:[%s11526_s5 + $0x90] sm:$0xff]  ;;  %v3738_v15 = vsel %vm1173_vm6, %v10145_v41, %v11635_v56  ;;  %v6953_v28 = vld [vmem:[%s11526_s5 + $0x48] sm:$0xff] }
 0x5f6   : > { %7711 = vrot.lane.b32.xlu0 %v7710_v27, %s11602_s22  ;;  %v7725_v14 = vpack.i.bf16 %v4648_v10, %v4646_v6  ;;  %v4642_v27 = vrot.slane %v10249_v7, 2  ;;  %3364 = vmatpush.bf16.msra.mxu3 %v6962_v45  ;;  %v4605_v6 = vsel %vm1133_vm4, %v4603_v29, %v4604_v13  ;;  %v6961_v10 = vld [vmem:[%s11526_s5 + $0x88] sm:$0xff]  ;;  %v6960_v13 = vld [vmem:[%s11526_s5 + $0x80] sm:$0xff]  ;;  %v4838_v29 = vrot.slane %v10199_v36, 7 }
 0x5f7   : > { %v4763_v38 = vsel %vm1293_vm2, %v4760_v18, %v4762_v20  ;;  %v4840_v20 = vrot.slane %v10184_v34, 7  ;;  %3351 = vmatpush.bf16.msra.mxu2 %v6953_v28  ;;  %v3746_v45 = vsel %vm1213_vm3, %v10173_v26, %v11637_v48  ;;  %v4799_v56 = vrot.slane %v10199_v36, 6 }
 0x5f8   : > { %v4644_v49 = vsel %vm1173_vm6, %v4642_v27, %v4643_v16  ;;  %v7740_v16 = vpack.i.bf16 %v3730_v61, %v4605_v6  ;;  %v4801_v27 = vrot.slane %v10184_v34, 6  ;;  %v11639_v61 = vrot.slane %v8776_v37, 6 }
 0x5fa   : > { %3365 = vmatpush.bf16.msra.mxu3 %v6961_v10  ;;  %v4804_v6 = vsel %vm1333_vm7, %v4801_v27, %v11639_v61 }
 0x5fb   : > { %3352 = vmatpush.bf16.msra.mxu2 %v6952_v51  ;;  %v6990_v51 = vld [vmem:[%s11524_s3 + $0x70] sm:$0xff] }
 0x5fd   : > { %7731 = vrot.lane.b32.xlu1 %v7730_v39, %s11603_s23  ;;  %7736 = vrot.lane.b32.xlu2 %v7735_v46, %s11606_s25  ;;  %v7745_v39 = vpack.i.bf16 %v4765_v42, %v4763_v38  ;;  %v7750_v46 = vpack.i.bf16 %v3738_v15, %v4644_v49  ;;  %v4841_v38 = vsel %vm1373_vm8, %v4838_v29, %v4840_v20 }
 0x5fe   : > { %7726 = vrot.lane.b32.xlu0 %v7725_v14, %s11607_s27  ;;  %v4681_v14 = vrot.slane %v10249_v7, 3  ;;  %v4843_v42 = vsel %vm1373_vm8, %v4840_v20, %v11638_v2  ;;  %3366 = vmatpush.bf16.msra.mxu3 %v6960_v13  ;;  %v4802_v49 = vsel %vm1333_vm7, %v4799_v56, %v4801_v27  ;;  %v6982_v20 = vld [vmem:[%s11524_s3 + $0x30] sm:$0xff]  ;;  %v11640_v27 = vrot.slane %v8774_v52, 5 }
 0x5ff   : > { %v7765_v26 = vpack.i.bf16 %v4843_v42, %v4841_v38  ;;  %v7755_v10 = vpack.i.bf16 %v4804_v6, %v4802_v49  ;;  %v11642_v42 = vrot.slane %v8774_v52, 4 }
 0x600   : > { %v4683_v15 = vsel %vm1213_vm3, %v4681_v14, %v4682_v59  ;;  %v4798_v59 = vrot.slane %v10249_v7, 6  ;;  %v6991_v14 = vld [vmem:[%s11524_s3 + $0x78] sm:$0xff]  ;;  %v3762_v48 = vsel %vm1293_vm2, %v10215_v35, %v11640_v27 }
 0x601   : > { %v7760_v28 = vpack.i.bf16 %v3746_v45, %v4683_v15  ;;  %v11641_v15 = vrot.slane %v8774_v52, 6  ;;  %v3754_v49 = vsel %vm1253_vm5, %v10187_v4, %v11642_v42  ;;  %v6979_v27 = vld [vmem:[%s11524_s3 + $0x18] sm:$0xff]  ;;  %v6976_v42 = vld [vmem:[%s11524_s3] sm:$0xff] }
 0x602   : > { %4024 = vmatpush.bf16.msrb.mxu3 %v6991_v14  ;;  %v4800_v2 = vsel %vm1333_vm7, %v4798_v59, %v4799_v56  ;;  %v6981_v56 = vld [vmem:[%s11524_s3 + $0x28] sm:$0xff] }
 0x603   : > { %v3770_v38 = vsel %vm1333_vm7, %v10176_v33, %v11641_v15 }
 0x604   : > { %v7780_v35 = vpack.i.bf16 %v3770_v38, %v4800_v2  ;;  %v7503_v38 = vunpack.i.l.bf16 %v9934_v40  ;;  %v2964_v40 = vrot.slane %v9782_v47, 4 }
 0x605   : > { %7746 = vrot.lane.b32.xlu1 %v7745_v39, %s11602_s22  ;;  %7751 = vrot.lane.b32.xlu2 %v7750_v46, %s11607_s27  ;;  %v4759_v39 = vrot.slane %v10249_v7, 5  ;;  %v4720_v46 = vrot.slane %v10249_v7, 4 }
 0x606   : > { %7741 = vrot.lane.b32.xlu0 %v7740_v16, %s11604_s24  ;;  %v6983_v16 = vld [vmem:[%s11524_s3 + $0x38] sm:$0xff]  ;;  %4025 = vmatpush.bf16.msrb.mxu3 %v6990_v51 }
 0x607   : > { %3995 = vmatpush.bf16.msrb.mxu2 %v6983_v16  ;;  %v4761_v45 = vsel %vm1293_vm2, %v4759_v39, %v4760_v18  ;;  %v4722_v61 = vsel %vm1253_vm5, %v4720_v46, %v4721_v50  ;;  %v4837_v50 = vrot.slane %v10249_v7, 7  ;;  %v6988_v39 = vld [vmem:[%s11524_s3 + $0x60] sm:$0xff]  ;;  %v11643_v46 = vrot.slane %v8774_v52, 7 }
 0x608   : > { %v7775_v6 = vpack.i.bf16 %v3762_v48, %v4761_v45  ;;  %v7770_v18 = vpack.i.bf16 %v3754_v49, %v4722_v61  ;;  %v6985_v45 = vld [vmem:[%s11524_s3 + $0x48] sm:$0xff]  ;;  %v6984_v49 = vld [vmem:[%s11524_s3 + $0x40] sm:$0xff] }
 0x609   : > { %v3778_v16 = vsel %vm1373_vm8, %v10208_v62, %v11643_v46  ;;  %v4839_v14 = vsel %vm1373_vm8, %v4837_v50, %v4838_v29  ;;  %v6978_v62 = vld [vmem:[%s11524_s3 + $0x10] sm:$0xff]  ;;  %v6977_v29 = vld [vmem:[%s11524_s3 + $0x8] sm:$0xff]  ;;  %v2963_v46 = vrot.slane %v9785_v30, 4 }
 0x60a   : > { %v7785_v48 = vpack.i.bf16 %v3778_v16, %v4839_v14 }
 0x60b   : > { %3996 = vmatpush.bf16.msrb.mxu2 %v6982_v20 }
 0x60d   : > { %7761 = vrot.lane.b32.xlu1 %v7760_v28, %s11603_s23  ;;  %7766 = vrot.lane.b32.xlu2 %v7765_v26, %s11601_s28  ;;  %v4610_v28 = vrot.slane %v8779_v0, 1  ;;  %v6989_v26 = vld [vmem:[%s11524_s3 + $0x68] sm:$0xff] }
 0x60e   : > { %7756 = vrot.lane.b32.xlu0 %v7755_v10, %s11605_s16  ;;  %4026 = vmatpush.bf16.msrb.mxu3 %v6989_v26  ;;  %v6980_v10 = vld [vmem:[%s11524_s3 + $0x20] sm:$0xff] }
 0x60f   : > { %v10351_v13 = vpop.permute.xlu2 %7601  ;;  %3997 = vmatpush.bf16.msrb.mxu2 %v6981_v56  ;;  %v4611_v59 = vsel %vm1133_vm4, %v4608_v17, %v4610_v28  ;;  %v6987_v17 = vld [vmem:[%s11524_s3 + $0x58] sm:$0xff] }
 0x610   : > { %v7790_v51 = vpack.i.bf16 %v4611_v59, %v3729_v3  ;;  %v6986_v3 = vld [vmem:[%s11524_s3 + $0x50] sm:$0xff] }
 0x612   : > { %4027 = vmatpush.bf16.msrb.mxu3 %v6988_v39  ;;  %v7569_v39 = vunpack.i.h.bf16 %v9979_v24  ;;  %v2965_v24 = vsel %vm1253_vm5, %v2963_v46, %v2964_v40 }
 0x613   : > { %3998 = vmatpush.bf16.msrb.mxu2 %v6980_v10  ;;  %v7533_v10 = vunpack.i.l.bf16 %v9963_v11  ;;  %v7548_v11 = vunpack.i.l.bf16 %v9971_v31 }
 0x615   : > { %7776 = vrot.lane.b32.xlu1 %v7775_v6, %s11602_s22  ;;  %7781 = vrot.lane.b32.xlu2 %v7780_v35, %s11605_s16  ;;  %v3785_v35 = vsel %vm1008_vm1, %v9696_v32, %v7503_v38  ;;  %v7579_v32 = vunpack.i.h.bf16 %v9998_v5 }
 0x616   : > { %7771 = vrot.lane.b32.xlu0 %v7770_v18, %s11606_s25  ;;  %4028 = vmatpush.bf16.msrb.mxu3 %v6987_v17  ;;  %v7518_v18 = vunpack.i.l.bf16 %v9951_v19  ;;  %v7604_v19 = vunpack.i.h.bf16 %v10351_v13 }
 0x617   : > { %v10397_v20 = vpop.permute.xlu2 %7626  ;;  %3999 = vmatpush.bf16.msrb.mxu2 %v6979_v27  ;;  %v2966_v27 = vrot.slane %v10028_v58, 4 }
 0x61a   : > { %4029 = vmatpush.bf16.msrb.mxu3 %v6986_v3  ;;  %v3052_v3 = vsel %vm1478_vm9, %v2965_v24, %v7569_v39 }
 0x61b   : > { %4000 = vmatpush.bf16.msrb.mxu2 %v6978_v62  ;;  %v7589_v62 = vunpack.i.h.bf16 %v9985_v12 }
 0x61d   : > { %7791 = vrot.lane.b32.xlu1 %v7790_v51, %s11604_s24 }
 0x61e   : > { %7786 = vrot.lane.b32.xlu0 %v7785_v48, %s11601_s28  ;;  %4030 = vmatpush.bf16.msrb.mxu3 %v6985_v45 }
 0x61f   : > { %v10421_v15 = vpop.permute.xlu2 %7631  ;;  %4001 = vmatpush.bf16.msrb.mxu2 %v6977_v29 }
 0x622   : > { %4031 = vmatpush.bf16.msrb.mxu3 %v6984_v49 }
 0x623   : > { %4002 = vmatpush.bf16.msrb.mxu2 %v6976_v42 }
 0x627   : > { %v7597_v2 = vpop.permute.xlu1 %7596  ;;  %v10442_v51 = vpop.permute.xlu2 %7646 }
 0x628   : > { %v7592_v61 = vpop.permute.xlu0 %7591  ;;  %v7599_v56 = vunpack.i.h.bf16 %v7597_v2  ;;  %v7598_v14 = vunpack.i.l.bf16 %v7597_v2  ;;  %v3054_v2 = vsel %vm1496_vm11, %v3052_v3, %v7579_v32 }
 0x629   : > { %v7594_v6 = vunpack.i.h.bf16 %v7592_v61  ;;  %v7593_v50 = vunpack.i.l.bf16 %v7592_v61  ;;  %v7603_v61 = vunpack.i.l.bf16 %v10351_v13  ;;  %v3056_v39 = vsel %vm638_vm0, %v3054_v2, %v7589_v62 }
 0x62b   : > { %v3793_v26 = vsel %vm1478_vm9, %v3785_v35, %v7594_v6  ;;  %v3059_v30 = vsel %vm1478_vm9, %v10028_v58, %v7593_v50  ;;  %v2967_v35 = vsel %vm1253_vm5, %v2964_v40, %v2966_v27 }
 0x62c   : > { %v3801_v59 = vsel %vm1487_vm10, %v3793_v26, %v7518_v18  ;;  %v3061_v6 = vsel %vm1496_vm11, %v3059_v30, %v7598_v14  ;;  %v7629_v18 = vunpack.i.h.bf16 %v10397_v20  ;;  %v7554_v30 = vunpack.i.h.bf16 %v9960_v21 }
 0x62d   : > { %v3809_v16 = vsel %vm1496_vm11, %v3801_v59, %v7599_v56  ;;  %v7628_v56 = vunpack.i.l.bf16 %v10397_v20  ;;  %v3063_v46 = vsel %vm638_vm0, %v3061_v6, %v7603_v61 }
 0x62e   : > { %v3817_v17 = vsel %vm1505_vm12, %v3809_v16, %v7533_v10 }
 0x62f   : > { %v7617_v48 = vpop.permute.xlu1 %7616  ;;  %v3825_v5 = vsel %vm638_vm0, %v3817_v17, %v7604_v19  ;;  %v7544_v17 = vunpack.i.h.bf16 %v9906_v55 }
 0x630   : > { %v7619_v29 = vunpack.i.h.bf16 %v7617_v48  ;;  %v7618_v45 = vunpack.i.l.bf16 %v7617_v48  ;;  %v7607_v38 = vpop.permute.xlu0 %7606  ;;  %v3833_v31 = vsel %vm1522_vm13, %v3825_v5, %v7548_v11  ;;  %v7648_v11 = vunpack.i.l.bf16 %v10442_v51 }
 0x631   : > { %v7609_v42 = vunpack.i.h.bf16 %v7607_v38  ;;  %v7608_v49 = vunpack.i.l.bf16 %v7607_v38  ;;  %v3855_v12 = vpack.c.bf16 %v9975_v25, %v3833_v31  ;;  %v11644_v31 = vpack.c.bf16 %v9967_v63, %v9975_v25 }
 0x633   : > { %v3058_v26 = vsel %vm1478_vm9, %v9782_v47, %v7609_v42  ;;  %v3053_v50 = vsel %vm1478_vm9, %v2967_v35, %v7608_v49  ;;  %v7662_v47 = vpop.permute.xlu2 %7661 }
 0x634   : > { %v3060_v10 = vsel %vm1496_vm11, %v3058_v26, %v7619_v29  ;;  %v3055_v13 = vsel %vm1496_vm11, %v3053_v50, %v7618_v45 }
 0x635   : > { %v10470_v59 = vsel %vm638_vm0, %v3055_v13, %v7628_v56  ;;  %v3062_v40 = vsel %vm638_vm0, %v3060_v10, %v7629_v18  ;;  %v7649_v13 = vunpack.i.h.bf16 %v10442_v51 }
 0x636   : > { %v3068_v20 = vpack.c.bf16 %v10470_v59, %v3056_v39  ;;  %v3069_v32 = vpack.c.bf16 %v3063_v46, %v3062_v40 }
 0x637   : > { %v7622_v19 = vpop.permute.xlu1 %7621 }
 0x638   : > { %v7623_v16 = vunpack.i.l.bf16 %v7622_v19  ;;  %v7612_v14 = vpop.permute.xlu0 %7611  ;;  %3353 = vmatmul.bf16.vlgmr.msra.gmra.mxu2 %v3068_v20  ;;  %3367 = vmatmul.bf16.vlgmr.msra.gmra.mxu3 %v3069_v32  ;;  %v7624_v56 = vunpack.i.h.bf16 %v7622_v19 }
 0x639   : > { %v7613_v2 = vunpack.i.l.bf16 %v7612_v14  ;;  %v7614_v6 = vunpack.i.h.bf16 %v7612_v14 }
 0x63a   : > { %v3812_v24 = vsel %vm1496_vm11, %v10012_v23, %v7623_v16  ;;  %v7559_v23 = vunpack.i.h.bf16 %v9931_v9  ;;  %v7633_v9 = vunpack.i.l.bf16 %v10421_v15 }
 0x63b   : > { %v3820_v48 = vsel %vm1505_vm12, %v3812_v24, %v7544_v17  ;;  %v7677_v38 = vpop.permute.xlu2 %7676  ;;  %v3789_v55 = vsel %vm1008_vm1, %v9564_v57, %v7613_v2 }
 0x63c   : > { %v3828_v5 = vsel %vm638_vm0, %v3820_v48, %v7648_v11  ;;  %v3797_v61 = vsel %vm1478_vm9, %v3789_v55, %v7559_v23  ;;  %v2694_v19 = vsel %vm1008_vm1, %v9567_v54, %v7633_v9  ;;  %v7664_v48 = vunpack.i.h.bf16 %v7662_v47 }
 0x63d   : > { %v3836_v62 = vsel %vm1522_vm13, %v3828_v5, %v7554_v30  ;;  %v7663_v5 = vunpack.i.l.bf16 %v7662_v47 }
 0x63e   : > { %v3857_v3 = vpack.c.bf16 %v3836_v62, %v9967_v63 }
 0x63f   : > { %v7642_v29 = vpop.permute.xlu1 %7641 }
 0x640   : > { %v7637_v45 = vpop.permute.xlu0 %7636  ;;  %v7643_v26 = vunpack.i.l.bf16 %v7642_v29  ;;  %v7644_v10 = vunpack.i.h.bf16 %v7642_v29 }
 0x641   : > { %v7638_v42 = vunpack.i.l.bf16 %v7637_v45  ;;  %v7639_v63 = vunpack.i.h.bf16 %v7637_v45 }
 0x643   : > { %v3805_v35 = vsel %vm1487_vm10, %v3797_v61, %v7638_v42  ;;  %v10494_v57 = vpop.permute.xlu2 %7691  ;;  %v7678_v61 = vunpack.i.l.bf16 %v7677_v38 }
 0x644   : > { %v3813_v50 = vsel %vm1496_vm11, %v3805_v35, %v7624_v56 }
 0x647   : > { %v7657_v49 = vpop.permute.xlu1 %7656 }
 0x648   : > { %v10487_v21 = vpop.permute.xlu0 %7651  ;;  %4003 = vmatmul.bf16.vlgmr.msrb.gmra.mxu2 %v3855_v12  ;;  %4032 = vmatmul.bf16.vlgmr.msrb.gmra.mxu3 %v11644_v31  ;;  %v7658_v18 = vunpack.i.l.bf16 %v7657_v49  ;;  %v2693_v12 = vsel %vm1008_vm1, %v9473_v44, %v7614_v6  ;;  %v2696_v44 = vsel %vm1478_vm9, %v2694_v19, %v7644_v10  ;;  %v7659_v11 = vunpack.i.h.bf16 %v7657_v49 }
 0x649   : > { %v2695_v39 = vsel %vm1478_vm9, %v2693_v12, %v7643_v26  ;;  %v7653_v40 = vunpack.i.l.bf16 %v10487_v21  ;;  %v7679_v31 = vunpack.i.h.bf16 %v7677_v38 }
 0x64a   : > { %v3821_v25 = vsel %vm1505_vm12, %v3813_v50, %v7658_v18  ;;  %v2697_v14 = vsel %vm1487_vm10, %v2695_v39, %v7639_v63  ;;  %v7693_v63 = vunpack.i.l.bf16 %v10494_v57 }
 0x64b   : > { %v3829_v16 = vsel %vm638_vm0, %v3821_v25, %v7649_v13  ;;  %v2698_v51 = vsel %vm1487_vm10, %v2696_v44, %v7653_v40  ;;  %v2699_v29 = vsel %vm1496_vm11, %v2697_v14, %v7663_v5  ;;  %v7707_v45 = vpop.permute.xlu2 %7706 }
 0x64c   : > { %v2700_v54 = vsel %vm1496_vm11, %v2698_v51, %v7664_v48  ;;  %v2701_v2 = vsel %vm1505_vm12, %v2699_v29, %v7659_v11  ;;  %v7709_v29 = vunpack.i.h.bf16 %v7707_v45 }
 0x64d   : > { %v2703_v47 = vsel %vm638_vm0, %v2701_v2, %v7678_v61 }
 0x64f   : > { %v7672_v46 = vpop.permute.xlu1 %7671 }
 0x650   : > { %v7673_v20 = vunpack.i.l.bf16 %v7672_v46  ;;  %v7667_v32 = vpop.permute.xlu0 %7666  ;;  %v7674_v55 = vunpack.i.h.bf16 %v7672_v46  ;;  %v7708_v46 = vunpack.i.l.bf16 %v7707_v45 }
 0x651   : > { %v7668_v24 = vunpack.i.l.bf16 %v7667_v32  ;;  %v7669_v13 = vunpack.i.h.bf16 %v7667_v32 }
 0x652   : > { %v3837_v17 = vsel %vm1522_vm13, %v3829_v16, %v7673_v20  ;;  %v2705_v56 = vsel %vm1522_vm13, %v2703_v47, %v7674_v55 }
 0x653   : > { %v3858_v30 = vpack.c.bf16 %v3837_v17, %v3836_v62  ;;  %v2702_v42 = vsel %vm1505_vm12, %v2700_v54, %v7668_v24  ;;  %v7634_v62 = vunpack.i.h.bf16 %v10421_v15  ;;  %v7654_v15 = vunpack.i.h.bf16 %v10487_v21  ;;  %v7722_v12 = vpop.permute.xlu2 %7721 }
 0x654   : > { %v2704_v35 = vsel %vm638_vm0, %v2702_v42, %v7679_v31  ;;  %v3791_v21 = vsel %vm1008_vm1, %v10069_v22, %v7693_v63  ;;  %v7724_v31 = vunpack.i.h.bf16 %v7722_v12 }
 0x655   : > { %v3790_v50 = vsel %vm1008_vm1, %v9569_v43, %v7634_v62 }
 0x657   : > { %v7687_v23 = vpop.permute.xlu1 %7686 }
 0x658   : > { %v7682_v49 = vpop.permute.xlu0 %7681  ;;  %4008 = vmatmul.bf16.gmra.mxu2 %v3857_v3  ;;  %4037 = vmatmul.bf16.gmra.mxu3 %v3858_v30  ;;  %v7688_v18 = vunpack.i.l.bf16 %v7687_v23  ;;  %v7689_v39 = vunpack.i.h.bf16 %v7687_v23 }
 0x659   : > { %v7683_v6 = vunpack.i.l.bf16 %v7682_v49  ;;  %v7684_v19 = vunpack.i.h.bf16 %v7682_v49 }
 0x65a   : > { %v3798_v3 = vsel %vm1478_vm9, %v3790_v50, %v7688_v18  ;;  %v3799_v14 = vsel %vm1478_vm9, %v3791_v21, %v7689_v39  ;;  %v4935_v18 = vsel %vm1008_vm1, %v10184_v34, %v7724_v31 }
 0x65b   : > { %v2706_v26 = vsel %vm1522_vm13, %v2704_v35, %v7683_v6  ;;  %v3806_v40 = vsel %vm1487_vm10, %v3798_v3, %v7654_v15  ;;  %v7737_v54 = vpop.permute.xlu2 %7736 }
 0x65c   : > { %v2714_v9 = vpack.c.bf16 %v2706_v26, %v2705_v56  ;;  %v7739_v26 = vunpack.i.h.bf16 %v7737_v54 }
 0x65e   : > { %2899 = vmatmul.bf16.gmra.mxu1 %v2714_v9  ;;  %v7738_v9 = vunpack.i.l.bf16 %v7737_v54 }
 0x65f   : > { %v10523_v38 = vpop.permute.xlu1 %7701 }
 0x660   : > { %v7697_v10 = vpop.permute.xlu0 %7696  ;;  %v7703_v20 = vunpack.i.l.bf16 %v10523_v38 }
 0x661   : > { %v7698_v25 = vunpack.i.l.bf16 %v7697_v10  ;;  %v7699_v11 = vunpack.i.h.bf16 %v7697_v10 }
 0x662   : > { %v3807_v51 = vsel %vm1487_vm10, %v3799_v14, %v7703_v20 }
 0x663   : > { %v3814_v43 = vsel %vm1496_vm11, %v3806_v40, %v7698_v25  ;;  %v3815_v22 = vsel %vm1496_vm11, %v3807_v51, %v7699_v11  ;;  %v7752_v15 = vpop.permute.xlu2 %7751 }
 0x664   : > { %v3822_v16 = vsel %vm1505_vm12, %v3814_v43, %v7669_v13  ;;  %v7754_v20 = vunpack.i.h.bf16 %v7752_v15  ;;  %v7753_v43 = vunpack.i.l.bf16 %v7752_v15 }
 0x665   : > { %v3830_v44 = vsel %vm638_vm0, %v3822_v16, %v7708_v46 }
 0x666   : > { %v3838_v32 = vsel %vm1522_vm13, %v3830_v44, %v7684_v19 }
 0x667   : > { %v10537_v24 = vpop.permute.xlu1 %7716  ;;  %v3859_v30 = vpack.c.bf16 %v3838_v32, %v3837_v17  ;;  %v7723_v17 = vunpack.i.l.bf16 %v7722_v12 }
 0x668   : > { %v10539_v48 = vpop.permute.xlu0 %7711  ;;  %v7718_v2 = vunpack.i.l.bf16 %v10537_v24 }
 0x669   : > { %v7713_v5 = vunpack.i.l.bf16 %v10539_v48  ;;  %4013 = vmatmul.bf16.gmra.mxu2 %v3859_v30  ;;  %v4934_v56 = vsel %vm1008_vm1, %v10199_v36, %v7723_v17 }
 0x66b   : > { %v3823_v55 = vsel %vm1505_vm12, %v3815_v22, %v7713_v5 }
 0x66c   : > { %v3831_v42 = vsel %vm638_vm0, %v3823_v55, %v7709_v29 }
 0x66d   : > { %v10547_v23 = vsel %vm1522_vm13, %v3831_v42, %v7718_v2 }
 0x66e   : > { %v3860_v61 = vpack.c.bf16 %v10547_v23, %v3838_v32  ;;  %v7767_v32 = vpop.permute.xlu2 %7766 }
 0x66f   : > { %v7732_v49 = vpop.permute.xlu1 %7731  ;;  %v7769_v2 = vunpack.i.h.bf16 %v7767_v32  ;;  %v7768_v55 = vunpack.i.l.bf16 %v7767_v32 }
 0x670   : > { %v7734_v6 = vunpack.i.h.bf16 %v7732_v49  ;;  %v7733_v62 = vunpack.i.l.bf16 %v7732_v49  ;;  %v7727_v45 = vpop.permute.xlu0 %7726  ;;  %4042 = vmatmul.bf16.gmra.mxu3 %v3860_v61 }
 0x671   : > { %v7729_v47 = vunpack.i.h.bf16 %v7727_v45  ;;  %v7728_v35 = vunpack.i.l.bf16 %v7727_v45 }
 0x673   : > { %v4943_v50 = vsel %vm1478_vm9, %v4935_v18, %v7729_v47  ;;  %v4942_v3 = vsel %vm1478_vm9, %v4934_v56, %v7728_v35 }
 0x674   : > { %v4951_v12 = vsel %vm1487_vm10, %v4943_v50, %v7734_v6  ;;  %v4950_v10 = vsel %vm1487_vm10, %v4942_v3, %v7733_v62 }
 0x675   : > { %v4958_v63 = vsel %vm1496_vm11, %v4950_v10, %v7738_v9  ;;  %v4959_v25 = vsel %vm1496_vm11, %v4951_v12, %v7739_v26 }
 0x676   : > { %v7782_v45 = vpop.permute.xlu2 %7781 }
 0x677   : > { %v7747_v13 = vpop.permute.xlu1 %7746  ;;  %v7784_v9 = vunpack.i.h.bf16 %v7782_v45  ;;  %v7783_v50 = vunpack.i.l.bf16 %v7782_v45 }
 0x678   : > { %v7749_v34 = vunpack.i.h.bf16 %v7747_v13  ;;  %v7748_v39 = vunpack.i.l.bf16 %v7747_v13  ;;  %v7742_v40 = vpop.permute.xlu0 %7741 }
 0x679   : > { %v7744_v36 = vunpack.i.h.bf16 %v7742_v40  ;;  %v7743_v46 = vunpack.i.l.bf16 %v7742_v40 }
 0x67a   : > { %v4966_v19 = vsel %vm1505_vm12, %v4958_v63, %v7748_v39  ;;  %v4967_v16 = vsel %vm1505_vm12, %v4959_v25, %v7749_v34 }
 0x67b   : > { %v3841_v21 = vsel %vm1008_vm1, %v10133_v1, %v7744_v36  ;;  %v4933_v44 = vsel %vm1008_vm1, %v10249_v7, %v7743_v46 }
 0x67c   : > { %v3843_v14 = vsel %vm1478_vm9, %v3841_v21, %v7754_v20  ;;  %v4941_v11 = vsel %vm1478_vm9, %v4933_v44, %v7753_v43  ;;  %v2871_v20 = vpop.f32.mrf.mxu3  ;;  %v3340_v43 = vpop.f32.mrf.mxu2  ;;  %v8049_v21 = vld [vmem:[%s11527_s6] ss:$0 sm:$0xff] }
 0x67d   : > { %v3341_v44 = vadd.f32 %v8049_v21, %v3340_v43 }
 0x67f   : > { %v7762_v51 = vpop.permute.xlu1 %7761 }
 0x680   : > { %v7764_v30 = vunpack.i.h.bf16 %v7762_v51  ;;  %v7763_v5 = vunpack.i.l.bf16 %v7762_v51  ;;  %v7757_v29 = vpop.permute.xlu0 %7756 }
 0x681   : > { %v7759_v54 = vunpack.i.h.bf16 %v7757_v29  ;;  %v7758_v22 = vunpack.i.l.bf16 %v7757_v29 }
 0x682   : > { %v3845_v42 = vsel %vm1487_vm10, %v3843_v14, %v7764_v30  ;;  %v4949_v31 = vsel %vm1487_vm10, %v4941_v11, %v7763_v5 }
 0x683   : > { %v4974_v17 = vsel %vm638_vm0, %v4966_v19, %v7758_v22  ;;  %v4975_v7 = vsel %vm638_vm0, %v4967_v16, %v7759_v54 }
 0x684   : > { %v10573_v61 = vsel %vm1522_vm13, %v4975_v7, %v7769_v2  ;;  %v10576_v49 = vsel %vm1522_vm13, %v4974_v17, %v7768_v55  ;;  %v2873_v19 = vpop.f32.mrf.mxu3  ;;  %v3342_v16 = vpop.f32.mrf.mxu2  ;;  %v10604_v2 = vld [vmem:[%s11525_s4] ss:$0 sm:$0xff] }
 0x685   : > { %v5004_v6 = vpack.c.bf16 %v10573_v61, %v10576_v49  ;;  %v3343_v30 = vadd.f32 %v8049_v21, %v3342_v16 }
 0x687   : > { %v7777_v62 = vpop.permute.xlu1 %7776 }
 0x688   : > { %v7779_v47 = vunpack.i.h.bf16 %v7777_v62  ;;  %v7778_v35 = vunpack.i.l.bf16 %v7777_v62  ;;  %v7772_v18 = vpop.permute.xlu0 %7771 }
 0x689   : > { %v7774_v56 = vunpack.i.h.bf16 %v7772_v18  ;;  %v7773_v26 = vunpack.i.l.bf16 %v7772_v18 }
 0x68b   : > { %v3847_v3 = vsel %vm1496_vm11, %v3845_v42, %v7774_v56  ;;  %v4957_v15 = vsel %vm1496_vm11, %v4949_v31, %v7773_v26  ;;  %v8057_v56 = vld [vmem:[%s11525_s4] ss:$0 sm:$0xff] }
 0x68c   : > { %v3849_v12 = vsel %vm1505_vm12, %v3847_v3, %v7779_v47  ;;  %v4965_v10 = vsel %vm1505_vm12, %v4957_v15, %v7778_v35  ;;  %v2872_v26 = vadd.f32 %v8057_v56, %v2871_v20  ;;  %v11645_v56 = vld [vmem:[#allocation10_spill] sm:$0xff] }
 0x68d   : > { %v4973_v63 = vsel %vm638_vm0, %v4965_v10, %v7783_v50  ;;  %v3851_v25 = vsel %vm638_vm0, %v3849_v12, %v7784_v9 }
 0x690   : > { %v7787_v13 = vpop.permute.xlu0 %7786 }
 0x691   : > { %v7789_v34 = vunpack.i.h.bf16 %v7787_v13  ;;  %v7788_v39 = vunpack.i.l.bf16 %v7787_v13 }
 0x693   : > { %v10587_v40 = vsel %vm1522_vm13, %v4973_v63, %v7788_v39  ;;  %v10590_v36 = vsel %vm1522_vm13, %v3851_v25, %v7789_v34 }
 0x694   : > { %v5003_v46 = vpack.c.bf16 %v10576_v49, %v10587_v40 }
 0x6bb   : > { %v3354_v14 = vpop.f32.mrf.mxu2  ;;  %v3368_v11 = vpop.f32.mrf.mxu3 }
 0x6bc   : > { %v3355_v32 = vadd.f32 %v3354_v14, %v3341_v44 }
 0x6be   : > { %v10597_v51 = vadd.f32 %v3368_v11, %v3355_v32 }
 0x6c3   : > { %v3356_v5 = vpop.f32.mrf.mxu2  ;;  %v3370_v29 = vpop.f32.mrf.mxu3 }
 0x6c4   : > { %v3357_v54 = vadd.f32 %v3356_v5, %v3343_v30 }
 0x6c6   : > { %v10599_v22 = vadd.f32 %v3370_v29, %v3357_v54 }
 0x6cb   : > { %v4004_v55 = vpop.f32.mrf.mxu2  ;;  %v4033_v42 = vpop.f32.mrf.mxu3 }
 0x6cc   : > { %v4005_v31 = vadd.f32 %v10604_v2, %v4004_v55 }
 0x6ce   : > { %v4034_v17 = vadd.f32 %v4033_v42, %v4005_v31 }
 0x6d0   : > { %v4053_v7 = vmax.f32 %v4034_v17, 0.0 }
 0x6d2   : > { %4061 = vst.msk [vmem:[#allocation3] sm:$0xff] %vm1478_vm9, %v4053_v7 }
 0x6d3   : > { %v4006_v62 = vpop.f32.mrf.mxu2  ;;  %v4035_v45 = vpop.f32.mrf.mxu3 }
 0x6d4   : > { %v4007_v47 = vadd.f32 %v10604_v2, %v4006_v62 }
 0x6d6   : > { %v4036_v35 = vadd.f32 %v4035_v45, %v4007_v47 }
 0x6d8   : > { %v4054_v18 = vmax.f32 %v4036_v35, 0.0 }
 0x6da   : > { %4062 = vst.msk [vmem:[#allocation3 + $0x8] sm:$0xff] %vm1478_vm9, %v4054_v18 }
 0x6db   : > { %v2900_v9 = vpop.f32.mrf.mxu1  ;;  %v4009_v50 = vpop.f32.mrf.mxu2 }
 0x6dc   : > { %v2901_v3 = vadd.f32 %v2900_v9, %v2872_v26  ;;  %v4010_v15 = vadd.f32 %v10604_v2, %v4009_v50  ;;  %v4038_v12 = vpop.f32.mrf.mxu3  ;;  %v11646_v26 = vld [vmem:[#allocation11_spill] sm:$0xff]  ;;  %v11647_v50 = vld [vmem:[#allocation12_spill] sm:$0xff] }
 0x6de   : > { %v2911_v10 = vmax.f32 %v2901_v3, 0.0  ;;  %v4039_v63 = vadd.f32 %v4038_v12, %v4010_v15 }
 0x6e0   : > { %2919 = vst.msk [vmem:[#allocation3 + $0x30] sm:$0xff] %vm1478_vm9, %v2911_v10  ;;  %v4055_v25 = vmax.f32 %v4039_v63, 0.0 }
 0x6e2   : > { %4063 = vst.msk [vmem:[#allocation3 + $0x10] sm:$0xff] %vm1478_vm9, %v4055_v25 }
 0x6e3   : > { %v2902_v13 = vpop.f32.mrf.mxu1  ;;  %v4011_v34 = vpop.f32.mrf.mxu2 }
 0x6e4   : > { %v4012_v39 = vadd.f32 %v10604_v2, %v4011_v34  ;;  %v4040_v20 = vpop.f32.mrf.mxu3 }
 0x6e6   : > { %v4041_v43 = vadd.f32 %v4040_v20, %v4012_v39 }
 0x6e7   : > { %v2924_v19 = vld [vmem:[#allocation3 + $0x30] ss:$2 sm:$0xf]  ;;  %v2928_v16 = vld [vmem:[#allocation3 + $0x31] ss:$2 sm:$0xf] }
 0x6e8   : > { %v4056_v21 = vmax.f32 %v4041_v43, 0.0  ;;  %v10617_v44 = vmax.f32 %v2924_v19, %v2928_v16 }
 0x6ea   : > { %4064 = vst.msk [vmem:[#allocation3 + $0x18] sm:$0xff] %vm1478_vm9, %v4056_v21  ;;  %v3041_v14 = vrot.slane %v10617_v44, 7  ;;  %v3036_v11 = vrot.slane %v10617_v44, 6  ;;  %v3031_v32 = vrot.slane %v10617_v44, 5 }
 0x6ec   : > { %v3042_v30 = vsel %vm1373_vm8, %v2995_v60, %v3041_v14  ;;  %v3037_v5 = vsel %vm1333_vm7, %v2984_v53, %v3036_v11  ;;  %v3032_v29 = vsel %vm1293_vm2, %v2973_v8, %v3031_v32  ;;  %v4014_v54 = vpop.f32.mrf.mxu2  ;;  %v4069_v60 = vld [vmem:[#allocation3] ss:$2 sm:$0xff]  ;;  %v4073_v53 = vld [vmem:[#allocation3 + $0x1] ss:$2 sm:$0xff]  ;;  %v6975_v11 = vld [vmem:[%s11526_s5 + $0xf8] sm:$0xff] }
 0x6ed   : > { %v7815_v55 = vpack.i.bf16 %v10176_v33, %v3042_v30  ;;  %v7805_v42 = vpack.i.bf16 %v10187_v4, %v3037_v5  ;;  %v7795_v31 = vpack.i.bf16 %v10145_v41, %v3032_v29  ;;  %v4015_v62 = vadd.f32 %v10604_v2, %v4014_v54  ;;  %3373 = vmatpush.bf16.msra.mxu1 %v6975_v11 }
 0x6ee   : > { %v10641_v47 = vmax.f32 %v4069_v60, %v4073_v53 }
 0x6ef   : > { %7816 = vrot.lane.b32.xlu1 %v7815_v55, %s11605_s16  ;;  %7806 = vrot.lane.b32.xlu0 %v7805_v42, %s11606_s25  ;;  %v4561_v42 = vld [vmem:[#allocation2 + $0x200] ss:$2 sm:$0xff] }
 0x6f0   : > { %7796 = vrot.lane.b32.xlu2 %v7795_v31, %s11607_s27  ;;  %v4101_v3 = vrot.slane %v10641_v47, 3  ;;  %v4092_v15 = vrot.slane %v10641_v47, 2  ;;  %v4083_v12 = vrot.slane %v10641_v47, 1  ;;  %v4579_v31 = vld [vmem:[#allocation2 + $0x201] ss:$2 sm:$0xff] }
 0x6f1   : > { %v4070_v17 = vld [vmem:[#allocation3 + $0x10] ss:$2 sm:$0xff]  ;;  %v4074_v7 = vld [vmem:[#allocation3 + $0x11] ss:$2 sm:$0xff] }
 0x6f2   : > { %v10639_v8 = vmax.f32 %v4070_v17, %v4074_v7  ;;  %v4563_v7 = vld [vmem:[#allocation2 + $0x210] ss:$2 sm:$0xff] }
 0x6f3   : > { %v4043_v45 = vpop.f32.mrf.mxu3 }
 0x6f4   : > { %v4044_v33 = vadd.f32 %v4043_v45, %v4015_v62  ;;  %v4102_v41 = vrot.slane %v10639_v8, 3  ;;  %v4093_v35 = vrot.slane %v10639_v8, 2  ;;  %v4016_v18 = vpop.f32.mrf.mxu2  ;;  %v4084_v9 = vrot.slane %v10639_v8, 1  ;;  %v4581_v62 = vld [vmem:[#allocation2 + $0x211] ss:$2 sm:$0xff] }
 0x6f5   : > { %v4017_v10 = vadd.f32 %v10604_v2, %v4016_v18  ;;  %v6974_v18 = vld [vmem:[%s11526_s5 + $0xf0] sm:$0xff] }
 0x6f6   : > { %v4057_v4 = vmax.f32 %v4044_v33, 0.0  ;;  %v4103_v63 = vsel %vm1213_vm3, %v4101_v3, %v4102_v41  ;;  %v4094_v25 = vsel %vm1173_vm6, %v4092_v15, %v4093_v35  ;;  %v4085_v34 = vsel %vm1133_vm4, %v4083_v12, %v4084_v9  ;;  %3374 = vmatpush.bf16.msra.mxu1 %v6974_v18  ;;  %v6969_v18 = vld [vmem:[%s11526_s5 + $0xc8] sm:$0xff] }
 0x6f7   : > { %7821 = vrot.lane.b32.xlu1 %v11645_v56, %s11606_s25  ;;  %7811 = vrot.lane.b32.xlu0 %v11646_v26, %s11603_s23  ;;  %v7835_v20 = vpack.i.bf16 %v4102_v41, %v4103_v63  ;;  %v7830_v43 = vpack.i.bf16 %v4093_v35, %v4094_v25  ;;  %v7825_v16 = vpack.i.bf16 %v4084_v9, %v4085_v34  ;;  %v4129_v15 = vrot.slane %v10641_v47, 6 }
 0x6f8   : > { %4065 = vst.msk [vmem:[#allocation3 + $0x20] sm:$0xff] %vm1478_vm9, %v4057_v4  ;;  %7801 = vrot.lane.b32.xlu2 %v11647_v50, %s11607_s27  ;;  %v10686_v56 = vmax.f32 %v4561_v42, %v4579_v31  ;;  %v10688_v26 = vmax.f32 %v4563_v7, %v4581_v62  ;;  %v4140_v50 = vrot.slane %v10641_v47, 7  ;;  %v4118_v63 = vrot.slane %v10641_v47, 5  ;;  %v11649_v31 = vld [vmem:[#allocation14_spill] sm:$0xff] }
 0x6f9   : > { %v11651_v62 = vrot.slane %v8779_v0, 2 }
 0x6fa   : > { %v4653_v42 = vrot.slane %v10688_v26, 2 }
 0x6fb   : > { %v4045_v13 = vpop.f32.mrf.mxu3 }
 0x6fc   : > { %v4046_v39 = vadd.f32 %v4045_v13, %v4017_v10  ;;  %v6973_v10 = vld [vmem:[%s11526_s5 + $0xe8] sm:$0xff] }
 0x6fd   : > { %3375 = vmatpush.bf16.msra.mxu1 %v6973_v10  ;;  %v4807_v10 = vrot.slane %v10686_v56, 6 }
 0x6fe   : > { %v4058_v19 = vmax.f32 %v4046_v39, 0.0 }
 0x6ff   : > { %7836 = vrot.lane.b32.xlu1 %v7835_v20, %s11605_s16  ;;  %7831 = vrot.lane.b32.xlu0 %v7830_v43, %s11606_s25 }
 0x700   : > { %4066 = vst.msk [vmem:[#allocation3 + $0x28] sm:$0xff] %vm1478_vm9, %v4058_v19  ;;  %7826 = vrot.lane.b32.xlu2 %v7825_v16, %s11607_s27  ;;  %v4612_v16 = vrot.slane %v10686_v56, 1 }
 0x702   : > { %v4613_v11 = vsel %vm1133_vm4, %v4610_v28, %v4612_v16  ;;  %v11648_v28 = vld [vmem:[#allocation13_spill] sm:$0xff] }
 0x707   : > { %v4071_v2 = vld [vmem:[#allocation3 + $0x20] ss:$2 sm:$0xff]  ;;  %v4075_v21 = vld [vmem:[#allocation3 + $0x21] ss:$2 sm:$0xff] }
 0x708   : > { %v10664_v14 = vmax.f32 %v4071_v2, %v4075_v21  ;;  %v4614_v2 = vrot.slane %v10688_v26, 1  ;;  %v6972_v21 = vld [vmem:[%s11526_s5 + $0xe0] sm:$0xff] }
 0x709   : > { %3376 = vmatpush.bf16.msra.mxu1 %v6972_v21  ;;  %v11653_v21 = vrot.slane %v8779_v0, 6 }
 0x70a   : > { %v4167_v32 = vrot.slane %v10664_v14, 3  ;;  %v4159_v30 = vrot.slane %v10664_v14, 2  ;;  %v4151_v5 = vrot.slane %v10664_v14, 1  ;;  %v4143_v45 = vrot.slane %v10664_v14, 7 }
 0x70b   : > { %v4132_v33 = vrot.slane %v10664_v14, 6  ;;  %v4121_v4 = vrot.slane %v10664_v14, 5 }
 0x70c   : > { %v4168_v29 = vsel %vm1213_vm3, %v4102_v41, %v4167_v32  ;;  %v4160_v54 = vsel %vm1173_vm6, %v4093_v35, %v4159_v30  ;;  %v4152_v55 = vsel %vm1133_vm4, %v4084_v9, %v4151_v5  ;;  %v4141_v41 = vrot.slane %v10639_v8, 7 }
 0x70d   : > { %v7850_v60 = vpack.i.bf16 %v4167_v32, %v4168_v29  ;;  %v7845_v17 = vpack.i.bf16 %v4159_v30, %v4160_v54  ;;  %v7840_v53 = vpack.i.bf16 %v4151_v5, %v4152_v55  ;;  %v4130_v35 = vrot.slane %v10639_v8, 6  ;;  %v6971_v30 = vld [vmem:[%s11526_s5 + $0xd8] sm:$0xff] }
 0x70e   : > { %v4119_v9 = vrot.slane %v10639_v8, 5  ;;  %v4144_v3 = vsel %vm1373_vm8, %v4141_v41, %v4143_v45  ;;  %v4142_v13 = vsel %vm1373_vm8, %v4140_v50, %v4141_v41  ;;  %v4615_v32 = vsel %vm1133_vm4, %v4612_v16, %v4614_v2  ;;  %3377 = vmatpush.bf16.msra.mxu1 %v6971_v30  ;;  %v4583_v50 = vld [vmem:[#allocation2 + $0x221] ss:$2 sm:$0xff] }
 0x70f   : > { %7851 = vrot.lane.b32.xlu1 %v7850_v60, %s11605_s16  ;;  %7846 = vrot.lane.b32.xlu0 %v7845_v17, %s11606_s25  ;;  %v4133_v12 = vsel %vm1333_vm7, %v4130_v35, %v4132_v33  ;;  %v4131_v34 = vsel %vm1333_vm7, %v4129_v15, %v4130_v35  ;;  %v7875_v39 = vpack.i.bf16 %v4144_v3, %v4142_v13  ;;  %v4690_v29 = vrot.slane %v10686_v56, 3  ;;  %v6970_v60 = vld [vmem:[%s11526_s5 + $0xd0] sm:$0xff] }
 0x710   : > { %7841 = vrot.lane.b32.xlu2 %v7840_v53, %s11607_s27  ;;  %v4122_v25 = vsel %vm1293_vm2, %v4119_v9, %v4121_v4  ;;  %v7865_v20 = vpack.i.bf16 %v4133_v12, %v4131_v34  ;;  %v4120_v43 = vsel %vm1293_vm2, %v4118_v63, %v4119_v9  ;;  %v7870_v5 = vpack.i.bf16 %v4615_v32, %v4613_v11  ;;  %v4565_v9 = vld [vmem:[#allocation2 + $0x220] ss:$2 sm:$0xff]  ;;  %v4567_v3 = vld [vmem:[#allocation2 + $0x230] ss:$2 sm:$0xff] }
 0x711   : > { %v7855_v19 = vpack.i.bf16 %v4122_v25, %v4120_v43  ;;  %v4692_v54 = vrot.slane %v10688_v26, 3  ;;  %v4651_v55 = vrot.slane %v10686_v56, 2  ;;  %v11650_v17 = vrot.slane %v8779_v0, 3  ;;  %v4585_v25 = vld [vmem:[#allocation2 + $0x231] ss:$2 sm:$0xff]  ;;  %v11652_v43 = vld [vmem:[#allocation15_spill] sm:$0xff] }
 0x712   : > { %3378 = vmatpush.bf16.msra.mxu1 %v6970_v60  ;;  %v4809_v63 = vrot.slane %v10688_v26, 6  ;;  %v4768_v13 = vrot.slane %v10686_v56, 5  ;;  %v4770_v34 = vrot.slane %v10688_v26, 5  ;;  %v10763_v16 = vmax.f32 %v4567_v3, %v4585_v25 }
 0x713   : > { %v4691_v53 = vsel %vm1213_vm3, %v11650_v17, %v4690_v29  ;;  %v4693_v7 = vsel %vm1213_vm3, %v4690_v29, %v4692_v54  ;;  %v4652_v41 = vsel %vm1173_vm6, %v11651_v62, %v4651_v55  ;;  %v4654_v35 = vsel %vm1173_vm6, %v4651_v55, %v4653_v42 }
 0x714   : > { %v7895_v15 = vpack.i.bf16 %v4693_v7, %v4691_v53  ;;  %v7885_v12 = vpack.i.bf16 %v4654_v35, %v4652_v41  ;;  %v4808_v11 = vsel %vm1333_vm7, %v11653_v21, %v4807_v10  ;;  %v4810_v32 = vsel %vm1333_vm7, %v4807_v10, %v4809_v63  ;;  %v6968_v41 = vld [vmem:[%s11526_s5 + $0xc0] sm:$0xff]  ;;  %v6999_v35 = vld [vmem:[%s11526_s5 + $0x38] sm:$0xff] }
 0x715   : > { %v11654_v30 = vrot.slane %v8779_v0, 5  ;;  %v4771_v29 = vsel %vm1293_vm2, %v4768_v13, %v4770_v34  ;;  %v11655_v55 = vrot.slane %v8779_v0, 4  ;;  %v7910_v60 = vpack.i.bf16 %v4810_v32, %v4808_v11 }
 0x716   : > { %3379 = vmatpush.bf16.msra.mxu1 %v6969_v18  ;;  %v4846_v7 = vrot.slane %v10686_v56, 7  ;;  %v4848_v62 = vrot.slane %v10688_v26, 7  ;;  %v4877_v3 = vrot.slane %v10763_v16, 1 }
 0x717   : > { %7876 = vrot.lane.b32.xlu1 %v7875_v39, %s11605_s16  ;;  %7866 = vrot.lane.b32.xlu0 %v7865_v20, %s11606_s25  ;;  %v4729_v39 = vrot.slane %v10686_v56, 4  ;;  %v4731_v20 = vrot.slane %v10688_v26, 4 }
 0x718   : > { %7856 = vrot.lane.b32.xlu2 %v7855_v19, %s11607_s27  ;;  %v10761_v19 = vmax.f32 %v4565_v9, %v4583_v50  ;;  %v4885_v9 = vrot.slane %v10763_v16, 2  ;;  %v4849_v25 = vsel %vm1373_vm8, %v4846_v7, %v4848_v62 }
 0x71a   : > { %v10788_v18 = vrot.slane %v10761_v19, 2  ;;  %v4616_v50 = vrot.slane %v10761_v19, 1  ;;  %3380 = vmatpush.bf16.msra.mxu1 %v6968_v41 }
 0x71c   : > { %v4617_v21 = vsel %vm1133_vm4, %v4614_v2, %v4616_v50  ;;  %v4878_v11 = vsel %vm1133_vm4, %v4616_v50, %v4877_v3  ;;  %v4901_v2 = vrot.slane %v10763_v16, 4 }
 0x71e   : > { %4479 = vmatpush.bf16.msrb.mxu1 %v6999_v35 }
 0x71f   : > { %7881 = vrot.lane.b32.xlu1 %v11648_v28, %s11605_s16  ;;  %7871 = vrot.lane.b32.xlu0 %v7870_v5, %s11604_s24  ;;  %v4769_v5 = vsel %vm1293_vm2, %v11654_v30, %v4768_v13  ;;  %v4730_v28 = vsel %vm1253_vm5, %v11655_v55, %v4729_v39  ;;  %v6998_v13 = vld [vmem:[%s11526_s5 + $0x30] sm:$0xff]  ;;  %v7920_v30 = vpack.i.bf16 %v4878_v11, %v4617_v21  ;;  %v4909_v55 = vrot.slane %v10763_v16, 5 }
 0x720   : > { %7861 = vrot.lane.b32.xlu2 %v11649_v31, %s11602_s22  ;;  %v4732_v31 = vsel %vm1253_vm5, %v4729_v39, %v4731_v20  ;;  %v7905_v17 = vpack.i.bf16 %v4771_v29, %v4769_v5  ;;  %v4656_v39 = vsel %vm1173_vm6, %v4653_v42, %v10788_v18  ;;  %v6997_v42 = vld [vmem:[%s11526_s5 + $0x28] sm:$0xff]  ;;  %v10822_v29 = vrot.slane %v10761_v19, 5  ;;  %v6994_v21 = vld [vmem:[%s11526_s5 + $0x10] sm:$0xff] }
 0x721   : > { %v7900_v53 = vpack.i.bf16 %v4732_v31, %v4730_v28  ;;  %v4733_v28 = vrot.slane %v10761_v19, 4  ;;  %v4694_v31 = vrot.slane %v10761_v19, 3  ;;  %v4850_v11 = vrot.slane %v10761_v19, 7 }
 0x722   : > { %4480 = vmatpush.bf16.msrb.mxu1 %v6998_v13  ;;  %v4910_v41 = vsel %vm1293_vm2, %v10822_v29, %v4909_v55 }
 0x723   : > { %v4734_v35 = vsel %vm1253_vm5, %v4731_v20, %v4733_v28  ;;  %v4811_v20 = vrot.slane %v10761_v19, 6 }
 0x726   : > { %4481 = vmatpush.bf16.msrb.mxu1 %v6997_v42  ;;  %v6993_v42 = vld [vmem:[%s11526_s5 + $0x8] sm:$0xff] }
 0x727   : > { %7896 = vrot.lane.b32.xlu1 %v7895_v15, %s11603_s23  ;;  %7891 = vrot.lane.b32.xlu0 %v11652_v43, %s11601_s28  ;;  %v7015_v15 = vld [vmem:[%s11526_s5 + $0xb8] sm:$0xff]  ;;  %v4886_v43 = vsel %vm1173_vm6, %v10788_v18, %v4885_v9 }
 0x728   : > { %7886 = vrot.lane.b32.xlu2 %v7885_v12, %s11607_s27  ;;  %v11656_v12 = vrot.slane %v8779_v0, 7  ;;  %4507 = vmatpush.bf16.msra.mxu2 %v7015_v15  ;;  %v7925_v32 = vpack.i.bf16 %v4886_v43, %v4656_v39  ;;  %v4902_v15 = vsel %vm1253_vm5, %v4733_v28, %v4901_v2  ;;  %v4917_v43 = vrot.slane %v10763_v16, 6 }
 0x729   : > { %v7935_v13 = vpack.i.bf16 %v4902_v15, %v4734_v35  ;;  %v7704_v35 = vunpack.i.h.bf16 %v10523_v38  ;;  %v7965_v15 = vpack.i.bf16 %v4733_v28, %v4901_v2  ;;  %v7009_v2 = vld [vmem:[%s11526_s5 + $0x88] sm:$0xff] }
 0x72a   : > { %v4847_v10 = vsel %vm1373_vm8, %v11656_v12, %v4846_v7  ;;  %v4773_v7 = vsel %vm1293_vm2, %v4770_v34, %v10822_v29  ;;  %v4695_v12 = vsel %vm1213_vm3, %v4692_v54, %v4694_v31  ;;  %v6995_v34 = vld [vmem:[%s11526_s5 + $0x18] sm:$0xff]  ;;  %v7013_v54 = vld [vmem:[%s11526_s5 + $0xa8] sm:$0xff] }
 0x72b   : > { %v7915_v5 = vpack.i.bf16 %v4849_v25, %v4847_v10  ;;  %v7940_v25 = vpack.i.bf16 %v4910_v41, %v4773_v7  ;;  %v7694_v7 = vunpack.i.h.bf16 %v10494_v57 }
 0x72d   : > { %v3792_v41 = vsel %vm1008_vm1, %v10133_v1, %v7694_v7  ;;  %v7010_v1 = vld [vmem:[%s11526_s5 + $0x90] sm:$0xff] }
 0x72f   : > { %7911 = vrot.lane.b32.xlu1 %v7910_v60, %s11605_s16  ;;  %7906 = vrot.lane.b32.xlu0 %v7905_v17, %s11602_s22  ;;  %v4893_v60 = vrot.slane %v10763_v16, 3  ;;  %v7014_v17 = vld [vmem:[%s11526_s5 + $0xb0] sm:$0xff] }
 0x730   : > { %7901 = vrot.lane.b32.xlu2 %v7900_v53, %s11606_s25  ;;  %v6996_v53 = vld [vmem:[%s11526_s5 + $0x20] sm:$0xff]  ;;  %4508 = vmatpush.bf16.msra.mxu2 %v7014_v17  ;;  %v4851_v17 = vsel %vm1373_vm8, %v4848_v62, %v4850_v11 }
 0x731   : > { %v4894_v10 = vsel %vm1213_vm3, %v4694_v31, %v4893_v60  ;;  %4482 = vmatpush.bf16.msrb.mxu1 %v6996_v53 }
 0x732   : > { %v7930_v39 = vpack.i.bf16 %v4894_v10, %v4695_v12  ;;  %v7960_v12 = vpack.i.bf16 %v4694_v31, %v4893_v60  ;;  %v7011_v10 = vld [vmem:[%s11526_s5 + $0x98] sm:$0xff]  ;;  %v10915_v60 = vpop.permute.xlu1 %7791 }
 0x734   : > { %4509 = vmatpush.bf16.msra.mxu2 %v7013_v54 }
 0x735   : > { %4483 = vmatpush.bf16.msrb.mxu1 %v6995_v34 }
 0x737   : > { %7926 = vrot.lane.b32.xlu1 %v7925_v32, %s11607_s27  ;;  %7921 = vrot.lane.b32.xlu0 %v7920_v30, %s11604_s24  ;;  %v4812_v32 = vsel %vm1333_vm7, %v4809_v63, %v4811_v20  ;;  %v4918_v30 = vsel %vm1333_vm7, %v4811_v20, %v4917_v43  ;;  %v6992_v63 = vld [vmem:[%s11526_s5] sm:$0xff] }
 0x738   : > { %7916 = vrot.lane.b32.xlu2 %v7915_v5, %s11601_s28  ;;  %v7950_v5 = vpack.i.bf16 %v4616_v50, %v4877_v3  ;;  %v7945_v53 = vpack.i.bf16 %v4918_v30, %v4812_v32  ;;  %v7012_v50 = vld [vmem:[%s11526_s5 + $0xa0] sm:$0xff]  ;;  %v7037_v32 = vld [vmem:[%s11524_s3 + $0x68] sm:$0xff] }
 0x739   : > { %4484 = vmatpush.bf16.msrb.mxu1 %v6994_v21  ;;  %4510 = vmatpush.bf16.msra.mxu2 %v7012_v50 }
 0x73d   : > { %4485 = vmatpush.bf16.msrb.mxu1 %v6993_v42  ;;  %4511 = vmatpush.bf16.msra.mxu2 %v7011_v10 }
 0x73f   : > { %7941 = vrot.lane.b32.xlu1 %v7940_v25, %s11602_s22  ;;  %7936 = vrot.lane.b32.xlu0 %v7935_v13, %s11606_s25  ;;  %v7955_v25 = vpack.i.bf16 %v10788_v18, %v4885_v9  ;;  %v4925_v13 = vrot.slane %v10763_v16, 7  ;;  %v7975_v18 = vpack.i.bf16 %v4811_v20, %v4917_v43  ;;  %v7970_v9 = vpack.i.bf16 %v10822_v29, %v4909_v55  ;;  %v7039_v29 = vld [vmem:[%s11524_s3 + $0x78] sm:$0xff]  ;;  %v7038_v55 = vld [vmem:[%s11524_s3 + $0x70] sm:$0xff] }
 0x740   : > { %7931 = vrot.lane.b32.xlu2 %v7930_v39, %s11603_s23  ;;  %v7008_v39 = vld [vmem:[%s11526_s5 + $0x80] sm:$0xff]  ;;  %v3028_v20 = vrot.slane %v10617_v44, 4  ;;  %v7714_v44 = vunpack.i.h.bf16 %v10539_v48 }
 0x741   : > { %4486 = vmatpush.bf16.msrb.mxu1 %v6992_v63  ;;  %v4926_v38 = vsel %vm1373_vm8, %v4850_v11, %v4925_v13  ;;  %4512 = vmatpush.bf16.msra.mxu2 %v7010_v1 }
 0x742   : > { %v7980_v28 = vpack.i.bf16 %v4925_v13, %v4926_v38  ;;  %v3029_v30 = vsel %vm1253_vm5, %v2966_v27, %v3028_v20  ;;  %v7007_v27 = vld [vmem:[%s11526_s5 + $0x78] sm:$0xff]  ;;  %v7034_v13 = vld [vmem:[%s11524_s3 + $0x50] sm:$0xff] }
 0x745   : > { %4513 = vmatpush.bf16.msra.mxu2 %v7009_v2 }
 0x747   : > { %7951 = vrot.lane.b32.xlu1 %v7950_v5, %s11604_s24  ;;  %4864 = vrot.lane.b32.xlu0 %v4851_v17, %s11601_s28 }
 0x748   : > { %7946 = vrot.lane.b32.xlu2 %v7945_v53, %s11605_s16 }
 0x749   : > { %4514 = vmatpush.bf16.msra.mxu2 %v7008_v39 }
 0x74a   : > { %v7797_v3 = vpop.permute.xlu2 %7796 }
 0x74b   : > { %v7799_v62 = vunpack.i.h.bf16 %v7797_v3  ;;  %v7798_v43 = vunpack.i.l.bf16 %v7797_v3  ;;  %v7719_v3 = vunpack.i.h.bf16 %v10537_v24 }
 0x74d   : > { %v3800_v57 = vsel %vm1478_vm9, %v3792_v41, %v7799_v62  ;;  %5172 = vmatpush.bf16.msrb.mxu2 %v7039_v29  ;;  %v3064_v7 = vsel %vm1478_vm9, %v3029_v30, %v7798_v43 }
 0x74e   : > { %v3808_v34 = vsel %vm1487_vm10, %v3800_v57, %v7704_v35  ;;  %v7036_v35 = vld [vmem:[%s11524_s3 + $0x60] sm:$0xff] }
 0x74f   : > { %7966 = vrot.lane.b32.xlu1 %v7965_v15, %s11606_s25  ;;  %7961 = vrot.lane.b32.xlu0 %v7960_v12, %s11603_s23 }
 0x750   : > { %7956 = vrot.lane.b32.xlu2 %v7955_v25, %s11607_s27  ;;  %v7035_v25 = vld [vmem:[%s11524_s3 + $0x58] sm:$0xff] }
 0x751   : > { %5173 = vmatpush.bf16.msrb.mxu2 %v7038_v55  ;;  %v7033_v55 = vld [vmem:[%s11524_s3 + $0x48] sm:$0xff] }
 0x752   : > { %v10912_v31 = vpop.permute.xlu2 %7801 }
 0x755   : > { %5174 = vmatpush.bf16.msrb.mxu2 %v7037_v32 }
 0x757   : > { %7981 = vrot.lane.b32.xlu1 %v7980_v28, %s11601_s28  ;;  %7976 = vrot.lane.b32.xlu0 %v7975_v18, %s11605_s16  ;;  %v7004_v18 = vld [vmem:[%s11526_s5 + $0x60] sm:$0xff] }
 0x758   : > { %7971 = vrot.lane.b32.xlu2 %v7970_v9, %s11602_s22  ;;  %s8079_s22 = scalar_lea.hbm %s11530_s9, 16 }
 0x759   : > { %5175 = vmatpush.bf16.msrb.mxu2 %v7036_v35 }
 0x75a   : > { %v7827_v5 = vpop.permute.xlu2 %7826 }
 0x75b   : > { %v7828_v1 = vunpack.i.l.bf16 %v7827_v5 }
 0x75d   : > { %5176 = vmatpush.bf16.msrb.mxu2 %v7035_v25  ;;  %v4194_v43 = vsel %vm1478_vm9, %v10641_v47, %v7828_v1 }
 0x760   : > { %4866 = vrot.lane.b32.xlu2 %v4850_v11, %s11601_s28 }
 0x761   : > { %v7817_v54 = vpop.permute.xlu1 %7816  ;;  %v7807_v21 = vpop.permute.xlu0 %7806  ;;  %5177 = vmatpush.bf16.msrb.mxu2 %v7034_v13  ;;  %v4114_v13 = vrot.slane %v10664_v14, 4 }
 0x762   : > { %v7818_v42 = vunpack.i.l.bf16 %v7817_v54  ;;  %v7809_v17 = vunpack.i.h.bf16 %v7807_v21  ;;  %v7808_v53 = vunpack.i.l.bf16 %v7807_v21  ;;  %v7819_v11 = vunpack.i.h.bf16 %v7817_v54 }
 0x764   : > { %v3065_v63 = vsel %vm1496_vm11, %v3064_v7, %v7808_v53  ;;  %v3816_v50 = vsel %vm1496_vm11, %v3808_v34, %v7809_v17  ;;  %v7829_v34 = vunpack.i.h.bf16 %v7827_v5  ;;  %v7032_v53 = vld [vmem:[%s11524_s3 + $0x40] sm:$0xff]  ;;  %v7001_v7 = vld [vmem:[%s11526_s5 + $0x48] sm:$0xff] }
 0x765   : > { %v3824_v62 = vsel %vm1505_vm12, %v3816_v50, %v7714_v44  ;;  %v3066_v58 = vsel %vm638_vm0, %v3065_v63, %v7818_v42  ;;  %v7003_v42 = vld [vmem:[%s11526_s5 + $0x58] sm:$0xff]  ;;  %5178 = vmatpush.bf16.msrb.mxu2 %v7033_v55  ;;  %v7002_v44 = vld [vmem:[%s11526_s5 + $0x50] sm:$0xff] }
 0x766   : > { %v3070_v48 = vpack.c.bf16 %v3066_v58, %v10470_v59  ;;  %v3832_v41 = vsel %vm638_vm0, %v3824_v62, %v7819_v11  ;;  %v7006_v59 = vld [vmem:[%s11526_s5 + $0x70] sm:$0xff]  ;;  %v4195_v20 = vsel %vm1478_vm9, %v10639_v8, %v7829_v34  ;;  %v7000_v58 = vld [vmem:[%s11526_s5 + $0x40] sm:$0xff] }
 0x767   : > { %v3840_v57 = vsel %vm1522_vm13, %v3832_v41, %v7719_v3 }
 0x768   : > { %3381 = vmatmul.bf16.vlgmr.msra.gmra.mxu1 %v3070_v48  ;;  %v3861_v24 = vpack.c.bf16 %v3840_v57, %v10547_v23  ;;  %v7005_v23 = vld [vmem:[%s11526_s5 + $0x68] sm:$0xff]  ;;  %v7031_v57 = vld [vmem:[%s11524_s3 + $0x38] sm:$0xff] }
 0x769   : > { %4493 = vmatpush.bf16.msra.mxu1 %v7007_v27  ;;  %v10951_v15 = vpop.permute.xlu1 %7821  ;;  %v10953_v12 = vpop.permute.xlu0 %7811  ;;  %5179 = vmatpush.bf16.msrb.mxu2 %v7032_v53 }
 0x76a   : > { %v7842_v10 = vpop.permute.xlu2 %7841  ;;  %4018 = vmatmul.bf16.gmra.mxu2 %v3861_v24 }
 0x76b   : > { %v7844_v63 = vunpack.i.h.bf16 %v7842_v10  ;;  %v7843_v50 = vunpack.i.l.bf16 %v7842_v10 }
 0x76d   : > { %4494 = vmatpush.bf16.msra.mxu1 %v7006_v59  ;;  %v4207_v24 = vsel %vm1478_vm9, %v10664_v14, %v7844_v63  ;;  %v4206_v59 = vsel %vm1478_vm9, %v10639_v8, %v7843_v50  ;;  %v7028_v63 = vld [vmem:[%s11524_s3 + $0x20] sm:$0xff]  ;;  %v7794_v50 = vunpack.i.h.bf16 %v10915_v60 }
 0x76e   : > { %v7056_v14 = vld [vmem:[%s11526_s5 + $0x80] sm:$0xff] }
 0x771   : > { %4495 = vmatpush.bf16.msra.mxu1 %v7005_v23  ;;  %v7837_v38 = vpop.permute.xlu1 %7836  ;;  %v7832_v28 = vpop.permute.xlu0 %7831  ;;  %v4112_v23 = vrot.slane %v10639_v8, 4 }
 0x772   : > { %v7839_v9 = vunpack.i.h.bf16 %v7837_v38  ;;  %v7838_v2 = vunpack.i.l.bf16 %v7837_v38  ;;  %v7834_v39 = vunpack.i.h.bf16 %v7832_v28  ;;  %v7833_v29 = vunpack.i.l.bf16 %v7832_v28  ;;  %v7857_v32 = vpop.permute.xlu2 %7856  ;;  %v7030_v28 = vld [vmem:[%s11524_s3 + $0x30] sm:$0xff] }
 0x774   : > { %v4196_v54 = vsel %vm1496_vm11, %v4194_v43, %v7833_v29  ;;  %v4197_v21 = vsel %vm1496_vm11, %v4195_v20, %v7834_v39  ;;  %v4115_v29 = vsel %vm1253_vm5, %v4112_v23, %v4114_v13 }
 0x775   : > { %v4198_v30 = vsel %vm638_vm0, %v4196_v54, %v7838_v2  ;;  %v4199_v5 = vsel %vm638_vm0, %v4197_v21, %v7839_v9  ;;  %4496 = vmatpush.bf16.msra.mxu1 %v7004_v18  ;;  %v4111_v18 = vrot.slane %v10641_v47, 4  ;;  %v7859_v9 = vunpack.i.h.bf16 %v7857_v32  ;;  %v7029_v47 = vld [vmem:[%s11524_s3 + $0x28] sm:$0xff] }
 0x776   : > { %v4215_v17 = vpack.c.bf16 %v4199_v5, %v4198_v30  ;;  %v7858_v2 = vunpack.i.l.bf16 %v7857_v32 }
 0x777   : > { %v4113_v8 = vsel %vm1253_vm5, %v4111_v18, %v4112_v23  ;;  %v4201_v32 = vsel %vm1478_vm9, %v4115_v29, %v7859_v9 }
 0x778   : > { %4487 = vmatmul.bf16.vlgmr.msrb.gmra.mxu1 %v4215_v17  ;;  %v4200_v5 = vsel %vm1478_vm9, %v4113_v8, %v7858_v2 }
 0x779   : > { %4497 = vmatpush.bf16.msra.mxu1 %v7003_v42 }
 0x77a   : > { %v10993_v11 = vpop.permute.xlu2 %7861 }
 0x77d   : > { %4498 = vmatpush.bf16.msra.mxu1 %v7002_v44 }
 0x781   : > { %4499 = vmatpush.bf16.msra.mxu1 %v7001_v7  ;;  %v7852_v3 = vpop.permute.xlu1 %7851  ;;  %v7847_v62 = vpop.permute.xlu0 %7846 }
 0x782   : > { %v7854_v27 = vunpack.i.h.bf16 %v7852_v3  ;;  %v7853_v48 = vunpack.i.l.bf16 %v7852_v3  ;;  %v7849_v41 = vunpack.i.h.bf16 %v7847_v62  ;;  %v7848_v35 = vunpack.i.l.bf16 %v7847_v62  ;;  %v11015_v39 = vpop.permute.xlu2 %7886 }
 0x783   : > { %v7793_v3 = vunpack.i.l.bf16 %v10915_v60  ;;  %v7804_v62 = vunpack.i.h.bf16 %v10912_v31  ;;  %v4936_v60 = vsel %vm1008_vm1, %v8776_v37, %v7794_v50  ;;  %v7889_v40 = vunpack.i.h.bf16 %v11015_v39 }
 0x784   : > { %v4208_v10 = vsel %vm1496_vm11, %v4206_v59, %v7848_v35  ;;  %v4209_v25 = vsel %vm1496_vm11, %v4207_v24, %v7849_v41  ;;  %v7814_v41 = vunpack.i.h.bf16 %v10953_v12  ;;  %v7813_v35 = vunpack.i.l.bf16 %v10953_v12  ;;  %v7027_v24 = vld [vmem:[%s11524_s3 + $0x18] sm:$0xff] }
 0x785   : > { %v4210_v34 = vsel %vm638_vm0, %v4208_v10, %v7853_v48  ;;  %v4211_v1 = vsel %vm638_vm0, %v4209_v25, %v7854_v27  ;;  %4500 = vmatpush.bf16.msra.mxu1 %v7000_v58  ;;  %v7803_v58 = vunpack.i.l.bf16 %v10912_v31  ;;  %v3842_v31 = vsel %vm1008_vm1, %v8774_v52, %v7793_v3  ;;  %v7026_v52 = vld [vmem:[%s11524_s3 + $0x10] sm:$0xff] }
 0x786   : > { %v4217_v38 = vpack.c.bf16 %v4211_v1, %v4210_v34  ;;  %v4944_v59 = vsel %vm1478_vm9, %v4936_v60, %v7804_v62  ;;  %v7824_v25 = vunpack.i.h.bf16 %v10951_v15  ;;  %v7823_v12 = vunpack.i.l.bf16 %v10951_v15 }
 0x787   : > { %v3844_v10 = vsel %vm1478_vm9, %v3842_v31, %v7803_v58  ;;  %v4952_v34 = vsel %vm1487_vm10, %v4944_v59, %v7814_v41  ;;  %v7864_v1 = vunpack.i.h.bf16 %v10993_v11 }
 0x788   : > { %4515 = vmatmul.bf16.vlgmr.msra.gmra.mxu2 %v4217_v38  ;;  %v3846_v23 = vsel %vm1487_vm10, %v3844_v10, %v7813_v35  ;;  %v7863_v38 = vunpack.i.l.bf16 %v10993_v11  ;;  %v4960_v9 = vsel %vm1496_vm11, %v4952_v34, %v7824_v25 }
 0x789   : > { %5143 = vmatpush.bf16.msrb.mxu1 %v7031_v57  ;;  %v7877_v55 = vpop.permute.xlu1 %7876  ;;  %v7867_v20 = vpop.permute.xlu0 %7866  ;;  %v3848_v15 = vsel %vm1496_vm11, %v3846_v23, %v7823_v12  ;;  %v4968_v29 = vsel %vm1505_vm12, %v4960_v9, %v7864_v1 }
 0x78a   : > { %v7879_v43 = vunpack.i.h.bf16 %v7877_v55  ;;  %v7878_v54 = vunpack.i.l.bf16 %v7877_v55  ;;  %v7869_v21 = vunpack.i.h.bf16 %v7867_v20  ;;  %v7868_v30 = vunpack.i.l.bf16 %v7867_v20  ;;  %v11044_v57 = vpop.permute.xlu2 %7901 }
 0x78b   : > { %v3850_v11 = vsel %vm1505_vm12, %v3848_v15, %v7863_v38  ;;  %v7903_v50 = vunpack.i.l.bf16 %v11044_v57 }
 0x78c   : > { %v4202_v42 = vsel %vm1496_vm11, %v4200_v5, %v7868_v30  ;;  %v4203_v17 = vsel %vm1496_vm11, %v4201_v32, %v7869_v21 }
 0x78d   : > { %5144 = vmatpush.bf16.msrb.mxu1 %v7030_v28  ;;  %v4204_v53 = vsel %vm638_vm0, %v4202_v42, %v7878_v54  ;;  %v11030_v44 = vsel %vm638_vm0, %v4203_v17, %v7879_v43  ;;  %v7025_v43 = vld [vmem:[%s11524_s3 + $0x8] sm:$0xff]  ;;  %v7888_v42 = vunpack.i.l.bf16 %v11015_v39 }
 0x78e   : > { %v4216_v7 = vpack.c.bf16 %v11030_v44, %v4204_v53 }
 0x790   : > { %4501 = vmatmul.bf16.vlgmr.msra.gmra.mxu1 %v4216_v7  ;;  %v7024_v7 = vld [vmem:[%s11524_s3] sm:$0xff] }
 0x791   : > { %5145 = vmatpush.bf16.msrb.mxu1 %v7029_v47  ;;  %v7882_v27 = vpop.permute.xlu1 %7881  ;;  %v11040_v48 = vpop.permute.xlu0 %7871 }
 0x792   : > { %v7884_v37 = vunpack.i.h.bf16 %v7882_v27  ;;  %v7883_v28 = vunpack.i.l.bf16 %v7882_v27  ;;  %v7873_v18 = vunpack.i.l.bf16 %v11040_v48  ;;  %v11079_v30 = vpop.permute.xlu2 %7916  ;;  %v7874_v59 = vunpack.i.h.bf16 %v11040_v48 }
 0x794   : > { %v3852_v54 = vsel %vm638_vm0, %v3850_v11, %v7883_v28  ;;  %v4937_v21 = vsel %vm1008_vm1, %v8779_v0, %v7873_v18  ;;  %v4938_v23 = vsel %vm1008_vm1, %v10686_v56, %v7874_v59  ;;  %v7904_v28 = vunpack.i.h.bf16 %v11044_v57 }
 0x795   : > { %5146 = vmatpush.bf16.msrb.mxu1 %v7028_v63  ;;  %v4945_v0 = vsel %vm1478_vm9, %v4937_v21, %v7888_v42  ;;  %v4946_v1 = vsel %vm1478_vm9, %v4938_v23, %v7889_v40 }
 0x798   : > { %5180 = vmatmul.bf16.vlgmr.msrb.gmra.mxu2 %v5004_v6  ;;  %v4976_v6 = vsel %vm638_vm0, %v4968_v29, %v7884_v37 }
 0x799   : > { %5147 = vmatpush.bf16.msrb.mxu1 %v7027_v24  ;;  %v7897_v2 = vpop.permute.xlu1 %7896  ;;  %v7892_v8 = vpop.permute.xlu0 %7891 }
 0x79a   : > { %v7894_v55 = vunpack.i.h.bf16 %v7892_v8  ;;  %v7893_v20 = vunpack.i.l.bf16 %v7892_v8  ;;  %v7898_v47 = vunpack.i.l.bf16 %v7897_v2  ;;  %v7932_v24 = vpop.permute.xlu2 %7931  ;;  %v7899_v34 = vunpack.i.h.bf16 %v7897_v2 }
 0x79b   : > { %v7933_v18 = vunpack.i.l.bf16 %v7932_v24 }
 0x79c   : > { %v3854_v32 = vsel %vm1522_vm13, %v3852_v54, %v7893_v20  ;;  %v4984_v5 = vsel %vm1522_vm13, %v4976_v6, %v7894_v55  ;;  %v4953_v63 = vsel %vm1487_vm10, %v4945_v0, %v7898_v47  ;;  %v4954_v38 = vsel %vm1487_vm10, %v4946_v1, %v7899_v34 }
 0x79d   : > { %5148 = vmatpush.bf16.msrb.mxu1 %v7026_v52  ;;  %v3862_v17 = vpack.c.bf16 %v3854_v32, %v10590_v36  ;;  %v5005_v53 = vpack.c.bf16 %v4984_v5, %v10573_v61  ;;  %v4961_v36 = vsel %vm1496_vm11, %v4953_v63, %v7903_v50  ;;  %v7918_v61 = vunpack.i.l.bf16 %v11079_v30 }
 0x79e   : > { %v4962_v8 = vsel %vm1496_vm11, %v4954_v38, %v7904_v28  ;;  %v7934_v50 = vunpack.i.h.bf16 %v7932_v24 }
 0x79f   : > { %4047 = vmatmul.bf16.gmra.mxu3 %v3862_v17 }
 0x7a1   : > { %5149 = vmatpush.bf16.msrb.mxu1 %v7025_v43  ;;  %v7912_v3 = vpop.permute.xlu1 %7911  ;;  %v7907_v62 = vpop.permute.xlu0 %7906  ;;  %v7919_v43 = vunpack.i.h.bf16 %v11079_v30 }
 0x7a2   : > { %v7913_v58 = vunpack.i.l.bf16 %v7912_v3  ;;  %v7908_v27 = vunpack.i.l.bf16 %v7907_v62  ;;  %v7909_v52 = vunpack.i.h.bf16 %v7907_v62  ;;  %v11111_v48 = vpop.permute.xlu2 %7946  ;;  %v7914_v39 = vunpack.i.h.bf16 %v7912_v3 }
 0x7a3   : > { %v7948_v20 = vunpack.i.l.bf16 %v11111_v48  ;;  %v7949_v1 = vunpack.i.h.bf16 %v11111_v48 }
 0x7a4   : > { %v4969_v41 = vsel %vm1505_vm12, %v4961_v36, %v7908_v27  ;;  %v4970_v11 = vsel %vm1505_vm12, %v4962_v8, %v7909_v52 }
 0x7a5   : > { %5150 = vmatpush.bf16.msrb.mxu1 %v7024_v7  ;;  %v4977_v35 = vsel %vm638_vm0, %v4969_v41, %v7913_v58  ;;  %v4978_v57 = vsel %vm638_vm0, %v4970_v11, %v7914_v39 }
 0x7a6   : > { %v11100_v60 = vsel %vm1522_vm13, %v4977_v35, %v7918_v61  ;;  %v4986_v32 = vsel %vm1522_vm13, %v4978_v57, %v7919_v43 }
 0x7a7   : > { %v5006_v31 = vpack.c.bf16 %v11100_v60, %v4984_v5  ;;  %v5007_v59 = vpack.c.bf16 %v4986_v32, %v11100_v60 }
 0x7a8   : > { %5151 = vmatmul.bf16.vlgmr.msrb.gmra.mxu1 %v5003_v46 }
 0x7a9   : > { %v7927_v10 = vpop.permute.xlu1 %7926  ;;  %v7922_v25 = vpop.permute.xlu0 %7921  ;;  %5185 = vmatmul.bf16.gmra.mxu2 %v5006_v31 }
 0x7aa   : > { %v7923_v12 = vunpack.i.l.bf16 %v7922_v25  ;;  %v7928_v49 = vunpack.i.l.bf16 %v7927_v10  ;;  %v7924_v47 = vunpack.i.h.bf16 %v7922_v25  ;;  %v7957_v42 = vpop.permute.xlu2 %7956 }
 0x7ab   : > { %v7958_v36 = vunpack.i.l.bf16 %v7957_v42  ;;  %v7959_v31 = vunpack.i.h.bf16 %v7957_v42  ;;  %v11157_v42 = vld [vmem:[#allocation4 + $0x2] ss:$6 sm:$0x3] }
 0x7ac   : > { %v4939_v46 = vsel %vm1008_vm1, %v10688_v26, %v7923_v12  ;;  %v4989_v0 = vsel %vm1008_vm1, %v10761_v19, %v7924_v47  ;;  %v11153_v47 = vld [vmem:[#allocation4] ss:$6 sm:$0x3] }
 0x7ad   : > { %v4947_v37 = vsel %vm1478_vm9, %v4939_v46, %v7928_v49 }
 0x7ae   : > { %v4955_v26 = vsel %vm1487_vm10, %v4947_v37, %v7933_v18 }
 0x7b1   : > { %v7942_v56 = vpop.permute.xlu1 %7941  ;;  %v7937_v15 = vpop.permute.xlu0 %7936 }
 0x7b2   : > { %v7943_v9 = vunpack.i.l.bf16 %v7942_v56  ;;  %v7938_v2 = vunpack.i.l.bf16 %v7937_v15  ;;  %v7939_v3 = vunpack.i.h.bf16 %v7937_v15 }
 0x7b4   : > { %v4963_v29 = vsel %vm1496_vm11, %v4955_v26, %v7938_v2 }
 0x7b5   : > { %v4971_v55 = vsel %vm1505_vm12, %v4963_v29, %v7943_v9 }
 0x7b6   : > { %v4979_v21 = vsel %vm638_vm0, %v4971_v55, %v7948_v20 }
 0x7b8   : > { %5156 = vmatmul.bf16.gmra.mxu1 %v5005_v53  ;;  %v7929_v53 = vunpack.i.h.bf16 %v7927_v10  ;;  %v7944_v10 = vunpack.i.h.bf16 %v7942_v56 }
 0x7b9   : > { %v7952_v54 = vpop.permute.xlu1 %7951  ;;  %v4865_v6 = vpop.permute.xlu0 %4864 }
 0x7ba   : > { %v4987_v5 = vsel %vm1522_vm13, %v4979_v21, %v4865_v6  ;;  %v7953_v7 = vunpack.i.l.bf16 %v7952_v54  ;;  %v7954_v63 = vunpack.i.h.bf16 %v7952_v54  ;;  %v4991_v30 = vsel %vm1478_vm9, %v4989_v0, %v7929_v53  ;;  %v11163_v0 = vld [vmem:[#allocation4 + $0x5] ss:$6 sm:$0x3] }
 0x7bb   : > { %v5008_v17 = vpack.c.bf16 %v4987_v5, %v4986_v32  ;;  %v4993_v24 = vsel %vm1487_vm10, %v4991_v30, %v7934_v50  ;;  %v11155_v32 = vld [vmem:[#allocation4 + $0x1] ss:$6 sm:$0x3] }
 0x7bc   : > { %v4990_v62 = vsel %vm1008_vm1, %v10763_v16, %v7953_v7  ;;  %v4940_v61 = vsel %vm1008_vm1, %v10761_v19, %v7954_v63  ;;  %v4995_v23 = vsel %vm1496_vm11, %v4993_v24, %v7939_v3  ;;  %v7972_v16 = vpop.permute.xlu2 %7971  ;;  %v11161_v7 = vld [vmem:[#allocation4 + $0x4] ss:$6 sm:$0x3] }
 0x7bd   : > { %5190 = vmatmul.bf16.gmra.mxu2 %v5008_v17  ;;  %v4992_v12 = vsel %vm1478_vm9, %v4990_v62, %v7958_v36  ;;  %v4948_v49 = vsel %vm1478_vm9, %v4940_v61, %v7959_v31  ;;  %v4997_v46 = vsel %vm1505_vm12, %v4995_v23, %v7944_v10  ;;  %v7974_v38 = vunpack.i.h.bf16 %v7972_v16  ;;  %v11159_v17 = vld [vmem:[#allocation4 + $0x3] ss:$6 sm:$0x3]  ;;  %v8058_v23 = vld [vmem:[%s11525_s4] ss:$0 sm:$0xff] }
 0x7be   : > { %v7973_v52 = vunpack.i.l.bf16 %v7972_v16  ;;  %v4999_v8 = vsel %vm638_vm0, %v4997_v46, %v7949_v1 }
 0x7c1   : > { %v7967_v58 = vpop.permute.xlu1 %7966  ;;  %v7962_v27 = vpop.permute.xlu0 %7961 }
 0x7c2   : > { %v7964_v41 = vunpack.i.h.bf16 %v7962_v27  ;;  %v7963_v35 = vunpack.i.l.bf16 %v7962_v27  ;;  %v7968_v25 = vunpack.i.l.bf16 %v7967_v58  ;;  %v7969_v34 = vunpack.i.h.bf16 %v7967_v58  ;;  %v8051_v58 = vld [vmem:[%s11527_s6] ss:$0 sm:$0xff] }
 0x7c4   : > { %v4994_v40 = vsel %vm1487_vm10, %v4992_v12, %v7963_v35  ;;  %v4956_v19 = vsel %vm1487_vm10, %v4948_v49, %v7964_v41  ;;  %v4867_v57 = vpop.permute.xlu2 %4866  ;;  %v11178_v12 = vld [vmem:[%s11525_s4] ss:$0 sm:$0xff] }
 0x7c5   : > { %v4996_v60 = vsel %vm1496_vm11, %v4994_v40, %v7968_v25  ;;  %v4964_v37 = vsel %vm1496_vm11, %v4956_v19, %v7969_v34 }
 0x7c6   : > { %v4998_v39 = vsel %vm1505_vm12, %v4996_v60, %v7973_v52  ;;  %v4972_v26 = vsel %vm1505_vm12, %v4964_v37, %v7974_v38 }
 0x7c8   : > { %5161 = vmatmul.bf16.gmra.mxu1 %v5007_v59 }
 0x7c9   : > { %v7982_v28 = vpop.permute.xlu1 %7981  ;;  %v7977_v18 = vpop.permute.xlu0 %7976 }
 0x7ca   : > { %v7984_v56 = vunpack.i.h.bf16 %v7982_v28  ;;  %v7983_v15 = vunpack.i.l.bf16 %v7982_v28  ;;  %v7979_v9 = vunpack.i.h.bf16 %v7977_v18  ;;  %v7978_v2 = vunpack.i.l.bf16 %v7977_v18 }
 0x7cc   : > { %v5000_v11 = vsel %vm638_vm0, %v4998_v39, %v7978_v2  ;;  %v5001_v48 = vsel %vm1522_vm13, %v4999_v8, %v7983_v15  ;;  %v4980_v29 = vsel %vm638_vm0, %v4972_v26, %v7979_v9 }
 0x7cd   : > { %v5002_v55 = vsel %vm1522_vm13, %v5000_v11, %v7984_v56  ;;  %v4988_v43 = vsel %vm1522_vm13, %v4980_v29, %v4867_v57 }
 0x7ce   : > { %v5010_v20 = vpack.c.bf16 %v5002_v55, %v5001_v48  ;;  %v5009_v54 = vpack.c.bf16 %v4988_v43, %v4987_v5 }
 0x7d0   : > { %5195 = vmatmul.bf16.gmra.mxu2 %v5010_v20 }
 0x7d8   : > { %5166 = vmatmul.bf16.gmra.mxu1 %v5009_v54 }
 0x7e5   : > { %v3382_v6 = vpop.f32.mrf.mxu1 }
 0x7e6   : > { %v3383_v21 = vadd.f32 %v3382_v6, %v10597_v51 }
 0x7e8   : > { %v3387_v53 = vmax.f32 %v3383_v21, 0.0 }
 0x7ea   : > { %3389 = vst.msk [vmem:[#allocation4] sm:$0xff] %vm1496_vm11, %v3387_v53 }
 0x7ed   : > { %v3384_v5 = vpop.f32.mrf.mxu1  ;;  %v4019_v51 = vpop.f32.mrf.mxu2 }
 0x7ee   : > { %v3385_v63 = vadd.f32 %v3384_v5, %v10599_v22  ;;  %v4020_v16 = vadd.f32 %v8058_v23, %v4019_v51 }
 0x7f0   : > { %v3388_v50 = vmax.f32 %v3385_v63, 0.0 }
 0x7f2   : > { %3390 = vst.msk [vmem:[#allocation4 + $0x8] sm:$0x1f] %vm2236_vm14, %v3388_v50 }
 0x7f5   : > { %v4488_v30 = vpop.f32.mrf.mxu1  ;;  %v4021_v3 = vpop.f32.mrf.mxu2 }
 0x7f6   : > { %v4489_v36 = vadd.f32 %v8051_v58, %v4488_v30 }
 0x7fd   : > { %v4490_v62 = vpop.f32.mrf.mxu1 }
 0x7fe   : > { %v4491_v59 = vadd.f32 %v8051_v58, %v4490_v62 }
 0x80b   : > { %v4516_v27 = vpop.f32.mrf.mxu2 }
 0x80d   : > { %v4502_v61 = vpop.f32.mrf.mxu1 }
 0x80e   : > { %v4503_v41 = vadd.f32 %v4502_v61, %v4489_v36 }
 0x810   : > { %v11171_v35 = vadd.f32 %v4516_v27, %v4503_v41 }
 0x813   : > { %v4518_v31 = vpop.f32.mrf.mxu2 }
 0x815   : > { %v4504_v22 = vpop.f32.mrf.mxu1 }
 0x816   : > { %v4505_v10 = vadd.f32 %v4504_v22, %v4491_v59 }
 0x818   : > { %v11173_v24 = vadd.f32 %v4518_v31, %v4505_v10 }
 0x81b   : > { %v5181_v25 = vpop.f32.mrf.mxu2 }
 0x822   : > { %v4048_v49 = vpop.f32.mrf.mxu3 }
 0x823   : > { %v4049_v19 = vadd.f32 %v4048_v49, %v4020_v16  ;;  %v5183_v1 = vpop.f32.mrf.mxu2 }
 0x825   : > { %v5152_v34 = vpop.f32.mrf.mxu1  ;;  %v4059_v60 = vmax.f32 %v4049_v19, 0.0 }
 0x826   : > { %v5153_v40 = vadd.f32 %v11178_v12, %v5152_v34 }
 0x827   : > { %4067 = vst.msk [vmem:[#allocation3 + $0x30] sm:$0xff] %vm1478_vm9, %v4059_v60 }
 0x828   : > { %v5182_v46 = vadd.f32 %v5181_v25, %v5153_v40 }
 0x82a   : > { %v5201_v38 = vmax.f32 %v5182_v46, 0.0  ;;  %v4050_v37 = vpop.f32.mrf.mxu3 }
 0x82c   : > { %5209 = vst.msk [vmem:[#allocation3] sm:$0xff] %vm1478_vm9, %v5201_v38  ;;  %v5186_v15 = vpop.f32.mrf.mxu2 }
 0x82d   : > { %v5154_v52 = vpop.f32.mrf.mxu1 }
 0x82e   : > { %v5155_v28 = vadd.f32 %v11178_v12, %v5154_v52  ;;  %v4072_v20 = vld [vmem:[#allocation3 + $0x30] ss:$2 sm:$0xf]  ;;  %v4076_v57 = vld [vmem:[#allocation3 + $0x31] ss:$2 sm:$0xf] }
 0x82f   : > { %v11193_v21 = vmax.f32 %v4072_v20, %v4076_v57 }
 0x830   : > { %v5184_v18 = vadd.f32 %v5183_v1, %v5155_v28 }
 0x831   : > { %v4189_v30 = vrot.slane %v11193_v21, 7  ;;  %v4184_v58 = vrot.slane %v11193_v21, 6  ;;  %v4179_v27 = vrot.slane %v11193_v21, 5 }
 0x832   : > { %v5202_v56 = vmax.f32 %v5184_v18, 0.0 }
 0x833   : > { %v4190_v34 = vsel %vm1373_vm8, %v4143_v45, %v4189_v30  ;;  %v4185_v49 = vsel %vm1333_vm7, %v4132_v33, %v4184_v58  ;;  %v4180_v40 = vsel %vm1293_vm2, %v4121_v4, %v4179_v27  ;;  %v7020_v30 = vld [vmem:[%s11526_s5 + $0xe0] sm:$0xff]  ;;  %v7019_v58 = vld [vmem:[%s11526_s5 + $0xd8] sm:$0xff] }
 0x834   : > { %5210 = vst.msk [vmem:[#allocation3 + $0x8] sm:$0xff] %vm1478_vm9, %v5202_v56  ;;  %v5188_v26 = vpop.f32.mrf.mxu2 }
 0x835   : > { %v5157_v9 = vpop.f32.mrf.mxu1 }
 0x836   : > { %v5158_v2 = vadd.f32 %v11178_v12, %v5157_v9 }
 0x838   : > { %v5187_v39 = vadd.f32 %v5186_v15, %v5158_v2  ;;  %v7023_v15 = vld [vmem:[%s11526_s5 + $0xf8] sm:$0xff] }
 0x839   : > { %4521 = vmatpush.bf16.msra.mxu3 %v7023_v15 }
 0x83a   : > { %v5203_v8 = vmax.f32 %v5187_v39, 0.0 }
 0x83b   : > { %v5217_v53 = vld [vmem:[#allocation3] ss:$2 sm:$0xff]  ;;  %v5221_v5 = vld [vmem:[#allocation3 + $0x1] ss:$2 sm:$0xff] }
 0x83c   : > { %5211 = vst.msk [vmem:[#allocation3 + $0x10] sm:$0xff] %vm1478_vm9, %v5203_v8  ;;  %v11195_v50 = vmax.f32 %v5217_v53, %v5221_v5 }
 0x83d   : > { %v5159_v11 = vpop.f32.mrf.mxu1 }
 0x83e   : > { %v5160_v48 = vadd.f32 %v11178_v12, %v5159_v11  ;;  %v5249_v41 = vrot.slane %v11195_v50, 3  ;;  %v5240_v31 = vrot.slane %v11195_v50, 2  ;;  %v5231_v59 = vrot.slane %v11195_v50, 1 }
 0x83f   : > { %v5288_v18 = vrot.slane %v11195_v50, 7  ;;  %v5277_v56 = vrot.slane %v11195_v50, 6  ;;  %v5266_v2 = vrot.slane %v11195_v50, 5 }
 0x840   : > { %v5189_v29 = vadd.f32 %v5188_v26, %v5160_v48  ;;  %v5191_v43 = vpop.f32.mrf.mxu2  ;;  %v7022_v48 = vld [vmem:[%s11526_s5 + $0xf0] sm:$0xff] }
 0x841   : > { %4522 = vmatpush.bf16.msra.mxu3 %v7022_v48  ;;  %v7070_v48 = vld [vmem:[%s11526_s5 + $0xf0] sm:$0xff] }
 0x842   : > { %v5204_v55 = vmax.f32 %v5189_v29, 0.0 }
 0x844   : > { %5212 = vst.msk [vmem:[#allocation3 + $0x18] sm:$0xff] %vm1478_vm9, %v5204_v55 }
 0x845   : > { %v5162_v54 = vpop.f32.mrf.mxu1 }
 0x846   : > { %v5163_v6 = vadd.f32 %v11178_v12, %v5162_v54  ;;  %v7021_v54 = vld [vmem:[%s11526_s5 + $0xe8] sm:$0xff] }
 0x847   : > { %4523 = vmatpush.bf16.msra.mxu3 %v7021_v54  ;;  %v7041_v54 = vld [vmem:[%s11526_s5 + $0x8] sm:$0xff] }
 0x848   : > { %v5192_v63 = vadd.f32 %v5191_v43, %v5163_v6  ;;  %v5193_v22 = vpop.f32.mrf.mxu2 }
 0x84a   : > { %v5205_v51 = vmax.f32 %v5192_v63, 0.0 }
 0x84b   : > { %v5218_v3 = vld [vmem:[#allocation3 + $0x10] ss:$2 sm:$0xff]  ;;  %v5222_v62 = vld [vmem:[#allocation3 + $0x11] ss:$2 sm:$0xff]  ;;  %4524 = vmatpush.bf16.msra.mxu3 %v7020_v30 }
 0x84c   : > { %5213 = vst.msk [vmem:[#allocation3 + $0x20] sm:$0xff] %vm1478_vm9, %v5205_v51  ;;  %v11201_v36 = vmax.f32 %v5218_v3, %v5222_v62  ;;  %v7059_v30 = vld [vmem:[%s11526_s5 + $0x98] sm:$0xff] }
 0x84d   : > { %v5164_v61 = vpop.f32.mrf.mxu1 }
 0x84e   : > { %v5165_v10 = vadd.f32 %v11178_v12, %v5164_v61  ;;  %v11208_v25 = vrot.slane %v11201_v36, 3  ;;  %v11211_v23 = vrot.slane %v11201_v36, 2  ;;  %v11214_v16 = vrot.slane %v11201_v36, 1 }
 0x84f   : > { %v5289_v33 = vrot.slane %v11201_v36, 7  ;;  %v5278_v28 = vrot.slane %v11201_v36, 6  ;;  %v5267_v4 = vrot.slane %v11201_v36, 5  ;;  %4525 = vmatpush.bf16.msra.mxu3 %v7019_v58  ;;  %v7065_v58 = vld [vmem:[%s11526_s5 + $0xc8] sm:$0xff] }
 0x850   : > { %v5194_v19 = vadd.f32 %v5193_v22, %v5165_v10  ;;  %v5251_v46 = vsel %vm1213_vm3, %v5249_v41, %v11208_v25  ;;  %v5242_v60 = vsel %vm1173_vm6, %v5240_v31, %v11211_v23  ;;  %v5233_v1 = vsel %vm1133_vm4, %v5231_v59, %v11214_v16 }
 0x851   : > { %v7995_v38 = vpack.i.bf16 %v5251_v46, %v4190_v34  ;;  %v7990_v45 = vpack.i.bf16 %v5242_v60, %v4185_v49  ;;  %v7985_v52 = vpack.i.bf16 %v5233_v1, %v4180_v40  ;;  %v5290_v26 = vsel %vm1373_vm8, %v5288_v18, %v5289_v33  ;;  %v7018_v34 = vld [vmem:[%s11526_s5 + $0xd0] sm:$0xff] }
 0x852   : > { %v5206_v37 = vmax.f32 %v5194_v19, 0.0  ;;  %v5279_v11 = vsel %vm1333_vm7, %v5277_v56, %v5278_v28  ;;  %v5268_v29 = vsel %vm1293_vm2, %v5266_v2, %v5267_v4  ;;  %v8010_v20 = vpack.i.bf16 %v5290_v26, %v11208_v25  ;;  %v7046_v26 = vld [vmem:[%s11526_s5 + $0x30] sm:$0xff] }
 0x853   : > { %7996 = vrot.lane.b32.xlu2 %v7995_v38, %s11605_s16  ;;  %7991 = vrot.lane.b32.xlu1 %v7990_v45, %s11606_s25  ;;  %v5196_v8 = vpop.f32.mrf.mxu2  ;;  %v8005_v57 = vpack.i.bf16 %v5279_v11, %v11211_v23  ;;  %v7045_v11 = vld [vmem:[%s11526_s5 + $0x28] sm:$0xff] }
 0x854   : > { %5214 = vst.msk [vmem:[#allocation3 + $0x28] sm:$0xff] %vm1478_vm9, %v5206_v37  ;;  %7986 = vrot.lane.b32.xlu0 %v7985_v52, %s11607_s27  ;;  %4526 = vmatpush.bf16.msra.mxu3 %v7018_v34 }
 0x855   : > { %v5167_v9 = vpop.f32.mrf.mxu1 }
 0x856   : > { %v5168_v39 = vadd.f32 %v11178_v12, %v5167_v9  ;;  %v8000_v12 = vpack.i.bf16 %v5268_v29, %v11214_v16  ;;  %v7062_v29 = vld [vmem:[%s11526_s5 + $0xb0] sm:$0xff] }
 0x858   : > { %v5197_v55 = vadd.f32 %v5196_v8, %v5168_v39  ;;  %v7063_v8 = vld [vmem:[%s11526_s5 + $0xb8] sm:$0xff] }
 0x859   : > { %5655 = vmatpush.bf16.msra.mxu1 %v7063_v8 }
 0x85a   : > { %v5207_v43 = vmax.f32 %v5197_v55, 0.0  ;;  %v7069_v55 = vld [vmem:[%s11526_s5 + $0xe8] sm:$0xff] }
 0x85b   : > { %8011 = vrot.lane.b32.xlu2 %v8010_v20, %s11605_s16  ;;  %8006 = vrot.lane.b32.xlu1 %v8005_v57, %s11606_s25  ;;  %v5219_v6 = vld [vmem:[#allocation3 + $0x20] ss:$2 sm:$0xff]  ;;  %v5223_v53 = vld [vmem:[#allocation3 + $0x21] ss:$2 sm:$0xff]  ;;  %v5198_v63 = vpop.f32.mrf.mxu2 }
 0x85c   : > { %5215 = vst.msk [vmem:[#allocation3 + $0x30] sm:$0xff] %vm1478_vm9, %v5207_v43  ;;  %8001 = vrot.lane.b32.xlu0 %v8000_v12, %s11607_s27  ;;  %v11261_v51 = vmax.f32 %v5219_v6, %v5223_v53  ;;  %v7044_v20 = vld [vmem:[%s11526_s5 + $0x20] sm:$0xff]  ;;  %v7061_v57 = vld [vmem:[%s11526_s5 + $0xa8] sm:$0xff]  ;;  %v7043_v43 = vld [vmem:[%s11526_s5 + $0x18] sm:$0xff] }
 0x85d   : > { %v5169_v5 = vpop.f32.mrf.mxu1  ;;  %5656 = vmatpush.bf16.msra.mxu1 %v7062_v29  ;;  %v7042_v12 = vld [vmem:[%s11526_s5 + $0x10] sm:$0xff]  ;;  %v7068_v6 = vld [vmem:[%s11526_s5 + $0xe0] sm:$0xff]  ;;  %v7067_v63 = vld [vmem:[%s11526_s5 + $0xd8] sm:$0xff] }
 0x85e   : > { %v5291_v3 = vrot.slane %v11261_v51, 7  ;;  %v5280_v62 = vrot.slane %v11261_v51, 6  ;;  %v5269_v31 = vrot.slane %v11261_v51, 5  ;;  %v5315_v37 = vrot.slane %v11261_v51, 3  ;;  %v7060_v53 = vld [vmem:[%s11526_s5 + $0xa0] sm:$0xff] }
 0x85f   : > { %v5307_v18 = vrot.slane %v11261_v51, 2  ;;  %v7040_v5 = vld [vmem:[%s11526_s5] sm:$0xff]  ;;  %v5262_v29 = vrot.slane %v11261_v51, 4 }
 0x860   : > { %v5292_v49 = vsel %vm1373_vm8, %v5289_v33, %v5291_v3  ;;  %v5281_v40 = vsel %vm1333_vm7, %v5278_v28, %v5280_v62  ;;  %v5270_v60 = vsel %vm1293_vm2, %v5267_v4, %v5269_v31  ;;  %v7017_v33 = vld [vmem:[%s11526_s5 + $0xc8] sm:$0xff]  ;;  %v5299_v28 = vrot.slane %v11261_v51, 1 }
 0x861   : > { %v5316_v4 = vsel %vm1213_vm3, %v11208_v25, %v5315_v37  ;;  %v5308_v56 = vsel %vm1173_vm6, %v11211_v23, %v5307_v18  ;;  %4527 = vmatpush.bf16.msra.mxu3 %v7017_v33  ;;  %v7016_v25 = vld [vmem:[%s11526_s5 + $0xc0] sm:$0xff]  ;;  %v7047_v23 = vld [vmem:[%s11526_s5 + $0x38] sm:$0xff]  ;;  %5657 = vmatpush.bf16.msra.mxu1 %v7061_v57  ;;  %v5260_v57 = vrot.slane %v11201_v36, 4 }
 0x862   : > { %v5300_v15 = vsel %vm1133_vm4, %v11214_v16, %v5299_v28  ;;  %v8040_v9 = vpack.i.bf16 %v5315_v37, %v5316_v4  ;;  %v8035_v2 = vpack.i.bf16 %v5307_v18, %v5308_v56  ;;  %v7071_v16 = vld [vmem:[%s11526_s5 + $0xf8] sm:$0xff]  ;;  %v7054_v37 = vld [vmem:[%s11526_s5 + $0x70] sm:$0xff] }
 0x863   : > { %v5220_v27 = vld [vmem:[#allocation3 + $0x30] ss:$2 sm:$0xf]  ;;  %v5224_v61 = vld [vmem:[#allocation3 + $0x31] ss:$2 sm:$0xf]  ;;  %v8030_v39 = vpack.i.bf16 %v5299_v28, %v5300_v15  ;;  %5669 = vmatpush.bf16.msra.mxu2 %v7071_v16 }
 0x864   : > { %v11271_v41 = vmax.f32 %v5220_v27, %v5224_v61  ;;  %v4176_v27 = vrot.slane %v11193_v21, 4  ;;  %v7057_v61 = vld [vmem:[%s11526_s5 + $0x88] sm:$0xff] }
 0x865   : > { %4528 = vmatpush.bf16.msra.mxu3 %v7016_v25  ;;  %5658 = vmatpush.bf16.msra.mxu1 %v7060_v53  ;;  %v7053_v28 = vld [vmem:[%s11526_s5 + $0x68] sm:$0xff] }
 0x866   : > { %v5337_v59 = vrot.slane %v11271_v41, 7  ;;  %v5332_v22 = vrot.slane %v11271_v41, 6  ;;  %v5327_v10 = vrot.slane %v11271_v41, 5 }
 0x867   : > { %5670 = vmatpush.bf16.msra.mxu2 %v7070_v48 }
 0x868   : > { %v5338_v19 = vsel %vm1373_vm8, %v5291_v3, %v5337_v59  ;;  %v5333_v46 = vsel %vm1333_vm7, %v5280_v62, %v5332_v22  ;;  %v5328_v1 = vsel %vm1293_vm2, %v5269_v31, %v5327_v10  ;;  %v7066_v3 = vld [vmem:[%s11526_s5 + $0xd0] sm:$0xff]  ;;  %v7064_v59 = vld [vmem:[%s11526_s5 + $0xc0] sm:$0xff] }
 0x869   : > { %v8025_v38 = vpack.i.bf16 %v5338_v19, %v5292_v49  ;;  %v8020_v45 = vpack.i.bf16 %v5333_v46, %v5281_v40  ;;  %v8015_v52 = vpack.i.bf16 %v5328_v1, %v5270_v60  ;;  %5627 = vmatpush.bf16.msrb.mxu3 %v7047_v23  ;;  %5659 = vmatpush.bf16.msra.mxu1 %v7059_v30  ;;  %v7058_v62 = vld [vmem:[%s11526_s5 + $0x90] sm:$0xff]  ;;  %v7055_v1 = vld [vmem:[%s11526_s5 + $0x78] sm:$0xff] }
 0x86a   : > { %v4177_v40 = vsel %vm1253_vm5, %v4114_v13, %v4176_v27  ;;  %v5263_v30 = vsel %vm1253_vm5, %v5260_v57, %v5262_v29 }
 0x86b   : > { %8026 = vrot.lane.b32.xlu2 %v8025_v38, %s11605_s16  ;;  %8021 = vrot.lane.b32.xlu1 %v8020_v45, %s11606_s25 }
 0x86c   : > { %8016 = vrot.lane.b32.xlu0 %v8015_v52, %s11607_s27  ;;  %5671 = vmatpush.bf16.msra.mxu2 %v7069_v55  ;;  %v5324_v55 = vrot.slane %v11271_v41, 4 }
 0x86d   : > { %5628 = vmatpush.bf16.msrb.mxu3 %v7046_v26  ;;  %5660 = vmatpush.bf16.msra.mxu1 %v7058_v62  ;;  %v7051_v26 = vld [vmem:[%s11526_s5 + $0x58] sm:$0xff] }
 0x870   : > { %5672 = vmatpush.bf16.msra.mxu2 %v7068_v6 }
 0x871   : > { %5629 = vmatpush.bf16.msrb.mxu3 %v7045_v11  ;;  %5661 = vmatpush.bf16.msra.mxu1 %v7057_v61  ;;  %v5259_v61 = vrot.slane %v11195_v50, 4 }
 0x873   : > { %8041 = vrot.lane.b32.xlu2 %v8040_v9, %s11605_s16  ;;  %8036 = vrot.lane.b32.xlu1 %v8035_v2, %s11606_s25  ;;  %s324_s16 = sand.u32 1, %s8113_s10   ;;  %s6835_s25 = sshll.u32 %s8201_s13, 3 }
 0x874   : > { %8031 = vrot.lane.b32.xlu0 %v8030_v39, %s11607_s27  ;;  %5673 = vmatpush.bf16.msra.mxu2 %v7067_v63  ;;  %v7052_v39 = vld [vmem:[%s11526_s5 + $0x60] sm:$0xff]  ;;  %s5843_s27 = sshll.u32 %s324_s16, 3  ;;  %s5775_s29 = scalar_lea.hbm %s11530_s9, %s6835_s25 }
 0x875   : > { %5630 = vmatpush.bf16.msrb.mxu3 %v7044_v20  ;;  %5662 = vmatpush.bf16.msra.mxu1 %v7056_v14  ;;  %s326_s11 = scalar_lea.vmem [#allocation5], %s5843_s27  ;;  %s5779_s21 = sshll.u32 %s5775_s29, 4  ;;  %s5780_s21 = int_to_ptr.hbm [resolvable:$true] %s5779_s21 }
 0x876   : > { %s5777_s23 = sshll.u32 %s326_s11, 4  ;;  %s5765_s13 = scalar_lea.sflag [#allocation6], %s324_s16  ;;  %s5778_s23 = int_to_ptr.vmem [resolvable:$true] %s5777_s23 }
 0x877   : > { %s8073_s0 = sshra.s32 %s5780_s21, 4  ;;  %s8074_s0 = int_to_ptr.hbm [resolvable:$true] %s8073_s0 }
 0x878   : > { %5674 = vmatpush.bf16.msra.mxu2 %v7066_v3  ;;  %v5325_v3 = vsel %vm1253_vm5, %v5262_v29, %v5324_v55  ;;  %v11452_v29 = vld [vmem:[#allocation4 + $0x5] ss:$6 sm:$0x3]  ;;  %s8075_s1 = scalar_lea.hbm %s8074_s0, 8  ;;  %p8080_p0 = scmp.lt.s32.totalorder %s8074_s0, %s11530_s9 }
 0x879   : > { %5631 = vmatpush.bf16.msrb.mxu3 %v7043_v43  ;;  %p8076_p11 = scmp.ne.s32.totalorder %s8074_s0, %s8075_s1  ;;  %p8081_p1 = scmp.lt.s32.totalorder %s8079_s22, %s8075_s1 }
 0x87b   : > { %p8077_p12 = pnand %p8076_p11, %p8218_p5  ;;  %p8082_p2 = por %p8081_p1, %p8080_p0 }
 0x87c   : > { %5675 = vmatpush.bf16.msra.mxu2 %v7065_v58 }
 0x87d   : > { %5632 = vmatpush.bf16.msrb.mxu3 %v7042_v12  ;;  %p8078_p13 = pneg %p8077_p12 }
 0x87f   : > { %p8083_p3 = pnand %p8082_p2, %p8078_p13 }
 0x880   : > { %5676 = vmatpush.bf16.msra.mxu2 %v7064_v59 }
 0x881   : > { %5633 = vmatpush.bf16.msrb.mxu3 %v7041_v54 }
 0x885   : > { %5634 = vmatpush.bf16.msrb.mxu3 %v7040_v5  ;;  %v7050_v5 = vld [vmem:[%s11526_s5 + $0x50] sm:$0xff] }
 0x8ad   : > { %v7997_v22 = vpop.permute.xlu2 %7996 }
 0x8ae   : > { %v7998_v21 = vunpack.i.l.bf16 %v7997_v22  ;;  %v7999_v23 = vunpack.i.h.bf16 %v7997_v22 }
 0x8b5   : > { %v11401_v4 = vpop.permute.xlu2 %8011 }
 0x8b6   : > { %v8013_v2 = vunpack.i.l.bf16 %v11401_v4 }
 0x8c5   : > { %v7992_v31 = vpop.permute.xlu1 %7991  ;;  %v8027_v11 = vpop.permute.xlu2 %8026 }
 0x8c6   : > { %v7993_v10 = vunpack.i.l.bf16 %v7992_v31  ;;  %v7987_v34 = vpop.permute.xlu0 %7986  ;;  %v7994_v56 = vunpack.i.h.bf16 %v7992_v31  ;;  %v8029_v63 = vunpack.i.h.bf16 %v8027_v11  ;;  %v8028_v41 = vunpack.i.l.bf16 %v8027_v11  ;;  %v3396_v11 = vld [vmem:[#allocation4 + $0x3] ss:$6 sm:$0x3] }
 0x8c7   : > { %v7988_v49 = vunpack.i.l.bf16 %v7987_v34  ;;  %v7989_v18 = vunpack.i.h.bf16 %v7987_v34  ;;  %v7049_v34 = vld [vmem:[%s11526_s5 + $0x48] sm:$0xff] }
 0x8c9   : > { %v4212_v19 = vsel %vm1478_vm9, %v4177_v40, %v7988_v49  ;;  %v5342_v15 = vsel %vm1478_vm9, %v11195_v50, %v7989_v18  ;;  %v5261_v40 = vsel %vm1253_vm5, %v5259_v61, %v5260_v57 }
 0x8ca   : > { %v4213_v46 = vsel %vm1496_vm11, %v4212_v19, %v7993_v10  ;;  %v5344_v25 = vsel %vm1496_vm11, %v5342_v15, %v7994_v56 }
 0x8cb   : > { %v4214_v60 = vsel %vm638_vm0, %v4213_v46, %v7998_v21  ;;  %v5346_v8 = vsel %vm638_vm0, %v5344_v25, %v7999_v23 }
 0x8cc   : > { %v4218_v38 = vpack.c.bf16 %v4214_v60, %v11030_v44 }
 0x8cd   : > { %v11390_v13 = vpop.permute.xlu1 %8006  ;;  %v8042_v46 = vpop.permute.xlu2 %8041 }
 0x8ce   : > { %v8002_v45 = vpop.permute.xlu0 %8001  ;;  %4529 = vmatmul.bf16.vlgmr.msra.gmra.mxu3 %v4218_v38  ;;  %v8008_v33 = vunpack.i.l.bf16 %v11390_v13  ;;  %v8009_v49 = vunpack.i.h.bf16 %v11390_v13  ;;  %v8014_v13 = vunpack.i.h.bf16 %v11401_v4  ;;  %v8044_v18 = vunpack.i.h.bf16 %v8042_v46 }
 0x8cf   : > { %v8003_v52 = vunpack.i.l.bf16 %v8002_v45  ;;  %5641 = vmatpush.bf16.msra.mxu3 %v7055_v1  ;;  %v8004_v62 = vunpack.i.h.bf16 %v8002_v45 }
 0x8d1   : > { %v5343_v44 = vsel %vm1478_vm9, %v11201_v36, %v8003_v52  ;;  %v5348_v50 = vsel %vm1478_vm9, %v5261_v40, %v8004_v62  ;;  %v7048_v52 = vld [vmem:[%s11526_s5 + $0x40] sm:$0xff] }
 0x8d2   : > { %v5345_v9 = vsel %vm1496_vm11, %v5343_v44, %v8008_v33  ;;  %v8043_v33 = vunpack.i.l.bf16 %v8042_v46 }
 0x8d3   : > { %5642 = vmatpush.bf16.msra.mxu3 %v7054_v37  ;;  %v5347_v16 = vsel %vm638_vm0, %v5345_v9, %v8013_v2  ;;  %v5350_v37 = vsel %vm1496_vm11, %v5348_v50, %v8009_v49 }
 0x8d4   : > { %v5363_v48 = vpack.c.bf16 %v5347_v16, %v5346_v8  ;;  %v5352_v9 = vsel %vm638_vm0, %v5350_v37, %v8014_v13  ;;  %v3391_v16 = vld [vmem:[#allocation4] ss:$6 sm:$0x3]  ;;  %v3394_v8 = vld [vmem:[#allocation4 + $0x2] ss:$6 sm:$0x3]  ;;  %v2241_v13 = vmax.f32 %v11153_v47, %v11155_v32 }
 0x8d7   : > { %5643 = vmatpush.bf16.msra.mxu3 %v7053_v28 }
 0x8db   : > { %5644 = vmatpush.bf16.msra.mxu3 %v7052_v39 }
 0x8dd   : > { %v8022_v20 = vpop.permute.xlu1 %8021 }
 0x8de   : > { %v8024_v43 = vunpack.i.h.bf16 %v8022_v20  ;;  %v8023_v12 = vunpack.i.l.bf16 %v8022_v20  ;;  %v8017_v54 = vpop.permute.xlu0 %8016  ;;  %5635 = vmatmul.bf16.vlgmr.msrb.gmra.mxu3 %v5363_v48  ;;  %v3398_v48 = vld [vmem:[#allocation4 + $0x4] ss:$6 sm:$0x3] }
 0x8df   : > { %v8019_v6 = vunpack.i.h.bf16 %v8017_v54  ;;  %v8018_v53 = vunpack.i.l.bf16 %v8017_v54  ;;  %5645 = vmatpush.bf16.msra.mxu3 %v7051_v26  ;;  %v7073_v54 = vld [vmem:[%s11528_s7 + $0x8] sm:$0xff] }
 0x8e1   : > { %v5360_v58 = vsel %vm1478_vm9, %v5325_v3, %v8019_v6  ;;  %v5349_v27 = vsel %vm1478_vm9, %v5263_v30, %v8018_v53  ;;  %v8053_v53 = vld [vmem:[%s11527_s6] ss:$0 sm:$0xff] }
 0x8e2   : > { %v5361_v31 = vsel %vm1496_vm11, %v5360_v58, %v8024_v43  ;;  %v5351_v59 = vsel %vm1496_vm11, %v5349_v27, %v8023_v12  ;;  %v7074_v12 = vld [vmem:[%s11528_s7 + $0x10] sm:$0xff] }
 0x8e3   : > { %v5362_v22 = vsel %vm638_vm0, %v5361_v31, %v8029_v63  ;;  %v5353_v10 = vsel %vm638_vm0, %v5351_v59, %v8028_v41  ;;  %5646 = vmatpush.bf16.msra.mxu3 %v7050_v5 }
 0x8e4   : > { %v5366_v21 = vpack.c.bf16 %v5362_v22, %v5353_v10  ;;  %v5364_v39 = vpack.c.bf16 %v5353_v10, %v5352_v9 }
 0x8e5   : > { %v8037_v19 = vpop.permute.xlu1 %8036 }
 0x8e6   : > { %v8039_v60 = vunpack.i.h.bf16 %v8037_v19  ;;  %v8038_v1 = vunpack.i.l.bf16 %v8037_v19  ;;  %v8032_v38 = vpop.permute.xlu0 %8031  ;;  %5677 = vmatmul.bf16.vlgmr.msra.gmra.mxu2 %v5366_v21 }
 0x8e7   : > { %v8034_v14 = vunpack.i.h.bf16 %v8032_v38  ;;  %v8033_v45 = vunpack.i.l.bf16 %v8032_v38  ;;  %5647 = vmatpush.bf16.msra.mxu3 %v7049_v34 }
 0x8e9   : > { %v5355_v44 = vsel %vm1478_vm9, %v11261_v51, %v8034_v14  ;;  %v5354_v28 = vsel %vm1478_vm9, %v11201_v36, %v8033_v45  ;;  %v3392_v36 = vld [vmem:[#allocation4 + $0x1] ss:$6 sm:$0x3] }
 0x8ea   : > { %v5357_v56 = vsel %vm1496_vm11, %v5355_v44, %v8039_v60  ;;  %v5356_v15 = vsel %vm1496_vm11, %v5354_v28, %v8038_v1  ;;  %v3393_v46 = vmax.f32 %v3391_v16, %v3392_v36 }
 0x8eb   : > { %v5359_v2 = vsel %vm638_vm0, %v5357_v56, %v8044_v18  ;;  %v5358_v4 = vsel %vm638_vm0, %v5356_v15, %v8043_v33  ;;  %5648 = vmatpush.bf16.msra.mxu3 %v7048_v52  ;;  %v2244_v33 = vmax.f32 %v2241_v13, %v11157_v42 }
 0x8ec   : > { %v5365_v25 = vpack.c.bf16 %v5359_v2, %v5358_v4  ;;  %v3395_v14 = vmax.f32 %v3393_v46, %v3394_v8 }
 0x8ed   : > { %v2247_v9 = vmax.f32 %v2244_v33, %v11159_v17 }
 0x8ee   : > { %5649 = vmatmul.bf16.vlgmr.msra.gmra.mxu3 %v5364_v39  ;;  %5663 = vmatmul.bf16.vlgmr.msra.gmra.mxu1 %v5365_v25  ;;  %v3397_v37 = vmax.f32 %v3395_v14, %v3396_v11 }
 0x8ef   : > { %v2250_v47 = vmax.f32 %v2247_v9, %v11161_v7  ;;  %v8054_v7 = vld [vmem:[%s11529_s8] ss:$0 sm:$0xff] }
 0x8f0   : > { %v3399_v56 = vmax.f32 %v3397_v37, %v3398_v48 }
 0x8f1   : > { %v2253_v11 = vmax.f32 %v2250_v47, %v11163_v0 }
 0x8f2   : > { %v3401_v39 = vmax.f32 %v3399_v56, %v11452_v29 }
 0x8f4   : > { %v5699_v36 = vrot.slane %v3401_v39, 6 }
 0x951   : > { %v4530_v23 = vpop.f32.mrf.mxu3 }
 0x952   : > { %v4531_v51 = vadd.f32 %v4530_v23, %v11171_v35  ;;  %v7075_v35 = vld [vmem:[%s11528_s7 + $0x18] sm:$0xff] }
 0x953   : > { %5754 = vmatpush.bf16.msrb.mxu3 %v7075_v35 }
 0x954   : > { %v4535_v26 = vmax.f32 %v4531_v51, 0.0 }
 0x956   : > { %4537 = vst.msk [vmem:[#allocation4] sm:$0xff] %vm1496_vm11, %v4535_v26 }
 0x957   : > { %5755 = vmatpush.bf16.msrb.mxu3 %v7074_v12 }
 0x959   : > { %v4532_v55 = vpop.f32.mrf.mxu3 }
 0x95a   : > { %v4533_v20 = vadd.f32 %v4532_v55, %v11173_v24  ;;  %v7072_v24 = vld [vmem:[%s11528_s7] sm:$0xff]  ;;  %v5707_v55 = vsel %vm1333_vm7, %v2253_v11, %v5699_v36 }
 0x95b   : > { %5756 = vmatpush.bf16.msrb.mxu3 %v7073_v54 }
 0x95c   : > { %v4536_v57 = vmax.f32 %v4533_v20, 0.0 }
 0x95d   : > { %v4539_v27 = vld [vmem:[#allocation4] ss:$6 sm:$0x3]  ;;  %v4540_v61 = vld [vmem:[#allocation4 + $0x1] ss:$6 sm:$0x3] }
 0x95e   : > { %4538 = vst.msk [vmem:[#allocation4 + $0x8] sm:$0x1f] %vm2236_vm14, %v4536_v57  ;;  %v4541_v1 = vmax.f32 %v4539_v27, %v4540_v61 }
 0x95f   : > { %5757 = vmatpush.bf16.msrb.mxu3 %v7072_v24 }
 0x961   : > { %v5636_v43 = vpop.f32.mrf.mxu3 }
 0x962   : > { %v5637_v5 = vadd.f32 %v8053_v53, %v5636_v43 }
 0x965   : > { %v4542_v31 = vld [vmem:[#allocation4 + $0x2] ss:$6 sm:$0x3]  ;;  %v4544_v10 = vld [vmem:[#allocation4 + $0x3] ss:$6 sm:$0x3] }
 0x966   : > { %v4546_v49 = vld [vmem:[#allocation4 + $0x4] ss:$6 sm:$0x3]  ;;  %v4548_v40 = vld [vmem:[#allocation4 + $0x5] ss:$6 sm:$0x3]  ;;  %v4543_v45 = vmax.f32 %v4541_v1, %v4542_v31 }
 0x968   : > { %v4545_v18 = vmax.f32 %v4543_v45, %v4544_v10 }
 0x969   : > { %v5638_v6 = vpop.f32.mrf.mxu3  ;;  %v5678_v41 = vpop.f32.mrf.mxu2 }
 0x96a   : > { %v5639_v59 = vadd.f32 %v8053_v53, %v5638_v6  ;;  %v4547_v15 = vmax.f32 %v4545_v18, %v4546_v49 }
 0x96b   : > { %v5664_v63 = vpop.f32.mrf.mxu1 }
 0x96c   : > { %v4549_v23 = vmax.f32 %v4547_v15, %v4548_v40 }
 0x96e   : > { %v5702_v26 = vrot.slane %v4549_v23, 4 }
 0x970   : > { %v5708_v29 = vsel %vm1253_vm5, %v5707_v55, %v5702_v26 }
 0x971   : > { %v5650_v30 = vpop.f32.mrf.mxu3  ;;  %v5680_v60 = vpop.f32.mrf.mxu2 }
 0x972   : > { %v5651_v3 = vadd.f32 %v5650_v30, %v5637_v5 }
 0x973   : > { %v5666_v50 = vpop.f32.mrf.mxu1 }
 0x974   : > { %v5665_v62 = vadd.f32 %v5664_v63, %v5651_v3 }
 0x976   : > { %v5679_v58 = vadd.f32 %v5678_v41, %v5665_v62 }
 0x978   : > { %v5683_v22 = vmax.f32 %v5679_v58, 0.0 }
 0x979   : > { %v5652_v34 = vpop.f32.mrf.mxu3 }
 0x97a   : > { %v5653_v21 = vadd.f32 %v5652_v34, %v5639_v59  ;;  %5685 = vst.msk [vmem:[#allocation4] sm:$0xff] %vm1496_vm11, %v5683_v22 }
 0x97c   : > { %v5667_v19 = vadd.f32 %v5666_v50, %v5653_v21 }
 0x97e   : > { %v5681_v38 = vadd.f32 %v5680_v60, %v5667_v19 }
 0x980   : > { %v5684_v52 = vmax.f32 %v5681_v38, 0.0 }
 0x981   : > { %v5687_v44 = vld [vmem:[#allocation4] ss:$6 sm:$0x3]  ;;  %v5688_v28 = vld [vmem:[#allocation4 + $0x1] ss:$6 sm:$0x3] }
 0x982   : > { %5686 = vst.msk [vmem:[#allocation4 + $0x8] sm:$0x1f] %vm2236_vm14, %v5684_v52  ;;  %v5689_v2 = vmax.f32 %v5687_v44, %v5688_v28 }
 0x989   : > { %v5690_v4 = vld [vmem:[#allocation4 + $0x2] ss:$6 sm:$0x3]  ;;  %v5692_v51 = vld [vmem:[#allocation4 + $0x3] ss:$6 sm:$0x3] }
 0x98a   : > { %v5691_v25 = vmax.f32 %v5689_v2, %v5690_v4  ;;  %v5694_v16 = vld [vmem:[#allocation4 + $0x4] ss:$6 sm:$0x3]  ;;  %v5696_v8 = vld [vmem:[#allocation4 + $0x5] ss:$6 sm:$0x3] }
 0x98c   : > { %v5693_v32 = vmax.f32 %v5691_v25, %v5692_v51 }
 0x98e   : > { %v5695_v42 = vmax.f32 %v5693_v32, %v5694_v16 }
 0x990   : > { %v5697_v17 = vmax.f32 %v5695_v42, %v5696_v8 }
 0x992   : > { %v5705_v48 = vrot.slane %v5697_v17, 2 }
 0x994   : > { %v5709_v20 = vsel %vm1173_vm6, %v5708_v29, %v5705_v48 }
 0x995   : > { %v5710_v57 = vpack.c.bf16 %v5709_v20, %v5709_v20 }
 0x997   : > { %6833 = vmatmul.msk.bf16.vlgmr.msrb.gmra.mxu3 %vm1496_vm11, %v5710_v57 }
 0xa1a   : > { %v5759_v0 = vpop.f32.mrf.mxu3 }
 0xa1b   : > { %v5760_v35 = vadd.f32 %v8054_v7, %v5759_v0 }
 0xa1d   : > { %5763 = vst.msk [vmem:[%s326_s11] sm:$0xff] %vm1478_vm9, %v5760_v35 }
 0xa1e   : > { %8086 = shalt.err (!%p8083_p3)
}
 0xa1f   : > { %7094 = dma.vmem_to_hbm [thread:$0]  (%p8218_p5), %s5778_s23, 128, %s5780_s21, %s5765_s13  }
 0xa22   : > { %v5761_v43 = vpop.f32.mrf.mxu3 }
 0xa23 PF: > { %p7100_p4 = scmp.ge.s32.totalorder %s8121_s12, 2  ;;  %s5791_s16 = sand.u32 1, %s8109_s30  }
 0xa24   : > { %s5792_s27 = scalar_lea.sflag [#allocation6], %s5791_s16 }
 0xa25   : > { %p7097_p7 = pnand %p7100_p4, %p8222_p6 }
 0xa27   : > { %p7098_p8 = pneg %p7097_p7 }
 0xa29   : > { %8104 = dma.done.wait (%p7098_p8), %s5792_s27, 128  }
 0xa2a   : > { %8106 = vsyncadd (%p7098_p8), %s5792_s27, 4294967168  ;;  %s11657_s28 = sld [smem:[#allocation8_spill]]  ;;  %p19_p9 = scmp.ge.s32.totalorder %s8205_s15, 4  }
 0xa2b   : > { %s11658_s11 = sld [smem:[#allocation9_spill]]  ;;  %s11659_s30 = smov %s8113_s10 }
 0xa2c   : > { %s11661_s12 = smov %s8205_s15  ;;  %21 = sbr.rel (!%p19_p9) target bundleno = 7 (0x7), region = 174 }
 0xa30   : > { %s11660_s10 = smov %s11657_s28 }
 0xa31   :  { %5798 = vsyncpa [#allocation6], 1 }
 0xa32   :  { %5800 = vsyncpa [#allocation6 + $0x1], 1 }

</bundles_post_ra>
